<compile_context>
chip_gen: v5e
topology: v5e:2x2
jax: 0.10.0
libtpu: 0.0.40
codegen_flags: <defaults>
</compile_context>

<pallas_src>
import jax
import jax.numpy as jnp
from jax.experimental import pallas as pl
from jax.experimental.pallas import tpu as pltpu

NEG_SLOPE = 0.01  # PyTorch nn.LeakyReLU default

D_TEXT, D_AUDIO = 512, 768
D_IN = D_TEXT + D_AUDIO          # 1280
D_H1, D_H2, D_H3 = 1280, 256, 64
D_OUT = 5
D_OUT_PAD = 128                  # lane-dense padded output width


def _leaky_relu(x):
    return jnp.where(x > 0, x, NEG_SLOPE * x)


def classifier_kernel(xa_ref, xb_ref,
                      w1_ref, b1_ref,
                      w2_ref, b2_ref,
                      w3_ref, b3_ref,
                      w4_ref, b4_ref,
                      out_ref):
    # Fused concat + single K=1280 matmul (bf16 operands, f32 accumulation).
    x = jnp.concatenate([xa_ref[...], xb_ref[...]], axis=1).astype(jnp.bfloat16)
    h = jnp.dot(x, w1_ref[...], preferred_element_type=jnp.float32) + b1_ref[...]
    h = _leaky_relu(h)

    h = jnp.dot(h.astype(jnp.bfloat16), w2_ref[...],
                preferred_element_type=jnp.float32) + b2_ref[...]
    h = _leaky_relu(h)

    h = jnp.dot(h.astype(jnp.bfloat16), w3_ref[...],
                preferred_element_type=jnp.float32) + b3_ref[...]
    h = _leaky_relu(h)

    h = jnp.dot(h.astype(jnp.bfloat16), w4_ref[...],
                preferred_element_type=jnp.float32) + b4_ref[...]
    out_ref[...] = h.astype(out_ref.dtype)


def net_classifier(logits_a, logits_b, params, *, tile_b=128):
    """Classifier head of Net on TPU via a single weight-resident Pallas kernel.

    logits_a: [B, 512] float32 (text features)
    logits_b: [B, 768] float32 (audio features)
    returns:  [B, 5]   float32 logits
    """
    B = logits_a.shape[0]
    w1, b1, w2, b2, w3, b3, w4p, b4p = params

    # Batch tile: multiple of 8 (sublane), capped at tile_b; pad batch to a
    # whole number of tiles so block shapes satisfy the (8,128) constraint.
    tb = min(tile_b, max(8, 8 * pl.cdiv(B, 8)))
    b_pad = tb * pl.cdiv(B, tb)
    if b_pad != B:
        pad = ((0, b_pad - B), (0, 0))
        logits_a = jnp.pad(logits_a, pad)
        logits_b = jnp.pad(logits_b, pad)

    grid = (b_pad // tb,)

    # Activations tile along the batch; weights stay resident (block index is
    # always (0, 0) so they are DMA'd into VMEM exactly once).
    def _resident(shape):
        return pl.BlockSpec(shape, lambda i: (0, 0))

    in_specs = [
        pl.BlockSpec((tb, D_TEXT), lambda i: (i, 0)),
        pl.BlockSpec((tb, D_AUDIO), lambda i: (i, 0)),
        _resident((D_IN, D_H1)), _resident((1, D_H1)),
        _resident((D_H1, D_H2)), _resident((1, D_H2)),
        _resident((D_H2, D_H3)), _resident((1, D_H3)),
        _resident((D_H3, D_OUT_PAD)), _resident((1, D_OUT_PAD)),
    ]
    out_specs = pl.BlockSpec((tb, D_OUT_PAD), lambda i: (i, 0))

    flops = 2 * b_pad * (D_IN * D_H1 + D_H1 * D_H2 + D_H2 * D_H3 + D_H3 * D_OUT_PAD)
    bytes_accessed = (
        2 * (w1.size + w2.size + w3.size + w4p.size)            # bf16 weights
        + 4 * (b1.size + b2.size + b3.size + b4p.size)          # f32 biases
        + 4 * (logits_a.size + logits_b.size)                   # f32 activations in
        + 4 * b_pad * D_OUT_PAD                                 # f32 out
    )

    out = pl.pallas_call(
        classifier_kernel,
        out_shape=jax.ShapeDtypeStruct((b_pad, D_OUT_PAD), jnp.float32),
        grid_spec=pltpu.PrefetchScalarGridSpec(
            num_scalar_prefetch=0,
            grid=grid,
            in_specs=in_specs,
            out_specs=out_specs,
        ),
        compiler_params=pltpu.CompilerParams(
            dimension_semantics=("parallel",),
            vmem_limit_bytes=24 << 20,
        ),
        cost_estimate=pl.CostEstimate(
            flops=flops, transcendentals=0, bytes_accessed=bytes_accessed),
    )(logits_a, logits_b, w1, b1, w2, b2, w3, b3, w4p, b4p)

    return out[:B, :D_OUT]


def init_params(key):
    """Deterministic synthetic init of the classifier weights.

    Shapes match nn.Linear(1280,1280), (1280,256), (256,64), (64,5), stored
    transposed as [in, out]. Weights are stored in bf16 (streamed bytes halved),
    biases in f32. The last layer is padded to 128 output lanes (zeros)."""
    ks = jax.random.split(key, 8)
    scale = 0.02
    w1 = scale * jax.random.normal(ks[0], (D_IN, D_H1), jnp.float32)
    b1 = scale * jax.random.normal(ks[1], (1, D_H1), jnp.float32)
    w2 = scale * jax.random.normal(ks[2], (D_H1, D_H2), jnp.float32)
    b2 = scale * jax.random.normal(ks[3], (1, D_H2), jnp.float32)
    w3 = scale * jax.random.normal(ks[4], (D_H2, D_H3), jnp.float32)
    b3 = scale * jax.random.normal(ks[5], (1, D_H3), jnp.float32)
    w4 = scale * jax.random.normal(ks[6], (D_H3, D_OUT), jnp.float32)
    b4 = scale * jax.random.normal(ks[7], (1, D_OUT), jnp.float32)

    w4p = jnp.zeros((D_H3, D_OUT_PAD), jnp.float32).at[:, :D_OUT].set(w4)
    b4p = jnp.zeros((1, D_OUT_PAD), jnp.float32).at[:, :D_OUT].set(b4)

    return (w1.astype(jnp.bfloat16), b1,
            w2.astype(jnp.bfloat16), b2,
            w3.astype(jnp.bfloat16), b3,
            w4p.astype(jnp.bfloat16), b4p)


def reference(logits_a, logits_b, params):
    """Pure-JAX reference using the same bf16 weights / f32 accumulation."""
    w1, b1, w2, b2, w3, b3, w4p, b4p = params
    x = jnp.concatenate([logits_a, logits_b], axis=1)
    h = _leaky_relu(jnp.dot(x.astype(jnp.bfloat16), w1,
                            preferred_element_type=jnp.float32) + b1)
    h = _leaky_relu(jnp.dot(h.astype(jnp.bfloat16), w2,
                            preferred_element_type=jnp.float32) + b2)
    h = _leaky_relu(jnp.dot(h.astype(jnp.bfloat16), w3,
                            preferred_element_type=jnp.float32) + b3)
    h = jnp.dot(h.astype(jnp.bfloat16), w4p,
                preferred_element_type=jnp.float32) + b4p
    return h[:, :D_OUT]


if __name__ == "__main__":
    key = jax.random.PRNGKey(0)
    k_a, k_b, k_p = jax.random.split(key, 3)

    B = 2
    # Backbone outputs (synthetic): text features [B, 512], audio features [B, 768].
    # TODO(synk): the BERT/HuBERT backbones themselves are not translated to Pallas.
    logits_a = jax.random.normal(k_a, (B, D_TEXT), jnp.float32)
    logits_b = jax.random.normal(k_b, (B, D_AUDIO), jnp.float32)
    params = init_params(k_p)

    out = net_classifier(logits_a, logits_b, params)
    out = jax.block_until_ready(out)

    ref = reference(logits_a, logits_b, params)
    assert out.shape == (B, D_OUT)
    assert jnp.allclose(out, ref, atol=1e-2, rtol=1e-2), "mismatch vs reference"

    print("KERNEL_OK")
</pallas_src>

<mosaic_0001>
module attributes {stable_mosaic.version = 11 : i64} {
  func.func @classifier_kernel(%arg0: i32, %arg1: memref<8x512xf32, #tpu.memory_space<vmem>>, %arg2: memref<8x768xf32, #tpu.memory_space<vmem>>, %arg3: memref<1280x1280xbf16, #tpu.memory_space<vmem>>, %arg4: memref<1x1280xf32, #tpu.memory_space<vmem>>, %arg5: memref<1280x256xbf16, #tpu.memory_space<vmem>>, %arg6: memref<1x256xf32, #tpu.memory_space<vmem>>, %arg7: memref<256x64xbf16, #tpu.memory_space<vmem>>, %arg8: memref<1x64xf32, #tpu.memory_space<vmem>>, %arg9: memref<64x128xbf16, #tpu.memory_space<vmem>>, %arg10: memref<1x128xf32, #tpu.memory_space<vmem>>, %arg11: memref<8x128xf32, #tpu.memory_space<vmem>>) attributes {dimension_semantics = [#tpu.dimension_semantics<parallel>], iteration_bounds = array<i64: 1>, scalar_prefetch = 0 : i64, scratch_operands = 0 : i64, tpu.core_type = #tpu.core_type<tc>, window_params = [{transform_indices = @transform_0, window_bounds = array<i64: 8, 512>}, {transform_indices = @transform_1, window_bounds = array<i64: 8, 768>}, {pipeline_mode = #tpu.pipeline_mode<synchronous>, transform_indices = @transform_2, window_bounds = array<i64: 1280, 1280>}, {pipeline_mode = #tpu.pipeline_mode<synchronous>, transform_indices = @transform_3, window_bounds = array<i64: 1, 1280>}, {pipeline_mode = #tpu.pipeline_mode<synchronous>, transform_indices = @transform_4, window_bounds = array<i64: 1280, 256>}, {pipeline_mode = #tpu.pipeline_mode<synchronous>, transform_indices = @transform_5, window_bounds = array<i64: 1, 256>}, {pipeline_mode = #tpu.pipeline_mode<synchronous>, transform_indices = @transform_6, window_bounds = array<i64: 256, 64>}, {pipeline_mode = #tpu.pipeline_mode<synchronous>, transform_indices = @transform_7, window_bounds = array<i64: 1, 64>}, {pipeline_mode = #tpu.pipeline_mode<synchronous>, transform_indices = @transform_8, window_bounds = array<i64: 64, 128>}, {pipeline_mode = #tpu.pipeline_mode<synchronous>, transform_indices = @transform_9, window_bounds = array<i64: 1, 128>}, {transform_indices = @transform_10, window_bounds = array<i64: 8, 128>}]} {
    %c0 = arith.constant 0 : index
    %c0_0 = arith.constant 0 : index
    %0 = vector.load %arg1[%c0, %c0_0] : memref<8x512xf32, #tpu.memory_space<vmem>>, vector<8x512xf32>
    %c0_1 = arith.constant 0 : index
    %c0_2 = arith.constant 0 : index
    %1 = vector.load %arg2[%c0_1, %c0_2] : memref<8x768xf32, #tpu.memory_space<vmem>>, vector<8x768xf32>
    %2 = tpu.concatenate %0, %1 in 1 : vector<8x512xf32>, vector<8x768xf32> -> vector<8x1280xf32>
    %3 = arith.truncf %2 : vector<8x1280xf32> to vector<8x1280xbf16>
    %c0_3 = arith.constant 0 : index
    %c0_4 = arith.constant 0 : index
    %4 = vector.load %arg3[%c0_3, %c0_4] : memref<1280x1280xbf16, #tpu.memory_space<vmem>>, vector<1280x1280xbf16>
    %cst = arith.constant dense<0.000000e+00> : vector<8x1280xf32>
    %5 = tpu.matmul %3, %4, %cst {dimension_numbers = #tpu.dot_dimension_numbers<[1], [0], [0], [1], [0, 0, 1, 1], [], []>} : vector<8x1280xbf16>, vector<1280x1280xbf16>, vector<8x1280xf32> -> vector<8x1280xf32>
    %c0_5 = arith.constant 0 : index
    %c0_6 = arith.constant 0 : index
    %6 = vector.load %arg4[%c0_5, %c0_6] : memref<1x1280xf32, #tpu.memory_space<vmem>>, vector<1x1280xf32>
    %7 = vector.broadcast %6 : vector<1x1280xf32> to vector<8x1280xf32>
    %8 = arith.addf %5, %7 : vector<8x1280xf32>
    %cst_7 = arith.constant 0.000000e+00 : f32
    %9 = vector.broadcast %cst_7 : f32 to vector<8x1280xf32>
    %10 = arith.cmpf ogt, %8, %9 : vector<8x1280xf32>
    %cst_8 = arith.constant 0.00999999977 : f32
    %11 = vector.broadcast %cst_8 : f32 to vector<8x1280xf32>
    %12 = arith.mulf %11, %8 : vector<8x1280xf32>
    %13 = arith.select %10, %8, %12 : vector<8x1280xi1>, vector<8x1280xf32>
    %14 = arith.truncf %13 : vector<8x1280xf32> to vector<8x1280xbf16>
    %c0_9 = arith.constant 0 : index
    %c0_10 = arith.constant 0 : index
    %15 = vector.load %arg5[%c0_9, %c0_10] : memref<1280x256xbf16, #tpu.memory_space<vmem>>, vector<1280x256xbf16>
    %cst_11 = arith.constant dense<0.000000e+00> : vector<8x256xf32>
    %16 = tpu.matmul %14, %15, %cst_11 {dimension_numbers = #tpu.dot_dimension_numbers<[1], [0], [0], [1], [0, 0, 1, 1], [], []>} : vector<8x1280xbf16>, vector<1280x256xbf16>, vector<8x256xf32> -> vector<8x256xf32>
    %c0_12 = arith.constant 0 : index
    %c0_13 = arith.constant 0 : index
    %17 = vector.load %arg6[%c0_12, %c0_13] : memref<1x256xf32, #tpu.memory_space<vmem>>, vector<1x256xf32>
    %18 = vector.broadcast %17 : vector<1x256xf32> to vector<8x256xf32>
    %19 = arith.addf %16, %18 : vector<8x256xf32>
    %cst_14 = arith.constant 0.000000e+00 : f32
    %20 = vector.broadcast %cst_14 : f32 to vector<8x256xf32>
    %21 = arith.cmpf ogt, %19, %20 : vector<8x256xf32>
    %cst_15 = arith.constant 0.00999999977 : f32
    %22 = vector.broadcast %cst_15 : f32 to vector<8x256xf32>
    %23 = arith.mulf %22, %19 : vector<8x256xf32>
    %24 = arith.select %21, %19, %23 : vector<8x256xi1>, vector<8x256xf32>
    %25 = arith.truncf %24 : vector<8x256xf32> to vector<8x256xbf16>
    %c0_16 = arith.constant 0 : index
    %c0_17 = arith.constant 0 : index
    %26 = vector.load %arg7[%c0_16, %c0_17] : memref<256x64xbf16, #tpu.memory_space<vmem>>, vector<256x64xbf16>
    %cst_18 = arith.constant dense<0.000000e+00> : vector<8x64xf32>
    %27 = tpu.matmul %25, %26, %cst_18 {dimension_numbers = #tpu.dot_dimension_numbers<[1], [0], [0], [1], [0, 0, 1, 1], [], []>} : vector<8x256xbf16>, vector<256x64xbf16>, vector<8x64xf32> -> vector<8x64xf32>
    %c0_19 = arith.constant 0 : index
    %c0_20 = arith.constant 0 : index
    %28 = vector.load %arg8[%c0_19, %c0_20] : memref<1x64xf32, #tpu.memory_space<vmem>>, vector<1x64xf32>
    %29 = vector.broadcast %28 : vector<1x64xf32> to vector<8x64xf32>
    %30 = arith.addf %27, %29 : vector<8x64xf32>
    %cst_21 = arith.constant 0.000000e+00 : f32
    %31 = vector.broadcast %cst_21 : f32 to vector<8x64xf32>
    %32 = arith.cmpf ogt, %30, %31 : vector<8x64xf32>
    %cst_22 = arith.constant 0.00999999977 : f32
    %33 = vector.broadcast %cst_22 : f32 to vector<8x64xf32>
    %34 = arith.mulf %33, %30 : vector<8x64xf32>
    %35 = arith.select %32, %30, %34 : vector<8x64xi1>, vector<8x64xf32>
    %36 = arith.truncf %35 : vector<8x64xf32> to vector<8x64xbf16>
    %c0_23 = arith.constant 0 : index
    %c0_24 = arith.constant 0 : index
    %37 = vector.load %arg9[%c0_23, %c0_24] : memref<64x128xbf16, #tpu.memory_space<vmem>>, vector<64x128xbf16>
    %cst_25 = arith.constant dense<0.000000e+00> : vector<8x128xf32>
    %38 = tpu.matmul %36, %37, %cst_25 {dimension_numbers = #tpu.dot_dimension_numbers<[1], [0], [0], [1], [0, 0, 1, 1], [], []>} : vector<8x64xbf16>, vector<64x128xbf16>, vector<8x128xf32> -> vector<8x128xf32>
    %c0_26 = arith.constant 0 : index
    %c0_27 = arith.constant 0 : index
    %39 = vector.load %arg10[%c0_26, %c0_27] : memref<1x128xf32, #tpu.memory_space<vmem>>, vector<1x128xf32>
    %40 = vector.broadcast %39 : vector<1x128xf32> to vector<8x128xf32>
    %41 = arith.addf %38, %40 : vector<8x128xf32>
    %c0_28 = arith.constant 0 : index
    %c0_29 = arith.constant 0 : index
    %42 = vector.load %arg11[%c0_28, %c0_29] : memref<8x128xf32, #tpu.memory_space<vmem>>, vector<8x128xf32>
    tpu.vector_store %arg11[%c0_28, %c0_29], %41 {strides = array<i32>} : memref<8x128xf32, #tpu.memory_space<vmem>>, vector<8x128xf32>,
    return
  }
  func.func @transform_0(%arg0: i32) -> (i32, i32) {
    %c0_i32 = arith.constant 0 : i32
    %c0_i32_0 = arith.constant 0 : i32
    return %arg0, %c0_i32 : i32, i32
  }
  func.func @transform_1(%arg0: i32) -> (i32, i32) {
    %c0_i32 = arith.constant 0 : i32
    %c0_i32_0 = arith.constant 0 : i32
    return %arg0, %c0_i32 : i32, i32
  }
  func.func @transform_2(%arg0: i32) -> (i32, i32) {
    %c0_i32 = arith.constant 0 : i32
    %c0_i32_0 = arith.constant 0 : i32
    %c0_i32_1 = arith.constant 0 : i32
    return %c0_i32, %c0_i32_0 : i32, i32
  }
  func.func @transform_3(%arg0: i32) -> (i32, i32) {
    %c0_i32 = arith.constant 0 : i32
    %c0_i32_0 = arith.constant 0 : i32
    %c0_i32_1 = arith.constant 0 : i32
    return %c0_i32, %c0_i32_0 : i32, i32
  }
  func.func @transform_4(%arg0: i32) -> (i32, i32) {
    %c0_i32 = arith.constant 0 : i32
    %c0_i32_0 = arith.constant 0 : i32
    %c0_i32_1 = arith.constant 0 : i32
    return %c0_i32, %c0_i32_0 : i32, i32
  }
  func.func @transform_5(%arg0: i32) -> (i32, i32) {
    %c0_i32 = arith.constant 0 : i32
    %c0_i32_0 = arith.constant 0 : i32
    %c0_i32_1 = arith.constant 0 : i32
    return %c0_i32, %c0_i32_0 : i32, i32
  }
  func.func @transform_6(%arg0: i32) -> (i32, i32) {
    %c0_i32 = arith.constant 0 : i32
    %c0_i32_0 = arith.constant 0 : i32
    %c0_i32_1 = arith.constant 0 : i32
    return %c0_i32, %c0_i32_0 : i32, i32
  }
  func.func @transform_7(%arg0: i32) -> (i32, i32) {
    %c0_i32 = arith.constant 0 : i32
    %c0_i32_0 = arith.constant 0 : i32
    %c0_i32_1 = arith.constant 0 : i32
    return %c0_i32, %c0_i32_0 : i32, i32
  }
  func.func @transform_8(%arg0: i32) -> (i32, i32) {
    %c0_i32 = arith.constant 0 : i32
    %c0_i32_0 = arith.constant 0 : i32
    %c0_i32_1 = arith.constant 0 : i32
    return %c0_i32, %c0_i32_0 : i32, i32
  }
  func.func @transform_9(%arg0: i32) -> (i32, i32) {
    %c0_i32 = arith.constant 0 : i32
    %c0_i32_0 = arith.constant 0 : i32
    %c0_i32_1 = arith.constant 0 : i32
    return %c0_i32, %c0_i32_0 : i32, i32
  }
  func.func @transform_10(%arg0: i32) -> (i32, i32) {
    %c0_i32 = arith.constant 0 : i32
    %c0_i32_0 = arith.constant 0 : i32
    return %arg0, %c0_i32 : i32, i32
  }
}

</mosaic_0001>

<bundles_post_ra>
// kernel: tpu_custom_call.1
= control target key start
LH: loop header
LB: loop body
LE: loop exit
PB: predicated region body
PF: predicated region fallthrough
CT: control target
= control target key end

     0   :  { %15 = vsyncpa [#allocation3], 0  ;;  %s13465_s0 = inlined_call_operand.hbm [shape: f32[8,512], index: 0, kind: input, shape index: {}]   ;;  %s13466_s1 = inlined_call_operand.hbm [shape: f32[8,768], index: 1, kind: input, shape index: {}]   ;;  %s13467_s2 = inlined_call_operand.hbm [shape: bf16[1280,1280], index: 2, kind: input, shape index: {}]   ;;  %s13468_s3 = inlined_call_operand.hbm [shape: f32[1,1280], index: 3, kind: input, shape index: {}]   ;;  %s13469_s4 = inlined_call_operand.hbm [shape: bf16[1280,256], index: 4, kind: input, shape index: {}]   ;;  %s13470_s5 = inlined_call_operand.hbm [shape: f32[1,256], index: 5, kind: input, shape index: {}]   ;;  %s13471_s6 = inlined_call_operand.vmem [shape: bf16[256,64], index: 6, kind: input, shape index: {}]   ;;  %s13472_s7 = inlined_call_operand.hbm [shape: f32[1,64], index: 7, kind: input, shape index: {}]   ;;  %s13473_s8 = inlined_call_operand.hbm [shape: bf16[64,128], index: 8, kind: input, shape index: {}]   ;;  %s13474_s9 = inlined_call_operand.hbm [shape: f32[1,128], index: 9, kind: input, shape index: {}]   ;;  %s13475_s10 = inlined_call_operand.hbm [shape: f32[8,128], index: 10, kind: output, shape index: {}]  }
   0x1   :  { %16 = vsyncpa [#allocation6], 0 }
   0x2   :  { %17 = vsyncpa [#allocation9], 0 }
   0x3   :  { %18 = vsyncpa [#allocation12], 0 }
   0x4   :  { %19 = vsyncpa [#allocation15], 0  ;;  %s37_s15 = sshll.u32 %s13466_s1, 4  ;;  %s38_s15 = int_to_ptr.hbm [resolvable:$true] %s37_s15 }
   0x5   :  { %20 = vsyncpa [#allocation4], 0  ;;  %s12994_s16 = smov [#allocation5]   ;;  %s61_s20 = sshll.u32 %s13468_s3, 4  ;;  %s62_s20 = int_to_ptr.hbm [resolvable:$true] %s61_s20 }
   0x6   :  { %s39_s17 = sshll.u32 %s12994_s16, 4  ;;  %s12995_s21 = smov [#allocation8]   ;;  %s40_s17 = int_to_ptr.vmem [resolvable:$true] %s39_s17 }
   0x7   :  { %42 = dma.hbm_to_vmem [thread:$0]  %s38_s15, 768, %s40_s17, [#allocation6]  }
   0x8   :  { %s63_s22 = sshll.u32 %s12995_s21, 4  ;;  %s85_s25 = sshll.u32 %s13470_s5, 4  ;;  %s64_s22 = int_to_ptr.vmem [resolvable:$true] %s63_s22  ;;  %s86_s25 = int_to_ptr.hbm [resolvable:$true] %s85_s25 }
   0x9   :  { %66 = dma.hbm_to_vmem [thread:$0]  %s62_s20, 160, %s64_s22, [#allocation9]  }
   0xa   :  { %s108_s27 = sshll.u32 %s13473_s8, 4  ;;  %s12996_s28 = smov [#allocation11]   ;;  %s109_s27 = int_to_ptr.hbm [resolvable:$true] %s108_s27 }
   0xb   :  { %s87_s29 = sshll.u32 %s12996_s28, 4  ;;  %s12997_s3 = smov [#allocation14]   ;;  %s88_s29 = int_to_ptr.vmem [resolvable:$true] %s87_s29 }
   0xc   :  { %90 = dma.hbm_to_vmem [thread:$0]  %s86_s25, 32, %s88_s29, [#allocation12]  }
   0xd   :  { %s110_s30 = sshll.u32 %s12997_s3, 4  ;;  %s12998_s11 = smov 64   ;;  %s111_s30 = int_to_ptr.vmem [resolvable:$true] %s110_s30 }
   0xe   :  { %s12999_s12 = smov 4   ;;  %s26_s14 = sshll.u32 %s13465_s0, 4  ;;  %s27_s14 = int_to_ptr.hbm [resolvable:$true] %s26_s14 }
   0xf   :  { %116 = dma.hbm_to_vmem [thread:$0]  %s109_s27, 512, %s111_s30, [#allocation15], %s12998_s11, %s12998_s11, %s12999_s12  }
  0x10   :  { %s13000_s15 = smov [#allocation2]   ;;  %s47_s18 = sshll.u32 %s13467_s2, 4  ;;  %s48_s18 = int_to_ptr.hbm [resolvable:$true] %s47_s18 }
  0x11   :  { %s28_s16 = sshll.u32 %s13000_s15, 4  ;;  %s13001_s19 = smov [#allocation7]   ;;  %s29_s16 = int_to_ptr.vmem [resolvable:$true] %s28_s16 }
  0x12   :  { %31 = dma.hbm_to_vmem [thread:$0]  %s27_s14, 512, %s29_s16, [#allocation3]  }
  0x13   :  { %s49_s20 = sshll.u32 %s13001_s19, 4  ;;  %s13002_s21 = smov 640   ;;  %s50_s20 = int_to_ptr.vmem [resolvable:$true] %s49_s20 }
  0x14   :  { %s13003_s22 = smov 40   ;;  %s71_s0 = sshll.u32 %s13469_s4, 4  ;;  %s72_s0 = int_to_ptr.hbm [resolvable:$true] %s71_s0 }
  0x15   :  { %55 = dma.hbm_to_vmem [thread:$0]  %s48_s18, 102400, %s50_s20, [#allocation6], %s13002_s21, %s13002_s21, %s13003_s22  }
  0x16   :  { %s13004_s25 = smov [#allocation10]   ;;  %s98_s2 = sshll.u32 %s13472_s7, 4  ;;  %s99_s2 = int_to_ptr.hbm [resolvable:$true] %s98_s2 }
  0x17   :  { %s73_s1 = sshll.u32 %s13004_s25, 4  ;;  %s13005_s28 = smov 128   ;;  %s74_s1 = int_to_ptr.vmem [resolvable:$true] %s73_s1 }
  0x18   :  { %s13006_s29 = smov 8   ;;  %s13007_s3 = smov [#allocation13]  }
  0x19   :  { %79 = dma.hbm_to_vmem [thread:$0]  %s72_s0, 20480, %s74_s1, [#allocation9], %s13005_s28, %s13005_s28, %s13006_s29  }
  0x1a   :  { %s100_s30 = sshll.u32 %s13007_s3, 4  ;;  %s122_s13 = sshll.u32 %s13474_s9, 4  ;;  %s101_s30 = int_to_ptr.vmem [resolvable:$true] %s100_s30  ;;  %s123_s13 = int_to_ptr.hbm [resolvable:$true] %s122_s13 }
  0x1b   :  { %103 = dma.hbm_to_vmem [thread:$0]  %s99_s2, 16, %s101_s30, [#allocation12]  }
  0x1c   :  { %s13008_s4 = smov [#allocation16]  }
  0x1d   :  { %s124_s5 = sshll.u32 %s13008_s4, 4  ;;  %s125_s5 = int_to_ptr.vmem [resolvable:$true] %s124_s5 }
  0x1e   :  { %127 = dma.hbm_to_vmem [thread:$0]  %s123_s13, 16, %s125_s5, [#allocation15]  }
  0x1f   :  { %12982 = dma.done.wait [#allocation3], 512  }
  0x20   :  { %12983 = vsyncadd [#allocation3], 4294966784 }
  0x21   :  { %12984 = dma.done.wait [#allocation6], 103168  }
  0x22   :  { %12985 = vsyncadd [#allocation6], 4294864128 }
  0x23   :  { %12986 = dma.done.wait [#allocation9], 20640  }
  0x24   :  { %12987 = vsyncadd [#allocation9], 4294946656 }
  0x25   :  { %12988 = dma.done.wait [#allocation12], 48  }
  0x26   :  { %12989 = vsyncadd [#allocation12], 4294967248 }
  0x27   :  { %12990 = dma.done.wait [#allocation15], 528  }
  0x28   :  { %12991 = vsyncadd [#allocation15], 4294966768  ;;  %v8102_v0 = vld [vmem:[#allocation7 + $0x230] sm:$0xf]  ;;  %v11816_v1 = vld [vmem:[#allocation7 + $0x254] sm:$0xf0] }
  0x29   :  { %v8422_v2 = vld [vmem:[#allocation7 + $0x4b0] sm:$0xf]  ;;  %v8103_v3 = vor.u32 %v11816_v1, %v8102_v0  ;;  %v11896_v4 = vld [vmem:[#allocation7 + $0x4d4] sm:$0xf0]  ;;  %v8062_v11 = vld [vmem:[#allocation7 + $0x1e0] sm:$0xf] }
  0x2a   :  { %v8742_v5 = vld [vmem:[#allocation7 + $0x730] sm:$0xf]  ;;  %v11976_v6 = vld [vmem:[#allocation7 + $0x754] sm:$0xf0]  ;;  %v8423_v7 = vor.u32 %v11896_v4, %v8422_v2  ;;  %v11806_v13 = vld [vmem:[#allocation7 + $0x204] sm:$0xf0] }
  0x2b   :  { %v8743_v8 = vor.u32 %v11976_v6, %v8742_v5  ;;  %v9062_v9 = vld [vmem:[#allocation7 + $0x9b0] sm:$0xf]  ;;  %v12056_v10 = vld [vmem:[#allocation7 + $0x9d4] sm:$0xf0]  ;;  %5009 = vmatpush.bf16.msra.mxu0 %v8103_v3  ;;  %v8382_v14 = vld [vmem:[#allocation7 + $0x460] sm:$0xf]  ;;  %v8063_v16 = vor.u32 %v11806_v13, %v8062_v11 }
  0x2c   :  { %v9063_v12 = vor.u32 %v12056_v10, %v9062_v9  ;;  %v11886_v15 = vld [vmem:[#allocation7 + $0x484] sm:$0xf0]  ;;  %5022 = vmatpush.bf16.msra.mxu1 %v8423_v7  ;;  %v8702_v18 = vld [vmem:[#allocation7 + $0x6e0] sm:$0xf]  ;;  %v8022_v23 = vld [vmem:[#allocation7 + $0x190] sm:$0xf] }
  0x2d   :  { %5035 = vmatpush.bf16.msra.mxu2 %v8743_v8  ;;  %v8383_v17 = vor.u32 %v11886_v15, %v8382_v14  ;;  %v11966_v19 = vld [vmem:[#allocation7 + $0x704] sm:$0xf0]  ;;  %v9022_v20 = vld [vmem:[#allocation7 + $0x960] sm:$0xf]  ;;  %v11796_v24 = vld [vmem:[#allocation7 + $0x1b4] sm:$0xf0] }
  0x2e   :  { %5048 = vmatpush.bf16.msra.mxu3 %v9063_v12  ;;  %v8703_v21 = vor.u32 %v11966_v19, %v8702_v18  ;;  %v12046_v22 = vld [vmem:[#allocation7 + $0x984] sm:$0xf0]  ;;  %v8342_v26 = vld [vmem:[#allocation7 + $0x410] sm:$0xf]  ;;  %v11876_v27 = vld [vmem:[#allocation7 + $0x434] sm:$0xf0]  ;;  %v8023_v29 = vor.u32 %v11796_v24, %v8022_v23 }
  0x2f   :  { %v9023_v25 = vor.u32 %v12046_v22, %v9022_v20  ;;  %v8662_v28 = vld [vmem:[#allocation7 + $0x690] sm:$0xf]  ;;  %5010 = vmatpush.bf16.msra.mxu0 %v8063_v16  ;;  %v11956_v30 = vld [vmem:[#allocation7 + $0x6b4] sm:$0xf0]  ;;  %v8343_v33 = vor.u32 %v11876_v27, %v8342_v26  ;;  %v7982_v35 = vld [vmem:[#allocation7 + $0x140] sm:$0xf] }
  0x30   :  { %v8982_v31 = vld [vmem:[#allocation7 + $0x910] sm:$0xf]  ;;  %v12036_v32 = vld [vmem:[#allocation7 + $0x934] sm:$0xf0]  ;;  %5023 = vmatpush.bf16.msra.mxu1 %v8383_v17  ;;  %v8663_v34 = vor.u32 %v11956_v30, %v8662_v28  ;;  %v11786_v36 = vld [vmem:[#allocation7 + $0x164] sm:$0xf0] }
  0x31   :  { %5036 = vmatpush.bf16.msra.mxu2 %v8703_v21  ;;  %v8302_v37 = vld [vmem:[#allocation7 + $0x3c0] sm:$0xf]  ;;  %v8983_v38 = vor.u32 %v12036_v32, %v8982_v31  ;;  %v11866_v39 = vld [vmem:[#allocation7 + $0x3e4] sm:$0xf0]  ;;  %v7983_v44 = vor.u32 %v11786_v36, %v7982_v35  ;;  %v7942_v47 = vld [vmem:[#allocation7 + $0xf0] sm:$0xf] }
  0x32   :  { %5049 = vmatpush.bf16.msra.mxu3 %v9023_v25  ;;  %v8622_v40 = vld [vmem:[#allocation7 + $0x640] sm:$0xf]  ;;  %v11946_v41 = vld [vmem:[#allocation7 + $0x664] sm:$0xf0]  ;;  %v8303_v45 = vor.u32 %v11866_v39, %v8302_v37  ;;  %v11776_v48 = vld [vmem:[#allocation7 + $0x114] sm:$0xf0] }
  0x33   :  { %v8942_v42 = vld [vmem:[#allocation7 + $0x8c0] sm:$0xf]  ;;  %v12026_v43 = vld [vmem:[#allocation7 + $0x8e4] sm:$0xf0]  ;;  %5011 = vmatpush.bf16.msra.mxu0 %v8023_v29  ;;  %v8623_v46 = vor.u32 %v11946_v41, %v8622_v40  ;;  %v8262_v49 = vld [vmem:[#allocation7 + $0x370] sm:$0xf]  ;;  %v7943_v56 = vor.u32 %v11776_v48, %v7942_v47 }
  0x34   :  { %5024 = vmatpush.bf16.msra.mxu1 %v8343_v33  ;;  %v8943_v50 = vor.u32 %v12026_v43, %v8942_v42  ;;  %v11856_v51 = vld [vmem:[#allocation7 + $0x394] sm:$0xf0]  ;;  %v8582_v52 = vld [vmem:[#allocation7 + $0x5f0] sm:$0xf]  ;;  %v7902_v59 = vld [vmem:[#allocation7 + $0xa0] sm:$0xf] }
  0x35   :  { %5037 = vmatpush.bf16.msra.mxu2 %v8663_v34  ;;  %v11936_v53 = vld [vmem:[#allocation7 + $0x614] sm:$0xf0]  ;;  %v8902_v54 = vld [vmem:[#allocation7 + $0x870] sm:$0xf]  ;;  %v8263_v57 = vor.u32 %v11856_v51, %v8262_v49  ;;  %v11766_v60 = vld [vmem:[#allocation7 + $0xc4] sm:$0xf0] }
  0x36   :  { %5050 = vmatpush.bf16.msra.mxu3 %v8983_v38  ;;  %v12016_v55 = vld [vmem:[#allocation7 + $0x894] sm:$0xf0]  ;;  %v8583_v58 = vor.u32 %v11936_v53, %v8582_v52  ;;  %v8222_v61 = vld [vmem:[#allocation7 + $0x320] sm:$0xf]  ;;  %v11846_v63 = vld [vmem:[#allocation7 + $0x344] sm:$0xf0]  ;;  %v7903_v4 = vor.u32 %v11766_v60, %v7902_v59 }
  0x37   :  { %5012 = vmatpush.bf16.msra.mxu0 %v7983_v44  ;;  %v8903_v62 = vor.u32 %v12016_v55, %v8902_v54  ;;  %v8542_v0 = vld [vmem:[#allocation7 + $0x5a0] sm:$0xf]  ;;  %v11926_v1 = vld [vmem:[#allocation7 + $0x5c4] sm:$0xf0]  ;;  %v8223_v5 = vor.u32 %v11846_v63, %v8222_v61  ;;  %v7862_v7 = vld [vmem:[#allocation7 + $0x50] sm:$0xf] }
  0x38   :  { %5025 = vmatpush.bf16.msra.mxu1 %v8303_v45  ;;  %v8862_v2 = vld [vmem:[#allocation7 + $0x820] sm:$0xf]  ;;  %v12006_v3 = vld [vmem:[#allocation7 + $0x844] sm:$0xf0]  ;;  %v8543_v6 = vor.u32 %v11926_v1, %v8542_v0  ;;  %v11756_v8 = vld [vmem:[#allocation7 + $0x74] sm:$0xf0] }
  0x39   :  { %5038 = vmatpush.bf16.msra.mxu2 %v8623_v46  ;;  %v8182_v9 = vld [vmem:[#allocation7 + $0x2d0] sm:$0xf]  ;;  %v8863_v10 = vor.u32 %v12006_v3, %v8862_v2  ;;  %v11836_v11 = vld [vmem:[#allocation7 + $0x2f4] sm:$0xf0]  ;;  %v7863_v16 = vor.u32 %v11756_v8, %v7862_v7  ;;  %v7822_v17 = vld [vmem:[#allocation7] sm:$0xf] }
  0x3a   :  { %5051 = vmatpush.bf16.msra.mxu3 %v8943_v50  ;;  %v8502_v12 = vld [vmem:[#allocation7 + $0x550] sm:$0xf]  ;;  %v11916_v13 = vld [vmem:[#allocation7 + $0x574] sm:$0xf0]  ;;  %v11746_v18 = vld [vmem:[#allocation7 + $0x24] sm:$0xf0]  ;;  %v8183_v19 = vor.u32 %v11836_v11, %v8182_v9 }
  0x3b   :  { %5013 = vmatpush.bf16.msra.mxu0 %v7943_v56  ;;  %v8822_v14 = vld [vmem:[#allocation7 + $0x7d0] sm:$0xf]  ;;  %v11996_v15 = vld [vmem:[#allocation7 + $0x7f4] sm:$0xf0]  ;;  %v8503_v20 = vor.u32 %v11916_v13, %v8502_v12  ;;  %v8142_v21 = vld [vmem:[#allocation7 + $0x280] sm:$0xf]  ;;  %v7823_v31 = vor.u32 %v11746_v18, %v7822_v17 }
  0x3c   :  { %5026 = vmatpush.bf16.msra.mxu1 %v8263_v57  ;;  %v11826_v22 = vld [vmem:[#allocation7 + $0x2a4] sm:$0xf0]  ;;  %v8462_v23 = vld [vmem:[#allocation7 + $0x500] sm:$0xf]  ;;  %v8823_v24 = vor.u32 %v11996_v15, %v8822_v14  ;;  %v9382_v28 = vld [vmem:[#allocation7 + $0xc30] sm:$0xf] }
  0x3d   :  { %5039 = vmatpush.bf16.msra.mxu2 %v8583_v58  ;;  %v11906_v25 = vld [vmem:[#allocation7 + $0x524] sm:$0xf0]  ;;  %v8782_v26 = vld [vmem:[#allocation7 + $0x780] sm:$0xf]  ;;  %v12136_v29 = vld [vmem:[#allocation7 + $0xc54] sm:$0xf0]  ;;  %v8143_v35 = vor.u32 %v11826_v22, %v8142_v21 }
  0x3e   :  { %5052 = vmatpush.bf16.msra.mxu3 %v8903_v62  ;;  %v11986_v27 = vld [vmem:[#allocation7 + $0x7a4] sm:$0xf0]  ;;  %v9702_v30 = vld [vmem:[#allocation7 + $0xeb0] sm:$0xf]  ;;  %v12216_v32 = vld [vmem:[#allocation7 + $0xed4] sm:$0xf0]  ;;  %v8463_v36 = vor.u32 %v11906_v25, %v8462_v23  ;;  %v9383_v40 = vor.u32 %v12136_v29, %v9382_v28 }
  0x3f   :  { %5014 = vmatpush.bf16.msra.mxu0 %v7903_v4  ;;  %v10022_v33 = vld [vmem:[#allocation7 + $0x1130] sm:$0xf]  ;;  %v12296_v34 = vld [vmem:[#allocation7 + $0x1154] sm:$0xf0]  ;;  %v8783_v39 = vor.u32 %v11986_v27, %v8782_v26  ;;  %v9703_v41 = vor.u32 %v12216_v32, %v9702_v30  ;;  %v9342_v43 = vld [vmem:[#allocation7 + $0xbe0] sm:$0xf] }
  0x40   :  { %5027 = vmatpush.bf16.msra.mxu1 %v8223_v5  ;;  %v10342_v37 = vld [vmem:[#allocation7 + $0x13b0] sm:$0xf]  ;;  %v12376_v38 = vld [vmem:[#allocation7 + $0x13d4] sm:$0xf0]  ;;  %v10023_v42 = vor.u32 %v12296_v34, %v10022_v33  ;;  %v12126_v44 = vld [vmem:[#allocation7 + $0xc04] sm:$0xf0] }
  0x41   :  { %5040 = vmatpush.bf16.msra.mxu2 %v8543_v6  ;;  %v9662_v45 = vld [vmem:[#allocation7 + $0xe60] sm:$0xf]  ;;  %v10343_v46 = vor.u32 %v12376_v38, %v10342_v37  ;;  %v12206_v47 = vld [vmem:[#allocation7 + $0xe84] sm:$0xf0]  ;;  %v9343_v52 = vor.u32 %v12126_v44, %v9342_v43  ;;  %v9302_v53 = vld [vmem:[#allocation7 + $0xb90] sm:$0xf] }
  0x42   :  { %5053 = vmatpush.bf16.msra.mxu3 %v8863_v10  ;;  %v9982_v48 = vld [vmem:[#allocation7 + $0x10e0] sm:$0xf]  ;;  %v12286_v49 = vld [vmem:[#allocation7 + $0x1104] sm:$0xf0]  ;;  %v9663_v54 = vor.u32 %v12206_v47, %v9662_v45  ;;  %v12116_v56 = vld [vmem:[#allocation7 + $0xbb4] sm:$0xf0] }
  0x43   :  { %5015 = vmatpush.bf16.msra.mxu0 %v7863_v16  ;;  %v10302_v50 = vld [vmem:[#allocation7 + $0x1360] sm:$0xf]  ;;  %v12366_v51 = vld [vmem:[#allocation7 + $0x1384] sm:$0xf0]  ;;  %v9983_v55 = vor.u32 %v12286_v49, %v9982_v48  ;;  %v9622_v57 = vld [vmem:[#allocation7 + $0xe10] sm:$0xf]  ;;  %v9303_v0 = vor.u32 %v12116_v56, %v9302_v53 }
  0x44   :  { %5028 = vmatpush.bf16.msra.mxu1 %v8183_v19  ;;  %v12196_v58 = vld [vmem:[#allocation7 + $0xe34] sm:$0xf0]  ;;  %v10303_v59 = vor.u32 %v12366_v51, %v10302_v50  ;;  %v9942_v60 = vld [vmem:[#allocation7 + $0x1090] sm:$0xf]  ;;  %v9262_v2 = vld [vmem:[#allocation7 + $0xb40] sm:$0xf] }
  0x45   :  { %5041 = vmatpush.bf16.msra.mxu2 %v8503_v20  ;;  %v12276_v61 = vld [vmem:[#allocation7 + $0x10b4] sm:$0xf0]  ;;  %v10262_v62 = vld [vmem:[#allocation7 + $0x1310] sm:$0xf]  ;;  %v9623_v1 = vor.u32 %v12196_v58, %v9622_v57  ;;  %v167_v3 = vld [vmem:[#allocation2 + $0x10] sm:$0xff]  ;;  %vm7781_vm13 = vcmask 523264  }
  0x46   :  { %5054 = vmatpush.bf16.msra.mxu3 %v8823_v24  ;;  %v12356_v63 = vld [vmem:[#allocation7 + $0x1334] sm:$0xf0]  ;;  %v165_v4 = vld [vmem:[#allocation2] sm:$0xff]  ;;  %v9943_v5 = vor.u32 %v12276_v61, %v9942_v60  ;;  %v12106_v6 = vld [vmem:[#allocation7 + $0xb64] sm:$0xf0]  ;;  %v13092_v8 = vpack.c.bf16 %v167_v3, %v167_v3  ;;  %s7806_s17 = sshll.u32 %s13475_s10, 4  ;;  %s7807_s17 = int_to_ptr.hbm [resolvable:$true] %s7806_s17 }
  0x47   :  { %5016 = vmatpush.bf16.msra.mxu0 %v7823_v31  ;;  %v9582_v7 = vld [vmem:[#allocation7 + $0xdc0] sm:$0xf]  ;;  %v13094_v9 = vpack.c.bf16 %v165_v4, %v165_v4  ;;  %v168_v10 = vld [vmem:[#allocation2 + $0x18] sm:$0xff]  ;;  %v10263_v11 = vor.u32 %v12356_v63, %v10262_v62  ;;  %v9263_v18 = vor.u32 %v12106_v6, %v9262_v2  ;;  %v166_v19 = vld [vmem:[#allocation2 + $0x8] sm:$0xff] }
  0x48   :  { %5029 = vmatpush.bf16.msra.mxu1 %v8143_v35  ;;  %v12186_v12 = vld [vmem:[#allocation7 + $0xde4] sm:$0xf0]  ;;  %v9902_v13 = vld [vmem:[#allocation7 + $0x1040] sm:$0xf]  ;;  %v13096_v15 = vpack.c.bf16 %v168_v10, %v168_v10  ;;  %v9222_v22 = vld [vmem:[#allocation7 + $0xaf0] sm:$0xf]  ;;  %v13101_v25 = vpack.c.bf16 %v166_v19, %v166_v19 }
  0x49   :  { %5042 = vmatpush.bf16.msra.mxu2 %v8463_v36  ;;  %v12266_v14 = vld [vmem:[#allocation7 + $0x1064] sm:$0xf0]  ;;  %v10222_v16 = vld [vmem:[#allocation7 + $0x12c0] sm:$0xf]  ;;  %v9583_v20 = vor.u32 %v12186_v12, %v9582_v7  ;;  %v12096_v23 = vld [vmem:[#allocation7 + $0xb14] sm:$0xf0] }
  0x4a   :  { %5055 = vmatpush.bf16.msra.mxu3 %v8783_v39  ;;  %v12346_v17 = vld [vmem:[#allocation7 + $0x12e4] sm:$0xf0]  ;;  %5017 = vmatmul.bf16.vlgmr.msra.gmra.mxu0 %v13094_v9  ;;  %v9903_v21 = vor.u32 %v12266_v14, %v9902_v13  ;;  %v9542_v24 = vld [vmem:[#allocation7 + $0xd70] sm:$0xf]  ;;  %v12176_v27 = vld [vmem:[#allocation7 + $0xd94] sm:$0xf0]  ;;  %v9223_v32 = vor.u32 %v12096_v23, %v9222_v22 }
  0x4b   :  { %5061 = vmatpush.bf16.msrb.mxu0 %v9383_v40  ;;  %v10223_v26 = vor.u32 %v12346_v17, %v10222_v16  ;;  %v9862_v28 = vld [vmem:[#allocation7 + $0xff0] sm:$0xf]  ;;  %v12256_v29 = vld [vmem:[#allocation7 + $0x1014] sm:$0xf0]  ;;  %5030 = vmatmul.bf16.vlgmr.msra.gmra.mxu1 %v13101_v25  ;;  %v9543_v33 = vor.u32 %v12176_v27, %v9542_v24  ;;  %v9182_v35 = vld [vmem:[#allocation7 + $0xaa0] sm:$0xf] }
  0x4c   :  { %5074 = vmatpush.bf16.msrb.mxu1 %v9703_v41  ;;  %5043 = vmatmul.bf16.vlgmr.msra.gmra.mxu2 %v13092_v8  ;;  %v10182_v30 = vld [vmem:[#allocation7 + $0x1270] sm:$0xf]  ;;  %v12336_v31 = vld [vmem:[#allocation7 + $0x1294] sm:$0xf0]  ;;  %v9863_v34 = vor.u32 %v12256_v29, %v9862_v28  ;;  %v12086_v36 = vld [vmem:[#allocation7 + $0xac4] sm:$0xf0] }
  0x4d   :  { %5087 = vmatpush.bf16.msrb.mxu2 %v10023_v42  ;;  %5056 = vmatmul.bf16.vlgmr.msra.gmra.mxu3 %v13096_v15  ;;  %v9502_v37 = vld [vmem:[#allocation7 + $0xd20] sm:$0xf]  ;;  %v10183_v38 = vor.u32 %v12336_v31, %v10182_v30  ;;  %v12166_v39 = vld [vmem:[#allocation7 + $0xd44] sm:$0xf0]  ;;  %v9183_v44 = vor.u32 %v12086_v36, %v9182_v35  ;;  %v9142_v47 = vld [vmem:[#allocation7 + $0xa50] sm:$0xf] }
  0x4e   :  { %5100 = vmatpush.bf16.msrb.mxu3 %v10343_v46  ;;  %v9822_v40 = vld [vmem:[#allocation7 + $0xfa0] sm:$0xf]  ;;  %v12246_v41 = vld [vmem:[#allocation7 + $0xfc4] sm:$0xf0]  ;;  %v9503_v45 = vor.u32 %v12166_v39, %v9502_v37  ;;  %v12076_v48 = vld [vmem:[#allocation7 + $0xa74] sm:$0xf0] }
  0x4f   :  { %5062 = vmatpush.bf16.msrb.mxu0 %v9343_v52  ;;  %v10142_v42 = vld [vmem:[#allocation7 + $0x1220] sm:$0xf]  ;;  %v12326_v43 = vld [vmem:[#allocation7 + $0x1244] sm:$0xf0]  ;;  %v9823_v46 = vor.u32 %v12246_v41, %v9822_v40  ;;  %v9462_v49 = vld [vmem:[#allocation7 + $0xcd0] sm:$0xf]  ;;  %v9143_v56 = vor.u32 %v12076_v48, %v9142_v47 }
  0x50   :  { %5075 = vmatpush.bf16.msrb.mxu1 %v9663_v54  ;;  %v10143_v50 = vor.u32 %v12326_v43, %v10142_v42  ;;  %v12156_v51 = vld [vmem:[#allocation7 + $0xcf4] sm:$0xf0]  ;;  %v9782_v52 = vld [vmem:[#allocation7 + $0xf50] sm:$0xf]  ;;  %v9102_v57 = vld [vmem:[#allocation7 + $0xa00] sm:$0xf] }
  0x51   :  { %5088 = vmatpush.bf16.msrb.mxu2 %v9983_v55  ;;  %v12236_v53 = vld [vmem:[#allocation7 + $0xf74] sm:$0xf0]  ;;  %v10102_v54 = vld [vmem:[#allocation7 + $0x11d0] sm:$0xf]  ;;  %v12066_v58 = vld [vmem:[#allocation7 + $0xa24] sm:$0xf0] }
  0x52   :  { %5101 = vmatpush.bf16.msrb.mxu3 %v10303_v59  ;;  %v12316_v55 = vld [vmem:[#allocation7 + $0x11f4] sm:$0xf0]  ;;  %v9463_v59 = vor.u32 %v12156_v51, %v9462_v49  ;;  %v9783_v60 = vor.u32 %v12236_v53, %v9782_v52  ;;  %v9422_v61 = vld [vmem:[#allocation7 + $0xc80] sm:$0xf]  ;;  %v12146_v62 = vld [vmem:[#allocation7 + $0xca4] sm:$0xf0]  ;;  %v9103_v7 = vor.u32 %v12066_v58, %v9102_v57 }
  0x53   :  { %5063 = vmatpush.bf16.msrb.mxu0 %v9303_v0  ;;  %v9742_v63 = vld [vmem:[#allocation7 + $0xf00] sm:$0xf]  ;;  %v10103_v0 = vor.u32 %v12316_v55, %v10102_v54  ;;  %v12306_v3 = vld [vmem:[#allocation7 + $0x11a4] sm:$0xf0]  ;;  %v10662_v4 = vld [vmem:[#allocation7 + $0x1630] sm:$0xf]  ;;  %v9423_v13 = vor.u32 %v12146_v62, %v9422_v61 }
  0x54   :  { %5076 = vmatpush.bf16.msrb.mxu1 %v9623_v1  ;;  %v12226_v1 = vld [vmem:[#allocation7 + $0xf24] sm:$0xf0]  ;;  %v10062_v2 = vld [vmem:[#allocation7 + $0x1180] sm:$0xf]  ;;  %v10982_v6 = vld [vmem:[#allocation7 + $0x18b0] sm:$0xf] }
  0x55   :  { %5089 = vmatpush.bf16.msrb.mxu2 %v9943_v5  ;;  %v12456_v5 = vld [vmem:[#allocation7 + $0x1654] sm:$0xf0]  ;;  %v8104_v12 = vld [vmem:[#allocation7 + $0x258] sm:$0xf0]  ;;  %v9743_v14 = vor.u32 %v12226_v1, %v9742_v63  ;;  %v11891_v16 = vld [vmem:[#allocation7 + $0x4b4] sm:$0xf]  ;;  %v10063_v19 = vor.u32 %v12306_v3, %v10062_v2 }
  0x56   :  { %5102 = vmatpush.bf16.msrb.mxu3 %v10263_v11  ;;  %v12536_v10 = vld [vmem:[#allocation7 + $0x18d4] sm:$0xf0]  ;;  %v11811_v11 = vld [vmem:[#allocation7 + $0x234] sm:$0xf]  ;;  %v8424_v17 = vld [vmem:[#allocation7 + $0x4d8] sm:$0xf0] }
  0x57   :  { %5064 = vmatpush.bf16.msrb.mxu0 %v9263_v18  ;;  %v171_v18 = vld [vmem:[#allocation5 + $0x10] sm:$0xff]  ;;  %v169_v22 = vld [vmem:[#allocation5] sm:$0xff]  ;;  %v172_v23 = vld [vmem:[#allocation5 + $0x18] sm:$0xff]  ;;  %v10983_v24 = vor.u32 %v12536_v10, %v10982_v6  ;;  %v8427_v30 = vor.u32 %v11891_v16, %v8424_v17 }
  0x58   :  { %5077 = vmatpush.bf16.msrb.mxu1 %v9583_v20  ;;  %v10663_v20 = vor.u32 %v12456_v5, %v10662_v4  ;;  %v12446_v27 = vld [vmem:[#allocation7 + $0x1604] sm:$0xf0]  ;;  %v10942_v28 = vld [vmem:[#allocation7 + $0x1860] sm:$0xf]  ;;  %v170_v29 = vld [vmem:[#allocation5 + $0x8] sm:$0xff]  ;;  %v13106_v37 = vpack.c.bf16 %v169_v22, %v169_v22 }
  0x59   :  { %5090 = vmatpush.bf16.msrb.mxu2 %v9903_v21  ;;  %v10622_v21 = vld [vmem:[#allocation7 + $0x15e0] sm:$0xf]  ;;  %v12526_v31 = vld [vmem:[#allocation7 + $0x1884] sm:$0xf0]  ;;  %v11881_v35 = vld [vmem:[#allocation7 + $0x464] sm:$0xf]  ;;  %v13110_v40 = vpack.c.bf16 %v170_v29, %v170_v29 }
  0x5a   :  { %5103 = vmatpush.bf16.msrb.mxu3 %v10223_v26  ;;  %v8107_v26 = vor.u32 %v11811_v11, %v8104_v12  ;;  %v8384_v36 = vld [vmem:[#allocation7 + $0x488] sm:$0xf0]  ;;  %v10623_v39 = vor.u32 %v12446_v27, %v10622_v21  ;;  %v10943_v41 = vor.u32 %v12526_v31, %v10942_v28  ;;  %v10582_v43 = vld [vmem:[#allocation7 + $0x1590] sm:$0xf]  ;;  %v12516_v47 = vld [vmem:[#allocation7 + $0x1834] sm:$0xf0] }
  0x5b   :  { %5065 = vmatpush.bf16.msrb.mxu0 %v9223_v32  ;;  %v11801_v32 = vld [vmem:[#allocation7 + $0x1e4] sm:$0xf]  ;;  %v11791_v48 = vld [vmem:[#allocation7 + $0x194] sm:$0xf]  ;;  %v8024_v49 = vld [vmem:[#allocation7 + $0x1b8] sm:$0xf0] }
  0x5c   :  { %5078 = vmatpush.bf16.msrb.mxu1 %v9543_v33  ;;  %v8064_v33 = vld [vmem:[#allocation7 + $0x208] sm:$0xf0]  ;;  %v8344_v51 = vld [vmem:[#allocation7 + $0x438] sm:$0xf0]  ;;  %v8027_v54 = vor.u32 %v11791_v48, %v8024_v49  ;;  %v10542_v55 = vld [vmem:[#allocation7 + $0x1540] sm:$0xf] }
  0x5d   :  { %5091 = vmatpush.bf16.msrb.mxu2 %v9863_v34  ;;  %v13104_v34 = vpack.c.bf16 %v171_v18, %v171_v18  ;;  %v8067_v42 = vor.u32 %v11801_v32, %v8064_v33  ;;  %v10862_v57 = vld [vmem:[#allocation7 + $0x17c0] sm:$0xf]  ;;  %v7984_v61 = vld [vmem:[#allocation7 + $0x168] sm:$0xf0]  ;;  %v11861_v62 = vld [vmem:[#allocation7 + $0x3c4] sm:$0xf] }
  0x5e   :  { %5104 = vmatpush.bf16.msrb.mxu3 %v10183_v38  ;;  %v13108_v38 = vpack.c.bf16 %v172_v23, %v172_v23  ;;  %v8304_v63 = vld [vmem:[#allocation7 + $0x3e8] sm:$0xf0]  ;;  %v10502_v3 = vld [vmem:[#allocation7 + $0x14f0] sm:$0xf]  ;;  %v12416_v4 = vld [vmem:[#allocation7 + $0x1514] sm:$0xf0] }
  0x5f   :  { %5066 = vmatpush.bf16.msrb.mxu0 %v9183_v44  ;;  %v12436_v44 = vld [vmem:[#allocation7 + $0x15b4] sm:$0xf0]  ;;  %v10822_v5 = vld [vmem:[#allocation7 + $0x1770] sm:$0xf]  ;;  %v8307_v6 = vor.u32 %v11861_v62, %v8304_v63  ;;  %v11771_v10 = vld [vmem:[#allocation7 + $0xf4] sm:$0xf] }
  0x60   :  { %5079 = vmatpush.bf16.msrb.mxu1 %v9503_v45  ;;  %v10902_v45 = vld [vmem:[#allocation7 + $0x1810] sm:$0xf]  ;;  %v10583_v52 = vor.u32 %v12436_v44, %v10582_v43  ;;  %v7944_v11 = vld [vmem:[#allocation7 + $0x118] sm:$0xf0]  ;;  %v11851_v12 = vld [vmem:[#allocation7 + $0x374] sm:$0xf] }
  0x61   :  { %5092 = vmatpush.bf16.msrb.mxu2 %v9823_v46  ;;  %v8387_v46 = vor.u32 %v11881_v35, %v8384_v36  ;;  %v10903_v53 = vor.u32 %v12516_v47, %v10902_v45  ;;  %v7947_v17 = vor.u32 %v11771_v10, %v7944_v11  ;;  %v10462_v18 = vld [vmem:[#allocation7 + $0x14a0] sm:$0xf]  ;;  %v12486_v22 = vld [vmem:[#allocation7 + $0x1744] sm:$0xf0]  ;;  %v11761_v23 = vld [vmem:[#allocation7 + $0xa4] sm:$0xf] }
  0x62   :  { %5105 = vmatpush.bf16.msrb.mxu3 %v10143_v50  ;;  %v11871_v50 = vld [vmem:[#allocation7 + $0x414] sm:$0xf]  ;;  %v8224_v27 = vld [vmem:[#allocation7 + $0x348] sm:$0xf0]  ;;  %v10422_v31 = vld [vmem:[#allocation7 + $0x1450] sm:$0xf] }
  0x63   :  { %5067 = vmatpush.bf16.msrb.mxu0 %v9143_v56  ;;  %v12426_v56 = vld [vmem:[#allocation7 + $0x1564] sm:$0xf0]  ;;  %v8347_v58 = vor.u32 %v11871_v50, %v8344_v51  ;;  %v12396_v32 = vld [vmem:[#allocation7 + $0x1474] sm:$0xf0]  ;;  %v10742_v33 = vld [vmem:[#allocation7 + $0x16d0] sm:$0xf] }
  0x64   :  { %5080 = vmatpush.bf16.msrb.mxu1 %v9463_v59  ;;  %v12506_v59 = vld [vmem:[#allocation7 + $0x17e4] sm:$0xf0]  ;;  %v12476_v36 = vld [vmem:[#allocation7 + $0x16f4] sm:$0xf0]  ;;  %v8184_v43 = vld [vmem:[#allocation7 + $0x2f8] sm:$0xf0]  ;;  %v10423_v45 = vor.u32 %v12396_v32, %v10422_v31 }
  0x65   :  { %5093 = vmatpush.bf16.msrb.mxu2 %v9783_v60  ;;  %v11781_v60 = vld [vmem:[#allocation7 + $0x144] sm:$0xf]  ;;  %v10863_v1 = vor.u32 %v12506_v59, %v10862_v57  ;;  %v10382_v44 = vld [vmem:[#allocation7 + $0x1400] sm:$0xf]  ;;  %v12466_v48 = vld [vmem:[#allocation7 + $0x16a4] sm:$0xf0]  ;;  %v10743_v49 = vor.u32 %v12476_v36, %v10742_v33 }
  0x66   :  { %5106 = vmatpush.bf16.msrb.mxu3 %v10103_v0  ;;  %v10543_v0 = vor.u32 %v12426_v56, %v10542_v55  ;;  %v7987_v2 = vor.u32 %v11781_v60, %v7984_v61  ;;  %v10702_v47 = vld [vmem:[#allocation7 + $0x1680] sm:$0xf]  ;;  %v11741_v51 = vld [vmem:[#allocation7 + $0x4] sm:$0xf]  ;;  %v8144_v55 = vld [vmem:[#allocation7 + $0x2a8] sm:$0xf0] }
  0x67   :  { %5068 = vmatpush.bf16.msrb.mxu0 %v9103_v7  ;;  %v12496_v7 = vld [vmem:[#allocation7 + $0x1794] sm:$0xf0]  ;;  %v11971_v56 = vld [vmem:[#allocation7 + $0x734] sm:$0xf]  ;;  %v8744_v57 = vld [vmem:[#allocation7 + $0x758] sm:$0xf0]  ;;  %v10703_v63 = vor.u32 %v12466_v48, %v10702_v47 }
  0x68   :  { %5081 = vmatpush.bf16.msrb.mxu1 %v9423_v13  ;;  %v8264_v13 = vld [vmem:[#allocation7 + $0x398] sm:$0xf0]  ;;  %v10823_v16 = vor.u32 %v12496_v7, %v10822_v5  ;;  %v12131_v61 = vld [vmem:[#allocation7 + $0xc34] sm:$0xf]  ;;  %v8747_v5 = vor.u32 %v11971_v56, %v8744_v57  ;;  %v11961_v11 = vld [vmem:[#allocation7 + $0x6e4] sm:$0xf] }
  0x69   :  { %5094 = vmatpush.bf16.msrb.mxu2 %v9743_v14  ;;  %v10503_v14 = vor.u32 %v12416_v4, %v10502_v3  ;;  %v8267_v21 = vor.u32 %v11851_v12, %v8264_v13  ;;  %v9064_v60 = vld [vmem:[#allocation7 + $0x9d8] sm:$0xf0]  ;;  %v173_v3 = vld [vmem:[#allocation5 + $0x20] sm:$0xff]  ;;  %v8704_v12 = vld [vmem:[#allocation7 + $0x708] sm:$0xf0] }
  0x6a   :  { %5107 = vmatpush.bf16.msrb.mxu3 %v10063_v19  ;;  %5069 = vmatmul.bf16.vlgmr.msrb.gmra.mxu0 %v13106_v37  ;;  %v12406_v19 = vld [vmem:[#allocation7 + $0x14c4] sm:$0xf0]  ;;  %v9384_v62 = vld [vmem:[#allocation7 + $0xc58] sm:$0xf0]  ;;  %v12041_v13 = vld [vmem:[#allocation7 + $0x964] sm:$0xf] }
  0x6b   :  { %5113 = vmatpush.bf16.msra.mxu0 %v10663_v20  ;;  %5082 = vmatmul.bf16.vlgmr.msrb.gmra.mxu1 %v13110_v40  ;;  %v10782_v20 = vld [vmem:[#allocation7 + $0x1720] sm:$0xf]  ;;  %v10463_v28 = vor.u32 %v12406_v19, %v10462_v18  ;;  %v9387_v10 = vor.u32 %v12131_v61, %v9384_v62  ;;  %v12121_v18 = vld [vmem:[#allocation7 + $0xbe4] sm:$0xf]  ;;  %v9344_v19 = vld [vmem:[#allocation7 + $0xc08] sm:$0xf0] }
  0x6c   :  { %5126 = vmatpush.bf16.msra.mxu1 %v10983_v24  ;;  %5095 = vmatmul.bf16.vlgmr.msrb.gmra.mxu2 %v13104_v34  ;;  %v7904_v24 = vld [vmem:[#allocation7 + $0xc8] sm:$0xf0]  ;;  %v10783_v29 = vor.u32 %v12486_v22, %v10782_v20  ;;  %v8984_v31 = vld [vmem:[#allocation7 + $0x938] sm:$0xf0]  ;;  %v12111_v32 = vld [vmem:[#allocation7 + $0xb94] sm:$0xf] }
  0x6d   :  { %5139 = vmatpush.bf16.msra.mxu2 %v8107_v26  ;;  %5108 = vmatmul.bf16.vlgmr.msrb.gmra.mxu3 %v13108_v38  ;;  %v11841_v26 = vld [vmem:[#allocation7 + $0x324] sm:$0xf]  ;;  %v9664_v22 = vld [vmem:[#allocation7 + $0xe88] sm:$0xf0]  ;;  %v9304_v33 = vld [vmem:[#allocation7 + $0xbb8] sm:$0xf0] }
  0x6e   :  { %5152 = vmatpush.bf16.msra.mxu3 %v8427_v30  ;;  %v7907_v30 = vor.u32 %v11761_v23, %v7904_v24  ;;  %v8227_v35 = vor.u32 %v11841_v26, %v8224_v27  ;;  %v8707_v23 = vor.u32 %v11961_v11, %v8704_v12  ;;  %v9347_v26 = vor.u32 %v12121_v18, %v9344_v19  ;;  %v11951_v27 = vld [vmem:[#allocation7 + $0x694] sm:$0xf]  ;;  %v9624_v36 = vld [vmem:[#allocation7 + $0xe38] sm:$0xf0]  ;;  %v8944_v47 = vld [vmem:[#allocation7 + $0x8e8] sm:$0xf0] }
  0x6f   :  { %5114 = vmatpush.bf16.msra.mxu0 %v10623_v39  ;;  %v11751_v39 = vld [vmem:[#allocation7 + $0x54] sm:$0xf]  ;;  %v12101_v48 = vld [vmem:[#allocation7 + $0xb44] sm:$0xf]  ;;  %v8584_v56 = vld [vmem:[#allocation7 + $0x618] sm:$0xf0] }
  0x70   :  { %5127 = vmatpush.bf16.msra.mxu1 %v10943_v41  ;;  %v7864_v41 = vld [vmem:[#allocation7 + $0x78] sm:$0xf0]  ;;  %v12011_v57 = vld [vmem:[#allocation7 + $0x874] sm:$0xf]  ;;  %v9184_v11 = vld [vmem:[#allocation7 + $0xac8] sm:$0xf0] }
  0x71   :  { %5140 = vmatpush.bf16.msra.mxu2 %v8067_v42  ;;  %v11831_v42 = vld [vmem:[#allocation7 + $0x2d4] sm:$0xf]  ;;  %v7867_v50 = vor.u32 %v11751_v39, %v7864_v41  ;;  %v9224_v61 = vld [vmem:[#allocation7 + $0xb18] sm:$0xf0]  ;;  %v12161_v12 = vld [vmem:[#allocation7 + $0xd24] sm:$0xf] }
  0x72   :  { %5153 = vmatpush.bf16.msra.mxu3 %v8387_v46  ;;  %v12386_v46 = vld [vmem:[#allocation7 + $0x1424] sm:$0xf0]  ;;  %v12171_v62 = vld [vmem:[#allocation7 + $0xd74] sm:$0xf] }
  0x73   :  { %5115 = vmatpush.bf16.msra.mxu0 %v10583_v52  ;;  %v7824_v52 = vld [vmem:[#allocation7 + $0x28] sm:$0xf0]  ;;  %v10383_v59 = vor.u32 %v12386_v46, %v10382_v44  ;;  %v11911_v19 = vld [vmem:[#allocation7 + $0x554] sm:$0xf] }
  0x74   :  { %5128 = vmatpush.bf16.msra.mxu1 %v10903_v53  ;;  %v11821_v53 = vld [vmem:[#allocation7 + $0x284] sm:$0xf]  ;;  %v8624_v44 = vld [vmem:[#allocation7 + $0x668] sm:$0xf0] }
  0x75   :  { %5141 = vmatpush.bf16.msra.mxu2 %v8027_v54  ;;  %v8187_v54 = vor.u32 %v11831_v42, %v8184_v43  ;;  %v8147_v4 = vor.u32 %v11821_v53, %v8144_v55  ;;  %v9307_v42 = vor.u32 %v12111_v32, %v9304_v33  ;;  %v11941_v43 = vld [vmem:[#allocation7 + $0x644] sm:$0xf]  ;;  %v11931_v55 = vld [vmem:[#allocation7 + $0x5f4] sm:$0xf]  ;;  %v8464_v32 = vld [vmem:[#allocation7 + $0x528] sm:$0xf0] }
  0x76   :  { %5154 = vmatpush.bf16.msra.mxu3 %v8347_v58  ;;  %v12051_v58 = vld [vmem:[#allocation7 + $0x9b4] sm:$0xf] }
  0x77   :  { %5116 = vmatpush.bf16.msra.mxu0 %v10543_v0  ;;  %v7827_v0 = vor.u32 %v11741_v51, %v7824_v52  ;;  %v9067_v7 = vor.u32 %v12051_v58, %v9064_v60  ;;  %v9584_v51 = vld [vmem:[#allocation7 + $0xde8] sm:$0xf0]  ;;  %v8627_v52 = vor.u32 %v11941_v43, %v8624_v44  ;;  %v12091_v60 = vld [vmem:[#allocation7 + $0xaf4] sm:$0xf]  ;;  %v12141_v44 = vld [vmem:[#allocation7 + $0xc84] sm:$0xf] }
  0x78   :  { %5129 = vmatpush.bf16.msra.mxu1 %v10863_v1  ;;  %v12211_v1 = vld [vmem:[#allocation7 + $0xeb4] sm:$0xf]  ;;  %v9104_v43 = vld [vmem:[#allocation7 + $0xa28] sm:$0xf0] }
  0x79   :  { %5142 = vmatpush.bf16.msra.mxu2 %v7987_v2  ;;  %v9704_v2 = vld [vmem:[#allocation7 + $0xed8] sm:$0xf0] }
  0x7a   :  { %5155 = vmatpush.bf16.msra.mxu3 %v8307_v6  ;;  %v174_v6 = vld [vmem:[#allocation5 + $0x28] sm:$0xff] }
  0x7b   :  { %5117 = vmatpush.bf16.msra.mxu0 %v10503_v14  ;;  %v9707_v14 = vor.u32 %v12211_v1, %v9704_v2  ;;  %v13118_v20 = vpack.c.bf16 %v174_v6, %v174_v6  ;;  %v9227_v2 = vor.u32 %v12091_v60, %v9224_v61  ;;  %v12281_v61 = vld [vmem:[#allocation7 + $0x10e4] sm:$0xf] }
  0x7c   :  { %5130 = vmatpush.bf16.msra.mxu1 %v10823_v16  ;;  %v13116_v16 = vpack.c.bf16 %v173_v3, %v173_v3  ;;  %v11921_v3 = vld [vmem:[#allocation7 + $0x5a4] sm:$0xf] }
  0x7d   :  { %5143 = vmatpush.bf16.msra.mxu2 %v7947_v17  ;;  %v9024_v17 = vld [vmem:[#allocation7 + $0x988] sm:$0xf0] }
  0x7e   :  { %5156 = vmatpush.bf16.msra.mxu3 %v8267_v21  ;;  %v12201_v21 = vld [vmem:[#allocation7 + $0xe64] sm:$0xf]  ;;  %v9027_v24 = vor.u32 %v12041_v13, %v9024_v17  ;;  %v9504_v13 = vld [vmem:[#allocation7 + $0xd48] sm:$0xf0] }
  0x7f   :  { %5118 = vmatpush.bf16.msra.mxu0 %v10463_v28  ;;  %v8664_v28 = vld [vmem:[#allocation7 + $0x6b8] sm:$0xf0] }
  0x80   :  { %5131 = vmatpush.bf16.msra.mxu1 %v10783_v29  ;;  %v12031_v29 = vld [vmem:[#allocation7 + $0x914] sm:$0xf]  ;;  %v8667_v39 = vor.u32 %v11951_v27, %v8664_v28  ;;  %v9144_v27 = vld [vmem:[#allocation7 + $0xa78] sm:$0xf0] }
  0x81   :  { %5144 = vmatpush.bf16.msra.mxu2 %v7907_v30  ;;  %v9667_v30 = vor.u32 %v12201_v21, %v9664_v22  ;;  %v8987_v41 = vor.u32 %v12031_v29, %v8984_v31  ;;  %v8504_v21 = vld [vmem:[#allocation7 + $0x578] sm:$0xf0]  ;;  %v11991_v22 = vld [vmem:[#allocation7 + $0x7d4] sm:$0xf]  ;;  %v11901_v31 = vld [vmem:[#allocation7 + $0x504] sm:$0xf] }
  0x82   :  { %5157 = vmatpush.bf16.msra.mxu3 %v8227_v35  ;;  %v12191_v35 = vld [vmem:[#allocation7 + $0xe14] sm:$0xf]  ;;  %v9464_v29 = vld [vmem:[#allocation7 + $0xcf8] sm:$0xf0] }
  0x83   :  { %5119 = vmatpush.bf16.msra.mxu0 %v10423_v45  ;;  %v12021_v45 = vld [vmem:[#allocation7 + $0x8c4] sm:$0xf]  ;;  %v9627_v46 = vor.u32 %v12191_v35, %v9624_v36  ;;  %v12151_v28 = vld [vmem:[#allocation7 + $0xcd4] sm:$0xf] }
  0x84   :  { %5132 = vmatpush.bf16.msra.mxu1 %v10743_v49  ;;  %v9264_v49 = vld [vmem:[#allocation7 + $0xb68] sm:$0xf0]  ;;  %v8947_v53 = vor.u32 %v12021_v45, %v8944_v47  ;;  %v11981_v36 = vld [vmem:[#allocation7 + $0x784] sm:$0xf]  ;;  %v10024_v47 = vld [vmem:[#allocation7 + $0x1158] sm:$0xf0] }
  0x85   :  { %5145 = vmatpush.bf16.msra.mxu2 %v7867_v50  ;;  %v12181_v50 = vld [vmem:[#allocation7 + $0xdc4] sm:$0xf]  ;;  %v9424_v45 = vld [vmem:[#allocation7 + $0xca8] sm:$0xf0] }
  0x86   :  { %5158 = vmatpush.bf16.msra.mxu3 %v8187_v54  ;;  %v9267_v54 = vor.u32 %v12101_v48, %v9264_v49  ;;  %v9587_v58 = vor.u32 %v12181_v50, %v9584_v51  ;;  %v12371_v48 = vld [vmem:[#allocation7 + $0x13b4] sm:$0xf]  ;;  %v8467_v49 = vor.u32 %v11901_v31, %v8464_v32  ;;  %v10344_v50 = vld [vmem:[#allocation7 + $0x13d8] sm:$0xf0]  ;;  %v10224_v31 = vld [vmem:[#allocation7 + $0x12e8] sm:$0xf0] }
  0x87   :  { %5120 = vmatpush.bf16.msra.mxu0 %v10383_v59  ;;  %v8904_v59 = vld [vmem:[#allocation7 + $0x898] sm:$0xf0]  ;;  %v12451_v51 = vld [vmem:[#allocation7 + $0x1634] sm:$0xf]  ;;  %v12421_v32 = vld [vmem:[#allocation7 + $0x1544] sm:$0xf] }
  0x88   :  { %5133 = vmatpush.bf16.msra.mxu1 %v10703_v63  ;;  %v9544_v63 = vld [vmem:[#allocation7 + $0xd98] sm:$0xf0]  ;;  %v8907_v1 = vor.u32 %v12011_v57, %v8904_v59  ;;  %v9427_v57 = vor.u32 %v12141_v44, %v9424_v45  ;;  %v10347_v59 = vor.u32 %v12371_v48, %v10344_v50  ;;  %v12331_v45 = vld [vmem:[#allocation7 + $0x1274] sm:$0xf] }
  0x89   :  { %5146 = vmatpush.bf16.msra.mxu2 %v7827_v0  ;;  %v8587_v0 = vor.u32 %v11931_v55, %v8584_v56  ;;  %v9547_v6 = vor.u32 %v12171_v62, %v9544_v63  ;;  %v12531_v55 = vld [vmem:[#allocation7 + $0x18b4] sm:$0xf]  ;;  %v10984_v56 = vld [vmem:[#allocation7 + $0x18d8] sm:$0xf0]  ;;  %v9984_v62 = vld [vmem:[#allocation7 + $0x1108] sm:$0xf0] }
  0x8a   :  { %5159 = vmatpush.bf16.msra.mxu3 %v8147_v4  ;;  %5121 = vmatmul.bf16.vlgmr.msra.gmra.mxu0 %v13116_v16  ;;  %v8544_v4 = vld [vmem:[#allocation7 + $0x5c8] sm:$0xf0]  ;;  %v12361_v63 = vld [vmem:[#allocation7 + $0x1364] sm:$0xf]  ;;  %v9864_v44 = vld [vmem:[#allocation7 + $0x1018] sm:$0xf0] }
  0x8b   :  { %5165 = vmatpush.bf16.msrb.mxu0 %v8747_v5  ;;  %5134 = vmatmul.bf16.vlgmr.msra.gmra.mxu1 %v13118_v20  ;;  %v12001_v5 = vld [vmem:[#allocation7 + $0x824] sm:$0xf]  ;;  %v12411_v48 = vld [vmem:[#allocation7 + $0x14f4] sm:$0xf] }
  0x8c   :  { %5178 = vmatpush.bf16.msrb.mxu1 %v9067_v7  ;;  %5147 = vmatmul.bf16.vlgmr.msra.gmra.mxu2 %v13094_v9  ;;  %v8864_v7 = vld [vmem:[#allocation7 + $0x848] sm:$0xf0]  ;;  %v12491_v50 = vld [vmem:[#allocation7 + $0x1774] sm:$0xf] }
  0x8d   :  { %5191 = vmatpush.bf16.msrb.mxu2 %v9387_v10  ;;  %5160 = vmatmul.bf16.vlgmr.msra.gmra.mxu3 %v13101_v25  ;;  %v12081_v10 = vld [vmem:[#allocation7 + $0xaa4] sm:$0xf]  ;;  %v8867_v17 = vor.u32 %v12001_v5, %v8864_v7  ;;  %v10944_v5 = vld [vmem:[#allocation7 + $0x1888] sm:$0xf0] }
  0x8e   :  { %5204 = vmatpush.bf16.msrb.mxu3 %v9707_v14  ;;  %v8547_v14 = vor.u32 %v11921_v3, %v8544_v4  ;;  %v9187_v18 = vor.u32 %v12081_v10, %v9184_v11  ;;  %v10624_v3 = vld [vmem:[#allocation7 + $0x1608] sm:$0xf0]  ;;  %v12521_v4 = vld [vmem:[#allocation7 + $0x1864] sm:$0xf]  ;;  %v12271_v11 = vld [vmem:[#allocation7 + $0x1094] sm:$0xf] }
  0x8f   :  { %5166 = vmatpush.bf16.msrb.mxu0 %v8707_v23  ;;  %v9507_v23 = vor.u32 %v12161_v12, %v9504_v13  ;;  %v9944_v12 = vld [vmem:[#allocation7 + $0x10b8] sm:$0xf0]  ;;  %v12351_v13 = vld [vmem:[#allocation7 + $0x1314] sm:$0xf] }
  0x90   :  { %5179 = vmatpush.bf16.msrb.mxu1 %v9027_v24  ;;  %v8824_v24 = vld [vmem:[#allocation7 + $0x7f8] sm:$0xf0] }
  0x91   :  { %5192 = vmatpush.bf16.msrb.mxu2 %v9347_v26  ;;  %v12071_v26 = vld [vmem:[#allocation7 + $0xa54] sm:$0xf]  ;;  %v8827_v33 = vor.u32 %v11991_v22, %v8824_v24  ;;  %v10904_v22 = vld [vmem:[#allocation7 + $0x1838] sm:$0xf0] }
  0x92   :  { %5205 = vmatpush.bf16.msrb.mxu3 %v9667_v30  ;;  %v8507_v30 = vor.u32 %v11911_v19, %v8504_v21  ;;  %v9147_v35 = vor.u32 %v12071_v26, %v9144_v27  ;;  %v10584_v19 = vld [vmem:[#allocation7 + $0x15b8] sm:$0xf0]  ;;  %v12511_v21 = vld [vmem:[#allocation7 + $0x1814] sm:$0xf]  ;;  %v12261_v27 = vld [vmem:[#allocation7 + $0x1044] sm:$0xf] }
  0x93   :  { %5167 = vmatpush.bf16.msrb.mxu0 %v8667_v39  ;;  %v8784_v39 = vld [vmem:[#allocation7 + $0x7a8] sm:$0xf0] }
  0x94   :  { %5180 = vmatpush.bf16.msrb.mxu1 %v8987_v41  ;;  %v12061_v41 = vld [vmem:[#allocation7 + $0xa04] sm:$0xf] }
  0x95   :  { %5193 = vmatpush.bf16.msrb.mxu2 %v9307_v42  ;;  %v9467_v42 = vor.u32 %v12151_v28, %v9464_v29  ;;  %v9904_v28 = vld [vmem:[#allocation7 + $0x1068] sm:$0xf0]  ;;  %v12341_v29 = vld [vmem:[#allocation7 + $0x12c4] sm:$0xf] }
  0x96   :  { %5206 = vmatpush.bf16.msrb.mxu3 %v9627_v46  ;;  %v12291_v46 = vld [vmem:[#allocation7 + $0x1134] sm:$0xf] }
  0x97   :  { %5168 = vmatpush.bf16.msrb.mxu0 %v8627_v52  ;;  %v10664_v52 = vld [vmem:[#allocation7 + $0x1658] sm:$0xf0] }
  0x98   :  { %5181 = vmatpush.bf16.msrb.mxu1 %v8947_v53  ;;  %v8787_v53 = vor.u32 %v11981_v36, %v8784_v39  ;;  %v10667_v60 = vor.u32 %v12451_v51, %v10664_v52  ;;  %v10864_v36 = vld [vmem:[#allocation7 + $0x17e8] sm:$0xf0]  ;;  %v9907_v39 = vor.u32 %v12261_v27, %v9904_v28  ;;  %v10824_v51 = vld [vmem:[#allocation7 + $0x1798] sm:$0xf0]  ;;  %v12461_v28 = vld [vmem:[#allocation7 + $0x1684] sm:$0xf] }
  0x99   :  { %5194 = vmatpush.bf16.msrb.mxu2 %v9267_v54  ;;  %v9107_v54 = vor.u32 %v12061_v41, %v9104_v43  ;;  %v10227_v41 = vor.u32 %v12341_v29, %v10224_v31  ;;  %v12251_v43 = vld [vmem:[#allocation7 + $0xff4] sm:$0xf]  ;;  %v10384_v27 = vld [vmem:[#allocation7 + $0x1428] sm:$0xf0]  ;;  %v11817_v31 = vld [vmem:[#allocation7 + $0x25c] sm:$0xf0] }
  0x9a   :  { %5207 = vmatpush.bf16.msrb.mxu3 %v9587_v58  ;;  %v10027_v58 = vor.u32 %v12291_v46, %v10024_v47  ;;  %v10184_v47 = vld [vmem:[#allocation7 + $0x1298] sm:$0xf0]  ;;  %v9867_v52 = vor.u32 %v12251_v43, %v9864_v44  ;;  %v10704_v29 = vld [vmem:[#allocation7 + $0x16a8] sm:$0xf0]  ;;  %v9070_v43 = vld [vmem:[#allocation7 + $0x9b8] sm:$0xf] }
  0x9b   :  { %5169 = vmatpush.bf16.msrb.mxu0 %v8587_v0  ;;  %v10987_v0 = vor.u32 %v12531_v55, %v10984_v56  ;;  %v12241_v55 = vld [vmem:[#allocation7 + $0xfa4] sm:$0xf]  ;;  %v9824_v56 = vld [vmem:[#allocation7 + $0xfc8] sm:$0xf0]  ;;  %v12057_v44 = vld [vmem:[#allocation7 + $0x9dc] sm:$0xf0] }
  0x9c   :  { %5182 = vmatpush.bf16.msrb.mxu1 %v8907_v1  ;;  %v10304_v1 = vld [vmem:[#allocation7 + $0x1388] sm:$0xf0] }
  0x9d   :  { %5195 = vmatpush.bf16.msrb.mxu2 %v9227_v2  ;;  %v12441_v2 = vld [vmem:[#allocation7 + $0x15e4] sm:$0xf]  ;;  %v10307_v7 = vor.u32 %v12361_v63, %v10304_v1  ;;  %v10784_v63 = vld [vmem:[#allocation7 + $0x1748] sm:$0xf0] }
  0x9e   :  { %5208 = vmatpush.bf16.msrb.mxu3 %v9547_v6  ;;  %v9987_v6 = vor.u32 %v12281_v61, %v9984_v62  ;;  %v10627_v10 = vor.u32 %v12441_v2, %v10624_v3  ;;  %v10464_v61 = vld [vmem:[#allocation7 + $0x14c8] sm:$0xf0]  ;;  %v12481_v62 = vld [vmem:[#allocation7 + $0x1724] sm:$0xf]  ;;  %v12231_v3 = vld [vmem:[#allocation7 + $0xf54] sm:$0xf] }
  0x9f   :  { %5170 = vmatpush.bf16.msrb.mxu0 %v8547_v14  ;;  %v10947_v14 = vor.u32 %v12521_v4, %v10944_v5  ;;  %v9784_v4 = vld [vmem:[#allocation7 + $0xf78] sm:$0xf0]  ;;  %v12311_v5 = vld [vmem:[#allocation7 + $0x11d4] sm:$0xf] }
  0xa0   :  { %5183 = vmatpush.bf16.msrb.mxu1 %v8867_v17  ;;  %v10264_v17 = vld [vmem:[#allocation7 + $0x1338] sm:$0xf0] }
  0xa1   :  { %5196 = vmatpush.bf16.msrb.mxu2 %v9187_v18  ;;  %v12431_v18 = vld [vmem:[#allocation7 + $0x1594] sm:$0xf]  ;;  %v10267_v24 = vor.u32 %v12351_v13, %v10264_v17  ;;  %v10744_v13 = vld [vmem:[#allocation7 + $0x16f8] sm:$0xf0]  ;;  %v12221_v17 = vld [vmem:[#allocation7 + $0xf04] sm:$0xf] }
  0xa2   :  { %5209 = vmatpush.bf16.msrb.mxu3 %v9507_v23  ;;  %v9947_v23 = vor.u32 %v12271_v11, %v9944_v12  ;;  %v10587_v26 = vor.u32 %v12431_v18, %v10584_v19  ;;  %v10424_v11 = vld [vmem:[#allocation7 + $0x1478] sm:$0xf0]  ;;  %v12471_v12 = vld [vmem:[#allocation7 + $0x16d4] sm:$0xf]  ;;  %v9744_v18 = vld [vmem:[#allocation7 + $0xf28] sm:$0xf0] }
  0xa3   :  { %5171 = vmatpush.bf16.msrb.mxu0 %v8507_v30  ;;  %v10907_v30 = vor.u32 %v12511_v21, %v10904_v22  ;;  %v12301_v22 = vld [vmem:[#allocation7 + $0x1184] sm:$0xf] }
  0xa4   :  { %5184 = vmatpush.bf16.msrb.mxu1 %v8827_v33  ;;  %v10544_v33 = vld [vmem:[#allocation7 + $0x1568] sm:$0xf0] }
  0xa5   :  { %5197 = vmatpush.bf16.msrb.mxu2 %v9147_v35  ;;  %v12501_v35 = vld [vmem:[#allocation7 + $0x17c4] sm:$0xf] }
  0xa6   :  { %5210 = vmatpush.bf16.msrb.mxu3 %v9467_v42  ;;  %v10547_v42 = vor.u32 %v12421_v32, %v10544_v33  ;;  %v10867_v46 = vor.u32 %v12501_v35, %v10864_v36  ;;  %v8430_v32 = vld [vmem:[#allocation7 + $0x4b8] sm:$0xf]  ;;  %v9747_v33 = vor.u32 %v12221_v17, %v9744_v18  ;;  %v11897_v35 = vld [vmem:[#allocation7 + $0x4dc] sm:$0xf0]  ;;  %v8630_v18 = vld [vmem:[#allocation7 + $0x648] sm:$0xf] }
  0xa7   :  { %5172 = vmatpush.bf16.msrb.mxu0 %v8467_v49  ;;  %v10504_v49 = vld [vmem:[#allocation7 + $0x1518] sm:$0xf0]  ;;  %v8750_v36 = vld [vmem:[#allocation7 + $0x738] sm:$0xf] }
  0xa8   :  { %5185 = vmatpush.bf16.msrb.mxu1 %v8787_v53  ;;  %v10187_v53 = vor.u32 %v12331_v45, %v10184_v47  ;;  %v10707_v45 = vor.u32 %v12461_v28, %v10704_v29  ;;  %v8431_v47 = vor.u32 %v11897_v35, %v8430_v32  ;;  %v11777_v29 = vld [vmem:[#allocation7 + $0x11c] sm:$0xf0]  ;;  %v8590_v35 = vld [vmem:[#allocation7 + $0x5f8] sm:$0xf] }
  0xa9   :  { %5198 = vmatpush.bf16.msrb.mxu2 %v9107_v54  ;;  %v10507_v54 = vor.u32 %v12411_v48, %v10504_v49  ;;  %v8070_v49 = vld [vmem:[#allocation7 + $0x1e8] sm:$0xf] }
  0xaa   :  { %5211 = vmatpush.bf16.msrb.mxu3 %v9427_v57  ;;  %5173 = vmatmul.bf16.vlgmr.msrb.gmra.mxu0 %v13092_v8  ;;  %v12321_v57 = vld [vmem:[#allocation7 + $0x1224] sm:$0xf] }
  0xab   :  { %5217 = vmatpush.bf16.msra.mxu0 %v10027_v58  ;;  %5186 = vmatmul.bf16.vlgmr.msrb.gmra.mxu1 %v13096_v15  ;;  %v10827_v58 = vor.u32 %v12491_v50, %v10824_v51  ;;  %v11807_v50 = vld [vmem:[#allocation7 + $0x20c] sm:$0xf0]  ;;  %v8390_v51 = vld [vmem:[#allocation7 + $0x468] sm:$0xf] }
  0xac   :  { %5230 = vmatpush.bf16.msra.mxu1 %v10347_v59  ;;  %5199 = vmatmul.bf16.vlgmr.msrb.gmra.mxu2 %v13106_v37  ;;  %v10144_v59 = vld [vmem:[#allocation7 + $0x1248] sm:$0xf0] }
  0xad   :  { %5243 = vmatpush.bf16.msra.mxu2 %v10667_v60  ;;  %5212 = vmatmul.bf16.vlgmr.msrb.gmra.mxu3 %v13110_v40  ;;  %v12401_v60 = vld [vmem:[#allocation7 + $0x14a4] sm:$0xf]  ;;  %v10147_v1 = vor.u32 %v12321_v57, %v10144_v59  ;;  %v12047_v57 = vld [vmem:[#allocation7 + $0x98c] sm:$0xf0] }
  0xae   :  { %5256 = vmatpush.bf16.msra.mxu3 %v10987_v0  ;;  %v9827_v0 = vor.u32 %v12241_v55, %v9824_v56  ;;  %v10467_v2 = vor.u32 %v12401_v60, %v10464_v61  ;;  %v11967_v55 = vld [vmem:[#allocation7 + $0x70c] sm:$0xf0]  ;;  %v9030_v56 = vld [vmem:[#allocation7 + $0x968] sm:$0xf]  ;;  %v8030_v61 = vld [vmem:[#allocation7 + $0x198] sm:$0xf] }
  0xaf   :  { %5218 = vmatpush.bf16.msra.mxu0 %v9987_v6  ;;  %v10787_v6 = vor.u32 %v12481_v62, %v10784_v63  ;;  %v11797_v62 = vld [vmem:[#allocation7 + $0x1bc] sm:$0xf0]  ;;  %v8350_v63 = vld [vmem:[#allocation7 + $0x418] sm:$0xf] }
  0xb0   :  { %5231 = vmatpush.bf16.msra.mxu1 %v10307_v7  ;;  %v10104_v7 = vld [vmem:[#allocation7 + $0x11f8] sm:$0xf0] }
  0xb1   :  { %5244 = vmatpush.bf16.msra.mxu2 %v10627_v10  ;;  %v12391_v10 = vld [vmem:[#allocation7 + $0x1454] sm:$0xf]  ;;  %v10107_v19 = vor.u32 %v12311_v5, %v10104_v7  ;;  %v12037_v5 = vld [vmem:[#allocation7 + $0x93c] sm:$0xf0]  ;;  %v7990_v7 = vld [vmem:[#allocation7 + $0x148] sm:$0xf] }
  0xb2   :  { %5257 = vmatpush.bf16.msra.mxu3 %v10947_v14  ;;  %v9787_v14 = vor.u32 %v12231_v3, %v9784_v4  ;;  %v10427_v21 = vor.u32 %v12391_v10, %v10424_v11  ;;  %v11957_v3 = vld [vmem:[#allocation7 + $0x6bc] sm:$0xf0]  ;;  %v8990_v4 = vld [vmem:[#allocation7 + $0x918] sm:$0xf] }
  0xb3   :  { %5219 = vmatpush.bf16.msra.mxu0 %v9947_v23  ;;  %v10064_v23 = vld [vmem:[#allocation7 + $0x11a8] sm:$0xf0]  ;;  %v8991_v17 = vor.u32 %v12037_v5, %v8990_v4  ;;  %v8830_v5 = vld [vmem:[#allocation7 + $0x7d8] sm:$0xf] }
  0xb4   :  { %5232 = vmatpush.bf16.msra.mxu1 %v10267_v24  ;;  %v12381_v24 = vld [vmem:[#allocation7 + $0x1404] sm:$0xf] }
  0xb5   :  { %5245 = vmatpush.bf16.msra.mxu2 %v10587_v26  ;;  %v10747_v26 = vor.u32 %v12471_v12, %v10744_v13  ;;  %v11787_v12 = vld [vmem:[#allocation7 + $0x16c] sm:$0xf0]  ;;  %v8310_v13 = vld [vmem:[#allocation7 + $0x3c8] sm:$0xf] }
  0xb6   :  { %5258 = vmatpush.bf16.msra.mxu3 %v10907_v30  ;;  %v8110_v30 = vld [vmem:[#allocation7 + $0x238] sm:$0xf] }
  0xb7   :  { %5220 = vmatpush.bf16.msra.mxu0 %v9907_v39  ;;  %v11977_v39 = vld [vmem:[#allocation7 + $0x75c] sm:$0xf0] }
  0xb8   :  { %5233 = vmatpush.bf16.msra.mxu1 %v10227_v41  ;;  %v10067_v41 = vor.u32 %v12301_v22, %v10064_v23  ;;  %v8751_v48 = vor.u32 %v11977_v39, %v8750_v36  ;;  %v8950_v22 = vld [vmem:[#allocation7 + $0x8c8] sm:$0xf]  ;;  %v12027_v23 = vld [vmem:[#allocation7 + $0x8ec] sm:$0xf0]  ;;  %v11937_v36 = vld [vmem:[#allocation7 + $0x61c] sm:$0xf0] }
  0xb9   :  { %5246 = vmatpush.bf16.msra.mxu2 %v10547_v42  ;;  %v10387_v42 = vor.u32 %v12381_v24, %v10384_v27  ;;  %v7991_v24 = vor.u32 %v11787_v12, %v7990_v7  ;;  %v8951_v32 = vor.u32 %v12027_v23, %v8950_v22  ;;  %v8910_v39 = vld [vmem:[#allocation7 + $0x878] sm:$0xf]  ;;  %v7830_v12 = vld [vmem:[#allocation7 + $0x8] sm:$0xf]  ;;  %v11827_v22 = vld [vmem:[#allocation7 + $0x2ac] sm:$0xf0] }
  0xba   :  { %5259 = vmatpush.bf16.msra.mxu3 %v10867_v46  ;;  %v8111_v46 = vor.u32 %v11817_v31, %v8110_v30  ;;  %v8270_v30 = vld [vmem:[#allocation7 + $0x378] sm:$0xf]  ;;  %v8470_v23 = vld [vmem:[#allocation7 + $0x508] sm:$0xf] }
  0xbb   :  { %5221 = vmatpush.bf16.msra.mxu0 %v9867_v52  ;;  %v9071_v52 = vor.u32 %v12057_v44, %v9070_v43 }
  0xbc   :  { %5234 = vmatpush.bf16.msra.mxu1 %v10187_v53  ;;  %v11887_v53 = vld [vmem:[#allocation7 + $0x48c] sm:$0xf0] }
  0xbd   :  { %5247 = vmatpush.bf16.msra.mxu2 %v10507_v54  ;;  %v8710_v54 = vld [vmem:[#allocation7 + $0x6e8] sm:$0xf]  ;;  %v8391_v59 = vor.u32 %v11887_v53, %v8390_v51  ;;  %v11847_v51 = vld [vmem:[#allocation7 + $0x34c] sm:$0xf0] }
  0xbe   :  { %5260 = vmatpush.bf16.msra.mxu3 %v10827_v58  ;;  %v8071_v58 = vor.u32 %v11807_v50, %v8070_v49  ;;  %v8711_v60 = vor.u32 %v11967_v55, %v8710_v54  ;;  %v11927_v53 = vld [vmem:[#allocation7 + $0x5cc] sm:$0xf0]  ;;  %v8870_v54 = vld [vmem:[#allocation7 + $0x828] sm:$0xf] }
  0xbf   :  { %5222 = vmatpush.bf16.msra.mxu0 %v9827_v0  ;;  %v9031_v0 = vor.u32 %v12047_v57, %v9030_v56  ;;  %v12007_v55 = vld [vmem:[#allocation7 + $0x84c] sm:$0xf0] }
  0xc0   :  { %5235 = vmatpush.bf16.msra.mxu1 %v10147_v1  ;;  %v11877_v1 = vld [vmem:[#allocation7 + $0x43c] sm:$0xf0] }
  0xc1   :  { %5248 = vmatpush.bf16.msra.mxu2 %v10467_v2  ;;  %v8670_v2 = vld [vmem:[#allocation7 + $0x698] sm:$0xf]  ;;  %v8351_v10 = vor.u32 %v11877_v1, %v8350_v63  ;;  %v11837_v1 = vld [vmem:[#allocation7 + $0x2fc] sm:$0xf0] }
  0xc2   :  { %5261 = vmatpush.bf16.msra.mxu3 %v10787_v6  ;;  %v8031_v6 = vor.u32 %v11797_v62, %v8030_v61  ;;  %v8671_v11 = vor.u32 %v11957_v3, %v8670_v2  ;;  %v11757_v61 = vld [vmem:[#allocation7 + $0x7c] sm:$0xf0]  ;;  %v8190_v62 = vld [vmem:[#allocation7 + $0x2d8] sm:$0xf] }
  0xc3   :  { %5223 = vmatpush.bf16.msra.mxu0 %v9787_v14  ;;  %v11867_v14 = vld [vmem:[#allocation7 + $0x3ec] sm:$0xf0]  ;;  %v8510_v2 = vld [vmem:[#allocation7 + $0x558] sm:$0xf]  ;;  %v11917_v3 = vld [vmem:[#allocation7 + $0x57c] sm:$0xf0] }
  0xc4   :  { %5236 = vmatpush.bf16.msra.mxu1 %v10107_v19  ;;  %v11947_v19 = vld [vmem:[#allocation7 + $0x66c] sm:$0xf0]  ;;  %v8311_v27 = vor.u32 %v11867_v14, %v8310_v13 }
  0xc5   :  { %5249 = vmatpush.bf16.msra.mxu2 %v10427_v21  ;;  %v13132_v21 = vld [vmem:[#allocation8] sm:$0xff]  ;;  %v8631_v28 = vor.u32 %v11947_v19, %v8630_v18  ;;  %v11747_v13 = vld [vmem:[#allocation7 + $0x2c] sm:$0xf0]  ;;  %v8511_v18 = vor.u32 %v11917_v3, %v8510_v2  ;;  %v8150_v19 = vld [vmem:[#allocation7 + $0x288] sm:$0xf] }
  0xc6   :  { %5262 = vmatpush.bf16.msra.mxu3 %v10747_v26  ;;  %v7950_v26 = vld [vmem:[#allocation7 + $0xf8] sm:$0xf]  ;;  %v989_v31 = vperm.slane %v13132_v21, 0 }
  0xc7   :  { %5224 = vmatpush.bf16.msra.mxu0 %v9747_v33  ;;  %v11857_v33 = vld [vmem:[#allocation7 + $0x39c] sm:$0xf0]  ;;  %v5018_v43 = vpop.f32.mrf.mxu0  ;;  %v9630_v2 = vld [vmem:[#allocation7 + $0xe18] sm:$0xf] }
  0xc8   :  { %5237 = vmatpush.bf16.msra.mxu1 %v10067_v41  ;;  %v12017_v41 = vld [vmem:[#allocation7 + $0x89c] sm:$0xf0]  ;;  %v8271_v44 = vor.u32 %v11857_v33, %v8270_v30  ;;  %v5019_v49 = vadd.f32 %v5018_v43, %v989_v31  ;;  %v5031_v57 = vpop.f32.mrf.mxu1  ;;  %v9390_v30 = vld [vmem:[#allocation7 + $0xc38] sm:$0xf]  ;;  %v7831_v33 = vor.u32 %v11747_v13, %v7830_v12 }
  0xc9   :  { %5250 = vmatpush.bf16.msra.mxu2 %v10387_v42  ;;  %v7951_v42 = vor.u32 %v11777_v29, %v7950_v26  ;;  %v8911_v50 = vor.u32 %v12017_v41, %v8910_v39  ;;  %v11987_v29 = vld [vmem:[#allocation7 + $0x7ac] sm:$0xf0]  ;;  %v12137_v31 = vld [vmem:[#allocation7 + $0xc5c] sm:$0xf0] }
  0xca   :  { %5263 = vmatpush.bf16.msra.mxu3 %v10707_v45  ;;  %5225 = vmatmul.bf16.vlgmr.msra.gmra.mxu0 %v13104_v34  ;;  %v8591_v45 = vor.u32 %v11937_v36, %v8590_v35  ;;  %v5032_v63 = vadd.f32 %v5031_v57, %v5019_v49  ;;  %v12217_v35 = vld [vmem:[#allocation7 + $0xedc] sm:$0xf0]  ;;  %v10030_v36 = vld [vmem:[#allocation7 + $0x1138] sm:$0xf]  ;;  %v9990_v57 = vld [vmem:[#allocation7 + $0x10e8] sm:$0xf] }
  0xcb   :  { %5269 = vmatpush.bf16.msrb.mxu0 %v8111_v46  ;;  %5238 = vmatmul.bf16.vlgmr.msra.gmra.mxu1 %v13108_v38  ;;  %v7910_v46 = vld [vmem:[#allocation7 + $0xa8] sm:$0xf]  ;;  %v12297_v39 = vld [vmem:[#allocation7 + $0x115c] sm:$0xf0] }
  0xcc   :  { %5282 = vmatpush.bf16.msrb.mxu1 %v8431_v47  ;;  %5251 = vmatmul.bf16.vlgmr.msra.gmra.mxu2 %v13116_v16  ;;  %v11767_v47 = vld [vmem:[#allocation7 + $0xcc] sm:$0xf0] }
  0xcd   :  { %5295 = vmatpush.bf16.msrb.mxu2 %v8751_v48  ;;  %5264 = vmatmul.bf16.vlgmr.msra.gmra.mxu3 %v13118_v20  ;;  %v8230_v48 = vld [vmem:[#allocation7 + $0x328] sm:$0xf]  ;;  %v7911_v56 = vor.u32 %v11767_v47, %v7910_v46  ;;  %v9391_v47 = vor.u32 %v12137_v31, %v9390_v30 }
  0xce   :  { %5308 = vmatpush.bf16.msrb.mxu3 %v9071_v52  ;;  %v8550_v52 = vld [vmem:[#allocation7 + $0x5a8] sm:$0xf] }
  0xcf   :  { %5270 = vmatpush.bf16.msrb.mxu0 %v8071_v58  ;;  %v8231_v58 = vor.u32 %v11847_v51, %v8230_v48  ;;  %v5044_v4 = vpop.f32.mrf.mxu2  ;;  %v5020_v14 = vpop.f32.mrf.mxu0  ;;  %v9350_v51 = vld [vmem:[#allocation7 + $0xbe8] sm:$0xf] }
  0xd0   :  { %5283 = vmatpush.bf16.msrb.mxu1 %v8391_v59  ;;  %v8551_v59 = vor.u32 %v11927_v53, %v8550_v52  ;;  %v5045_v7 = vadd.f32 %v5044_v4, %v5032_v63  ;;  %v5033_v41 = vpop.f32.mrf.mxu1  ;;  %v12127_v52 = vld [vmem:[#allocation7 + $0xc0c] sm:$0xf0]  ;;  %v9670_v53 = vld [vmem:[#allocation7 + $0xe68] sm:$0xf]  ;;  %v12197_v4 = vld [vmem:[#allocation7 + $0xe3c] sm:$0xf0] }
  0xd1   :  { %5296 = vmatpush.bf16.msrb.mxu2 %v8711_v60  ;;  %v7870_v60 = vld [vmem:[#allocation7 + $0x58] sm:$0xf]  ;;  %v9631_v12 = vor.u32 %v12197_v4, %v9630_v2  ;;  %v9270_v14 = vld [vmem:[#allocation7 + $0xb48] sm:$0xf] }
  0xd2   :  { %5309 = vmatpush.bf16.msrb.mxu3 %v9031_v0  ;;  %v8871_v0 = vor.u32 %v12007_v55, %v8870_v54  ;;  %v9150_v4 = vld [vmem:[#allocation7 + $0xa58] sm:$0xf] }
  0xd3   :  { %5271 = vmatpush.bf16.msrb.mxu0 %v8031_v6  ;;  %v11997_v6 = vld [vmem:[#allocation7 + $0x7fc] sm:$0xf0] }
  0xd4   :  { %5284 = vmatpush.bf16.msrb.mxu1 %v8351_v10  ;;  %v5057_v10 = vpop.f32.mrf.mxu3  ;;  %v8831_v26 = vor.u32 %v11997_v6, %v8830_v5  ;;  %v9950_v5 = vld [vmem:[#allocation7 + $0x1098] sm:$0xf]  ;;  %v12277_v6 = vld [vmem:[#allocation7 + $0x10bc] sm:$0xf0] }
  0xd5   :  { %5297 = vmatpush.bf16.msrb.mxu2 %v8671_v11  ;;  %v7871_v11 = vor.u32 %v11757_v61, %v7870_v60  ;;  %v12367_v60 = vld [vmem:[#allocation7 + $0x138c] sm:$0xf0]  ;;  %v9351_v61 = vor.u32 %v12127_v52, %v9350_v51  ;;  %v9951_v13 = vor.u32 %v12277_v6, %v9950_v5  ;;  %v9190_v52 = vld [vmem:[#allocation7 + $0xaa8] sm:$0xf]  ;;  %v12077_v5 = vld [vmem:[#allocation7 + $0xa7c] sm:$0xf0] }
  0xd6   :  { %5310 = vmatpush.bf16.msrb.mxu3 %v8991_v17  ;;  %v8191_v17 = vor.u32 %v11837_v1, %v8190_v62  ;;  %v12117_v1 = vld [vmem:[#allocation7 + $0xbbc] sm:$0xf0]  ;;  %v9470_v6 = vld [vmem:[#allocation7 + $0xcd8] sm:$0xf] }
  0xd7   :  { %5272 = vmatpush.bf16.msrb.mxu0 %v7991_v24  ;;  %v13135_v24 = vadd.f32 %v5057_v10, %v5045_v7  ;;  %v5046_v48 = vpop.f32.mrf.mxu2  ;;  %v10270_v7 = vld [vmem:[#allocation7 + $0x1318] sm:$0xf]  ;;  %v12357_v10 = vld [vmem:[#allocation7 + $0x133c] sm:$0xf0] }
  0xd8   :  { %5285 = vmatpush.bf16.msrb.mxu1 %v8311_v27  ;;  %v11907_v27 = vld [vmem:[#allocation7 + $0x52c] sm:$0xf0] }
  0xd9   :  { %5298 = vmatpush.bf16.msrb.mxu2 %v8631_v28  ;;  %v8790_v28 = vld [vmem:[#allocation7 + $0x788] sm:$0xf]  ;;  %v8471_v43 = vor.u32 %v11907_v27, %v8470_v23 }
  0xda   :  { %5311 = vmatpush.bf16.msrb.mxu3 %v8951_v32  ;;  %v9710_v32 = vld [vmem:[#allocation7 + $0xeb8] sm:$0xf]  ;;  %v8791_v46 = vor.u32 %v11987_v29, %v8790_v28  ;;  %v9910_v23 = vld [vmem:[#allocation7 + $0x1048] sm:$0xf]  ;;  %v12347_v28 = vld [vmem:[#allocation7 + $0x12ec] sm:$0xf0] }
  0xdb   :  { %5273 = vmatpush.bf16.msrb.mxu0 %v7951_v42  ;;  %v8151_v42 = vor.u32 %v11827_v22, %v8150_v19  ;;  %v9711_v49 = vor.u32 %v12217_v35, %v9710_v32  ;;  %v10271_v19 = vor.u32 %v12357_v10, %v10270_v7  ;;  %v12187_v22 = vld [vmem:[#allocation7 + $0xdec] sm:$0xf0]  ;;  %v10230_v27 = vld [vmem:[#allocation7 + $0x12c8] sm:$0xf]  ;;  %v12097_v35 = vld [vmem:[#allocation7 + $0xb1c] sm:$0xf0] }
  0xdc   :  { %5286 = vmatpush.bf16.msrb.mxu1 %v8271_v44  ;;  %v10350_v44 = vld [vmem:[#allocation7 + $0x13b8] sm:$0xf]  ;;  %v5059_v54 = vpop.f32.mrf.mxu3 }
  0xdd   :  { %5299 = vmatpush.bf16.msrb.mxu2 %v8591_v45  ;;  %v12377_v45 = vld [vmem:[#allocation7 + $0x13dc] sm:$0xf0]  ;;  %v9510_v54 = vld [vmem:[#allocation7 + $0xd28] sm:$0xf] }
  0xde   :  { %5312 = vmatpush.bf16.msrb.mxu3 %v8911_v50  ;;  %v10031_v50 = vor.u32 %v12297_v39, %v10030_v36  ;;  %v10351_v55 = vor.u32 %v12377_v45, %v10350_v44  ;;  %v9550_v36 = vld [vmem:[#allocation7 + $0xd78] sm:$0xf]  ;;  %v12257_v45 = vld [vmem:[#allocation7 + $0x101c] sm:$0xf0] }
  0xdf   :  { %5274 = vmatpush.bf16.msrb.mxu0 %v7911_v56  ;;  %v12207_v56 = vld [vmem:[#allocation7 + $0xe8c] sm:$0xf0]  ;;  %v9870_v44 = vld [vmem:[#allocation7 + $0xff8] sm:$0xf] }
  0xe0   :  { %5287 = vmatpush.bf16.msrb.mxu1 %v8231_v58  ;;  %v12287_v58 = vld [vmem:[#allocation7 + $0x110c] sm:$0xf0]  ;;  %v9671_v62 = vor.u32 %v12207_v56, %v9670_v53  ;;  %v9871_v51 = vor.u32 %v12257_v45, %v9870_v44  ;;  %v12537_v44 = vld [vmem:[#allocation7 + $0x18dc] sm:$0xf0]  ;;  %v11812_v45 = vld [vmem:[#allocation7 + $0x23c] sm:$0xf] }
  0xe1   :  { %5300 = vmatpush.bf16.msrb.mxu2 %v8551_v59  ;;  %v10310_v59 = vld [vmem:[#allocation7 + $0x1368] sm:$0xf]  ;;  %v9991_v63 = vor.u32 %v12287_v58, %v9990_v57  ;;  %v12087_v53 = vld [vmem:[#allocation7 + $0xacc] sm:$0xf0] }
  0xe2   :  { %5313 = vmatpush.bf16.msrb.mxu3 %v8871_v0  ;;  %v9310_v0 = vld [vmem:[#allocation7 + $0xb98] sm:$0xf]  ;;  %v10311_v3 = vor.u32 %v12367_v60, %v10310_v59  ;;  %v12167_v56 = vld [vmem:[#allocation7 + $0xd4c] sm:$0xf0]  ;;  %v9830_v57 = vld [vmem:[#allocation7 + $0xfa8] sm:$0xf] }
  0xe3   :  { %5275 = vmatpush.bf16.msrb.mxu0 %v7871_v11  ;;  %v9311_v11 = vor.u32 %v12117_v1, %v9310_v0  ;;  %v12247_v58 = vld [vmem:[#allocation7 + $0xfcc] sm:$0xf0]  ;;  %v9511_v2 = vor.u32 %v12167_v56, %v9510_v54  ;;  %v10950_v56 = vld [vmem:[#allocation7 + $0x1868] sm:$0xf] }
  0xe4   :  { %5288 = vmatpush.bf16.msrb.mxu1 %v8191_v17  ;;  %v12107_v17 = vld [vmem:[#allocation7 + $0xb6c] sm:$0xf0] }
  0xe5   :  { %5301 = vmatpush.bf16.msrb.mxu2 %v8511_v18  ;;  %v9590_v18 = vld [vmem:[#allocation7 + $0xdc8] sm:$0xf]  ;;  %v9271_v29 = vor.u32 %v12107_v17, %v9270_v14  ;;  %v10110_v14 = vld [vmem:[#allocation7 + $0x11d8] sm:$0xf]  ;;  %v12317_v17 = vld [vmem:[#allocation7 + $0x11fc] sm:$0xf0] }
  0xe6   :  { %5314 = vmatpush.bf16.msrb.mxu3 %v8831_v26  ;;  %v12267_v26 = vld [vmem:[#allocation7 + $0x106c] sm:$0xf0]  ;;  %v9591_v31 = vor.u32 %v12187_v22, %v9590_v18  ;;  %v9151_v18 = vor.u32 %v12077_v5, %v9150_v4  ;;  %v12437_v4 = vld [vmem:[#allocation7 + $0x15bc] sm:$0xf0]  ;;  %v10910_v5 = vld [vmem:[#allocation7 + $0x1818] sm:$0xf] }
  0xe7   :  { %5276 = vmatpush.bf16.msrb.mxu0 %v7831_v33  ;;  %v5070_v30 = vpop.f32.mrf.mxu0  ;;  %v9911_v32 = vor.u32 %v12267_v26, %v9910_v23  ;;  %v9230_v33 = vld [vmem:[#allocation7 + $0xaf8] sm:$0xf]  ;;  %v12067_v22 = vld [vmem:[#allocation7 + $0xa2c] sm:$0xf0] }
  0xe8   :  { %5289 = vmatpush.bf16.msrb.mxu1 %v8151_v42  ;;  %v5071_v39 = vadd.f32 %v5070_v30, %v13135_v24  ;;  %v5083_v41 = vpop.f32.mrf.mxu1  ;;  %v10231_v42 = vor.u32 %v12347_v28, %v10230_v27  ;;  %v9430_v27 = vld [vmem:[#allocation7 + $0xc88] sm:$0xf]  ;;  %v12147_v28 = vld [vmem:[#allocation7 + $0xcac] sm:$0xf0] }
  0xe9   :  { %5302 = vmatpush.bf16.msrb.mxu2 %v8471_v43  ;;  %v12177_v43 = vld [vmem:[#allocation7 + $0xd9c] sm:$0xf0] }
  0xea   :  { %5315 = vmatpush.bf16.msrb.mxu3 %v8791_v46  ;;  %5277 = vmatmul.bf16.vlgmr.msrb.gmra.mxu0 %v13094_v9  ;;  %v10190_v46 = vld [vmem:[#allocation7 + $0x1278] sm:$0xf]  ;;  %v5084_v48 = vadd.f32 %v5083_v41, %v5071_v39  ;;  %v12457_v41 = vld [vmem:[#allocation7 + $0x165c] sm:$0xf0] }
  0xeb   :  { %5321 = vmatpush.bf16.msra.mxu0 %v9391_v47  ;;  %5290 = vmatmul.bf16.vlgmr.msrb.gmra.mxu1 %v13101_v25  ;;  %v12337_v47 = vld [vmem:[#allocation7 + $0x129c] sm:$0xf0]  ;;  %v10670_v39 = vld [vmem:[#allocation7 + $0x1638] sm:$0xf] }
  0xec   :  { %5334 = vmatpush.bf16.msra.mxu1 %v9711_v49  ;;  %5303 = vmatmul.bf16.vlgmr.msrb.gmra.mxu2 %v13092_v8  ;;  %v9231_v49 = vor.u32 %v12097_v35, %v9230_v33  ;;  %v10191_v24 = vor.u32 %v12337_v47, %v10190_v46  ;;  %v10070_v33 = vld [vmem:[#allocation7 + $0x1188] sm:$0xf]  ;;  %v12307_v35 = vld [vmem:[#allocation7 + $0x11ac] sm:$0xf0]  ;;  %v8112_v46 = vld [vmem:[#allocation7 + $0x260] sm:$0xf0]  ;;  %v9431_v47 = vor.u32 %v12147_v28, %v9430_v27 }
  0xed   :  { %5347 = vmatpush.bf16.msra.mxu2 %v10031_v50  ;;  %5316 = vmatmul.bf16.vlgmr.msrb.gmra.mxu3 %v13096_v15  ;;  %v9551_v50 = vor.u32 %v12177_v43, %v9550_v36  ;;  %v8115_v54 = vor.u32 %v11812_v45, %v8112_v46  ;;  %v12507_v27 = vld [vmem:[#allocation7 + $0x17ec] sm:$0xf0]  ;;  %v11782_v28 = vld [vmem:[#allocation7 + $0x14c] sm:$0xf] }
  0xee   :  { %5360 = vmatpush.bf16.msra.mxu3 %v10351_v55 }
  0xef   :  { %5322 = vmatpush.bf16.msra.mxu0 %v9351_v61  ;;  %v5096_v55 = vpop.f32.mrf.mxu2  ;;  %v10150_v61 = vld [vmem:[#allocation7 + $0x1228] sm:$0xf]  ;;  %v5072_v1 = vpop.f32.mrf.mxu0 }
  0xf0   :  { %5335 = vmatpush.bf16.msra.mxu1 %v9671_v62  ;;  %v5097_v59 = vadd.f32 %v5096_v55, %v5084_v48  ;;  %v5109_v60 = vpop.f32.mrf.mxu3  ;;  %v12327_v62 = vld [vmem:[#allocation7 + $0x124c] sm:$0xf0]  ;;  %v5085_v7 = vpop.f32.mrf.mxu1  ;;  %v10630_v55 = vld [vmem:[#allocation7 + $0x15e8] sm:$0xf] }
  0xf1   :  { %5348 = vmatpush.bf16.msra.mxu2 %v9991_v63  ;;  %v9191_v63 = vor.u32 %v12087_v53, %v9190_v52  ;;  %v10151_v10 = vor.u32 %v12327_v62, %v10150_v61  ;;  %v10671_v52 = vor.u32 %v12457_v41, %v10670_v39  ;;  %v11882_v61 = vld [vmem:[#allocation7 + $0x46c] sm:$0xf]  ;;  %v8392_v62 = vld [vmem:[#allocation7 + $0x490] sm:$0xf0]  ;;  %v12517_v7 = vld [vmem:[#allocation7 + $0x183c] sm:$0xf0] }
  0xf2   :  { %5361 = vmatpush.bf16.msra.mxu3 %v10311_v3  ;;  %v13142_v0 = vadd.f32 %v5109_v60, %v5097_v59  ;;  %v9831_v3 = vor.u32 %v12247_v58, %v9830_v57  ;;  %v12527_v58 = vld [vmem:[#allocation7 + $0x188c] sm:$0xf0]  ;;  %v11802_v59 = vld [vmem:[#allocation7 + $0x1ec] sm:$0xf]  ;;  %v8072_v60 = vld [vmem:[#allocation7 + $0x210] sm:$0xf0] }
  0xf3   :  { %5323 = vmatpush.bf16.msra.mxu0 %v9311_v11  ;;  %v12157_v11 = vld [vmem:[#allocation7 + $0xcfc] sm:$0xf0]  ;;  %v10951_v1 = vor.u32 %v12527_v58, %v10950_v56  ;;  %v10790_v56 = vld [vmem:[#allocation7 + $0x1728] sm:$0xf]  ;;  %v12487_v58 = vld [vmem:[#allocation7 + $0x174c] sm:$0xf0] }
  0xf4   :  { %5336 = vmatpush.bf16.msra.mxu1 %v9631_v12  ;;  %v9790_v12 = vld [vmem:[#allocation7 + $0xf58] sm:$0xf]  ;;  %v9471_v23 = vor.u32 %v12157_v11, %v9470_v6  ;;  %v8395_v6 = vor.u32 %v11882_v61, %v8392_v62  ;;  %v8032_v11 = vld [vmem:[#allocation7 + $0x1c0] sm:$0xf0]  ;;  %v11842_v62 = vld [vmem:[#allocation7 + $0x32c] sm:$0xf] }
  0xf5   :  { %5349 = vmatpush.bf16.msra.mxu2 %v9951_v13  ;;  %v12237_v13 = vld [vmem:[#allocation7 + $0xf7c] sm:$0xf0] }
  0xf6   :  { %5362 = vmatpush.bf16.msra.mxu3 %v10271_v19  ;;  %v9110_v19 = vld [vmem:[#allocation7 + $0xa08] sm:$0xf]  ;;  %v9791_v26 = vor.u32 %v12237_v13, %v9790_v12  ;;  %v11872_v12 = vld [vmem:[#allocation7 + $0x41c] sm:$0xf]  ;;  %v8352_v13 = vld [vmem:[#allocation7 + $0x440] sm:$0xf0] }
  0xf7   :  { %5324 = vmatpush.bf16.msra.mxu0 %v9271_v29  ;;  %v9750_v29 = vld [vmem:[#allocation7 + $0xf08] sm:$0xf]  ;;  %v5098_v30 = vpop.f32.mrf.mxu2  ;;  %v9111_v43 = vor.u32 %v12067_v22, %v9110_v19  ;;  %v12427_v22 = vld [vmem:[#allocation7 + $0x156c] sm:$0xf0] }
  0xf8   :  { %5337 = vmatpush.bf16.msra.mxu1 %v9591_v31  ;;  %v10111_v31 = vor.u32 %v12317_v17, %v10110_v14  ;;  %v5111_v36 = vpop.f32.mrf.mxu3  ;;  %v10911_v17 = vor.u32 %v12517_v7, %v10910_v5  ;;  %v10550_v19 = vld [vmem:[#allocation7 + $0x1548] sm:$0xf]  ;;  %v10791_v5 = vor.u32 %v12487_v58, %v10790_v56  ;;  %v10430_v7 = vld [vmem:[#allocation7 + $0x1458] sm:$0xf]  ;;  %v8712_v58 = vld [vmem:[#allocation7 + $0x710] sm:$0xf0] }
  0xf9   :  { %5350 = vmatpush.bf16.msra.mxu2 %v9911_v32  ;;  %v12227_v32 = vld [vmem:[#allocation7 + $0xf2c] sm:$0xf0] }
  0xfa   :  { %5363 = vmatpush.bf16.msra.mxu3 %v10231_v42  ;;  %v10990_v42 = vld [vmem:[#allocation7 + $0x18b8] sm:$0xf]  ;;  %v9751_v48 = vor.u32 %v12227_v32, %v9750_v29  ;;  %v7992_v29 = vld [vmem:[#allocation7 + $0x170] sm:$0xf0] }
  0xfb   :  { %5325 = vmatpush.bf16.msra.mxu0 %v9231_v49  ;;  %v11892_v49 = vld [vmem:[#allocation7 + $0x4bc] sm:$0xf]  ;;  %v10991_v53 = vor.u32 %v12537_v44, %v10990_v42  ;;  %v8312_v32 = vld [vmem:[#allocation7 + $0x3f0] sm:$0xf0]  ;;  %v7995_v41 = vor.u32 %v11782_v28, %v7992_v29  ;;  %v10510_v42 = vld [vmem:[#allocation7 + $0x14f8] sm:$0xf] }
  0xfc   :  { %5338 = vmatpush.bf16.msra.mxu1 %v9551_v50  ;;  %v8432_v50 = vld [vmem:[#allocation7 + $0x4e0] sm:$0xf0]  ;;  %v10830_v44 = vld [vmem:[#allocation7 + $0x1778] sm:$0xf] }
  0xfd   :  { %5351 = vmatpush.bf16.msra.mxu2 %v9871_v51  ;;  %v10071_v51 = vor.u32 %v12307_v35, %v10070_v33  ;;  %v8435_v57 = vor.u32 %v11892_v49, %v8432_v50  ;;  %v10551_v35 = vor.u32 %v12427_v22, %v10550_v19  ;;  %v7952_v49 = vld [vmem:[#allocation7 + $0x120] sm:$0xf0]  ;;  %v11852_v50 = vld [vmem:[#allocation7 + $0x37c] sm:$0xf] }
  0xfe   :  { %5364 = vmatpush.bf16.msra.mxu3 %v10191_v24  ;;  %v12447_v24 = vld [vmem:[#allocation7 + $0x160c] sm:$0xf0]  ;;  %v11832_v19 = vld [vmem:[#allocation7 + $0x2dc] sm:$0xf]  ;;  %v8192_v22 = vld [vmem:[#allocation7 + $0x300] sm:$0xf0] }
  0xff   :  { %5326 = vmatpush.bf16.msra.mxu0 %v9191_v63  ;;  %v10631_v63 = vor.u32 %v12447_v24, %v10630_v55  ;;  %v10470_v55 = vld [vmem:[#allocation7 + $0x14a8] sm:$0xf]  ;;  %v12407_v24 = vld [vmem:[#allocation7 + $0x14cc] sm:$0xf0] }
 0x100   :  { %5339 = vmatpush.bf16.msra.mxu1 %v9511_v2  ;;  %v8075_v2 = vor.u32 %v11802_v59, %v8072_v60  ;;  %v11762_v59 = vld [vmem:[#allocation7 + $0xac] sm:$0xf]  ;;  %v7912_v60 = vld [vmem:[#allocation7 + $0xd0] sm:$0xf0] }
 0x101   :  { %5352 = vmatpush.bf16.msra.mxu2 %v9831_v3  ;;  %v10590_v3 = vld [vmem:[#allocation7 + $0x1598] sm:$0xf] }
 0x102   :  { %5365 = vmatpush.bf16.msra.mxu3 %v10151_v10  ;;  %v11792_v10 = vld [vmem:[#allocation7 + $0x19c] sm:$0xf]  ;;  %v10591_v14 = vor.u32 %v12437_v4, %v10590_v3  ;;  %v10471_v3 = vor.u32 %v12407_v24, %v10470_v55 }
 0x103   :  { %5327 = vmatpush.bf16.msra.mxu0 %v9151_v18  ;;  %v8035_v18 = vor.u32 %v11792_v10, %v8032_v11  ;;  %v12397_v10 = vld [vmem:[#allocation7 + $0x147c] sm:$0xf0]  ;;  %v10750_v11 = vld [vmem:[#allocation7 + $0x16d8] sm:$0xf] }
 0x104   :  { %5340 = vmatpush.bf16.msra.mxu1 %v9471_v23  ;;  %v10870_v23 = vld [vmem:[#allocation7 + $0x17c8] sm:$0xf] }
 0x105   :  { %5353 = vmatpush.bf16.msra.mxu2 %v9791_v26  ;;  %v8355_v26 = vor.u32 %v11872_v12, %v8352_v13  ;;  %v10871_v39 = vor.u32 %v12507_v27, %v10870_v23  ;;  %v10431_v23 = vor.u32 %v12397_v10, %v10430_v7  ;;  %v12387_v27 = vld [vmem:[#allocation7 + $0x142c] sm:$0xf0]  ;;  %v12032_v7 = vld [vmem:[#allocation7 + $0x91c] sm:$0xf] }
 0x106   :  { %5366 = vmatpush.bf16.msra.mxu3 %v10111_v31  ;;  %v11862_v31 = vld [vmem:[#allocation7 + $0x3cc] sm:$0xf] }
 0x107   :  { %5328 = vmatpush.bf16.msra.mxu0 %v9111_v43  ;;  %v5122_v30 = vpop.f32.mrf.mxu0  ;;  %v12417_v43 = vld [vmem:[#allocation7 + $0x151c] sm:$0xf0]  ;;  %v8315_v45 = vor.u32 %v11862_v31, %v8312_v32  ;;  %v12467_v31 = vld [vmem:[#allocation7 + $0x16ac] sm:$0xf0]  ;;  %v11742_v32 = vld [vmem:[#allocation7 + $0xc] sm:$0xf] }
 0x108   :  { %5341 = vmatpush.bf16.msra.mxu1 %v9431_v47  ;;  %v5123_v33 = vadd.f32 %v5122_v30, %v13142_v0  ;;  %v5135_v36 = vpop.f32.mrf.mxu1  ;;  %v12497_v47 = vld [vmem:[#allocation7 + $0x179c] sm:$0xf0]  ;;  %v990_v0 = vperm.slane %v13132_v21, 1  ;;  %v10710_v30 = vld [vmem:[#allocation7 + $0x1688] sm:$0xf] }
 0x109   :  { %5354 = vmatpush.bf16.msra.mxu2 %v9751_v48  ;;  %v11772_v48 = vld [vmem:[#allocation7 + $0xfc] sm:$0xf] }
 0x10a   :  { %5367 = vmatpush.bf16.msra.mxu3 %v10071_v51  ;;  %5329 = vmatmul.bf16.vlgmr.msra.gmra.mxu0 %v13106_v37  ;;  %v13149_v46 = vadd.f32 %v5135_v36, %v5123_v33  ;;  %v8272_v51 = vld [vmem:[#allocation7 + $0x3a0] sm:$0xf0]  ;;  %v8195_v33 = vor.u32 %v11832_v19, %v8192_v22  ;;  %v11822_v36 = vld [vmem:[#allocation7 + $0x28c] sm:$0xf] }
 0x10b   :  { %5373 = vmatpush.bf16.msrb.mxu0 %v10671_v52  ;;  %5342 = vmatmul.bf16.vlgmr.msra.gmra.mxu1 %v13110_v40  ;;  %v10511_v52 = vor.u32 %v12417_v43, %v10510_v42  ;;  %v11972_v42 = vld [vmem:[#allocation7 + $0x73c] sm:$0xf]  ;;  %v8752_v43 = vld [vmem:[#allocation7 + $0x760] sm:$0xf0] }
 0x10c   :  { %5386 = vmatpush.bf16.msrb.mxu1 %v10991_v53  ;;  %5355 = vmatmul.bf16.vlgmr.msra.gmra.mxu2 %v13104_v34  ;;  %v10831_v53 = vor.u32 %v12497_v47, %v10830_v44  ;;  %v12052_v44 = vld [vmem:[#allocation7 + $0x9bc] sm:$0xf]  ;;  %v8755_v55 = vor.u32 %v11972_v42, %v8752_v43  ;;  %vm6309_vm0 = vcmp.gt.f32.partialorder %v13149_v46, 0.0 }
 0x10d   :  { %5399 = vmatpush.bf16.msrb.mxu2 %v8115_v54  ;;  %5368 = vmatmul.bf16.vlgmr.msra.gmra.mxu3 %v13108_v38  ;;  %v7955_v54 = vor.u32 %v11772_v48, %v7952_v49  ;;  %v9072_v48 = vld [vmem:[#allocation7 + $0x9e0] sm:$0xf0]  ;;  %v12132_v49 = vld [vmem:[#allocation7 + $0xc3c] sm:$0xf] }
 0x10e   :  { %5412 = vmatpush.bf16.msrb.mxu3 %v8435_v57  ;;  %v8275_v57 = vor.u32 %v11852_v50, %v8272_v51  ;;  %v9392_v50 = vld [vmem:[#allocation7 + $0xc60] sm:$0xf0]  ;;  %v10711_v51 = vor.u32 %v12467_v31, %v10710_v30  ;;  %v9075_v24 = vor.u32 %v12052_v44, %v9072_v48  ;;  %v8952_v30 = vld [vmem:[#allocation7 + $0x8f0] sm:$0xf0]  ;;  %v12102_v31 = vld [vmem:[#allocation7 + $0xb4c] sm:$0xf] }
 0x10f   :  { %5374 = vmatpush.bf16.msrb.mxu0 %v10631_v63  ;;  %v5148_v61 = vpop.f32.mrf.mxu2  ;;  %v8232_v63 = vld [vmem:[#allocation7 + $0x350] sm:$0xf0]  ;;  %v5124_v21 = vpop.f32.mrf.mxu0  ;;  %v9395_v56 = vor.u32 %v12132_v49, %v9392_v50  ;;  %v11932_v43 = vld [vmem:[#allocation7 + $0x5fc] sm:$0xf]  ;;  %v8592_v44 = vld [vmem:[#allocation7 + $0x620] sm:$0xf0] }
 0x110   :  { %5387 = vmatpush.bf16.msrb.mxu1 %v10951_v1  ;;  %v5149_v1 = vadd.f32 %v5148_v61, %v990_v0  ;;  %v5137_v4 = vpop.f32.mrf.mxu1  ;;  %v8235_v13 = vor.u32 %v11842_v62, %v8232_v63  ;;  %v9032_v61 = vld [vmem:[#allocation7 + $0x990] sm:$0xf0]  ;;  %v12122_v62 = vld [vmem:[#allocation7 + $0xbec] sm:$0xf]  ;;  %v8912_v50 = vld [vmem:[#allocation7 + $0x8a0] sm:$0xf0] }
 0x111   :  { %5400 = vmatpush.bf16.msrb.mxu2 %v8075_v2  ;;  %v5161_v2 = vpop.f32.mrf.mxu3  ;;  %v9352_v63 = vld [vmem:[#allocation7 + $0xc10] sm:$0xf0] }
 0x112   :  { %5413 = vmatpush.bf16.msrb.mxu3 %v8395_v6  ;;  %v7915_v6 = vor.u32 %v11762_v59, %v7912_v60  ;;  %v13152_v12 = vadd.f32 %v5161_v2, %v5149_v1  ;;  %v12042_v59 = vld [vmem:[#allocation7 + $0x96c] sm:$0xf]  ;;  %v9672_v2 = vld [vmem:[#allocation7 + $0xe90] sm:$0xf0]  ;;  %v9355_v4 = vor.u32 %v12122_v62, %v9352_v63 }
 0x113   :  { %5375 = vmatpush.bf16.msrb.mxu0 %v10591_v14  ;;  %v12477_v14 = vld [vmem:[#allocation7 + $0x16fc] sm:$0xf0]  ;;  %v12202_v1 = vld [vmem:[#allocation7 + $0xe6c] sm:$0xf]  ;;  %v9192_v63 = vld [vmem:[#allocation7 + $0xad0] sm:$0xf0] }
 0x114   :  { %5388 = vmatpush.bf16.msrb.mxu1 %v10911_v17  ;;  %v11752_v17 = vld [vmem:[#allocation7 + $0x5c] sm:$0xf]  ;;  %v10751_v28 = vor.u32 %v12477_v14, %v10750_v11  ;;  %v9675_v10 = vor.u32 %v12202_v1, %v9672_v2  ;;  %v8992_v11 = vld [vmem:[#allocation7 + $0x940] sm:$0xf0]  ;;  %v12082_v62 = vld [vmem:[#allocation7 + $0xaac] sm:$0xf] }
 0x115   :  { %5401 = vmatpush.bf16.msrb.mxu2 %v8035_v18  ;;  %v7872_v18 = vld [vmem:[#allocation7 + $0x80] sm:$0xf0]  ;;  %v8995_v22 = vor.u32 %v12032_v7, %v8992_v11  ;;  %v11912_v11 = vld [vmem:[#allocation7 + $0x55c] sm:$0xf] }
 0x116   :  { %5414 = vmatpush.bf16.msrb.mxu3 %v8355_v26  ;;  %v10390_v26 = vld [vmem:[#allocation7 + $0x1408] sm:$0xf]  ;;  %v7875_v29 = vor.u32 %v11752_v17, %v7872_v18  ;;  %v9312_v14 = vld [vmem:[#allocation7 + $0xbc0] sm:$0xf0]  ;;  %v12192_v17 = vld [vmem:[#allocation7 + $0xe1c] sm:$0xf] }
 0x117   :  { %5376 = vmatpush.bf16.msrb.mxu0 %v10551_v35  ;;  %v7832_v35 = vld [vmem:[#allocation7 + $0x30] sm:$0xf0]  ;;  %v10391_v47 = vor.u32 %v12387_v27, %v10390_v26  ;;  %v9632_v18 = vld [vmem:[#allocation7 + $0xe40] sm:$0xf0]  ;;  %v11942_v26 = vld [vmem:[#allocation7 + $0x64c] sm:$0xf] }
 0x118   :  { %5389 = vmatpush.bf16.msrb.mxu1 %v10871_v39  ;;  %v8152_v39 = vld [vmem:[#allocation7 + $0x2b0] sm:$0xf0]  ;;  %v7835_v0 = vor.u32 %v11742_v32, %v7832_v35 }
 0x119   :  { %5402 = vmatpush.bf16.msrb.mxu2 %v7995_v41  ;;  %v5150_v41 = vpop.f32.mrf.mxu2  ;;  %v8632_v27 = vld [vmem:[#allocation7 + $0x670] sm:$0xf0] }
 0x11a   :  { %5415 = vmatpush.bf16.msrb.mxu3 %v8315_v45  ;;  %v5163_v45 = vpop.f32.mrf.mxu3  ;;  %v9272_v32 = vld [vmem:[#allocation7 + $0xb70] sm:$0xf0] }
 0x11b   :  { %5377 = vmatpush.bf16.msrb.mxu0 %v10511_v52  ;;  %v12212_v52 = vld [vmem:[#allocation7 + $0xebc] sm:$0xf]  ;;  %v9592_v35 = vld [vmem:[#allocation7 + $0xdf0] sm:$0xf0]  ;;  %v9275_v42 = vor.u32 %v12102_v31, %v9272_v32 }
 0x11c   :  { %5390 = vmatpush.bf16.msrb.mxu1 %v10831_v53  ;;  %v9712_v53 = vld [vmem:[#allocation7 + $0xee0] sm:$0xf0]  ;;  %v12012_v45 = vld [vmem:[#allocation7 + $0x87c] sm:$0xf] }
 0x11d   :  { %5403 = vmatpush.bf16.msrb.mxu2 %v7955_v54  ;;  %v8155_v54 = vor.u32 %v11822_v36, %v8152_v39  ;;  %v9715_v60 = vor.u32 %v12212_v52, %v9712_v53  ;;  %v8635_v36 = vor.u32 %v11942_v26, %v8632_v27  ;;  %v12172_v52 = vld [vmem:[#allocation7 + $0xd7c] sm:$0xf]  ;;  %v9552_v53 = vld [vmem:[#allocation7 + $0xda0] sm:$0xf0] }
 0x11e   :  { %5416 = vmatpush.bf16.msrb.mxu3 %v8275_v57  ;;  %v11962_v57 = vld [vmem:[#allocation7 + $0x6ec] sm:$0xf]  ;;  %v12152_v26 = vld [vmem:[#allocation7 + $0xcdc] sm:$0xf]  ;;  %v9472_v27 = vld [vmem:[#allocation7 + $0xd00] sm:$0xf0] }
 0x11f   :  { %5378 = vmatpush.bf16.msrb.mxu0 %v10471_v3  ;;  %v8715_v21 = vor.u32 %v11962_v57, %v8712_v58  ;;  %v9035_v3 = vor.u32 %v12042_v59, %v9032_v61  ;;  %v11922_v57 = vld [vmem:[#allocation7 + $0x5ac] sm:$0xf]  ;;  %v8552_v58 = vld [vmem:[#allocation7 + $0x5d0] sm:$0xf0] }
 0x120   :  { %5391 = vmatpush.bf16.msrb.mxu1 %v10791_v5  ;;  %v11952_v5 = vld [vmem:[#allocation7 + $0x69c] sm:$0xf]  ;;  %v12002_v59 = vld [vmem:[#allocation7 + $0x82c] sm:$0xf]  ;;  %v8872_v61 = vld [vmem:[#allocation7 + $0x850] sm:$0xf0] }
 0x121   :  { %5404 = vmatpush.bf16.msrb.mxu2 %v7915_v6  ;;  %v8672_v6 = vld [vmem:[#allocation7 + $0x6c0] sm:$0xf0]  ;;  %v8875_v7 = vor.u32 %v12002_v59, %v8872_v61  ;;  %v12362_v61 = vld [vmem:[#allocation7 + $0x136c] sm:$0xf] }
 0x122   :  { %5417 = vmatpush.bf16.msrb.mxu3 %v8235_v13  ;;  %v12112_v13 = vld [vmem:[#allocation7 + $0xb9c] sm:$0xf]  ;;  %v8675_v19 = vor.u32 %v11952_v5, %v8672_v6 }
 0x123   :  { %5379 = vmatpush.bf16.msrb.mxu0 %v10431_v23  ;;  %v9315_v23 = vor.u32 %v12112_v13, %v9312_v14  ;;  %v8512_v13 = vld [vmem:[#allocation7 + $0x580] sm:$0xf0]  ;;  %v11992_v14 = vld [vmem:[#allocation7 + $0x7dc] sm:$0xf] }
 0x124   :  { %5392 = vmatpush.bf16.msrb.mxu1 %v10751_v28  ;;  %v12022_v28 = vld [vmem:[#allocation7 + $0x8cc] sm:$0xf] }
 0x125   :  { %5405 = vmatpush.bf16.msrb.mxu2 %v7875_v29  ;;  %v9635_v29 = vor.u32 %v12192_v17, %v9632_v18  ;;  %v8955_v41 = vor.u32 %v12022_v28, %v8952_v30  ;;  %v8515_v28 = vor.u32 %v11912_v11, %v8512_v13  ;;  %v8472_v30 = vld [vmem:[#allocation7 + $0x530] sm:$0xf0]  ;;  %v9952_v11 = vld [vmem:[#allocation7 + $0x10c0] sm:$0xf0]  ;;  %v12352_v13 = vld [vmem:[#allocation7 + $0x131c] sm:$0xf] }
 0x126   :  { %5418 = vmatpush.bf16.msrb.mxu3 %v8195_v33  ;;  %v12182_v33 = vld [vmem:[#allocation7 + $0xdcc] sm:$0xf] }
 0x127   :  { %5380 = vmatpush.bf16.msrb.mxu0 %v10391_v47  ;;  %v5174_v39 = vpop.f32.mrf.mxu0  ;;  %v9595_v49 = vor.u32 %v12182_v33, %v9592_v35  ;;  %v11982_v33 = vld [vmem:[#allocation7 + $0x78c] sm:$0xf]  ;;  %v8792_v35 = vld [vmem:[#allocation7 + $0x7b0] sm:$0xf0] }
 0x128   :  { %5393 = vmatpush.bf16.msrb.mxu1 %v10711_v51  ;;  %v5175_v47 = vadd.f32 %v5174_v39, %v13152_v12  ;;  %v5187_v48 = vpop.f32.mrf.mxu1  ;;  %v12092_v51 = vld [vmem:[#allocation7 + $0xafc] sm:$0xf]  ;;  %v9555_v12 = vor.u32 %v12172_v52, %v9552_v53  ;;  %v10672_v52 = vld [vmem:[#allocation7 + $0x1660] sm:$0xf0]  ;;  %v8795_v53 = vor.u32 %v11982_v33, %v8792_v35  ;;  %v10232_v33 = vld [vmem:[#allocation7 + $0x12f0] sm:$0xf0] }
 0x129   :  { %5406 = vmatpush.bf16.msrb.mxu2 %v7835_v0  ;;  %v9232_v0 = vld [vmem:[#allocation7 + $0xb20] sm:$0xf0]  ;;  %v12422_v35 = vld [vmem:[#allocation7 + $0x154c] sm:$0xf] }
 0x12a   :  { %5419 = vmatpush.bf16.msrb.mxu3 %v8155_v54  ;;  %5381 = vmatmul.bf16.vlgmr.msrb.gmra.mxu0 %v13116_v16  ;;  %v5188_v54 = vadd.f32 %v5187_v48, %v5175_v47  ;;  %v12292_v47 = vld [vmem:[#allocation7 + $0x113c] sm:$0xf]  ;;  %v10032_v48 = vld [vmem:[#allocation7 + $0x1160] sm:$0xf0] }
 0x12b   :  { %5425 = vmatpush.bf16.msra.mxu0 %v8755_v55  ;;  %5394 = vmatmul.bf16.vlgmr.msrb.gmra.mxu1 %v13118_v20  ;;  %v8595_v55 = vor.u32 %v11932_v43, %v8592_v44  ;;  %v12142_v43 = vld [vmem:[#allocation7 + $0xc8c] sm:$0xf]  ;;  %v9432_v44 = vld [vmem:[#allocation7 + $0xcb0] sm:$0xf0] }
 0x12c   :  { %5438 = vmatpush.bf16.msra.mxu1 %v9075_v24  ;;  %5407 = vmatmul.bf16.vlgmr.msrb.gmra.mxu2 %v13094_v9  ;;  %v8915_v24 = vor.u32 %v12012_v45, %v8912_v50 }
 0x12d   :  { %5451 = vmatpush.bf16.msra.mxu2 %v9395_v56  ;;  %5420 = vmatmul.bf16.vlgmr.msrb.gmra.mxu3 %v13101_v25  ;;  %v9235_v56 = vor.u32 %v12092_v51, %v9232_v0  ;;  %v10352_v51 = vld [vmem:[#allocation7 + $0x13e0] sm:$0xf0]  ;;  %v12452_v0 = vld [vmem:[#allocation7 + $0x163c] sm:$0xf] }
 0x12e   :  { %5464 = vmatpush.bf16.msra.mxu3 %v9715_v60  ;;  %v10675_v59 = vor.u32 %v12452_v0, %v10672_v52 }
 0x12f   :  { %5426 = vmatpush.bf16.msra.mxu0 %v8715_v21  ;;  %v5200_v60 = vpop.f32.mrf.mxu2  ;;  %v12162_v21 = vld [vmem:[#allocation7 + $0xd2c] sm:$0xf]  ;;  %v5176_v6 = vpop.f32.mrf.mxu0 }
 0x130   :  { %5439 = vmatpush.bf16.msra.mxu1 %v9035_v3  ;;  %v5201_v1 = vadd.f32 %v5200_v60, %v5188_v54  ;;  %v5213_v2 = vpop.f32.mrf.mxu3  ;;  %v9512_v3 = vld [vmem:[#allocation7 + $0xd50] sm:$0xf0]  ;;  %v5189_v17 = vpop.f32.mrf.mxu1  ;;  %v12282_v60 = vld [vmem:[#allocation7 + $0x10ec] sm:$0xf] }
 0x131   :  { %5452 = vmatpush.bf16.msra.mxu2 %v9355_v4  ;;  %v8555_v4 = vor.u32 %v11922_v57, %v8552_v58  ;;  %v9515_v18 = vor.u32 %v12162_v21, %v9512_v3  ;;  %v10035_v57 = vor.u32 %v12292_v47, %v10032_v48  ;;  %v12522_v21 = vld [vmem:[#allocation7 + $0x186c] sm:$0xf]  ;;  %v10952_v3 = vld [vmem:[#allocation7 + $0x1890] sm:$0xf0]  ;;  %v10272_v17 = vld [vmem:[#allocation7 + $0x1340] sm:$0xf0] }
 0x132   :  { %5465 = vmatpush.bf16.msra.mxu3 %v9675_v10  ;;  %v13159_v5 = vadd.f32 %v5213_v2, %v5201_v1  ;;  %v9195_v10 = vor.u32 %v12082_v62, %v9192_v63  ;;  %v10312_v63 = vld [vmem:[#allocation7 + $0x1390] sm:$0xf0]  ;;  %v12442_v1 = vld [vmem:[#allocation7 + $0x15ec] sm:$0xf] }
 0x133   :  { %5427 = vmatpush.bf16.msra.mxu0 %v8675_v19  ;;  %v8832_v19 = vld [vmem:[#allocation7 + $0x800] sm:$0xf0]  ;;  %v10632_v2 = vld [vmem:[#allocation7 + $0x1610] sm:$0xf0]  ;;  %v10315_v6 = vor.u32 %v12362_v61, %v10312_v63 }
 0x134   :  { %5440 = vmatpush.bf16.msra.mxu1 %v8995_v22  ;;  %v12072_v22 = vld [vmem:[#allocation7 + $0xa5c] sm:$0xf]  ;;  %v8835_v31 = vor.u32 %v11992_v14, %v8832_v19  ;;  %v10955_v14 = vor.u32 %v12522_v21, %v10952_v3  ;;  %v10592_v19 = vld [vmem:[#allocation7 + $0x15c0] sm:$0xf0]  ;;  %v10152_v63 = vld [vmem:[#allocation7 + $0x1250] sm:$0xf0] }
 0x135   :  { %5453 = vmatpush.bf16.msra.mxu2 %v9315_v23  ;;  %v9152_v23 = vld [vmem:[#allocation7 + $0xa80] sm:$0xf0] }
 0x136   :  { %5466 = vmatpush.bf16.msra.mxu3 %v9635_v29  ;;  %v11902_v29 = vld [vmem:[#allocation7 + $0x50c] sm:$0xf]  ;;  %v9155_v32 = vor.u32 %v12072_v22, %v9152_v23  ;;  %v12512_v22 = vld [vmem:[#allocation7 + $0x181c] sm:$0xf]  ;;  %v10912_v23 = vld [vmem:[#allocation7 + $0x1840] sm:$0xf0] }
 0x137   :  { %5428 = vmatpush.bf16.msra.mxu0 %v8635_v36  ;;  %v12062_v36 = vld [vmem:[#allocation7 + $0xa0c] sm:$0xf]  ;;  %v5202_v39 = vpop.f32.mrf.mxu2  ;;  %v8475_v50 = vor.u32 %v11902_v29, %v8472_v30  ;;  %v9912_v30 = vld [vmem:[#allocation7 + $0x1070] sm:$0xf0] }
 0x138   :  { %5441 = vmatpush.bf16.msra.mxu1 %v8955_v41  ;;  %v9475_v41 = vor.u32 %v12152_v26, %v9472_v27  ;;  %v5215_v45 = vpop.f32.mrf.mxu3  ;;  %v10275_v27 = vor.u32 %v12352_v13, %v10272_v17  ;;  %v12262_v29 = vld [vmem:[#allocation7 + $0x104c] sm:$0xf] }
 0x139   :  { %5454 = vmatpush.bf16.msra.mxu2 %v9275_v42  ;;  %v9112_v42 = vld [vmem:[#allocation7 + $0xa30] sm:$0xf0] }
 0x13a   :  { %5467 = vmatpush.bf16.msra.mxu3 %v9595_v49  ;;  %v12372_v49 = vld [vmem:[#allocation7 + $0x13bc] sm:$0xf]  ;;  %v9115_v54 = vor.u32 %v12062_v36, %v9112_v42  ;;  %v10552_v36 = vld [vmem:[#allocation7 + $0x1570] sm:$0xf0] }
 0x13b   :  { %5429 = vmatpush.bf16.msra.mxu0 %v8595_v55  ;;  %v12532_v55 = vld [vmem:[#allocation7 + $0x18bc] sm:$0xf]  ;;  %v10355_v58 = vor.u32 %v12372_v49, %v10352_v51  ;;  %v10872_v42 = vld [vmem:[#allocation7 + $0x17f0] sm:$0xf0]  ;;  %v10555_v48 = vor.u32 %v12422_v35, %v10552_v36 }
 0x13c   :  { %5442 = vmatpush.bf16.msra.mxu1 %v8915_v24  ;;  %v10992_v24 = vld [vmem:[#allocation7 + $0x18e0] sm:$0xf0]  ;;  %v12252_v49 = vld [vmem:[#allocation7 + $0xffc] sm:$0xf] }
 0x13d   :  { %5455 = vmatpush.bf16.msra.mxu2 %v9235_v56  ;;  %v9435_v56 = vor.u32 %v12142_v43, %v9432_v44  ;;  %v10995_v62 = vor.u32 %v12532_v55, %v10992_v24  ;;  %v9915_v44 = vor.u32 %v12262_v29, %v9912_v30  ;;  %v12332_v51 = vld [vmem:[#allocation7 + $0x127c] sm:$0xf]  ;;  %v10512_v55 = vld [vmem:[#allocation7 + $0x1520] sm:$0xf0] }
 0x13e   :  { %5468 = vmatpush.bf16.msra.mxu3 %v9555_v12  ;;  %v9992_v12 = vld [vmem:[#allocation7 + $0x1110] sm:$0xf0]  ;;  %v12492_v24 = vld [vmem:[#allocation7 + $0x177c] sm:$0xf]  ;;  %v10752_v30 = vld [vmem:[#allocation7 + $0x1700] sm:$0xf0] }
 0x13f   :  { %5430 = vmatpush.bf16.msra.mxu0 %v8555_v4  ;;  %v9995_v4 = vor.u32 %v12282_v60, %v9992_v12  ;;  %v9832_v60 = vld [vmem:[#allocation7 + $0xfd0] sm:$0xf0]  ;;  %v12322_v12 = vld [vmem:[#allocation7 + $0x122c] sm:$0xf]  ;;  %v12472_v29 = vld [vmem:[#allocation7 + $0x16dc] sm:$0xf] }
 0x140   :  { %5443 = vmatpush.bf16.msra.mxu1 %v8875_v7  ;;  %v10635_v7 = vor.u32 %v12442_v1, %v10632_v2  ;;  %v12402_v1 = vld [vmem:[#allocation7 + $0x14ac] sm:$0xf]  ;;  %v10472_v2 = vld [vmem:[#allocation7 + $0x14d0] sm:$0xf0] }
 0x141   :  { %5456 = vmatpush.bf16.msra.mxu2 %v9195_v10  ;;  %v12272_v10 = vld [vmem:[#allocation7 + $0x109c] sm:$0xf]  ;;  %v10475_v17 = vor.u32 %v12402_v1, %v10472_v2  ;;  %v11888_v2 = vld [vmem:[#allocation7 + $0x494] sm:$0xf0] }
 0x142   :  { %5469 = vmatpush.bf16.msra.mxu3 %v9515_v18  ;;  %v12432_v18 = vld [vmem:[#allocation7 + $0x159c] sm:$0xf]  ;;  %v9955_v26 = vor.u32 %v12272_v10, %v9952_v11 }
 0x143   :  { %5431 = vmatpush.bf16.msra.mxu0 %v8515_v28  ;;  %v10595_v28 = vor.u32 %v12432_v18, %v10592_v19  ;;  %v12232_v18 = vld [vmem:[#allocation7 + $0xf5c] sm:$0xf]  ;;  %v9792_v19 = vld [vmem:[#allocation7 + $0xf80] sm:$0xf0] }
 0x144   :  { %5444 = vmatpush.bf16.msra.mxu1 %v8835_v31  ;;  %v12342_v31 = vld [vmem:[#allocation7 + $0x12cc] sm:$0xf] }
 0x145   :  { %5457 = vmatpush.bf16.msra.mxu2 %v9155_v32  ;;  %v10915_v32 = vor.u32 %v12512_v22, %v10912_v23  ;;  %v10235_v47 = vor.u32 %v12342_v31, %v10232_v33  ;;  %v12312_v22 = vld [vmem:[#allocation7 + $0x11dc] sm:$0xf]  ;;  %v9795_v31 = vor.u32 %v12232_v18, %v9792_v19  ;;  %v9752_v33 = vld [vmem:[#allocation7 + $0xf30] sm:$0xf0]  ;;  %v8358_v18 = vld [vmem:[#allocation7 + $0x420] sm:$0xf] }
 0x146   :  { %5470 = vmatpush.bf16.msra.mxu3 %v9475_v41  ;;  %v12502_v41 = vld [vmem:[#allocation7 + $0x17cc] sm:$0xf] }
 0x147   :  { %5432 = vmatpush.bf16.msra.mxu0 %v8475_v50  ;;  %v5226_v39 = vpop.f32.mrf.mxu0  ;;  %v9872_v50 = vld [vmem:[#allocation7 + $0x1020] sm:$0xf0]  ;;  %v10875_v0 = vor.u32 %v12502_v41, %v10872_v42  ;;  %v10072_v41 = vld [vmem:[#allocation7 + $0x11b0] sm:$0xf0]  ;;  %v12382_v42 = vld [vmem:[#allocation7 + $0x140c] sm:$0xf] }
 0x148   :  { %5445 = vmatpush.bf16.msra.mxu1 %v8795_v53  ;;  %v5227_v43 = vadd.f32 %v5226_v39, %v13159_v5  ;;  %v5239_v45 = vpop.f32.mrf.mxu1  ;;  %v10192_v53 = vld [vmem:[#allocation7 + $0x12a0] sm:$0xf0]  ;;  %v12302_v39 = vld [vmem:[#allocation7 + $0x118c] sm:$0xf] }
 0x149   :  { %5458 = vmatpush.bf16.msra.mxu2 %v9115_v54  ;;  %v12412_v54 = vld [vmem:[#allocation7 + $0x14fc] sm:$0xf]  ;;  %v10195_v5 = vor.u32 %v12332_v51, %v10192_v53  ;;  %v8438_v51 = vld [vmem:[#allocation7 + $0x4c0] sm:$0xf]  ;;  %v11898_v53 = vld [vmem:[#allocation7 + $0x4e4] sm:$0xf0] }
 0x14a   :  { %5471 = vmatpush.bf16.msra.mxu3 %v9435_v56  ;;  %5433 = vmatmul.bf16.vlgmr.msra.gmra.mxu0 %v13092_v8  ;;  %v5240_v52 = vadd.f32 %v5239_v45, %v5227_v43  ;;  %v10832_v56 = vld [vmem:[#allocation7 + $0x17a0] sm:$0xf0]  ;;  %v10755_v43 = vor.u32 %v12472_v29, %v10752_v30  ;;  %v12462_v45 = vld [vmem:[#allocation7 + $0x168c] sm:$0xf]  ;;  %v7998_v30 = vld [vmem:[#allocation7 + $0x150] sm:$0xf] }
 0x14b   :  { %5477 = vmatpush.bf16.msrb.mxu0 %v10035_v57  ;;  %5446 = vmatmul.bf16.vlgmr.msra.gmra.mxu1 %v13096_v15  ;;  %v9875_v57 = vor.u32 %v12252_v49, %v9872_v50  ;;  %v10835_v61 = vor.u32 %v12492_v24, %v10832_v56  ;;  %v8118_v49 = vld [vmem:[#allocation7 + $0x240] sm:$0xf]  ;;  %v11818_v50 = vld [vmem:[#allocation7 + $0x264] sm:$0xf0]  ;;  %v10075_v24 = vor.u32 %v12302_v39, %v10072_v41 }
 0x14c   :  { %5490 = vmatpush.bf16.msrb.mxu1 %v10355_v58  ;;  %5459 = vmatmul.bf16.vlgmr.msra.gmra.mxu2 %v13106_v37  ;;  %v10515_v58 = vor.u32 %v12412_v54, %v10512_v55  ;;  %v8758_v54 = vld [vmem:[#allocation7 + $0x740] sm:$0xf]  ;;  %v11978_v55 = vld [vmem:[#allocation7 + $0x764] sm:$0xf0] }
 0x14d   :  { %5503 = vmatpush.bf16.msrb.mxu2 %v10675_v59  ;;  %5472 = vmatmul.bf16.vlgmr.msra.gmra.mxu3 %v13110_v40  ;;  %v12242_v59 = vld [vmem:[#allocation7 + $0xfac] sm:$0xf] }
 0x14e   :  { %5516 = vmatpush.bf16.msrb.mxu3 %v10995_v62  ;;  %v9835_v10 = vor.u32 %v12242_v59, %v9832_v60  ;;  %v8119_v59 = vor.u32 %v11818_v50, %v8118_v49  ;;  %v8439_v60 = vor.u32 %v11898_v53, %v8438_v51  ;;  %v8278_v53 = vld [vmem:[#allocation7 + $0x380] sm:$0xf] }
 0x14f   :  { %5478 = vmatpush.bf16.msrb.mxu0 %v9995_v4  ;;  %v5252_v62 = vpop.f32.mrf.mxu2  ;;  %v12482_v4 = vld [vmem:[#allocation7 + $0x172c] sm:$0xf] }
 0x150   :  { %5491 = vmatpush.bf16.msrb.mxu1 %v10315_v6  ;;  %v5253_v21 = vadd.f32 %v5252_v62, %v5240_v52  ;;  %v5265_v3 = vpop.f32.mrf.mxu3  ;;  %v10792_v6 = vld [vmem:[#allocation7 + $0x1750] sm:$0xf0]  ;;  %v5241_v11 = vpop.f32.mrf.mxu1  ;;  %v11808_v62 = vld [vmem:[#allocation7 + $0x214] sm:$0xf0] }
 0x151   :  { %5504 = vmatpush.bf16.msrb.mxu2 %v10635_v7  ;;  %v5228_v7 = vpop.f32.mrf.mxu0  ;;  %v10795_v23 = vor.u32 %v12482_v4, %v10792_v6  ;;  %v9038_v4 = vld [vmem:[#allocation7 + $0x970] sm:$0xf]  ;;  %v12048_v6 = vld [vmem:[#allocation7 + $0x994] sm:$0xf0] }
 0x152   :  { %5517 = vmatpush.bf16.msrb.mxu3 %v10955_v14  ;;  %v13166_v13 = vadd.f32 %v5265_v3, %v5253_v21  ;;  %v10155_v14 = vor.u32 %v12322_v12, %v10152_v63  ;;  %v8759_v12 = vor.u32 %v11978_v55, %v8758_v54  ;;  %v8398_v63 = vld [vmem:[#allocation7 + $0x470] sm:$0xf]  ;;  %v11968_v3 = vld [vmem:[#allocation7 + $0x714] sm:$0xf0]  ;;  %v9039_v19 = vor.u32 %v12048_v6, %v9038_v4 }
 0x153   :  { %5479 = vmatpush.bf16.msrb.mxu0 %v9955_v26  ;;  %v10112_v26 = vld [vmem:[#allocation7 + $0x1200] sm:$0xf0]  ;;  %v8718_v21 = vld [vmem:[#allocation7 + $0x6f0] sm:$0xf]  ;;  %v11848_v4 = vld [vmem:[#allocation7 + $0x354] sm:$0xf0] }
 0x154   :  { %5492 = vmatpush.bf16.msrb.mxu1 %v10275_v27  ;;  %v12392_v27 = vld [vmem:[#allocation7 + $0x145c] sm:$0xf]  ;;  %v10115_v35 = vor.u32 %v12312_v22, %v10112_v26  ;;  %v8719_v11 = vor.u32 %v11968_v3, %v8718_v21  ;;  %v11878_v22 = vld [vmem:[#allocation7 + $0x444] sm:$0xf0]  ;;  %v8558_v6 = vld [vmem:[#allocation7 + $0x5b0] sm:$0xf] }
 0x155   :  { %5505 = vmatpush.bf16.msrb.mxu2 %v10595_v28  ;;  %v10432_v28 = vld [vmem:[#allocation7 + $0x1480] sm:$0xf0]  ;;  %v11958_v26 = vld [vmem:[#allocation7 + $0x6c4] sm:$0xf0]  ;;  %vm6310_vm1 = vcmp.gt.f32.partialorder %v13166_v13, 0.0 }
 0x156   :  { %5518 = vmatpush.bf16.msrb.mxu3 %v10915_v32  ;;  %v12222_v32 = vld [vmem:[#allocation7 + $0xf0c] sm:$0xf]  ;;  %v10435_v36 = vor.u32 %v12392_v27, %v10432_v28  ;;  %v8998_v27 = vld [vmem:[#allocation7 + $0x920] sm:$0xf]  ;;  %v12038_v28 = vld [vmem:[#allocation7 + $0x944] sm:$0xf0] }
 0x157   :  { %5480 = vmatpush.bf16.msrb.mxu0 %v9915_v44  ;;  %v10392_v44 = vld [vmem:[#allocation7 + $0x1430] sm:$0xf0]  ;;  %v9755_v52 = vor.u32 %v12222_v32, %v9752_v33  ;;  %v11788_v33 = vld [vmem:[#allocation7 + $0x174] sm:$0xf0]  ;;  %v8999_v41 = vor.u32 %v12038_v28, %v8998_v27  ;;  %v7878_v27 = vld [vmem:[#allocation7 + $0x60] sm:$0xf] }
 0x158   :  { %5493 = vmatpush.bf16.msrb.mxu1 %v10235_v47  ;;  %v10712_v47 = vld [vmem:[#allocation7 + $0x16b0] sm:$0xf0]  ;;  %v10395_v56 = vor.u32 %v12382_v42, %v10392_v44  ;;  %v11868_v42 = vld [vmem:[#allocation7 + $0x3f4] sm:$0xf0]  ;;  %v11758_v28 = vld [vmem:[#allocation7 + $0x84] sm:$0xf0] }
 0x159   :  { %5506 = vmatpush.bf16.msrb.mxu2 %v10555_v48  ;;  %v5254_v48 = vpop.f32.mrf.mxu2  ;;  %v11948_v44 = vld [vmem:[#allocation7 + $0x674] sm:$0xf0] }
 0x15a   :  { %5519 = vmatpush.bf16.msrb.mxu3 %v10875_v0  ;;  %v5267_v0 = vpop.f32.mrf.mxu3  ;;  %v7999_v48 = vor.u32 %v11788_v33, %v7998_v30  ;;  %v8518_v33 = vld [vmem:[#allocation7 + $0x560] sm:$0xf] }
 0x15b   :  { %5481 = vmatpush.bf16.msrb.mxu0 %v9875_v57  ;;  %v9078_v57 = vld [vmem:[#allocation7 + $0x9c0] sm:$0xf] }
 0x15c   :  { %5494 = vmatpush.bf16.msrb.mxu1 %v10195_v5  ;;  %v12058_v5 = vld [vmem:[#allocation7 + $0x9e4] sm:$0xf0]  ;;  %v7958_v0 = vld [vmem:[#allocation7 + $0x100] sm:$0xf] }
 0x15d   :  { %5507 = vmatpush.bf16.msrb.mxu2 %v10515_v58  ;;  %v10715_v58 = vor.u32 %v12462_v45, %v10712_v47  ;;  %v9079_v1 = vor.u32 %v12058_v5, %v9078_v57  ;;  %v8958_v45 = vld [vmem:[#allocation7 + $0x8d0] sm:$0xf]  ;;  %v12028_v47 = vld [vmem:[#allocation7 + $0x8f4] sm:$0xf0]  ;;  %v8598_v57 = vld [vmem:[#allocation7 + $0x600] sm:$0xf] }
 0x15e   :  { %5520 = vmatpush.bf16.msrb.mxu3 %v10835_v61  ;;  %v8078_v61 = vld [vmem:[#allocation7 + $0x1f0] sm:$0xf]  ;;  %v11938_v5 = vld [vmem:[#allocation7 + $0x624] sm:$0xf0] }
 0x15f   :  { %5482 = vmatpush.bf16.msrb.mxu0 %v9835_v10  ;;  %v8079_v7 = vor.u32 %v11808_v62, %v8078_v61  ;;  %v8399_v10 = vor.u32 %v11888_v2, %v8398_v63  ;;  %v8599_v62 = vor.u32 %v11938_v5, %v8598_v57  ;;  %v7918_v63 = vld [vmem:[#allocation7 + $0xb0] sm:$0xf]  ;;  %v9718_v57 = vld [vmem:[#allocation7 + $0xec0] sm:$0xf] }
 0x160   :  { %5495 = vmatpush.bf16.msrb.mxu1 %v10155_v14  ;;  %v8038_v14 = vld [vmem:[#allocation7 + $0x1a0] sm:$0xf]  ;;  %v8238_v2 = vld [vmem:[#allocation7 + $0x330] sm:$0xf] }
 0x161   :  { %5508 = vmatpush.bf16.msrb.mxu2 %v10475_v17  ;;  %v11798_v17 = vld [vmem:[#allocation7 + $0x1c4] sm:$0xf0] }
 0x162   :  { %5521 = vmatpush.bf16.msrb.mxu3 %v10795_v23  ;;  %v8678_v23 = vld [vmem:[#allocation7 + $0x6a0] sm:$0xf]  ;;  %v8039_v29 = vor.u32 %v11798_v17, %v8038_v14  ;;  %v8878_v14 = vld [vmem:[#allocation7 + $0x830] sm:$0xf]  ;;  %v12008_v17 = vld [vmem:[#allocation7 + $0x854] sm:$0xf0] }
 0x163   :  { %5483 = vmatpush.bf16.msrb.mxu0 %v9795_v31  ;;  %v8359_v31 = vor.u32 %v11878_v22, %v8358_v18  ;;  %v8679_v32 = vor.u32 %v11958_v26, %v8678_v23  ;;  %v8239_v23 = vor.u32 %v11848_v4, %v8238_v2  ;;  %v9358_v4 = vld [vmem:[#allocation7 + $0xbf0] sm:$0xf] }
 0x164   :  { %5496 = vmatpush.bf16.msrb.mxu1 %v10115_v35  ;;  %v8318_v35 = vld [vmem:[#allocation7 + $0x3d0] sm:$0xf] }
 0x165   :  { %5509 = vmatpush.bf16.msrb.mxu2 %v10435_v36  ;;  %v13172_v36 = vld [vmem:[#allocation8] sm:$0xff]  ;;  %v8319_v50 = vor.u32 %v11868_v42, %v8318_v35  ;;  %v11918_v35 = vld [vmem:[#allocation7 + $0x584] sm:$0xf0]  ;;  %v7879_v42 = vor.u32 %v11758_v28, %v7878_v27 }
 0x166   :  { %5522 = vmatpush.bf16.msrb.mxu3 %v10755_v43  ;;  %v991_v39 = vperm.slane %v13172_v36, 2  ;;  %v8638_v43 = vld [vmem:[#allocation7 + $0x650] sm:$0xf]  ;;  %v9318_v28 = vld [vmem:[#allocation7 + $0xba0] sm:$0xf] }
 0x167   :  { %5484 = vmatpush.bf16.msrb.mxu0 %v9755_v52  ;;  %v5278_v49 = vpop.f32.mrf.mxu0  ;;  %v8639_v51 = vor.u32 %v11948_v44, %v8638_v43  ;;  %v11778_v52 = vld [vmem:[#allocation7 + $0x124] sm:$0xf0]  ;;  %v7838_v43 = vld [vmem:[#allocation7 + $0x10] sm:$0xf]  ;;  %v11748_v44 = vld [vmem:[#allocation7 + $0x34] sm:$0xf0] }
 0x168   :  { %5497 = vmatpush.bf16.msrb.mxu1 %v10075_v24  ;;  %v5279_v54 = vadd.f32 %v5278_v49, %v991_v39  ;;  %v5291_v55 = vpop.f32.mrf.mxu1  ;;  %v8959_v24 = vor.u32 %v12028_v47, %v8958_v45  ;;  %v8838_v39 = vld [vmem:[#allocation7 + $0x7e0] sm:$0xf]  ;;  %v8519_v47 = vor.u32 %v11918_v35, %v8518_v33  ;;  %v11828_v49 = vld [vmem:[#allocation7 + $0x2b4] sm:$0xf0]  ;;  %v7839_v5 = vor.u32 %v11748_v44, %v7838_v43  ;;  %v12278_v35 = vld [vmem:[#allocation7 + $0x10c4] sm:$0xf0] }
 0x169   :  { %5510 = vmatpush.bf16.msrb.mxu2 %v10395_v56  ;;  %v11858_v56 = vld [vmem:[#allocation7 + $0x3a4] sm:$0xf0]  ;;  %v9958_v33 = vld [vmem:[#allocation7 + $0x10a0] sm:$0xf] }
 0x16a   :  { %5523 = vmatpush.bf16.msrb.mxu3 %v10715_v58  ;;  %5485 = vmatmul.bf16.vlgmr.msrb.gmra.mxu0 %v13104_v34  ;;  %v8918_v58 = vld [vmem:[#allocation7 + $0x880] sm:$0xf]  ;;  %v8279_v61 = vor.u32 %v11858_v56, %v8278_v53  ;;  %v8798_v53 = vld [vmem:[#allocation7 + $0x790] sm:$0xf]  ;;  %v12138_v56 = vld [vmem:[#allocation7 + $0xc64] sm:$0xf0]  ;;  %v9959_v44 = vor.u32 %v12278_v35, %v9958_v33 }
 0x16b   :  { %5529 = vmatpush.bf16.msra.mxu0 %v8119_v59  ;;  %5498 = vmatmul.bf16.vlgmr.msrb.gmra.mxu1 %v13108_v38  ;;  %v12018_v59 = vld [vmem:[#allocation7 + $0x8a4] sm:$0xf0]  ;;  %v9158_v35 = vld [vmem:[#allocation7 + $0xa60] sm:$0xf] }
 0x16c   :  { %5542 = vmatpush.bf16.msra.mxu1 %v8439_v60  ;;  %5511 = vmatmul.bf16.vlgmr.msrb.gmra.mxu2 %v13116_v16  ;;  %v5292_v60 = vadd.f32 %v5291_v55, %v5279_v54  ;;  %v8919_v3 = vor.u32 %v12018_v59, %v8918_v58  ;;  %v11988_v54 = vld [vmem:[#allocation7 + $0x7b4] sm:$0xf0]  ;;  %v12218_v58 = vld [vmem:[#allocation7 + $0xee4] sm:$0xf0]  ;;  %v10038_v59 = vld [vmem:[#allocation7 + $0x1140] sm:$0xf] }
 0x16d   :  { %5555 = vmatpush.bf16.msra.mxu2 %v8759_v12  ;;  %5524 = vmatmul.bf16.vlgmr.msrb.gmra.mxu3 %v13118_v20  ;;  %v7959_v12 = vor.u32 %v11778_v52, %v7958_v0  ;;  %v11908_v52 = vld [vmem:[#allocation7 + $0x534] sm:$0xf0] }
 0x16e   :  { %5568 = vmatpush.bf16.msra.mxu3 %v9079_v1  ;;  %v11768_v1 = vld [vmem:[#allocation7 + $0xd4] sm:$0xf0] }
 0x16f   :  { %5530 = vmatpush.bf16.msra.mxu0 %v8079_v7  ;;  %v5304_v21 = vpop.f32.mrf.mxu2  ;;  %v11928_v7 = vld [vmem:[#allocation7 + $0x5d4] sm:$0xf0]  ;;  %v7919_v18 = vor.u32 %v11768_v1, %v7918_v63  ;;  %v5280_v22 = vpop.f32.mrf.mxu0  ;;  %v12378_v63 = vld [vmem:[#allocation7 + $0x13e4] sm:$0xf0]  ;;  %v8799_v1 = vor.u32 %v11988_v54, %v8798_v53 }
 0x170   :  { %5543 = vmatpush.bf16.msra.mxu1 %v8399_v10  ;;  %v5305_v10 = vadd.f32 %v5304_v21, %v5292_v60  ;;  %v8559_v26 = vor.u32 %v11928_v7, %v8558_v6  ;;  %v5293_v30 = vpop.f32.mrf.mxu1  ;;  %v12298_v60 = vld [vmem:[#allocation7 + $0x1164] sm:$0xf0]  ;;  %v9719_v21 = vor.u32 %v12218_v58, %v9718_v57  ;;  %v12128_v6 = vld [vmem:[#allocation7 + $0xc14] sm:$0xf0]  ;;  %v9678_v7 = vld [vmem:[#allocation7 + $0xe70] sm:$0xf] }
 0x171   :  { %5556 = vmatpush.bf16.msra.mxu2 %v8719_v11  ;;  %v5317_v11 = vpop.f32.mrf.mxu3  ;;  %v12368_v22 = vld [vmem:[#allocation7 + $0x1394] sm:$0xf0]  ;;  %v9638_v30 = vld [vmem:[#allocation7 + $0xe20] sm:$0xf] }
 0x172   :  { %5569 = vmatpush.bf16.msra.mxu3 %v9039_v19  ;;  %v13175_v19 = vadd.f32 %v5317_v11, %v5305_v10  ;;  %v12208_v11 = vld [vmem:[#allocation7 + $0xe94] sm:$0xf0]  ;;  %v9238_v57 = vld [vmem:[#allocation7 + $0xb00] sm:$0xf] }
 0x173   :  { %5531 = vmatpush.bf16.msra.mxu0 %v8039_v29  ;;  %v8198_v29 = vld [vmem:[#allocation7 + $0x2e0] sm:$0xf]  ;;  %v12348_v53 = vld [vmem:[#allocation7 + $0x12f4] sm:$0xf0] }
 0x174   :  { %5544 = vmatpush.bf16.msra.mxu1 %v8359_v31  ;;  %v8879_v31 = vor.u32 %v12008_v17, %v8878_v14  ;;  %v9998_v14 = vld [vmem:[#allocation7 + $0x10f0] sm:$0xf]  ;;  %v12288_v17 = vld [vmem:[#allocation7 + $0x1114] sm:$0xf0]  ;;  %v9558_v58 = vld [vmem:[#allocation7 + $0xd80] sm:$0xf] }
 0x175   :  { %5557 = vmatpush.bf16.msra.mxu2 %v8679_v32  ;;  %v11838_v32 = vld [vmem:[#allocation7 + $0x304] sm:$0xf0]  ;;  %v9999_v27 = vor.u32 %v12288_v17, %v9998_v14  ;;  %v12168_v17 = vld [vmem:[#allocation7 + $0xd54] sm:$0xf0] }
 0x176   :  { %5570 = vmatpush.bf16.msra.mxu3 %v8999_v41  ;;  %v11998_v41 = vld [vmem:[#allocation7 + $0x804] sm:$0xf0]  ;;  %v8199_v45 = vor.u32 %v11838_v32, %v8198_v29 }
 0x177   :  { %5532 = vmatpush.bf16.msra.mxu0 %v7999_v48  ;;  %v8158_v48 = vld [vmem:[#allocation7 + $0x290] sm:$0xf]  ;;  %v8839_v0 = vor.u32 %v11998_v41, %v8838_v39  ;;  %v12118_v29 = vld [vmem:[#allocation7 + $0xbc4] sm:$0xf0]  ;;  %v10278_v39 = vld [vmem:[#allocation7 + $0x1320] sm:$0xf] }
 0x178   :  { %5545 = vmatpush.bf16.msra.mxu1 %v8319_v50  ;;  %v8478_v50 = vld [vmem:[#allocation7 + $0x510] sm:$0xf]  ;;  %v12198_v32 = vld [vmem:[#allocation7 + $0xe44] sm:$0xf0] }
 0x179   :  { %5558 = vmatpush.bf16.msra.mxu2 %v8639_v51  ;;  %v5306_v51 = vpop.f32.mrf.mxu2  ;;  %v5319_v55 = vpop.f32.mrf.mxu3  ;;  %v12358_v41 = vld [vmem:[#allocation7 + $0x1344] sm:$0xf0]  ;;  %v9639_v43 = vor.u32 %v12198_v32, %v9638_v30 }
 0x17a   :  { %5571 = vmatpush.bf16.msra.mxu3 %v8959_v24  ;;  %v9398_v24 = vld [vmem:[#allocation7 + $0xc40] sm:$0xf]  ;;  %v9918_v51 = vld [vmem:[#allocation7 + $0x1050] sm:$0xf] }
 0x17b   :  { %5533 = vmatpush.bf16.msra.mxu0 %v7959_v12  ;;  %v8159_v12 = vor.u32 %v11828_v49, %v8158_v48  ;;  %v9399_v2 = vor.u32 %v12138_v56, %v9398_v24  ;;  %v9598_v48 = vld [vmem:[#allocation7 + $0xdd0] sm:$0xf]  ;;  %v10279_v49 = vor.u32 %v12358_v41, %v10278_v39  ;;  %v12078_v39 = vld [vmem:[#allocation7 + $0xa84] sm:$0xf0]  ;;  %v9478_v41 = vld [vmem:[#allocation7 + $0xce0] sm:$0xf] }
 0x17c   :  { %5546 = vmatpush.bf16.msra.mxu1 %v8279_v61  ;;  %v8479_v61 = vor.u32 %v11908_v52, %v8478_v50  ;;  %v12188_v50 = vld [vmem:[#allocation7 + $0xdf4] sm:$0xf0]  ;;  %v10238_v52 = vld [vmem:[#allocation7 + $0x12d0] sm:$0xf] }
 0x17d   :  { %5559 = vmatpush.bf16.msra.mxu2 %v8599_v62  ;;  %v10358_v62 = vld [vmem:[#allocation7 + $0x13c0] sm:$0xf]  ;;  %v9599_v24 = vor.u32 %v12188_v50, %v9598_v48  ;;  %v9159_v50 = vor.u32 %v12078_v39, %v9158_v35 }
 0x17e   :  { %5572 = vmatpush.bf16.msra.mxu3 %v8919_v3  ;;  %v10039_v3 = vor.u32 %v12298_v60, %v10038_v59  ;;  %v10359_v10 = vor.u32 %v12378_v63, %v10358_v62  ;;  %v9878_v62 = vld [vmem:[#allocation7 + $0x1000] sm:$0xf]  ;;  %v12258_v63 = vld [vmem:[#allocation7 + $0x1024] sm:$0xf0] }
 0x17f   :  { %5534 = vmatpush.bf16.msra.mxu0 %v7919_v18  ;;  %v10318_v18 = vld [vmem:[#allocation7 + $0x1370] sm:$0xf]  ;;  %v10118_v48 = vld [vmem:[#allocation7 + $0x11e0] sm:$0xf] }
 0x180   :  { %5547 = vmatpush.bf16.msra.mxu1 %v8239_v23  ;;  %v9359_v23 = vor.u32 %v12128_v6, %v9358_v4  ;;  %v9879_v6 = vor.u32 %v12258_v63, %v9878_v62  ;;  %v10998_v62 = vld [vmem:[#allocation7 + $0x18c0] sm:$0xf] }
 0x181   :  { %5560 = vmatpush.bf16.msra.mxu2 %v8559_v26  ;;  %v9679_v26 = vor.u32 %v12208_v11, %v9678_v7  ;;  %v9198_v7 = vld [vmem:[#allocation7 + $0xab0] sm:$0xf]  ;;  %v10598_v39 = vld [vmem:[#allocation7 + $0x15a0] sm:$0xf] }
 0x182   :  { %5573 = vmatpush.bf16.msra.mxu3 %v8879_v31  ;;  %v10319_v31 = vor.u32 %v12368_v22, %v10318_v18  ;;  %v9518_v11 = vld [vmem:[#allocation7 + $0xd30] sm:$0xf]  ;;  %v12248_v22 = vld [vmem:[#allocation7 + $0xfd4] sm:$0xf0] }
 0x183   :  { %5535 = vmatpush.bf16.msra.mxu0 %v7879_v42  ;;  %v9319_v42 = vor.u32 %v12118_v29, %v9318_v28  ;;  %v9838_v18 = vld [vmem:[#allocation7 + $0xfb0] sm:$0xf]  ;;  %v12328_v28 = vld [vmem:[#allocation7 + $0x1254] sm:$0xf0]  ;;  %v9519_v32 = vor.u32 %v12168_v17, %v9518_v11 }
 0x184   :  { %5548 = vmatpush.bf16.msra.mxu1 %v8199_v45  ;;  %v9278_v45 = vld [vmem:[#allocation7 + $0xb50] sm:$0xf]  ;;  %v9839_v33 = vor.u32 %v12248_v22, %v9838_v18  ;;  %v12448_v18 = vld [vmem:[#allocation7 + $0x1614] sm:$0xf0] }
 0x185   :  { %5561 = vmatpush.bf16.msra.mxu2 %v8519_v47  ;;  %v12108_v47 = vld [vmem:[#allocation7 + $0xb74] sm:$0xf0]  ;;  %v10638_v17 = vld [vmem:[#allocation7 + $0x15f0] sm:$0xf] }
 0x186   :  { %5574 = vmatpush.bf16.msra.mxu3 %v8839_v0  ;;  %v12268_v0 = vld [vmem:[#allocation7 + $0x1074] sm:$0xf0]  ;;  %v9279_v54 = vor.u32 %v12108_v47, %v9278_v45  ;;  %v9798_v45 = vld [vmem:[#allocation7 + $0xf60] sm:$0xf]  ;;  %v12238_v47 = vld [vmem:[#allocation7 + $0xf84] sm:$0xf0] }
 0x187   :  { %5536 = vmatpush.bf16.msra.mxu0 %v7839_v5  ;;  %v5330_v55 = vpop.f32.mrf.mxu0  ;;  %v9919_v56 = vor.u32 %v12268_v0, %v9918_v51  ;;  %v12098_v5 = vld [vmem:[#allocation7 + $0xb24] sm:$0xf0]  ;;  %v9118_v51 = vld [vmem:[#allocation7 + $0xa10] sm:$0xf]  ;;  %v12068_v0 = vld [vmem:[#allocation7 + $0xa34] sm:$0xf0] }
 0x188   :  { %5549 = vmatpush.bf16.msra.mxu1 %v8159_v12  ;;  %v5331_v59 = vadd.f32 %v5330_v55, %v13175_v19  ;;  %v5343_v60 = vpop.f32.mrf.mxu1  ;;  %v10239_v12 = vor.u32 %v12348_v53, %v10238_v52  ;;  %v9799_v53 = vor.u32 %v12238_v47, %v9798_v45  ;;  %v12148_v55 = vld [vmem:[#allocation7 + $0xcb4] sm:$0xf0]  ;;  %v9119_v63 = vor.u32 %v12068_v0, %v9118_v51  ;;  %v10958_v22 = vld [vmem:[#allocation7 + $0x1870] sm:$0xf]  ;;  %v11793_v45 = vld [vmem:[#allocation7 + $0x1a4] sm:$0xf] }
 0x189   :  { %5562 = vmatpush.bf16.msra.mxu2 %v8479_v61  ;;  %v12178_v61 = vld [vmem:[#allocation7 + $0xda4] sm:$0xf0]  ;;  %v8040_v47 = vld [vmem:[#allocation7 + $0x1c8] sm:$0xf0] }
 0x18a   :  { %5575 = vmatpush.bf16.msra.mxu3 %v8799_v1  ;;  %5537 = vmatmul.bf16.vlgmr.msra.gmra.mxu0 %v13094_v9  ;;  %v10198_v1 = vld [vmem:[#allocation7 + $0x1280] sm:$0xf]  ;;  %v9559_v4 = vor.u32 %v12178_v61, %v9558_v58  ;;  %v10078_v58 = vld [vmem:[#allocation7 + $0x1190] sm:$0xf]  ;;  %v12458_v61 = vld [vmem:[#allocation7 + $0x1664] sm:$0xf0]  ;;  %v8043_v0 = vor.u32 %v11793_v45, %v8040_v47 }
 0x18b   :  { %5581 = vmatpush.bf16.msrb.mxu0 %v9399_v2  ;;  %5550 = vmatmul.bf16.vlgmr.msra.gmra.mxu1 %v13101_v25  ;;  %v12338_v2 = vld [vmem:[#allocation7 + $0x12a4] sm:$0xf0]  ;;  %v10438_v47 = vld [vmem:[#allocation7 + $0x1460] sm:$0xf] }
 0x18c   :  { %5594 = vmatpush.bf16.msrb.mxu1 %v9719_v21  ;;  %5563 = vmatmul.bf16.vlgmr.msra.gmra.mxu2 %v13092_v8  ;;  %v5344_v21 = vadd.f32 %v5343_v60, %v5331_v59  ;;  %v10199_v19 = vor.u32 %v12338_v2, %v10198_v1  ;;  %v12308_v59 = vld [vmem:[#allocation7 + $0x11b4] sm:$0xf0]  ;;  %v12538_v1 = vld [vmem:[#allocation7 + $0x18e4] sm:$0xf0]  ;;  %v11813_v2 = vld [vmem:[#allocation7 + $0x244] sm:$0xf] }
 0x18d   :  { %5607 = vmatpush.bf16.msrb.mxu2 %v10039_v3  ;;  %5576 = vmatmul.bf16.vlgmr.msra.gmra.mxu3 %v13096_v15  ;;  %v9239_v3 = vor.u32 %v12098_v5, %v9238_v57  ;;  %v12228_v5 = vld [vmem:[#allocation7 + $0xf34] sm:$0xf0] }
 0x18e   :  { %5620 = vmatpush.bf16.msrb.mxu3 %v10359_v10  ;;  %v12088_v10 = vld [vmem:[#allocation7 + $0xad4] sm:$0xf0] }
 0x18f   :  { %5582 = vmatpush.bf16.msrb.mxu0 %v9359_v23  ;;  %v5356_v14 = vpop.f32.mrf.mxu2  ;;  %v9199_v29 = vor.u32 %v12088_v10, %v9198_v7  ;;  %v8440_v7 = vld [vmem:[#allocation7 + $0x4e8] sm:$0xf0]  ;;  %v10079_v10 = vor.u32 %v12308_v59, %v10078_v58  ;;  %v11863_v58 = vld [vmem:[#allocation7 + $0x3d4] sm:$0xf]  ;;  %v8320_v59 = vld [vmem:[#allocation7 + $0x3f8] sm:$0xf0] }
 0x190   :  { %5595 = vmatpush.bf16.msrb.mxu1 %v9679_v26  ;;  %v5357_v23 = vadd.f32 %v5356_v14, %v5344_v21  ;;  %v5369_v26 = vpop.f32.mrf.mxu3  ;;  %v8120_v21 = vld [vmem:[#allocation7 + $0x268] sm:$0xf0]  ;;  %v10999_v14 = vor.u32 %v12538_v1, %v10998_v62  ;;  %v10518_v1 = vld [vmem:[#allocation7 + $0x1500] sm:$0xf] }
 0x191   :  { %5608 = vmatpush.bf16.msrb.mxu2 %v9999_v27  ;;  %v10158_v27 = vld [vmem:[#allocation7 + $0x1230] sm:$0xf] }
 0x192   :  { %5621 = vmatpush.bf16.msrb.mxu3 %v10319_v31  ;;  %v13182_v30 = vadd.f32 %v5369_v26, %v5357_v23  ;;  %v5332_v31 = vpop.f32.mrf.mxu0  ;;  %v12528_v26 = vld [vmem:[#allocation7 + $0x1894] sm:$0xf0] }
 0x193   :  { %5583 = vmatpush.bf16.msrb.mxu0 %v9319_v42  ;;  %v5345_v42 = vpop.f32.mrf.mxu1  ;;  %v8400_v31 = vld [vmem:[#allocation7 + $0x498] sm:$0xf0] }
 0x194   :  { %5596 = vmatpush.bf16.msrb.mxu1 %v9639_v43  ;;  %v10159_v43 = vor.u32 %v12328_v28, %v10158_v27  ;;  %v11803_v27 = vld [vmem:[#allocation7 + $0x1f4] sm:$0xf]  ;;  %v8080_v28 = vld [vmem:[#allocation7 + $0x218] sm:$0xf0]  ;;  %v10918_v42 = vld [vmem:[#allocation7 + $0x1820] sm:$0xf] }
 0x195   :  { %5609 = vmatpush.bf16.msrb.mxu2 %v9959_v44  ;;  %v12158_v44 = vld [vmem:[#allocation7 + $0xd04] sm:$0xf0]  ;;  %v8083_v35 = vor.u32 %v11803_v27, %v8080_v28  ;;  %v12488_v28 = vld [vmem:[#allocation7 + $0x1754] sm:$0xf0] }
 0x196   :  { %5622 = vmatpush.bf16.msrb.mxu3 %v10279_v49  ;;  %v12318_v49 = vld [vmem:[#allocation7 + $0x1204] sm:$0xf0]  ;;  %v9479_v52 = vor.u32 %v12158_v44, %v9478_v41 }
 0x197   :  { %5584 = vmatpush.bf16.msrb.mxu0 %v9279_v54  ;;  %v9438_v54 = vld [vmem:[#allocation7 + $0xc90] sm:$0xf]  ;;  %v10119_v57 = vor.u32 %v12318_v49, %v10118_v48  ;;  %v12438_v41 = vld [vmem:[#allocation7 + $0x15c4] sm:$0xf0]  ;;  %v11873_v48 = vld [vmem:[#allocation7 + $0x424] sm:$0xf] }
 0x198   :  { %5597 = vmatpush.bf16.msrb.mxu1 %v9599_v24  ;;  %v9758_v24 = vld [vmem:[#allocation7 + $0xf10] sm:$0xf]  ;;  %v5371_v60 = vpop.f32.mrf.mxu3  ;;  %v12518_v44 = vld [vmem:[#allocation7 + $0x1844] sm:$0xf0]  ;;  %v8360_v49 = vld [vmem:[#allocation7 + $0x448] sm:$0xf0] }
 0x199   :  { %5610 = vmatpush.bf16.msrb.mxu2 %v9919_v56  ;;  %v5358_v56 = vpop.f32.mrf.mxu2  ;;  %v10919_v51 = vor.u32 %v12518_v44, %v10918_v42 }
 0x19a   :  { %5623 = vmatpush.bf16.msrb.mxu3 %v10239_v12  ;;  %v10678_v12 = vld [vmem:[#allocation7 + $0x1640] sm:$0xf]  ;;  %v11783_v56 = vld [vmem:[#allocation7 + $0x154] sm:$0xf] }
 0x19b   :  { %5585 = vmatpush.bf16.msrb.mxu0 %v9239_v3  ;;  %v9439_v3 = vor.u32 %v12148_v55, %v9438_v54  ;;  %v10679_v11 = vor.u32 %v12458_v61, %v10678_v12  ;;  %v10878_v54 = vld [vmem:[#allocation7 + $0x17d0] sm:$0xf]  ;;  %v8363_v55 = vor.u32 %v11873_v48, %v8360_v49  ;;  %v12398_v48 = vld [vmem:[#allocation7 + $0x1484] sm:$0xf0]  ;;  %v10758_v49 = vld [vmem:[#allocation7 + $0x16e0] sm:$0xf] }
 0x19c   :  { %5598 = vmatpush.bf16.msrb.mxu1 %v9559_v4  ;;  %v9759_v4 = vor.u32 %v12228_v5, %v9758_v24  ;;  %v12508_v24 = vld [vmem:[#allocation7 + $0x17f4] sm:$0xf0] }
 0x19d   :  { %5611 = vmatpush.bf16.msrb.mxu2 %v9879_v6  ;;  %v11893_v6 = vld [vmem:[#allocation7 + $0x4c4] sm:$0xf]  ;;  %v10879_v62 = vor.u32 %v12508_v24, %v10878_v54  ;;  %v10439_v24 = vor.u32 %v12398_v48, %v10438_v47  ;;  %v8680_v48 = vld [vmem:[#allocation7 + $0x6c8] sm:$0xf0] }
 0x19e   :  { %5624 = vmatpush.bf16.msrb.mxu3 %v10199_v19  ;;  %v8123_v19 = vor.u32 %v11813_v2, %v8120_v21  ;;  %v8443_v23 = vor.u32 %v11893_v6, %v8440_v7  ;;  %v12418_v2 = vld [vmem:[#allocation7 + $0x1524] sm:$0xf0]  ;;  %v10838_v21 = vld [vmem:[#allocation7 + $0x1780] sm:$0xf]  ;;  %v11773_v7 = vld [vmem:[#allocation7 + $0x104] sm:$0xf] }
 0x19f   :  { %5586 = vmatpush.bf16.msrb.mxu0 %v9199_v29  ;;  %v11883_v29 = vld [vmem:[#allocation7 + $0x474] sm:$0xf]  ;;  %v12498_v6 = vld [vmem:[#allocation7 + $0x17a4] sm:$0xf0]  ;;  %v11833_v54 = vld [vmem:[#allocation7 + $0x2e4] sm:$0xf] }
 0x1a0   :  { %5599 = vmatpush.bf16.msrb.mxu1 %v9519_v32  ;;  %v10639_v32 = vor.u32 %v12448_v18, %v10638_v17  ;;  %v10839_v17 = vor.u32 %v12498_v6, %v10838_v21  ;;  %v11973_v21 = vld [vmem:[#allocation7 + $0x744] sm:$0xf] }
 0x1a1   :  { %5612 = vmatpush.bf16.msrb.mxu2 %v9839_v33  ;;  %v10959_v33 = vor.u32 %v12528_v26, %v10958_v22  ;;  %v10478_v22 = vld [vmem:[#allocation7 + $0x14b0] sm:$0xf]  ;;  %v12053_v6 = vld [vmem:[#allocation7 + $0x9c4] sm:$0xf] }
 0x1a2   :  { %5625 = vmatpush.bf16.msrb.mxu3 %v10159_v43  ;;  %v8403_v43 = vor.u32 %v11883_v29, %v8400_v31  ;;  %v10798_v26 = vld [vmem:[#allocation7 + $0x1730] sm:$0xf]  ;;  %v11763_v29 = vld [vmem:[#allocation7 + $0xb4] sm:$0xf]  ;;  %v7920_v31 = vld [vmem:[#allocation7 + $0xd8] sm:$0xf0] }
 0x1a3   :  { %5587 = vmatpush.bf16.msrb.mxu0 %v9159_v50  ;;  %v10599_v50 = vor.u32 %v12438_v41, %v10598_v39  ;;  %v10799_v44 = vor.u32 %v12488_v28, %v10798_v26  ;;  %v7923_v45 = vor.u32 %v11763_v29, %v7920_v31  ;;  %v11963_v29 = vld [vmem:[#allocation7 + $0x6f4] sm:$0xf]  ;;  %v8720_v31 = vld [vmem:[#allocation7 + $0x718] sm:$0xf0]  ;;  %v11953_v47 = vld [vmem:[#allocation7 + $0x6a4] sm:$0xf] }
 0x1a4   :  { %5600 = vmatpush.bf16.msrb.mxu1 %v9479_v52  ;;  %v10558_v52 = vld [vmem:[#allocation7 + $0x1550] sm:$0xf] }
 0x1a5   :  { %5613 = vmatpush.bf16.msrb.mxu2 %v9799_v53  ;;  %v12428_v53 = vld [vmem:[#allocation7 + $0x1574] sm:$0xf0] }
 0x1a6   :  { %5626 = vmatpush.bf16.msrb.mxu3 %v10119_v57  ;;  %v8000_v57 = vld [vmem:[#allocation7 + $0x178] sm:$0xf0]  ;;  %v10559_v12 = vor.u32 %v12428_v53, %v10558_v52  ;;  %v11753_v52 = vld [vmem:[#allocation7 + $0x64] sm:$0xf]  ;;  %v7880_v53 = vld [vmem:[#allocation7 + $0x88] sm:$0xf0] }
 0x1a7   :  { %5588 = vmatpush.bf16.msrb.mxu0 %v9119_v63  ;;  %v5382_v5 = vpop.f32.mrf.mxu0  ;;  %v8003_v63 = vor.u32 %v11783_v56, %v8000_v57  ;;  %v10398_v56 = vld [vmem:[#allocation7 + $0x1410] sm:$0xf]  ;;  %v12388_v57 = vld [vmem:[#allocation7 + $0x1434] sm:$0xf0] }
 0x1a8   :  { %5601 = vmatpush.bf16.msrb.mxu1 %v9439_v3  ;;  %v5383_v60 = vadd.f32 %v5382_v5, %v13182_v30  ;;  %v5395_v61 = vpop.f32.mrf.mxu1  ;;  %v8323_v3 = vor.u32 %v11863_v58, %v8320_v59  ;;  %v992_v30 = vperm.slane %v13172_v36, 3  ;;  %v7883_v58 = vor.u32 %v11753_v52, %v7880_v53  ;;  %v10718_v59 = vld [vmem:[#allocation7 + $0x1690] sm:$0xf]  ;;  %v12113_v52 = vld [vmem:[#allocation7 + $0xba4] sm:$0xf] }
 0x1a9   :  { %5614 = vmatpush.bf16.msrb.mxu2 %v9759_v4  ;;  %v9320_v53 = vld [vmem:[#allocation7 + $0xbc8] sm:$0xf0] }
 0x1aa   :  { %5627 = vmatpush.bf16.msrb.mxu3 %v10079_v10  ;;  %5589 = vmatmul.bf16.vlgmr.msrb.gmra.mxu0 %v13106_v37  ;;  %v13189_v4 = vadd.f32 %v5395_v61, %v5383_v60  ;;  %v7960_v10 = vld [vmem:[#allocation7 + $0x128] sm:$0xf0]  ;;  %v12468_v60 = vld [vmem:[#allocation7 + $0x16b4] sm:$0xf0] }
 0x1ab   :  { %5633 = vmatpush.bf16.msra.mxu0 %v10679_v11  ;;  %5602 = vmatmul.bf16.vlgmr.msrb.gmra.mxu1 %v13110_v40  ;;  %v11853_v11 = vld [vmem:[#allocation7 + $0x384] sm:$0xf]  ;;  %v7963_v18 = vor.u32 %v11773_v7, %v7960_v10  ;;  %v10399_v10 = vor.u32 %v12388_v57, %v10398_v56  ;;  %v9323_v57 = vor.u32 %v12113_v52, %v9320_v53 }
 0x1ac   :  { %5646 = vmatpush.bf16.msra.mxu1 %v10999_v14  ;;  %5615 = vmatmul.bf16.vlgmr.msrb.gmra.mxu2 %v13104_v34  ;;  %v8280_v14 = vld [vmem:[#allocation7 + $0x3a8] sm:$0xf0]  ;;  %v11913_v53 = vld [vmem:[#allocation7 + $0x564] sm:$0xf]  ;;  %vm6311_vm2 = vcmp.gt.f32.partialorder %v13189_v4, 0.0 }
 0x1ad   :  { %5659 = vmatpush.bf16.msra.mxu2 %v8123_v19  ;;  %5628 = vmatmul.bf16.vlgmr.msrb.gmra.mxu3 %v13108_v38  ;;  %v10519_v19 = vor.u32 %v12418_v2, %v10518_v1  ;;  %v8283_v27 = vor.u32 %v11853_v11, %v8280_v14  ;;  %v8160_v1 = vld [vmem:[#allocation7 + $0x2b8] sm:$0xf0]  ;;  %v9080_v11 = vld [vmem:[#allocation7 + $0x9e8] sm:$0xf0]  ;;  %v12133_v14 = vld [vmem:[#allocation7 + $0xc44] sm:$0xf] }
 0x1ae   :  { %5672 = vmatpush.bf16.msra.mxu3 %v8443_v23  ;;  %v12408_v23 = vld [vmem:[#allocation7 + $0x14d4] sm:$0xf0] }
 0x1af   :  { %5634 = vmatpush.bf16.msra.mxu0 %v10639_v32  ;;  %v5408_v32 = vpop.f32.mrf.mxu2  ;;  %v5384_v36 = vpop.f32.mrf.mxu0  ;;  %v10479_v42 = vor.u32 %v12408_v23, %v10478_v22  ;;  %v9720_v22 = vld [vmem:[#allocation7 + $0xee8] sm:$0xf0] }
 0x1b0   :  { %5647 = vmatpush.bf16.msra.mxu1 %v10959_v33  ;;  %v11843_v33 = vld [vmem:[#allocation7 + $0x334] sm:$0xf]  ;;  %v5409_v39 = vadd.f32 %v5408_v32, %v992_v30  ;;  %v5421_v41 = vpop.f32.mrf.mxu3  ;;  %v9400_v30 = vld [vmem:[#allocation7 + $0xc68] sm:$0xf0] }
 0x1b1   :  { %5660 = vmatpush.bf16.msra.mxu2 %v8083_v35  ;;  %v8240_v35 = vld [vmem:[#allocation7 + $0x358] sm:$0xf0]  ;;  %v9403_v28 = vor.u32 %v12133_v14, %v9400_v30  ;;  %v12043_v32 = vld [vmem:[#allocation7 + $0x974] sm:$0xf] }
 0x1b2   :  { %5673 = vmatpush.bf16.msra.mxu3 %v8403_v43  ;;  %v5397_v43 = vpop.f32.mrf.mxu1  ;;  %v12203_v36 = vld [vmem:[#allocation7 + $0xe74] sm:$0xf] }
 0x1b3   :  { %5635 = vmatpush.bf16.msra.mxu0 %v10599_v50  ;;  %v13192_v50 = vadd.f32 %v5421_v41, %v5409_v39  ;;  %v12123_v39 = vld [vmem:[#allocation7 + $0xbf4] sm:$0xf]  ;;  %v9360_v41 = vld [vmem:[#allocation7 + $0xc18] sm:$0xf0]  ;;  %v8723_v43 = vor.u32 %v11963_v29, %v8720_v31 }
 0x1b4   :  { %5648 = vmatpush.bf16.msra.mxu1 %v10919_v51  ;;  %v8243_v51 = vor.u32 %v11843_v33, %v8240_v35  ;;  %v9040_v35 = vld [vmem:[#allocation7 + $0x998] sm:$0xf0] }
 0x1b5   :  { %5661 = vmatpush.bf16.msra.mxu2 %v8043_v0  ;;  %v12478_v0 = vld [vmem:[#allocation7 + $0x1704] sm:$0xf0] }
 0x1b6   :  { %5674 = vmatpush.bf16.msra.mxu3 %v8363_v55  ;;  %v8200_v55 = vld [vmem:[#allocation7 + $0x308] sm:$0xf0]  ;;  %v10759_v5 = vor.u32 %v12478_v0, %v10758_v49  ;;  %v12033_v49 = vld [vmem:[#allocation7 + $0x924] sm:$0xf] }
 0x1b7   :  { %5636 = vmatpush.bf16.msra.mxu0 %v10559_v12  ;;  %v11743_v12 = vld [vmem:[#allocation7 + $0x14] sm:$0xf]  ;;  %v8203_v61 = vor.u32 %v11833_v54, %v8200_v55  ;;  %v5410_v2 = vpop.f32.mrf.mxu2  ;;  %v9000_v0 = vld [vmem:[#allocation7 + $0x948] sm:$0xf0]  ;;  %v12193_v54 = vld [vmem:[#allocation7 + $0xe24] sm:$0xf] }
 0x1b8   :  { %5649 = vmatpush.bf16.msra.mxu1 %v10879_v62  ;;  %v7840_v62 = vld [vmem:[#allocation7 + $0x38] sm:$0xf0]  ;;  %v5423_v7 = vpop.f32.mrf.mxu3  ;;  %v9640_v55 = vld [vmem:[#allocation7 + $0xe48] sm:$0xf0]  ;;  %v9003_v56 = vor.u32 %v12033_v49, %v9000_v0 }
 0x1b9   :  { %5662 = vmatpush.bf16.msra.mxu2 %v8003_v63  ;;  %v11823_v63 = vld [vmem:[#allocation7 + $0x294] sm:$0xf]  ;;  %v11933_v7 = vld [vmem:[#allocation7 + $0x604] sm:$0xf] }
 0x1ba   :  { %5675 = vmatpush.bf16.msra.mxu3 %v8323_v3  ;;  %v8760_v3 = vld [vmem:[#allocation7 + $0x768] sm:$0xf0]  ;;  %v8163_v23 = vor.u32 %v11823_v63, %v8160_v1  ;;  %v12183_v63 = vld [vmem:[#allocation7 + $0xdd4] sm:$0xf]  ;;  %v9600_v1 = vld [vmem:[#allocation7 + $0xdf8] sm:$0xf0] }
 0x1bb   :  { %5637 = vmatpush.bf16.msra.mxu0 %v10519_v19  ;;  %v10719_v19 = vor.u32 %v12468_v60, %v10718_v59  ;;  %v8763_v26 = vor.u32 %v11973_v21, %v8760_v3  ;;  %v12023_v59 = vld [vmem:[#allocation7 + $0x8d4] sm:$0xf]  ;;  %v9643_v60 = vor.u32 %v12193_v54, %v9640_v55  ;;  %v8520_v54 = vld [vmem:[#allocation7 + $0x588] sm:$0xf0]  ;;  %v11993_v55 = vld [vmem:[#allocation7 + $0x7e4] sm:$0xf] }
 0x1bc   :  { %5650 = vmatpush.bf16.msra.mxu1 %v10839_v17  ;;  %v7843_v17 = vor.u32 %v11743_v12, %v7840_v62  ;;  %v8960_v12 = vld [vmem:[#allocation7 + $0x8f8] sm:$0xf0] }
 0x1bd   :  { %5663 = vmatpush.bf16.msra.mxu2 %v7963_v18  ;;  %v12213_v18 = vld [vmem:[#allocation7 + $0xec4] sm:$0xf]  ;;  %v9280_v62 = vld [vmem:[#allocation7 + $0xb78] sm:$0xf0]  ;;  %v8963_v3 = vor.u32 %v12023_v59, %v8960_v12  ;;  %v8523_v12 = vor.u32 %v11913_v53, %v8520_v54 }
 0x1be   :  { %5676 = vmatpush.bf16.msra.mxu3 %v8283_v27  ;;  %v9083_v27 = vor.u32 %v12053_v6, %v9080_v11  ;;  %v9723_v33 = vor.u32 %v12213_v18, %v9720_v22  ;;  %v12013_v11 = vld [vmem:[#allocation7 + $0x884] sm:$0xf]  ;;  %v9240_v22 = vld [vmem:[#allocation7 + $0xb28] sm:$0xf0] }
 0x1bf   :  { %5638 = vmatpush.bf16.msra.mxu0 %v10479_v42  ;;  %v9680_v42 = vld [vmem:[#allocation7 + $0xe98] sm:$0xf0]  ;;  %v12093_v18 = vld [vmem:[#allocation7 + $0xb04] sm:$0xf] }
 0x1c0   :  { %5651 = vmatpush.bf16.msra.mxu1 %v10799_v44  ;;  %v9043_v44 = vor.u32 %v12043_v32, %v9040_v35  ;;  %v9243_v31 = vor.u32 %v12093_v18, %v9240_v22  ;;  %v11923_v32 = vld [vmem:[#allocation7 + $0x5b4] sm:$0xf]  ;;  %v12153_v59 = vld [vmem:[#allocation7 + $0xce4] sm:$0xf] }
 0x1c1   :  { %5664 = vmatpush.bf16.msra.mxu2 %v7923_v45  ;;  %v9363_v45 = vor.u32 %v12123_v39, %v9360_v41  ;;  %v12003_v35 = vld [vmem:[#allocation7 + $0x834] sm:$0xf]  ;;  %v8880_v41 = vld [vmem:[#allocation7 + $0x858] sm:$0xf0]  ;;  %v12373_v18 = vld [vmem:[#allocation7 + $0x13c4] sm:$0xf] }
 0x1c2   :  { %5677 = vmatpush.bf16.msra.mxu3 %v8243_v51  ;;  %v9683_v51 = vor.u32 %v12203_v36, %v9680_v42  ;;  %v12083_v36 = vld [vmem:[#allocation7 + $0xab4] sm:$0xf]  ;;  %v9200_v42 = vld [vmem:[#allocation7 + $0xad8] sm:$0xf0]  ;;  %v8883_v0 = vor.u32 %v12003_v35, %v8880_v41  ;;  %v12273_v54 = vld [vmem:[#allocation7 + $0x10a4] sm:$0xf] }
 0x1c3   :  { %5639 = vmatpush.bf16.msra.mxu0 %v10439_v24  ;;  %v8683_v24 = vor.u32 %v11953_v47, %v8680_v48  ;;  %v9520_v47 = vld [vmem:[#allocation7 + $0xd58] sm:$0xf0]  ;;  %v9203_v52 = vor.u32 %v12083_v36, %v9200_v42  ;;  %v12283_v41 = vld [vmem:[#allocation7 + $0x10f4] sm:$0xf] }
 0x1c4   :  { %5652 = vmatpush.bf16.msra.mxu1 %v10759_v5  ;;  %v11943_v5 = vld [vmem:[#allocation7 + $0x654] sm:$0xf]  ;;  %v10000_v36 = vld [vmem:[#allocation7 + $0x1118] sm:$0xf0] }
 0x1c5   :  { %5665 = vmatpush.bf16.msra.mxu2 %v7883_v58  ;;  %v8640_v58 = vld [vmem:[#allocation7 + $0x678] sm:$0xf0]  ;;  %v12363_v42 = vld [vmem:[#allocation7 + $0x1374] sm:$0xf] }
 0x1c6   :  { %5678 = vmatpush.bf16.msra.mxu3 %v8203_v61  ;;  %v12103_v61 = vld [vmem:[#allocation7 + $0xb54] sm:$0xf]  ;;  %v8643_v2 = vor.u32 %v11943_v5, %v8640_v58  ;;  %v12073_v5 = vld [vmem:[#allocation7 + $0xa64] sm:$0xf]  ;;  %v9160_v58 = vld [vmem:[#allocation7 + $0xa88] sm:$0xf0] }
 0x1c7   :  { %5640 = vmatpush.bf16.msra.mxu0 %v10399_v10  ;;  %v5434_v21 = vpop.f32.mrf.mxu0  ;;  %v9283_v6 = vor.u32 %v12103_v61, %v9280_v62  ;;  %v8600_v10 = vld [vmem:[#allocation7 + $0x628] sm:$0xf0]  ;;  %v11903_v61 = vld [vmem:[#allocation7 + $0x514] sm:$0xf]  ;;  %v8480_v62 = vld [vmem:[#allocation7 + $0x538] sm:$0xf0] }
 0x1c8   :  { %5653 = vmatpush.bf16.msra.mxu1 %v10719_v19  ;;  %v5435_v14 = vadd.f32 %v5434_v21, %v13192_v50  ;;  %v5447_v30 = vpop.f32.mrf.mxu1  ;;  %v9603_v19 = vor.u32 %v12183_v63, %v9600_v1  ;;  %v9163_v1 = vor.u32 %v12073_v5, %v9160_v58  ;;  %v8800_v21 = vld [vmem:[#allocation7 + $0x7b8] sm:$0xf0]  ;;  %v8483_v22 = vor.u32 %v11903_v61, %v8480_v62  ;;  %v12433_v5 = vld [vmem:[#allocation7 + $0x15a4] sm:$0xf]  ;;  %v10600_v58 = vld [vmem:[#allocation7 + $0x15c8] sm:$0xf0] }
 0x1c9   :  { %5666 = vmatpush.bf16.msra.mxu2 %v7843_v17  ;;  %v8920_v17 = vld [vmem:[#allocation7 + $0x8a8] sm:$0xf0]  ;;  %v10603_v62 = vor.u32 %v12433_v5, %v10600_v58 }
 0x1ca   :  { %5679 = vmatpush.bf16.msra.mxu3 %v8163_v23  ;;  %5641 = vmatmul.bf16.vlgmr.msra.gmra.mxu0 %v13116_v16  ;;  %v12173_v23 = vld [vmem:[#allocation7 + $0xd84] sm:$0xf]  ;;  %v8923_v29 = vor.u32 %v12013_v11, %v8920_v17  ;;  %v12143_v11 = vld [vmem:[#allocation7 + $0xc94] sm:$0xf]  ;;  %v10040_v17 = vld [vmem:[#allocation7 + $0x1168] sm:$0xf0] }
 0x1cb   :  { %5685 = vmatpush.bf16.msrb.mxu0 %v8763_v26  ;;  %5654 = vmatmul.bf16.vlgmr.msra.gmra.mxu1 %v13118_v20  ;;  %v9560_v26 = vld [vmem:[#allocation7 + $0xda8] sm:$0xf0] }
 0x1cc   :  { %5698 = vmatpush.bf16.msrb.mxu1 %v9083_v27  ;;  %5667 = vmatmul.bf16.vlgmr.msra.gmra.mxu2 %v13094_v9  ;;  %v5448_v27 = vadd.f32 %v5447_v30, %v5435_v14  ;;  %v9563_v50 = vor.u32 %v12173_v23, %v9560_v26  ;;  %v9440_v14 = vld [vmem:[#allocation7 + $0xcb8] sm:$0xf0]  ;;  %v10360_v23 = vld [vmem:[#allocation7 + $0x13e8] sm:$0xf0]  ;;  %v12453_v26 = vld [vmem:[#allocation7 + $0x1644] sm:$0xf] }
 0x1cd   :  { %5711 = vmatpush.bf16.msrb.mxu2 %v9403_v28  ;;  %5680 = vmatmul.bf16.vlgmr.msra.gmra.mxu3 %v13101_v25  ;;  %v8603_v28 = vor.u32 %v11933_v7, %v8600_v10  ;;  %v9120_v10 = vld [vmem:[#allocation7 + $0xa38] sm:$0xf0] }
 0x1ce   :  { %5724 = vmatpush.bf16.msrb.mxu3 %v9723_v33  ;;  %v8560_v33 = vld [vmem:[#allocation7 + $0x5d8] sm:$0xf0] }
 0x1cf   :  { %5686 = vmatpush.bf16.msrb.mxu0 %v8723_v43  ;;  %v5460_v39 = vpop.f32.mrf.mxu2  ;;  %v8563_v48 = vor.u32 %v11923_v32, %v8560_v33  ;;  %v11000_v32 = vld [vmem:[#allocation7 + $0x18e8] sm:$0xf0]  ;;  %v9443_v33 = vor.u32 %v12143_v11, %v9440_v14  ;;  %v12503_v11 = vld [vmem:[#allocation7 + $0x17d4] sm:$0xf]  ;;  %v10880_v14 = vld [vmem:[#allocation7 + $0x17f8] sm:$0xf0] }
 0x1d0   :  { %5699 = vmatpush.bf16.msrb.mxu1 %v9043_v44  ;;  %v5461_v43 = vadd.f32 %v5460_v39, %v5448_v27  ;;  %v5473_v44 = vpop.f32.mrf.mxu3  ;;  %v10680_v27 = vld [vmem:[#allocation7 + $0x1668] sm:$0xf0]  ;;  %v10363_v39 = vor.u32 %v12373_v18, %v10360_v23  ;;  %v12253_v23 = vld [vmem:[#allocation7 + $0x1004] sm:$0xf] }
 0x1d1   :  { %5712 = vmatpush.bf16.msrb.mxu2 %v9363_v45  ;;  %v12163_v45 = vld [vmem:[#allocation7 + $0xd34] sm:$0xf] }
 0x1d2   :  { %5725 = vmatpush.bf16.msrb.mxu3 %v9683_v51  ;;  %v13199_v49 = vadd.f32 %v5473_v44, %v5461_v43  ;;  %v5436_v51 = vpop.f32.mrf.mxu0  ;;  %v10320_v44 = vld [vmem:[#allocation7 + $0x1398] sm:$0xf0] }
 0x1d3   :  { %5687 = vmatpush.bf16.msrb.mxu0 %v8683_v24  ;;  %v5449_v24 = vpop.f32.mrf.mxu1  ;;  %v10960_v51 = vld [vmem:[#allocation7 + $0x1898] sm:$0xf0] }
 0x1d4   :  { %5700 = vmatpush.bf16.msrb.mxu1 %v9003_v56  ;;  %v9523_v56 = vor.u32 %v12163_v45, %v9520_v47  ;;  %v12443_v45 = vld [vmem:[#allocation7 + $0x15f4] sm:$0xf]  ;;  %v10640_v47 = vld [vmem:[#allocation7 + $0x1618] sm:$0xf0]  ;;  %v12353_v24 = vld [vmem:[#allocation7 + $0x1324] sm:$0xf] }
 0x1d5   :  { %5713 = vmatpush.bf16.msrb.mxu2 %v9323_v57  ;;  %v8840_v57 = vld [vmem:[#allocation7 + $0x808] sm:$0xf0]  ;;  %v10643_v53 = vor.u32 %v12443_v45, %v10640_v47  ;;  %v10160_v47 = vld [vmem:[#allocation7 + $0x1258] sm:$0xf0] }
 0x1d6   :  { %5726 = vmatpush.bf16.msrb.mxu3 %v9643_v60  ;;  %v9480_v60 = vld [vmem:[#allocation7 + $0xd08] sm:$0xf0]  ;;  %v8843_v63 = vor.u32 %v11993_v55, %v8840_v57 }
 0x1d7   :  { %5688 = vmatpush.bf16.msrb.mxu0 %v8643_v2  ;;  %v11983_v2 = vld [vmem:[#allocation7 + $0x794] sm:$0xf]  ;;  %v9483_v7 = vor.u32 %v12153_v59, %v9480_v60  ;;  %v9960_v55 = vld [vmem:[#allocation7 + $0x10c8] sm:$0xf0]  ;;  %v12513_v59 = vld [vmem:[#allocation7 + $0x1824] sm:$0xf] }
 0x1d8   :  { %5701 = vmatpush.bf16.msrb.mxu1 %v8963_v3  ;;  %v12063_v3 = vld [vmem:[#allocation7 + $0xa14] sm:$0xf]  ;;  %v5475_v30 = vpop.f32.mrf.mxu3  ;;  %v10280_v57 = vld [vmem:[#allocation7 + $0x1348] sm:$0xf0] }
 0x1d9   :  { %5714 = vmatpush.bf16.msrb.mxu2 %v9283_v6  ;;  %v5462_v6 = vpop.f32.mrf.mxu2  ;;  %v10920_v60 = vld [vmem:[#allocation7 + $0x1848] sm:$0xf0]  ;;  %v10283_v61 = vor.u32 %v12353_v24, %v10280_v57 }
 0x1da   :  { %5727 = vmatpush.bf16.msrb.mxu3 %v9603_v19  ;;  %v12293_v19 = vld [vmem:[#allocation7 + $0x1144] sm:$0xf]  ;;  %v12423_v6 = vld [vmem:[#allocation7 + $0x1554] sm:$0xf] }
 0x1db   :  { %5689 = vmatpush.bf16.msrb.mxu0 %v8603_v28  ;;  %v8803_v28 = vor.u32 %v11983_v2, %v8800_v21  ;;  %v10043_v35 = vor.u32 %v12293_v19, %v10040_v17  ;;  %v12343_v2 = vld [vmem:[#allocation7 + $0x12d4] sm:$0xf]  ;;  %v10923_v21 = vor.u32 %v12513_v59, %v10920_v60  ;;  %v12233_v59 = vld [vmem:[#allocation7 + $0xf64] sm:$0xf]  ;;  %v9800_v60 = vld [vmem:[#allocation7 + $0xf88] sm:$0xf0] }
 0x1dc   :  { %5702 = vmatpush.bf16.msrb.mxu1 %v8923_v29  ;;  %v9123_v29 = vor.u32 %v12063_v3, %v9120_v10  ;;  %v10240_v3 = vld [vmem:[#allocation7 + $0x12f8] sm:$0xf0] }
 0x1dd   :  { %5715 = vmatpush.bf16.msrb.mxu2 %v9243_v31  ;;  %v12533_v31 = vld [vmem:[#allocation7 + $0x18c4] sm:$0xf]  ;;  %v10243_v18 = vor.u32 %v12343_v2, %v10240_v3  ;;  %v9803_v3 = vor.u32 %v12233_v59, %v9800_v60  ;;  %v8046_v59 = vld [vmem:[#allocation7 + $0x1a8] sm:$0xf]  ;;  %v11799_v60 = vld [vmem:[#allocation7 + $0x1cc] sm:$0xf0] }
 0x1de   :  { %5728 = vmatpush.bf16.msrb.mxu3 %v9563_v50  ;;  %v10683_v50 = vor.u32 %v12453_v26, %v10680_v27  ;;  %v11003_v43 = vor.u32 %v12533_v31, %v11000_v32  ;;  %v9880_v26 = vld [vmem:[#allocation7 + $0x1028] sm:$0xf0]  ;;  %v12333_v27 = vld [vmem:[#allocation7 + $0x1284] sm:$0xf] }
 0x1df   :  { %5690 = vmatpush.bf16.msrb.mxu0 %v8563_v48  ;;  %v12523_v48 = vld [vmem:[#allocation7 + $0x1874] sm:$0xf]  ;;  %v10200_v31 = vld [vmem:[#allocation7 + $0x12a8] sm:$0xf0]  ;;  %v12413_v32 = vld [vmem:[#allocation7 + $0x1504] sm:$0xf] }
 0x1e0   :  { %5703 = vmatpush.bf16.msrb.mxu1 %v8883_v0  ;;  %v10003_v0 = vor.u32 %v12283_v41, %v10000_v36  ;;  %v12243_v36 = vld [vmem:[#allocation7 + $0xfb4] sm:$0xf]  ;;  %v12473_v2 = vld [vmem:[#allocation7 + $0x16e4] sm:$0xf] }
 0x1e1   :  { %5716 = vmatpush.bf16.msrb.mxu2 %v9203_v52  ;;  %v10323_v52 = vor.u32 %v12363_v42, %v10320_v44  ;;  %v9840_v42 = vld [vmem:[#allocation7 + $0xfd8] sm:$0xf0] }
 0x1e2   :  { %5729 = vmatpush.bf16.msrb.mxu3 %v9523_v56  ;;  %v10963_v56 = vor.u32 %v12523_v48, %v10960_v51  ;;  %v12403_v48 = vld [vmem:[#allocation7 + $0x14b4] sm:$0xf]  ;;  %v10480_v51 = vld [vmem:[#allocation7 + $0x14d8] sm:$0xf0]  ;;  %v9843_v24 = vor.u32 %v12243_v36, %v9840_v42  ;;  %v12059_v36 = vld [vmem:[#allocation7 + $0x9ec] sm:$0xf0] }
 0x1e3   :  { %5691 = vmatpush.bf16.msrb.mxu0 %v8523_v12  ;;  %v9963_v12 = vor.u32 %v12273_v54, %v9960_v55  ;;  %v10800_v54 = vld [vmem:[#allocation7 + $0x1758] sm:$0xf0]  ;;  %v10483_v58 = vor.u32 %v12403_v48, %v10480_v51  ;;  %v11809_v48 = vld [vmem:[#allocation7 + $0x21c] sm:$0xf0]  ;;  %v8406_v51 = vld [vmem:[#allocation7 + $0x478] sm:$0xf] }
 0x1e4   :  { %5704 = vmatpush.bf16.msrb.mxu1 %v8843_v63  ;;  %v12263_v63 = vld [vmem:[#allocation7 + $0x1054] sm:$0xf] }
 0x1e5   :  { %5717 = vmatpush.bf16.msrb.mxu2 %v9163_v1  ;;  %v9920_v1 = vld [vmem:[#allocation7 + $0x1078] sm:$0xf0] }
 0x1e6   :  { %5730 = vmatpush.bf16.msrb.mxu3 %v9483_v7  ;;  %v10560_v7 = vld [vmem:[#allocation7 + $0x1578] sm:$0xf0]  ;;  %v9923_v19 = vor.u32 %v12263_v63, %v9920_v1  ;;  %v12393_v63 = vld [vmem:[#allocation7 + $0x1464] sm:$0xf]  ;;  %v10440_v1 = vld [vmem:[#allocation7 + $0x1488] sm:$0xf0] }
 0x1e7   :  { %5692 = vmatpush.bf16.msrb.mxu0 %v8483_v22  ;;  %v5486_v10 = vpop.f32.mrf.mxu0  ;;  %v10563_v22 = vor.u32 %v12423_v6, %v10560_v7  ;;  %v12223_v6 = vld [vmem:[#allocation7 + $0xf14] sm:$0xf]  ;;  %v9760_v7 = vld [vmem:[#allocation7 + $0xf38] sm:$0xf0] }
 0x1e8   :  { %5705 = vmatpush.bf16.msrb.mxu1 %v8803_v28  ;;  %v5487_v30 = vadd.f32 %v5486_v10, %v13199_v49  ;;  %v5499_v17 = vpop.f32.mrf.mxu1  ;;  %v10883_v28 = vor.u32 %v12503_v11, %v10880_v14  ;;  %v10203_v49 = vor.u32 %v12333_v27, %v10200_v31  ;;  %v10443_v11 = vor.u32 %v12393_v63, %v10440_v1  ;;  %v12303_v14 = vld [vmem:[#allocation7 + $0x1194] sm:$0xf]  ;;  %v8126_v27 = vld [vmem:[#allocation7 + $0x248] sm:$0xf]  ;;  %v11959_v1 = vld [vmem:[#allocation7 + $0x6cc] sm:$0xf0] }
 0x1e9   :  { %5718 = vmatpush.bf16.msrb.mxu2 %v9123_v29  ;;  %v8686_v63 = vld [vmem:[#allocation7 + $0x6a8] sm:$0xf] }
 0x1ea   :  { %5731 = vmatpush.bf16.msrb.mxu3 %v9443_v33  ;;  %5693 = vmatmul.bf16.vlgmr.msrb.gmra.mxu0 %v13092_v8  ;;  %v5500_v29 = vadd.f32 %v5499_v17, %v5487_v30  ;;  %v10520_v33 = vld [vmem:[#allocation7 + $0x1528] sm:$0xf0]  ;;  %v10080_v30 = vld [vmem:[#allocation7 + $0x11b8] sm:$0xf0] }
 0x1eb   :  { %5737 = vmatpush.bf16.msra.mxu0 %v10043_v35  ;;  %5706 = vmatmul.bf16.vlgmr.msrb.gmra.mxu1 %v13096_v15  ;;  %v12493_v35 = vld [vmem:[#allocation7 + $0x1784] sm:$0xf]  ;;  %v10523_v41 = vor.u32 %v12413_v32, %v10520_v33  ;;  %v9763_v32 = vor.u32 %v12223_v6, %v9760_v7  ;;  %v11899_v33 = vld [vmem:[#allocation7 + $0x4ec] sm:$0xf0]  ;;  %v8006_v6 = vld [vmem:[#allocation7 + $0x158] sm:$0xf] }
 0x1ec   :  { %5750 = vmatpush.bf16.msra.mxu1 %v10363_v39  ;;  %5719 = vmatmul.bf16.vlgmr.msrb.gmra.mxu2 %v13106_v37  ;;  %v10840_v39 = vld [vmem:[#allocation7 + $0x17a8] sm:$0xf0] }
 0x1ed   :  { %5763 = vmatpush.bf16.msra.mxu2 %v10683_v50  ;;  %5732 = vmatmul.bf16.vlgmr.msrb.gmra.mxu3 %v13110_v40  ;;  %v9883_v50 = vor.u32 %v12253_v23, %v9880_v26  ;;  %v10843_v44 = vor.u32 %v12493_v35, %v10840_v39  ;;  %v10720_v23 = vld [vmem:[#allocation7 + $0x16b8] sm:$0xf0]  ;;  %v8766_v35 = vld [vmem:[#allocation7 + $0x748] sm:$0xf]  ;;  %v11979_v39 = vld [vmem:[#allocation7 + $0x76c] sm:$0xf0] }
 0x1ee   :  { %5776 = vmatpush.bf16.msra.mxu3 %v11003_v43  ;;  %v12323_v43 = vld [vmem:[#allocation7 + $0x1234] sm:$0xf] }
 0x1ef   :  { %5738 = vmatpush.bf16.msra.mxu0 %v10003_v0  ;;  %v5512_v45 = vpop.f32.mrf.mxu2  ;;  %v5488_v55 = vpop.f32.mrf.mxu0  ;;  %v10163_v5 = vor.u32 %v12323_v43, %v10160_v47  ;;  %v8086_v47 = vld [vmem:[#allocation7 + $0x1f8] sm:$0xf] }
 0x1f0   :  { %5751 = vmatpush.bf16.msra.mxu1 %v10323_v52  ;;  %v5513_v0 = vadd.f32 %v5512_v45, %v5500_v29  ;;  %v5525_v52 = vpop.f32.mrf.mxu3  ;;  %v8446_v29 = vld [vmem:[#allocation7 + $0x4c8] sm:$0xf]  ;;  %v8767_v45 = vor.u32 %v11979_v39, %v8766_v35  ;;  %v9046_v55 = vld [vmem:[#allocation7 + $0x978] sm:$0xf]  ;;  %v11779_v35 = vld [vmem:[#allocation7 + $0x12c] sm:$0xf0] }
 0x1f1   :  { %5764 = vmatpush.bf16.msra.mxu2 %v10643_v53  ;;  %v12483_v53 = vld [vmem:[#allocation7 + $0x1734] sm:$0xf]  ;;  %v8286_v39 = vld [vmem:[#allocation7 + $0x388] sm:$0xf] }
 0x1f2   :  { %5777 = vmatpush.bf16.msra.mxu3 %v10963_v56  ;;  %v5501_v56 = vpop.f32.mrf.mxu1  ;;  %v13206_v57 = vadd.f32 %v5525_v52, %v5513_v0  ;;  %v11889_v52 = vld [vmem:[#allocation7 + $0x49c] sm:$0xf0] }
 0x1f3   :  { %5739 = vmatpush.bf16.msra.mxu0 %v9963_v12  ;;  %v12313_v12 = vld [vmem:[#allocation7 + $0x11e4] sm:$0xf]  ;;  %v8087_v56 = vor.u32 %v11809_v48, %v8086_v47 }
 0x1f4   :  { %5752 = vmatpush.bf16.msra.mxu1 %v10283_v61  ;;  %v10803_v61 = vor.u32 %v12483_v53, %v10800_v54  ;;  %v8726_v53 = vld [vmem:[#allocation7 + $0x6f8] sm:$0xf]  ;;  %v11969_v54 = vld [vmem:[#allocation7 + $0x71c] sm:$0xf0]  ;;  %vm6312_vm3 = vcmp.gt.f32.partialorder %v13206_v57, 0.0 }
 0x1f5   :  { %5765 = vmatpush.bf16.msra.mxu2 %v10603_v62  ;;  %v10120_v62 = vld [vmem:[#allocation7 + $0x1208] sm:$0xf0] }
 0x1f6   :  { %5778 = vmatpush.bf16.msra.mxu3 %v10923_v21  ;;  %v10760_v21 = vld [vmem:[#allocation7 + $0x1708] sm:$0xf0]  ;;  %v10123_v10 = vor.u32 %v12313_v12, %v10120_v62  ;;  %v8366_v12 = vld [vmem:[#allocation7 + $0x428] sm:$0xf]  ;;  %v11879_v62 = vld [vmem:[#allocation7 + $0x44c] sm:$0xf0] }
 0x1f7   :  { %5740 = vmatpush.bf16.msra.mxu0 %v9923_v19  ;;  %v12383_v19 = vld [vmem:[#allocation7 + $0x1414] sm:$0xf]  ;;  %v10763_v17 = vor.u32 %v12473_v2, %v10760_v21  ;;  %v5514_v26 = vpop.f32.mrf.mxu2  ;;  %v9006_v2 = vld [vmem:[#allocation7 + $0x928] sm:$0xf]  ;;  %v12039_v21 = vld [vmem:[#allocation7 + $0x94c] sm:$0xf0]  ;;  %v8367_v7 = vor.u32 %v11879_v62, %v8366_v12 }
 0x1f8   :  { %5753 = vmatpush.bf16.msra.mxu1 %v10243_v18  ;;  %v10400_v18 = vld [vmem:[#allocation7 + $0x1438] sm:$0xf0]  ;;  %v5527_v31 = vpop.f32.mrf.mxu3  ;;  %v8966_v26 = vld [vmem:[#allocation7 + $0x8d8] sm:$0xf] }
 0x1f9   :  { %5766 = vmatpush.bf16.msra.mxu2 %v10563_v22  ;;  %v12463_v22 = vld [vmem:[#allocation7 + $0x1694] sm:$0xf]  ;;  %v8886_v12 = vld [vmem:[#allocation7 + $0x838] sm:$0xf] }
 0x1fa   :  { %5779 = vmatpush.bf16.msra.mxu3 %v10883_v28  ;;  %v11819_v28 = vld [vmem:[#allocation7 + $0x26c] sm:$0xf0]  ;;  %v10723_v42 = vor.u32 %v12463_v22, %v10720_v23  ;;  %v8646_v22 = vld [vmem:[#allocation7 + $0x658] sm:$0xf]  ;;  %v11949_v23 = vld [vmem:[#allocation7 + $0x67c] sm:$0xf0] }
 0x1fb   :  { %5741 = vmatpush.bf16.msra.mxu0 %v9883_v50  ;;  %v10083_v50 = vor.u32 %v12303_v14, %v10080_v30  ;;  %v8127_v43 = vor.u32 %v11819_v28, %v8126_v27  ;;  %v8326_v14 = vld [vmem:[#allocation7 + $0x3d8] sm:$0xf]  ;;  %v13212_v30 = vld [vmem:[#allocation8] sm:$0xff] }
 0x1fc   :  { %5754 = vmatpush.bf16.msra.mxu1 %v10203_v49  ;;  %v10403_v49 = vor.u32 %v12383_v19, %v10400_v18  ;;  %v993_v19 = vperm.slane %v13212_v30, 4  ;;  %v11869_v18 = vld [vmem:[#allocation7 + $0x3fc] sm:$0xf0] }
 0x1fd   :  { %5767 = vmatpush.bf16.msra.mxu2 %v10523_v41  ;;  %v9086_v41 = vld [vmem:[#allocation7 + $0x9c8] sm:$0xf]  ;;  %v12029_v27 = vld [vmem:[#allocation7 + $0x8fc] sm:$0xf0]  ;;  %v8327_v31 = vor.u32 %v11869_v18, %v8326_v14  ;;  %v11839_v14 = vld [vmem:[#allocation7 + $0x30c] sm:$0xf0] }
 0x1fe   :  { %5780 = vmatpush.bf16.msra.mxu3 %v10843_v44  ;;  %v8447_v44 = vor.u32 %v11899_v33, %v8446_v29  ;;  %v9087_v0 = vor.u32 %v12059_v36, %v9086_v41  ;;  %v7966_v33 = vld [vmem:[#allocation7 + $0x108] sm:$0xf]  ;;  %v8967_v41 = vor.u32 %v12029_v27, %v8966_v26  ;;  %v11859_v36 = vld [vmem:[#allocation7 + $0x3ac] sm:$0xf0]  ;;  %v7846_v26 = vld [vmem:[#allocation7 + $0x18] sm:$0xf] }
 0x1ff   :  { %5742 = vmatpush.bf16.msra.mxu0 %v9843_v24  ;;  %v12049_v24 = vld [vmem:[#allocation7 + $0x99c] sm:$0xf0]  ;;  %v7967_v48 = vor.u32 %v11779_v35, %v7966_v33  ;;  %v8846_v18 = vld [vmem:[#allocation7 + $0x7e8] sm:$0xf]  ;;  %v8486_v33 = vld [vmem:[#allocation7 + $0x518] sm:$0xf] }
 0x200   :  { %5755 = vmatpush.bf16.msra.mxu1 %v10163_v5  ;;  %v8407_v5 = vor.u32 %v11889_v52, %v8406_v51  ;;  %v8287_v51 = vor.u32 %v11859_v36, %v8286_v39  ;;  %v7926_v52 = vld [vmem:[#allocation7 + $0xb8] sm:$0xf]  ;;  %v11749_v27 = vld [vmem:[#allocation7 + $0x3c] sm:$0xf0] }
 0x201   :  { %5768 = vmatpush.bf16.msra.mxu2 %v10483_v58  ;;  %v8727_v58 = vor.u32 %v11969_v54, %v8726_v53  ;;  %v11769_v53 = vld [vmem:[#allocation7 + $0xdc] sm:$0xf0]  ;;  %v8246_v54 = vld [vmem:[#allocation7 + $0x338] sm:$0xf] }
 0x202   :  { %5781 = vmatpush.bf16.msra.mxu3 %v10803_v61  ;;  %v9047_v61 = vor.u32 %v12049_v24, %v9046_v55  ;;  %v7927_v62 = vor.u32 %v11769_v53, %v7926_v52  ;;  %v10366_v53 = vld [vmem:[#allocation7 + $0x13c8] sm:$0xf] }
 0x203   :  { %5743 = vmatpush.bf16.msra.mxu0 %v9803_v3  ;;  %v8047_v3 = vor.u32 %v11799_v60, %v8046_v59 }
 0x204   :  { %5756 = vmatpush.bf16.msra.mxu1 %v10123_v10  ;;  %v8687_v10 = vor.u32 %v11959_v1, %v8686_v63 }
 0x205   :  { %5769 = vmatpush.bf16.msra.mxu2 %v10443_v11  ;;  %v11789_v11 = vld [vmem:[#allocation7 + $0x17c] sm:$0xf0] }
 0x206   :  { %5782 = vmatpush.bf16.msra.mxu3 %v10763_v17  ;;  %v9007_v17 = vor.u32 %v12039_v21, %v9006_v2  ;;  %v8007_v28 = vor.u32 %v11789_v11, %v8006_v6  ;;  %v11759_v6 = vld [vmem:[#allocation7 + $0x8c] sm:$0xf0] }
 0x207   :  { %5744 = vmatpush.bf16.msra.mxu0 %v9763_v32  ;;  %v5538_v29 = vpop.f32.mrf.mxu0  ;;  %v8647_v32 = vor.u32 %v11949_v23, %v8646_v22  ;;  %v11999_v22 = vld [vmem:[#allocation7 + $0x80c] sm:$0xf0] }
 0x208   :  { %5757 = vmatpush.bf16.msra.mxu1 %v10083_v50  ;;  %v5539_v50 = vadd.f32 %v5538_v29, %v993_v19  ;;  %v8526_v19 = vld [vmem:[#allocation7 + $0x568] sm:$0xf]  ;;  %v8847_v39 = vor.u32 %v11999_v22, %v8846_v18  ;;  %v12279_v22 = vld [vmem:[#allocation7 + $0x10cc] sm:$0xf0] }
 0x209   :  { %5770 = vmatpush.bf16.msra.mxu2 %v10403_v49  ;;  %v5551_v49 = vpop.f32.mrf.mxu1  ;;  %v9966_v18 = vld [vmem:[#allocation7 + $0x10a8] sm:$0xf] }
 0x20a   :  { %5783 = vmatpush.bf16.msra.mxu3 %v10723_v42  ;;  %5745 = vmatmul.bf16.vlgmr.msra.gmra.mxu0 %v13104_v34  ;;  %v8606_v42 = vld [vmem:[#allocation7 + $0x608] sm:$0xf]  ;;  %v5552_v47 = vadd.f32 %v5551_v49, %v5539_v50  ;;  %v11909_v50 = vld [vmem:[#allocation7 + $0x53c] sm:$0xf0]  ;;  %v8806_v49 = vld [vmem:[#allocation7 + $0x798] sm:$0xf] }
 0x20b   :  { %5789 = vmatpush.bf16.msrb.mxu0 %v8127_v43  ;;  %5758 = vmatmul.bf16.vlgmr.msra.gmra.mxu1 %v13108_v38  ;;  %v11939_v43 = vld [vmem:[#allocation7 + $0x62c] sm:$0xf0]  ;;  %v8487_v52 = vor.u32 %v11909_v50, %v8486_v33  ;;  %v9606_v33 = vld [vmem:[#allocation7 + $0xdd8] sm:$0xf] }
 0x20c   :  { %5802 = vmatpush.bf16.msrb.mxu1 %v8447_v44  ;;  %5771 = vmatmul.bf16.vlgmr.msra.gmra.mxu2 %v13116_v16  ;;  %v8926_v44 = vld [vmem:[#allocation7 + $0x888] sm:$0xf]  ;;  %v9926_v50 = vld [vmem:[#allocation7 + $0x1058] sm:$0xf] }
 0x20d   :  { %5815 = vmatpush.bf16.msrb.mxu2 %v8767_v45  ;;  %5784 = vmatmul.bf16.vlgmr.msra.gmra.mxu3 %v13118_v20  ;;  %v12019_v45 = vld [vmem:[#allocation7 + $0x8ac] sm:$0xf0] }
 0x20e   :  { %5828 = vmatpush.bf16.msrb.mxu3 %v9087_v0  ;;  %v8607_v0 = vor.u32 %v11939_v43, %v8606_v42  ;;  %v8927_v24 = vor.u32 %v12019_v45, %v8926_v44  ;;  %v9406_v42 = vld [vmem:[#allocation7 + $0xc48] sm:$0xf]  ;;  %v12139_v43 = vld [vmem:[#allocation7 + $0xc6c] sm:$0xf0]  ;;  %v7847_v45 = vor.u32 %v11749_v27, %v7846_v26 }
 0x20f   :  { %5790 = vmatpush.bf16.msrb.mxu0 %v8087_v56  ;;  %v5564_v55 = vpop.f32.mrf.mxu2  ;;  %v11849_v56 = vld [vmem:[#allocation7 + $0x35c] sm:$0xf0]  ;;  %v5540_v1 = vpop.f32.mrf.mxu0  ;;  %v9726_v44 = vld [vmem:[#allocation7 + $0xec8] sm:$0xf]  ;;  %v12359_v26 = vld [vmem:[#allocation7 + $0x134c] sm:$0xf0] }
 0x210   :  { %5803 = vmatpush.bf16.msrb.mxu1 %v8407_v5  ;;  %v8566_v5 = vld [vmem:[#allocation7 + $0x5b8] sm:$0xf]  ;;  %v5565_v59 = vadd.f32 %v5564_v55, %v5552_v47  ;;  %v5577_v60 = vpop.f32.mrf.mxu3  ;;  %v8247_v2 = vor.u32 %v11849_v56, %v8246_v54  ;;  %v12219_v47 = vld [vmem:[#allocation7 + $0xeec] sm:$0xf0]  ;;  %v12289_v1 = vld [vmem:[#allocation7 + $0x111c] sm:$0xf0] }
 0x211   :  { %5816 = vmatpush.bf16.msrb.mxu2 %v8727_v58  ;;  %v11929_v58 = vld [vmem:[#allocation7 + $0x5dc] sm:$0xf0]  ;;  %v12379_v54 = vld [vmem:[#allocation7 + $0x13ec] sm:$0xf0]  ;;  %v9727_v56 = vor.u32 %v12219_v47, %v9726_v44  ;;  %v9246_v47 = vld [vmem:[#allocation7 + $0xb08] sm:$0xf] }
 0x212   :  { %5829 = vmatpush.bf16.msrb.mxu3 %v9047_v61  ;;  %v12009_v61 = vld [vmem:[#allocation7 + $0x85c] sm:$0xf0]  ;;  %v13215_v63 = vadd.f32 %v5577_v60, %v5565_v59  ;;  %v8567_v21 = vor.u32 %v11929_v58, %v8566_v5  ;;  %v9366_v58 = vld [vmem:[#allocation7 + $0xbf8] sm:$0xf] }
 0x213   :  { %5791 = vmatpush.bf16.msrb.mxu0 %v8047_v3  ;;  %v7886_v3 = vld [vmem:[#allocation7 + $0x68] sm:$0xf]  ;;  %v8887_v11 = vor.u32 %v12009_v61, %v8886_v12  ;;  %v12129_v59 = vld [vmem:[#allocation7 + $0xc1c] sm:$0xf0]  ;;  %v9686_v60 = vld [vmem:[#allocation7 + $0xe78] sm:$0xf]  ;;  %v10367_v12 = vor.u32 %v12379_v54, %v10366_v53 }
 0x214   :  { %5804 = vmatpush.bf16.msrb.mxu1 %v8367_v7  ;;  %v8206_v7 = vld [vmem:[#allocation7 + $0x2e8] sm:$0xf]  ;;  %v7887_v23 = vor.u32 %v11759_v6, %v7886_v3  ;;  %v12209_v61 = vld [vmem:[#allocation7 + $0xe9c] sm:$0xf0]  ;;  %v9367_v3 = vor.u32 %v12129_v59, %v9366_v58  ;;  %v12179_v54 = vld [vmem:[#allocation7 + $0xdac] sm:$0xf0] }
 0x215   :  { %5817 = vmatpush.bf16.msrb.mxu2 %v8687_v10  ;;  %v5553_v10 = vpop.f32.mrf.mxu1  ;;  %v9687_v6 = vor.u32 %v12209_v61, %v9686_v60  ;;  %v9206_v61 = vld [vmem:[#allocation7 + $0xab8] sm:$0xf] }
 0x216   :  { %5830 = vmatpush.bf16.msrb.mxu3 %v9007_v17  ;;  %v11919_v17 = vld [vmem:[#allocation7 + $0x58c] sm:$0xf0]  ;;  %v9326_v10 = vld [vmem:[#allocation7 + $0xba8] sm:$0xf] }
 0x217   :  { %5792 = vmatpush.bf16.msrb.mxu0 %v8007_v28  ;;  %v8207_v28 = vor.u32 %v11839_v14, %v8206_v7  ;;  %v8527_v29 = vor.u32 %v11919_v17, %v8526_v19  ;;  %v5566_v35 = vpop.f32.mrf.mxu2  ;;  %v9646_v14 = vld [vmem:[#allocation7 + $0xe28] sm:$0xf]  ;;  %v12199_v17 = vld [vmem:[#allocation7 + $0xe4c] sm:$0xf0] }
 0x218   :  { %5805 = vmatpush.bf16.msrb.mxu1 %v8327_v31  ;;  %v8166_v31 = vld [vmem:[#allocation7 + $0x298] sm:$0xf]  ;;  %v5579_v36 = vpop.f32.mrf.mxu3 }
 0x219   :  { %5818 = vmatpush.bf16.msrb.mxu2 %v8647_v32  ;;  %v11829_v32 = vld [vmem:[#allocation7 + $0x2bc] sm:$0xf0] }
 0x21a   :  { %5831 = vmatpush.bf16.msrb.mxu3 %v8967_v41  ;;  %v11989_v41 = vld [vmem:[#allocation7 + $0x7bc] sm:$0xf0] }
 0x21b   :  { %5793 = vmatpush.bf16.msrb.mxu0 %v7967_v48  ;;  %v10046_v48 = vld [vmem:[#allocation7 + $0x1148] sm:$0xf]  ;;  %v8807_v55 = vor.u32 %v11989_v41, %v8806_v49  ;;  %v12269_v49 = vld [vmem:[#allocation7 + $0x107c] sm:$0xf0]  ;;  %v10246_v41 = vld [vmem:[#allocation7 + $0x12d8] sm:$0xf] }
 0x21c   :  { %5806 = vmatpush.bf16.msrb.mxu1 %v8287_v51  ;;  %v12299_v51 = vld [vmem:[#allocation7 + $0x116c] sm:$0xf0]  ;;  %v12349_v36 = vld [vmem:[#allocation7 + $0x12fc] sm:$0xf0] }
 0x21d   :  { %5819 = vmatpush.bf16.msrb.mxu2 %v8607_v0  ;;  %v8167_v0 = vor.u32 %v11829_v32, %v8166_v31  ;;  %v10047_v5 = vor.u32 %v12299_v51, %v10046_v48  ;;  %v9286_v31 = vld [vmem:[#allocation7 + $0xb58] sm:$0xf]  ;;  %v12109_v32 = vld [vmem:[#allocation7 + $0xb7c] sm:$0xf0]  ;;  %v12099_v48 = vld [vmem:[#allocation7 + $0xb2c] sm:$0xf0]  ;;  %v10247_v53 = vor.u32 %v12349_v36, %v10246_v41 }
 0x21e   :  { %5832 = vmatpush.bf16.msrb.mxu3 %v8927_v24  ;;  %v9407_v24 = vor.u32 %v12139_v43, %v9406_v42  ;;  %v9287_v42 = vor.u32 %v12109_v32, %v9286_v31  ;;  %v9566_v51 = vld [vmem:[#allocation7 + $0xd88] sm:$0xf]  ;;  %v9247_v59 = vor.u32 %v12099_v48, %v9246_v47  ;;  %v12159_v32 = vld [vmem:[#allocation7 + $0xd0c] sm:$0xf0]  ;;  %v9126_v41 = vld [vmem:[#allocation7 + $0xa18] sm:$0xf] }
 0x21f   :  { %5794 = vmatpush.bf16.msrb.mxu0 %v7927_v62  ;;  %v10006_v62 = vld [vmem:[#allocation7 + $0x10f8] sm:$0xf]  ;;  %v9567_v60 = vor.u32 %v12179_v54, %v9566_v51  ;;  %v12069_v36 = vld [vmem:[#allocation7 + $0xa3c] sm:$0xf0] }
 0x220   :  { %5807 = vmatpush.bf16.msrb.mxu1 %v8247_v2  ;;  %v10326_v2 = vld [vmem:[#allocation7 + $0x1378] sm:$0xf]  ;;  %v10007_v7 = vor.u32 %v12289_v1, %v10006_v62  ;;  %v12089_v62 = vld [vmem:[#allocation7 + $0xadc] sm:$0xf0] }
 0x221   :  { %5820 = vmatpush.bf16.msrb.mxu2 %v8567_v21  ;;  %v12369_v21 = vld [vmem:[#allocation7 + $0x139c] sm:$0xf0]  ;;  %v9526_v1 = vld [vmem:[#allocation7 + $0xd38] sm:$0xf] }
 0x222   :  { %5833 = vmatpush.bf16.msrb.mxu3 %v8887_v11  ;;  %v12119_v11 = vld [vmem:[#allocation7 + $0xbcc] sm:$0xf0]  ;;  %v10327_v19 = vor.u32 %v12369_v21, %v10326_v2  ;;  %v12169_v21 = vld [vmem:[#allocation7 + $0xd5c] sm:$0xf0]  ;;  %v9766_v47 = vld [vmem:[#allocation7 + $0xf18] sm:$0xf] }
 0x223   :  { %5795 = vmatpush.bf16.msrb.mxu0 %v7887_v23  ;;  %v10286_v23 = vld [vmem:[#allocation7 + $0x1328] sm:$0xf]  ;;  %v9327_v27 = vor.u32 %v12119_v11, %v9326_v10  ;;  %v10166_v11 = vld [vmem:[#allocation7 + $0x1238] sm:$0xf] }
 0x224   :  { %5808 = vmatpush.bf16.msrb.mxu1 %v8207_v28  ;;  %v9647_v28 = vor.u32 %v12199_v17, %v9646_v14  ;;  %v10287_v35 = vor.u32 %v12359_v26, %v10286_v23  ;;  %v12329_v14 = vld [vmem:[#allocation7 + $0x125c] sm:$0xf0]  ;;  %v9166_v26 = vld [vmem:[#allocation7 + $0xa68] sm:$0xf] }
 0x225   :  { %5821 = vmatpush.bf16.msrb.mxu2 %v8527_v29  ;;  %v9967_v29 = vor.u32 %v12279_v22, %v9966_v18  ;;  %v9527_v22 = vor.u32 %v12169_v21, %v9526_v1  ;;  %v10167_v31 = vor.u32 %v12329_v14, %v10166_v11  ;;  %v8448_v1 = vld [vmem:[#allocation7 + $0x4f0] sm:$0xf0]  ;;  %v12529_v14 = vld [vmem:[#allocation7 + $0x189c] sm:$0xf0] }
 0x226   :  { %5834 = vmatpush.bf16.msrb.mxu3 %v8847_v39  ;;  %v12189_v39 = vld [vmem:[#allocation7 + $0xdfc] sm:$0xf0] }
 0x227   :  { %5796 = vmatpush.bf16.msrb.mxu0 %v7847_v45  ;;  %v5590_v43 = vpop.f32.mrf.mxu0  ;;  %v9607_v44 = vor.u32 %v12189_v39, %v9606_v33  ;;  %v9927_v45 = vor.u32 %v12269_v49, %v9926_v50  ;;  %v9806_v33 = vld [vmem:[#allocation7 + $0xf68] sm:$0xf]  ;;  %v12319_v50 = vld [vmem:[#allocation7 + $0x120c] sm:$0xf0] }
 0x228   :  { %5809 = vmatpush.bf16.msrb.mxu1 %v8167_v0  ;;  %v5591_v0 = vadd.f32 %v5590_v43, %v13215_v63  ;;  %v10126_v39 = vld [vmem:[#allocation7 + $0x11e8] sm:$0xf] }
 0x229   :  { %5822 = vmatpush.bf16.msrb.mxu2 %v8487_v52  ;;  %v5603_v52 = vpop.f32.mrf.mxu1  ;;  %v10127_v51 = vor.u32 %v12319_v50, %v10126_v39  ;;  %v11794_v39 = vld [vmem:[#allocation7 + $0x1ac] sm:$0xf]  ;;  %v8048_v50 = vld [vmem:[#allocation7 + $0x1d0] sm:$0xf0] }
 0x22a   :  { %5835 = vmatpush.bf16.msrb.mxu3 %v8807_v55  ;;  %5797 = vmatmul.bf16.vlgmr.msrb.gmra.mxu0 %v13094_v9  ;;  %v9886_v55 = vld [vmem:[#allocation7 + $0x1008] sm:$0xf]  ;;  %v5604_v58 = vadd.f32 %v5603_v52, %v5591_v0  ;;  %v12229_v0 = vld [vmem:[#allocation7 + $0xf3c] sm:$0xf0]  ;;  %v10086_v52 = vld [vmem:[#allocation7 + $0x1198] sm:$0xf] }
 0x22b   :  { %5841 = vmatpush.bf16.msra.mxu0 %v9407_v24  ;;  %5810 = vmatmul.bf16.vlgmr.msrb.gmra.mxu1 %v13101_v25  ;;  %v12259_v24 = vld [vmem:[#allocation7 + $0x102c] sm:$0xf0] }
 0x22c   :  { %5854 = vmatpush.bf16.msra.mxu1 %v9727_v56  ;;  %5823 = vmatmul.bf16.vlgmr.msrb.gmra.mxu2 %v13092_v8  ;;  %v10206_v56 = vld [vmem:[#allocation7 + $0x1288] sm:$0xf] }
 0x22d   :  { %5867 = vmatpush.bf16.msra.mxu2 %v10047_v5  ;;  %5836 = vmatmul.bf16.vlgmr.msrb.gmra.mxu3 %v13096_v15  ;;  %v12339_v5 = vld [vmem:[#allocation7 + $0x12ac] sm:$0xf0] }
 0x22e   :  { %5880 = vmatpush.bf16.msra.mxu3 %v10367_v12  ;;  %v9887_v12 = vor.u32 %v12259_v24, %v9886_v55  ;;  %v10207_v63 = vor.u32 %v12339_v5, %v10206_v56  ;;  %v10686_v55 = vld [vmem:[#allocation7 + $0x1648] sm:$0xf]  ;;  %v12459_v24 = vld [vmem:[#allocation7 + $0x166c] sm:$0xf0]  ;;  %v9127_v5 = vor.u32 %v12069_v36, %v9126_v41  ;;  %v8368_v41 = vld [vmem:[#allocation7 + $0x450] sm:$0xf0] }
 0x22f   :  { %5842 = vmatpush.bf16.msra.mxu0 %v9367_v3  ;;  %v5616_v2 = vpop.f32.mrf.mxu2  ;;  %v9846_v3 = vld [vmem:[#allocation7 + $0xfb8] sm:$0xf]  ;;  %v5592_v18 = vpop.f32.mrf.mxu0  ;;  %v11006_v56 = vld [vmem:[#allocation7 + $0x18c8] sm:$0xf] }
 0x230   :  { %5855 = vmatpush.bf16.msra.mxu1 %v9687_v6  ;;  %v12249_v6 = vld [vmem:[#allocation7 + $0xfdc] sm:$0xf0]  ;;  %v5629_v10 = vpop.f32.mrf.mxu3  ;;  %v8088_v18 = vld [vmem:[#allocation7 + $0x220] sm:$0xf0] }
 0x231   :  { %5868 = vmatpush.bf16.msra.mxu2 %v10007_v7  ;;  %v5617_v7 = vadd.f32 %v5616_v2, %v5604_v58  ;;  %v9847_v23 = vor.u32 %v12249_v6, %v9846_v3  ;;  %v12539_v58 = vld [vmem:[#allocation7 + $0x18ec] sm:$0xf0]  ;;  %v10646_v6 = vld [vmem:[#allocation7 + $0x15f8] sm:$0xf] }
 0x232   :  { %5881 = vmatpush.bf16.msra.mxu3 %v10327_v19  ;;  %v9207_v19 = vor.u32 %v12089_v62, %v9206_v61  ;;  %v9767_v61 = vor.u32 %v12229_v0, %v9766_v47  ;;  %v11894_v62 = vld [vmem:[#allocation7 + $0x4cc] sm:$0xf]  ;;  %v11007_v21 = vor.u32 %v12539_v58, %v11006_v56  ;;  %v10886_v47 = vld [vmem:[#allocation7 + $0x17d8] sm:$0xf]  ;;  %v11784_v0 = vld [vmem:[#allocation7 + $0x15c] sm:$0xf] }
 0x233   :  { %5843 = vmatpush.bf16.msra.mxu0 %v9327_v27  ;;  %v13222_v17 = vadd.f32 %v5629_v10, %v5617_v7  ;;  %v12079_v27 = vld [vmem:[#allocation7 + $0xa8c] sm:$0xf0]  ;;  %v12449_v7 = vld [vmem:[#allocation7 + $0x161c] sm:$0xf0]  ;;  %v10966_v10 = vld [vmem:[#allocation7 + $0x1878] sm:$0xf]  ;;  %v8451_v11 = vor.u32 %v11894_v62, %v8448_v1 }
 0x234   :  { %5856 = vmatpush.bf16.msra.mxu1 %v9647_v28  ;;  %v9486_v28 = vld [vmem:[#allocation7 + $0xce8] sm:$0xf]  ;;  %v9167_v49 = vor.u32 %v12079_v27, %v9166_v26  ;;  %v10647_v26 = vor.u32 %v12449_v7, %v10646_v6  ;;  %v10967_v27 = vor.u32 %v12529_v14, %v10966_v10  ;;  %v8288_v6 = vld [vmem:[#allocation7 + $0x3b0] sm:$0xf0]  ;;  %v10486_v14 = vld [vmem:[#allocation7 + $0x14b8] sm:$0xf] }
 0x235   :  { %5869 = vmatpush.bf16.msra.mxu2 %v9967_v29  ;;  %v5605_v29 = vpop.f32.mrf.mxu1 }
 0x236   :  { %5882 = vmatpush.bf16.msra.mxu3 %v10287_v35  ;;  %v12239_v35 = vld [vmem:[#allocation7 + $0xf8c] sm:$0xf0]  ;;  %v10606_v29 = vld [vmem:[#allocation7 + $0x15a8] sm:$0xf] }
 0x237   :  { %5844 = vmatpush.bf16.msra.mxu0 %v9287_v42  ;;  %v9487_v42 = vor.u32 %v12159_v32, %v9486_v28  ;;  %v9807_v43 = vor.u32 %v12239_v35, %v9806_v33  ;;  %v5618_v48 = vpop.f32.mrf.mxu2  ;;  %v10926_v32 = vld [vmem:[#allocation7 + $0x1828] sm:$0xf]  ;;  %v12519_v35 = vld [vmem:[#allocation7 + $0x184c] sm:$0xf0] }
 0x238   :  { %5857 = vmatpush.bf16.msra.mxu1 %v9607_v44  ;;  %v9446_v44 = vld [vmem:[#allocation7 + $0xc98] sm:$0xf]  ;;  %v5631_v54 = vpop.f32.mrf.mxu3 }
 0x239   :  { %5870 = vmatpush.bf16.msra.mxu2 %v9927_v45  ;;  %v12149_v45 = vld [vmem:[#allocation7 + $0xcbc] sm:$0xf0]  ;;  %v11864_v54 = vld [vmem:[#allocation7 + $0x3dc] sm:$0xf] }
 0x23a   :  { %5883 = vmatpush.bf16.msra.mxu3 %v10247_v53  ;;  %v12309_v53 = vld [vmem:[#allocation7 + $0x11bc] sm:$0xf0] }
 0x23b   :  { %5845 = vmatpush.bf16.msra.mxu0 %v9247_v59  ;;  %v11814_v59 = vld [vmem:[#allocation7 + $0x24c] sm:$0xf]  ;;  %v10087_v2 = vor.u32 %v12309_v53, %v10086_v52  ;;  %v8008_v52 = vld [vmem:[#allocation7 + $0x180] sm:$0xf0] }
 0x23c   :  { %5858 = vmatpush.bf16.msra.mxu1 %v9567_v60  ;;  %v8128_v60 = vld [vmem:[#allocation7 + $0x270] sm:$0xf0] }
 0x23d   :  { %5871 = vmatpush.bf16.msra.mxu2 %v9887_v12  ;;  %v9447_v12 = vor.u32 %v12149_v45, %v9446_v44  ;;  %v8131_v3 = vor.u32 %v11814_v59, %v8128_v60  ;;  %v10566_v44 = vld [vmem:[#allocation7 + $0x1558] sm:$0xf]  ;;  %v12429_v45 = vld [vmem:[#allocation7 + $0x157c] sm:$0xf0]  ;;  %v8011_v59 = vor.u32 %v11784_v0, %v8008_v52  ;;  %v10526_v60 = vld [vmem:[#allocation7 + $0x1508] sm:$0xf] }
 0x23e   :  { %5884 = vmatpush.bf16.msra.mxu3 %v10207_v63  ;;  %v10687_v63 = vor.u32 %v12459_v24, %v10686_v55  ;;  %v8328_v55 = vld [vmem:[#allocation7 + $0x400] sm:$0xf0]  ;;  %v10567_v56 = vor.u32 %v12429_v45, %v10566_v44  ;;  %v12479_v45 = vld [vmem:[#allocation7 + $0x170c] sm:$0xf0]  ;;  %v8208_v0 = vld [vmem:[#allocation7 + $0x310] sm:$0xf0] }
 0x23f   :  { %5846 = vmatpush.bf16.msra.mxu0 %v9207_v19  ;;  %v11804_v19 = vld [vmem:[#allocation7 + $0x1fc] sm:$0xf]  ;;  %v8331_v62 = vor.u32 %v11864_v54, %v8328_v55  ;;  %v12389_v54 = vld [vmem:[#allocation7 + $0x143c] sm:$0xf0] }
 0x240   :  { %5859 = vmatpush.bf16.msra.mxu1 %v9527_v22  ;;  %v11884_v22 = vld [vmem:[#allocation7 + $0x47c] sm:$0xf]  ;;  %v8091_v28 = vor.u32 %v11804_v19, %v8088_v18  ;;  %v12409_v19 = vld [vmem:[#allocation7 + $0x14dc] sm:$0xf0]  ;;  %v10806_v18 = vld [vmem:[#allocation7 + $0x1738] sm:$0xf] }
 0x241   :  { %5872 = vmatpush.bf16.msra.mxu2 %v9847_v23  ;;  %v8408_v23 = vld [vmem:[#allocation7 + $0x4a0] sm:$0xf0] }
 0x242   :  { %5885 = vmatpush.bf16.msra.mxu3 %v10167_v31  ;;  %v12439_v31 = vld [vmem:[#allocation7 + $0x15cc] sm:$0xf0]  ;;  %v8411_v33 = vor.u32 %v11884_v22, %v8408_v23  ;;  %v12489_v23 = vld [vmem:[#allocation7 + $0x175c] sm:$0xf0] }
 0x243   :  { %5847 = vmatpush.bf16.msra.mxu0 %v9167_v49  ;;  %v11874_v49 = vld [vmem:[#allocation7 + $0x42c] sm:$0xf]  ;;  %v10607_v36 = vor.u32 %v12439_v31, %v10606_v29  ;;  %v11844_v29 = vld [vmem:[#allocation7 + $0x33c] sm:$0xf]  ;;  %v8248_v31 = vld [vmem:[#allocation7 + $0x360] sm:$0xf0] }
 0x244   :  { %5860 = vmatpush.bf16.msra.mxu1 %v9487_v42  ;;  %v10927_v42 = vor.u32 %v12519_v35, %v10926_v32  ;;  %v8371_v48 = vor.u32 %v11874_v49, %v8368_v41  ;;  %v10487_v35 = vor.u32 %v12409_v19, %v10486_v14  ;;  %v10446_v41 = vld [vmem:[#allocation7 + $0x1468] sm:$0xf]  ;;  %v8251_v44 = vor.u32 %v11844_v29, %v8248_v31  ;;  %v12214_v19 = vld [vmem:[#allocation7 + $0xecc] sm:$0xf]  ;;  %v8728_v29 = vld [vmem:[#allocation7 + $0x720] sm:$0xf0] }
 0x245   :  { %5873 = vmatpush.bf16.msra.mxu2 %v9807_v43  ;;  %v8051_v43 = vor.u32 %v11794_v39, %v8048_v50  ;;  %v10807_v50 = vor.u32 %v12489_v23, %v10806_v18  ;;  %v9728_v18 = vld [vmem:[#allocation7 + $0xef0] sm:$0xf0]  ;;  %v12044_v31 = vld [vmem:[#allocation7 + $0x97c] sm:$0xf] }
 0x246   :  { %5886 = vmatpush.bf16.msra.mxu3 %v10127_v51  ;;  %v12509_v51 = vld [vmem:[#allocation7 + $0x17fc] sm:$0xf0] }
 0x247   :  { %5848 = vmatpush.bf16.msra.mxu0 %v9127_v5  ;;  %v5642_v53 = vpop.f32.mrf.mxu0  ;;  %v10887_v58 = vor.u32 %v12509_v51, %v10886_v47  ;;  %v11754_v47 = vld [vmem:[#allocation7 + $0x6c] sm:$0xf] }
 0x248   :  { %5861 = vmatpush.bf16.msra.mxu1 %v9447_v12  ;;  %v5643_v24 = vadd.f32 %v5642_v53, %v13222_v17  ;;  %v5655_v5 = vpop.f32.mrf.mxu1  ;;  %v12419_v12 = vld [vmem:[#allocation7 + $0x152c] sm:$0xf0]  ;;  %v994_v17 = vperm.slane %v13212_v30, 5  ;;  %v11834_v51 = vld [vmem:[#allocation7 + $0x2ec] sm:$0xf] }
 0x249   :  { %5874 = vmatpush.bf16.msra.mxu2 %v9767_v61  ;;  %v10846_v61 = vld [vmem:[#allocation7 + $0x1788] sm:$0xf]  ;;  %v10527_v7 = vor.u32 %v12419_v12, %v10526_v60  ;;  %v10406_v53 = vld [vmem:[#allocation7 + $0x1418] sm:$0xf]  ;;  %v7848_v60 = vld [vmem:[#allocation7 + $0x40] sm:$0xf0] }
 0x24a   :  { %5887 = vmatpush.bf16.msra.mxu3 %v10087_v2  ;;  %5849 = vmatmul.bf16.vlgmr.msra.gmra.mxu0 %v13106_v37  ;;  %v13229_v1 = vadd.f32 %v5655_v5, %v5643_v24  ;;  %v12499_v2 = vld [vmem:[#allocation7 + $0x17ac] sm:$0xf0]  ;;  %v12469_v5 = vld [vmem:[#allocation7 + $0x16bc] sm:$0xf0]  ;;  %v11824_v12 = vld [vmem:[#allocation7 + $0x29c] sm:$0xf] }
 0x24b   :  { %5893 = vmatpush.bf16.msrb.mxu0 %v10687_v63  ;;  %5862 = vmatmul.bf16.vlgmr.msra.gmra.mxu1 %v13110_v40  ;;  %v11774_v63 = vld [vmem:[#allocation7 + $0x10c] sm:$0xf]  ;;  %v10847_v10 = vor.u32 %v12499_v2, %v10846_v61  ;;  %v8168_v61 = vld [vmem:[#allocation7 + $0x2c0] sm:$0xf0] }
 0x24c   :  { %5906 = vmatpush.bf16.msrb.mxu1 %v11007_v21  ;;  %5875 = vmatmul.bf16.vlgmr.msra.gmra.mxu2 %v13104_v34  ;;  %v7968_v21 = vld [vmem:[#allocation7 + $0x130] sm:$0xf0]  ;;  %v11974_v2 = vld [vmem:[#allocation7 + $0x74c] sm:$0xf]  ;;  %vm6313_vm4 = vcmp.gt.f32.partialorder %v13229_v1, 0.0 }
 0x24d   :  { %5919 = vmatpush.bf16.msrb.mxu2 %v8131_v3  ;;  %5888 = vmatmul.bf16.vlgmr.msra.gmra.mxu3 %v13108_v38  ;;  %v11854_v3 = vld [vmem:[#allocation7 + $0x38c] sm:$0xf] }
 0x24e   :  { %5932 = vmatpush.bf16.msrb.mxu3 %v8451_v11  ;;  %v7971_v11 = vor.u32 %v11774_v63, %v7968_v21  ;;  %v8291_v22 = vor.u32 %v11854_v3, %v8288_v6  ;;  %v8768_v63 = vld [vmem:[#allocation7 + $0x770] sm:$0xf0]  ;;  %v12054_v21 = vld [vmem:[#allocation7 + $0x9cc] sm:$0xf]  ;;  %v10407_v6 = vor.u32 %v12389_v54, %v10406_v53 }
 0x24f   :  { %5894 = vmatpush.bf16.msrb.mxu0 %v10647_v26  ;;  %v11764_v26 = vld [vmem:[#allocation7 + $0xbc] sm:$0xf]  ;;  %v5644_v30 = vpop.f32.mrf.mxu0  ;;  %v8771_v23 = vor.u32 %v11974_v2, %v8768_v63  ;;  %v9648_v53 = vld [vmem:[#allocation7 + $0xe50] sm:$0xf0]  ;;  %v9608_v2 = vld [vmem:[#allocation7 + $0xe00] sm:$0xf0] }
 0x250   :  { %5907 = vmatpush.bf16.msrb.mxu1 %v10967_v27  ;;  %v7928_v27 = vld [vmem:[#allocation7 + $0xe0] sm:$0xf0]  ;;  %v5657_v39 = vpop.f32.mrf.mxu1  ;;  %v12124_v30 = vld [vmem:[#allocation7 + $0xbfc] sm:$0xf] }
 0x251   :  { %5920 = vmatpush.bf16.msrb.mxu2 %v8091_v28  ;;  %v5668_v28 = vpop.f32.mrf.mxu2  ;;  %v7931_v49 = vor.u32 %v11764_v26, %v7928_v27  ;;  %v12204_v39 = vld [vmem:[#allocation7 + $0xe7c] sm:$0xf] }
 0x252   :  { %5933 = vmatpush.bf16.msrb.mxu3 %v8411_v33  ;;  %v5669_v32 = vadd.f32 %v5668_v28, %v994_v17  ;;  %v5681_v33 = vpop.f32.mrf.mxu3  ;;  %v9088_v17 = vld [vmem:[#allocation7 + $0x9f0] sm:$0xf0]  ;;  %v11964_v28 = vld [vmem:[#allocation7 + $0x6fc] sm:$0xf] }
 0x253   :  { %5895 = vmatpush.bf16.msrb.mxu0 %v10607_v36  ;;  %v12399_v36 = vld [vmem:[#allocation7 + $0x148c] sm:$0xf0]  ;;  %v9091_v26 = vor.u32 %v12054_v21, %v9088_v17  ;;  %v11934_v17 = vld [vmem:[#allocation7 + $0x60c] sm:$0xf] }
 0x254   :  { %5908 = vmatpush.bf16.msrb.mxu1 %v10927_v42  ;;  %v10766_v42 = vld [vmem:[#allocation7 + $0x16e8] sm:$0xf]  ;;  %v10447_v52 = vor.u32 %v12399_v36, %v10446_v41 }
 0x255   :  { %5921 = vmatpush.bf16.msrb.mxu2 %v8051_v43  ;;  %v13232_v43 = vadd.f32 %v5681_v33, %v5669_v32  ;;  %v10767_v55 = vor.u32 %v12479_v45, %v10766_v42  ;;  %v9731_v32 = vor.u32 %v12214_v19, %v9728_v18  ;;  %v9048_v33 = vld [vmem:[#allocation7 + $0x9a0] sm:$0xf0]  ;;  %v11954_v42 = vld [vmem:[#allocation7 + $0x6ac] sm:$0xf]  ;;  %v8928_v18 = vld [vmem:[#allocation7 + $0x8b0] sm:$0xf0] }
 0x256   :  { %5934 = vmatpush.bf16.msrb.mxu3 %v8371_v48  ;;  %v7888_v48 = vld [vmem:[#allocation7 + $0x90] sm:$0xf0]  ;;  %v9051_v41 = vor.u32 %v12044_v31, %v9048_v33  ;;  %v12034_v45 = vld [vmem:[#allocation7 + $0x92c] sm:$0xf]  ;;  %v11924_v33 = vld [vmem:[#allocation7 + $0x5bc] sm:$0xf] }
 0x257   :  { %5896 = vmatpush.bf16.msrb.mxu0 %v10567_v56  ;;  %v7891_v24 = vor.u32 %v11754_v47, %v7888_v48  ;;  %v10726_v56 = vld [vmem:[#allocation7 + $0x1698] sm:$0xf]  ;;  %v9008_v48 = vld [vmem:[#allocation7 + $0x950] sm:$0xf0] }
 0x258   :  { %5909 = vmatpush.bf16.msrb.mxu1 %v10887_v58  ;;  %v11744_v58 = vld [vmem:[#allocation7 + $0x1c] sm:$0xf] }
 0x259   :  { %5922 = vmatpush.bf16.msrb.mxu2 %v8011_v59  ;;  %v8211_v59 = vor.u32 %v11834_v51, %v8208_v0  ;;  %v7851_v14 = vor.u32 %v11744_v58, %v7848_v60  ;;  %v12114_v51 = vld [vmem:[#allocation7 + $0xbac] sm:$0xf]  ;;  %v9328_v0 = vld [vmem:[#allocation7 + $0xbd0] sm:$0xf0]  ;;  %v12024_v58 = vld [vmem:[#allocation7 + $0x8dc] sm:$0xf] }
 0x25a   :  { %5935 = vmatpush.bf16.msrb.mxu3 %v8331_v62  ;;  %v5670_v62 = vpop.f32.mrf.mxu2  ;;  %v5683_v3 = vpop.f32.mrf.mxu3  ;;  %v8968_v60 = vld [vmem:[#allocation7 + $0x900] sm:$0xf0] }
 0x25b   :  { %5897 = vmatpush.bf16.msrb.mxu0 %v10527_v7  ;;  %v12134_v7 = vld [vmem:[#allocation7 + $0xc4c] sm:$0xf]  ;;  %v12184_v62 = vld [vmem:[#allocation7 + $0xddc] sm:$0xf]  ;;  %v8971_v3 = vor.u32 %v12024_v58, %v8968_v60 }
 0x25c   :  { %5910 = vmatpush.bf16.msrb.mxu1 %v10847_v10  ;;  %v9408_v10 = vld [vmem:[#allocation7 + $0xc70] sm:$0xf0]  ;;  %v9611_v19 = vor.u32 %v12184_v62, %v9608_v2  ;;  %v12074_v58 = vld [vmem:[#allocation7 + $0xa6c] sm:$0xf]  ;;  %v11904_v62 = vld [vmem:[#allocation7 + $0x51c] sm:$0xf] }
 0x25d   :  { %5923 = vmatpush.bf16.msrb.mxu2 %v7971_v11  ;;  %v10727_v11 = vor.u32 %v12469_v5, %v10726_v56  ;;  %v9411_v27 = vor.u32 %v12134_v7, %v9408_v10  ;;  %v11944_v56 = vld [vmem:[#allocation7 + $0x65c] sm:$0xf]  ;;  %v8648_v5 = vld [vmem:[#allocation7 + $0x680] sm:$0xf0]  ;;  %v8608_v7 = vld [vmem:[#allocation7 + $0x630] sm:$0xf0] }
 0x25e   :  { %5936 = vmatpush.bf16.msrb.mxu3 %v8291_v22  ;;  %v8171_v22 = vor.u32 %v11824_v12, %v8168_v61  ;;  %v12104_v12 = vld [vmem:[#allocation7 + $0xb5c] sm:$0xf]  ;;  %v9288_v61 = vld [vmem:[#allocation7 + $0xb80] sm:$0xf0]  ;;  %v8651_v63 = vor.u32 %v11944_v56, %v8648_v5  ;;  %v12014_v10 = vld [vmem:[#allocation7 + $0x88c] sm:$0xf] }
 0x25f   :  { %5898 = vmatpush.bf16.msrb.mxu0 %v10487_v35  ;;  %v9368_v35 = vld [vmem:[#allocation7 + $0xc20] sm:$0xf0]  ;;  %v8931_v31 = vor.u32 %v12014_v10, %v8928_v18  ;;  %v8848_v5 = vld [vmem:[#allocation7 + $0x810] sm:$0xf0]  ;;  %v12154_v60 = vld [vmem:[#allocation7 + $0xcec] sm:$0xf] }
 0x260   :  { %5911 = vmatpush.bf16.msrb.mxu1 %v10807_v50  ;;  %v9688_v50 = vld [vmem:[#allocation7 + $0xea0] sm:$0xf0]  ;;  %v9371_v36 = vor.u32 %v12124_v30, %v9368_v35  ;;  %v12004_v35 = vld [vmem:[#allocation7 + $0x83c] sm:$0xf] }
 0x261   :  { %5924 = vmatpush.bf16.msrb.mxu2 %v7931_v49  ;;  %v8731_v49 = vor.u32 %v11964_v28, %v8728_v29  ;;  %v9691_v47 = vor.u32 %v12204_v39, %v9688_v50  ;;  %v8611_v29 = vor.u32 %v11934_v17, %v8608_v7  ;;  %v8568_v30 = vld [vmem:[#allocation7 + $0x5e0] sm:$0xf0]  ;;  %v12064_v17 = vld [vmem:[#allocation7 + $0xa1c] sm:$0xf] }
 0x262   :  { %5937 = vmatpush.bf16.msrb.mxu3 %v8251_v44  ;;  %v8688_v44 = vld [vmem:[#allocation7 + $0x6d0] sm:$0xf0]  ;;  %v8888_v50 = vld [vmem:[#allocation7 + $0x860] sm:$0xf0] }
 0x263   :  { %5899 = vmatpush.bf16.msrb.mxu0 %v10447_v52  ;;  %v12194_v52 = vld [vmem:[#allocation7 + $0xe2c] sm:$0xf]  ;;  %v8691_v54 = vor.u32 %v11954_v42, %v8688_v44  ;;  %v12164_v44 = vld [vmem:[#allocation7 + $0xd3c] sm:$0xf]  ;;  %v8488_v2 = vld [vmem:[#allocation7 + $0x540] sm:$0xf0] }
 0x264   :  { %5912 = vmatpush.bf16.msrb.mxu1 %v10767_v55  ;;  %v9011_v55 = vor.u32 %v12034_v45, %v9008_v48  ;;  %v9528_v45 = vld [vmem:[#allocation7 + $0xd60] sm:$0xf0] }
 0x265   :  { %5925 = vmatpush.bf16.msrb.mxu2 %v7891_v24  ;;  %v9331_v24 = vor.u32 %v12114_v51, %v9328_v0  ;;  %v8891_v0 = vor.u32 %v12004_v35, %v8888_v50  ;;  %v9531_v56 = vor.u32 %v12164_v44, %v9528_v45  ;;  %v11008_v35 = vld [vmem:[#allocation7 + $0x18f0] sm:$0xf0]  ;;  %v10328_v45 = vld [vmem:[#allocation7 + $0x13a0] sm:$0xf0] }
 0x266   :  { %5938 = vmatpush.bf16.msrb.mxu3 %v8211_v59  ;;  %v9651_v59 = vor.u32 %v12194_v52, %v9648_v53  ;;  %v11914_v53 = vld [vmem:[#allocation7 + $0x56c] sm:$0xf] }
 0x267   :  { %5900 = vmatpush.bf16.msrb.mxu0 %v10407_v6  ;;  %v5694_v21 = vpop.f32.mrf.mxu0  ;;  %v9291_v6 = vor.u32 %v12104_v12, %v9288_v61  ;;  %v9488_v12 = vld [vmem:[#allocation7 + $0xd10] sm:$0xf0] }
 0x268   :  { %5913 = vmatpush.bf16.msrb.mxu1 %v10727_v11  ;;  %v5695_v11 = vadd.f32 %v5694_v21, %v13232_v43  ;;  %v9491_v10 = vor.u32 %v12154_v60, %v9488_v12  ;;  %v12434_v60 = vld [vmem:[#allocation7 + $0x15ac] sm:$0xf]  ;;  %v10608_v12 = vld [vmem:[#allocation7 + $0x15d0] sm:$0xf0] }
 0x269   :  { %5926 = vmatpush.bf16.msrb.mxu2 %v7851_v14  ;;  %v5707_v14 = vpop.f32.mrf.mxu1 }
 0x26a   :  { %5939 = vmatpush.bf16.msrb.mxu3 %v8171_v22  ;;  %5901 = vmatmul.bf16.vlgmr.msrb.gmra.mxu0 %v13116_v16  ;;  %v12094_v22 = vld [vmem:[#allocation7 + $0xb0c] sm:$0xf]  ;;  %v5708_v28 = vadd.f32 %v5707_v14, %v5695_v11  ;;  %v9128_v11 = vld [vmem:[#allocation7 + $0xa40] sm:$0xf0]  ;;  %v12144_v14 = vld [vmem:[#allocation7 + $0xc9c] sm:$0xf] }
 0x26b   :  { %5945 = vmatpush.bf16.msra.mxu0 %v8771_v23  ;;  %5914 = vmatmul.bf16.vlgmr.msrb.gmra.mxu1 %v13118_v20  ;;  %v9248_v23 = vld [vmem:[#allocation7 + $0xb30] sm:$0xf0] }
 0x26c   :  { %5958 = vmatpush.bf16.msra.mxu1 %v9091_v26  ;;  %5927 = vmatmul.bf16.vlgmr.msrb.gmra.mxu2 %v13094_v9  ;;  %v12174_v26 = vld [vmem:[#allocation7 + $0xd8c] sm:$0xf] }
 0x26d   :  { %5971 = vmatpush.bf16.msra.mxu2 %v9411_v27  ;;  %5940 = vmatmul.bf16.vlgmr.msrb.gmra.mxu3 %v13101_v25  ;;  %v9568_v27 = vld [vmem:[#allocation7 + $0xdb0] sm:$0xf0] }
 0x26e   :  { %5984 = vmatpush.bf16.msra.mxu3 %v9731_v32  ;;  %v9251_v32 = vor.u32 %v12094_v22, %v9248_v23  ;;  %v9571_v43 = vor.u32 %v12174_v26, %v9568_v27  ;;  %v12294_v22 = vld [vmem:[#allocation7 + $0x114c] sm:$0xf]  ;;  %v10048_v23 = vld [vmem:[#allocation7 + $0x1170] sm:$0xf0]  ;;  %v8491_v27 = vor.u32 %v11904_v62, %v8488_v2 }
 0x26f   :  { %5946 = vmatpush.bf16.msra.mxu0 %v8731_v49  ;;  %v5720_v39 = vpop.f32.mrf.mxu2  ;;  %v12084_v49 = vld [vmem:[#allocation7 + $0xabc] sm:$0xf]  ;;  %v5696_v51 = vpop.f32.mrf.mxu0  ;;  %v12374_v26 = vld [vmem:[#allocation7 + $0x13cc] sm:$0xf]  ;;  %v10928_v62 = vld [vmem:[#allocation7 + $0x1850] sm:$0xf0] }
 0x270   :  { %5959 = vmatpush.bf16.msra.mxu1 %v9051_v41  ;;  %v9208_v41 = vld [vmem:[#allocation7 + $0xae0] sm:$0xf0]  ;;  %v5733_v42 = vpop.f32.mrf.mxu3 }
 0x271   :  { %5972 = vmatpush.bf16.msra.mxu2 %v9371_v36  ;;  %v5721_v36 = vadd.f32 %v5720_v39, %v5708_v28  ;;  %v9211_v52 = vor.u32 %v12084_v49, %v9208_v41  ;;  %v10368_v28 = vld [vmem:[#allocation7 + $0x13f0] sm:$0xf0]  ;;  %v12284_v41 = vld [vmem:[#allocation7 + $0x10fc] sm:$0xf]  ;;  %v10648_v51 = vld [vmem:[#allocation7 + $0x1620] sm:$0xf0] }
 0x272   :  { %5985 = vmatpush.bf16.msra.mxu3 %v9691_v47  ;;  %v8571_v47 = vor.u32 %v11924_v33, %v8568_v30  ;;  %v9131_v33 = vor.u32 %v12064_v17, %v9128_v11  ;;  %v12534_v30 = vld [vmem:[#allocation7 + $0x18cc] sm:$0xf]  ;;  %v10371_v50 = vor.u32 %v12374_v26, %v10368_v28  ;;  %v12344_v17 = vld [vmem:[#allocation7 + $0x12dc] sm:$0xf] }
 0x273   :  { %5947 = vmatpush.bf16.msra.mxu0 %v8691_v54  ;;  %v13239_v48 = vadd.f32 %v5733_v42, %v5721_v36  ;;  %v8528_v54 = vld [vmem:[#allocation7 + $0x590] sm:$0xf0]  ;;  %v10008_v36 = vld [vmem:[#allocation7 + $0x1120] sm:$0xf0]  ;;  %v12364_v42 = vld [vmem:[#allocation7 + $0x137c] sm:$0xf]  ;;  %v11011_v44 = vor.u32 %v12534_v30, %v11008_v35 }
 0x274   :  { %5960 = vmatpush.bf16.msra.mxu1 %v9011_v55  ;;  %v11994_v55 = vld [vmem:[#allocation7 + $0x7ec] sm:$0xf]  ;;  %v8531_v61 = vor.u32 %v11914_v53, %v8528_v54  ;;  %v10011_v53 = vor.u32 %v12284_v41, %v10008_v36  ;;  %v10331_v54 = vor.u32 %v12364_v42, %v10328_v45  ;;  %v12424_v11 = vld [vmem:[#allocation7 + $0x155c] sm:$0xf]  ;;  %v10848_v41 = vld [vmem:[#allocation7 + $0x17b0] sm:$0xf0] }
 0x275   :  { %5973 = vmatpush.bf16.msra.mxu2 %v9331_v24  ;;  %v5709_v24 = vpop.f32.mrf.mxu1  ;;  %v9848_v45 = vld [vmem:[#allocation7 + $0xfe0] sm:$0xf0] }
 0x276   :  { %5986 = vmatpush.bf16.msra.mxu3 %v9651_v59  ;;  %v9168_v59 = vld [vmem:[#allocation7 + $0xa90] sm:$0xf0]  ;;  %v12274_v24 = vld [vmem:[#allocation7 + $0x10ac] sm:$0xf] }
 0x277   :  { %5948 = vmatpush.bf16.msra.mxu0 %v8651_v63  ;;  %v8851_v63 = vor.u32 %v11994_v55, %v8848_v5  ;;  %v9171_v21 = vor.u32 %v12074_v58, %v9168_v59  ;;  %v5722_v7 = vpop.f32.mrf.mxu2  ;;  %v12354_v5 = vld [vmem:[#allocation7 + $0x132c] sm:$0xf]  ;;  %v10288_v59 = vld [vmem:[#allocation7 + $0x1350] sm:$0xf0] }
 0x278   :  { %5961 = vmatpush.bf16.msra.mxu1 %v8971_v3  ;;  %v11984_v3 = vld [vmem:[#allocation7 + $0x79c] sm:$0xf]  ;;  %v5735_v18 = vpop.f32.mrf.mxu3 }
 0x279   :  { %5974 = vmatpush.bf16.msra.mxu2 %v9291_v6  ;;  %v8808_v6 = vld [vmem:[#allocation7 + $0x7c0] sm:$0xf0]  ;;  %v12504_v18 = vld [vmem:[#allocation7 + $0x17dc] sm:$0xf] }
 0x27a   :  { %5987 = vmatpush.bf16.msra.mxu3 %v9611_v19  ;;  %v9448_v19 = vld [vmem:[#allocation7 + $0xcc0] sm:$0xf0] }
 0x27b   :  { %5949 = vmatpush.bf16.msra.mxu0 %v8611_v29  ;;  %v12454_v29 = vld [vmem:[#allocation7 + $0x164c] sm:$0xf]  ;;  %v9451_v39 = vor.u32 %v12144_v14, %v9448_v19  ;;  %v10568_v14 = vld [vmem:[#allocation7 + $0x1580] sm:$0xf0] }
 0x27c   :  { %5962 = vmatpush.bf16.msra.mxu1 %v8931_v31  ;;  %v10688_v31 = vld [vmem:[#allocation7 + $0x1670] sm:$0xf0] }
 0x27d   :  { %5975 = vmatpush.bf16.msra.mxu2 %v9251_v32  ;;  %v8811_v32 = vor.u32 %v11984_v3, %v8808_v6  ;;  %v10691_v49 = vor.u32 %v12454_v29, %v10688_v31  ;;  %v12264_v3 = vld [vmem:[#allocation7 + $0x105c] sm:$0xf]  ;;  %v9928_v6 = vld [vmem:[#allocation7 + $0x1080] sm:$0xf0]  ;;  %v10571_v29 = vor.u32 %v12424_v11, %v10568_v14  ;;  %v12254_v31 = vld [vmem:[#allocation7 + $0x100c] sm:$0xf] }
 0x27e   :  { %5988 = vmatpush.bf16.msra.mxu3 %v9571_v43  ;;  %v10051_v43 = vor.u32 %v12294_v22, %v10048_v23  ;;  %v10888_v22 = vld [vmem:[#allocation7 + $0x1800] sm:$0xf0]  ;;  %v9931_v26 = vor.u32 %v12264_v3, %v9928_v6  ;;  %v10128_v6 = vld [vmem:[#allocation7 + $0x1210] sm:$0xf0] }
 0x27f   :  { %5950 = vmatpush.bf16.msra.mxu0 %v8571_v47  ;;  %v12444_v47 = vld [vmem:[#allocation7 + $0x15fc] sm:$0xf]  ;;  %v10891_v30 = vor.u32 %v12504_v18, %v10888_v22  ;;  %v10768_v11 = vld [vmem:[#allocation7 + $0x1710] sm:$0xf0]  ;;  %v9768_v18 = vld [vmem:[#allocation7 + $0xf40] sm:$0xf0] }
 0x280   :  { %5963 = vmatpush.bf16.msra.mxu1 %v8891_v0  ;;  %v12524_v0 = vld [vmem:[#allocation7 + $0x187c] sm:$0xf]  ;;  %v10651_v55 = vor.u32 %v12444_v47, %v10648_v51 }
 0x281   :  { %5976 = vmatpush.bf16.msra.mxu2 %v9211_v52  ;;  %v10968_v52 = vld [vmem:[#allocation7 + $0x18a0] sm:$0xf0]  ;;  %v12324_v47 = vld [vmem:[#allocation7 + $0x123c] sm:$0xf] }
 0x282   :  { %5989 = vmatpush.bf16.msra.mxu3 %v9531_v56  ;;  %v9968_v56 = vld [vmem:[#allocation7 + $0x10d0] sm:$0xf0]  ;;  %v10971_v58 = vor.u32 %v12524_v0, %v10968_v52  ;;  %v10168_v52 = vld [vmem:[#allocation7 + $0x1260] sm:$0xf0] }
 0x283   :  { %5951 = vmatpush.bf16.msra.mxu0 %v8531_v61  ;;  %v12514_v61 = vld [vmem:[#allocation7 + $0x182c] sm:$0xf]  ;;  %v9971_v2 = vor.u32 %v12274_v24, %v9968_v56  ;;  %v12484_v56 = vld [vmem:[#allocation7 + $0x173c] sm:$0xf] }
 0x284   :  { %5964 = vmatpush.bf16.msra.mxu1 %v8851_v63  ;;  %v10291_v63 = vor.u32 %v12354_v5, %v10288_v59  ;;  %v10931_v7 = vor.u32 %v12514_v61, %v10928_v62  ;;  %v10808_v5 = vld [vmem:[#allocation7 + $0x1760] sm:$0xf0]  ;;  %v10171_v61 = vor.u32 %v12324_v47, %v10168_v52  ;;  %v12060_v47 = vld [vmem:[#allocation7 + $0x9f4] sm:$0xf0] }
 0x285   :  { %5977 = vmatpush.bf16.msra.mxu2 %v9171_v21  ;;  %v10611_v21 = vor.u32 %v12434_v60, %v10608_v12  ;;  %v10811_v3 = vor.u32 %v12484_v56, %v10808_v5  ;;  %v11890_v5 = vld [vmem:[#allocation7 + $0x4a4] sm:$0xf0] }
 0x286   :  { %5990 = vmatpush.bf16.msra.mxu3 %v9491_v10  ;;  %v10248_v10 = vld [vmem:[#allocation7 + $0x1300] sm:$0xf0] }
 0x287   :  { %5952 = vmatpush.bf16.msra.mxu0 %v8491_v27  ;;  %v5746_v19 = vpop.f32.mrf.mxu0  ;;  %v10251_v28 = vor.u32 %v12344_v17, %v10248_v10  ;;  %v12394_v17 = vld [vmem:[#allocation7 + $0x146c] sm:$0xf] }
 0x288   :  { %5965 = vmatpush.bf16.msra.mxu1 %v8811_v32  ;;  %v5747_v23 = vadd.f32 %v5746_v19, %v13239_v48  ;;  %v5759_v27 = vpop.f32.mrf.mxu1  ;;  %v9888_v32 = vld [vmem:[#allocation7 + $0x1030] sm:$0xf0]  ;;  %v12474_v10 = vld [vmem:[#allocation7 + $0x16ec] sm:$0xf]  ;;  %v12224_v19 = vld [vmem:[#allocation7 + $0xf1c] sm:$0xf] }
 0x289   :  { %5978 = vmatpush.bf16.msra.mxu2 %v9131_v33  ;;  %v12334_v33 = vld [vmem:[#allocation7 + $0x128c] sm:$0xf]  ;;  %v9891_v36 = vor.u32 %v12254_v31, %v9888_v32  ;;  %v10408_v31 = vld [vmem:[#allocation7 + $0x1440] sm:$0xf0]  ;;  %v12464_v32 = vld [vmem:[#allocation7 + $0x169c] sm:$0xf] }
 0x28a   :  { %5991 = vmatpush.bf16.msra.mxu3 %v9451_v39  ;;  %5953 = vmatmul.bf16.vlgmr.msra.gmra.mxu0 %v13092_v8  ;;  %v5760_v35 = vadd.f32 %v5759_v27, %v5747_v23  ;;  %v10208_v39 = vld [vmem:[#allocation7 + $0x12b0] sm:$0xf0]  ;;  %v10088_v27 = vld [vmem:[#allocation7 + $0x11c0] sm:$0xf0] }
 0x28b   :  { %5997 = vmatpush.bf16.msrb.mxu0 %v10051_v43  ;;  %5966 = vmatmul.bf16.vlgmr.msra.gmra.mxu1 %v13096_v15  ;;  %v12414_v43 = vld [vmem:[#allocation7 + $0x150c] sm:$0xf]  ;;  %v10211_v48 = vor.u32 %v12334_v33, %v10208_v39  ;;  %v10728_v33 = vld [vmem:[#allocation7 + $0x16c0] sm:$0xf0]  ;;  %v11820_v39 = vld [vmem:[#allocation7 + $0x274] sm:$0xf0] }
 0x28c   :  { %6010 = vmatpush.bf16.msrb.mxu1 %v10371_v50  ;;  %5979 = vmatmul.bf16.vlgmr.msra.gmra.mxu2 %v13106_v37  ;;  %v10528_v50 = vld [vmem:[#allocation7 + $0x1530] sm:$0xf0] }
 0x28d   :  { %6023 = vmatpush.bf16.msrb.mxu2 %v10691_v49  ;;  %5992 = vmatmul.bf16.vlgmr.msra.gmra.mxu3 %v13110_v40  ;;  %v12494_v49 = vld [vmem:[#allocation7 + $0x178c] sm:$0xf]  ;;  %v10531_v42 = vor.u32 %v12414_v43, %v10528_v50  ;;  %v8454_v43 = vld [vmem:[#allocation7 + $0x4d0] sm:$0xf] }
 0x28e   :  { %6036 = vmatpush.bf16.msrb.mxu3 %v11011_v44  ;;  %v12244_v44 = vld [vmem:[#allocation7 + $0xfbc] sm:$0xf]  ;;  %v10851_v51 = vor.u32 %v12494_v49, %v10848_v41  ;;  %v9771_v49 = vor.u32 %v12224_v19, %v9768_v18  ;;  %v11900_v41 = vld [vmem:[#allocation7 + $0x4f4] sm:$0xf0] }
 0x28f   :  { %5998 = vmatpush.bf16.msrb.mxu0 %v10011_v53  ;;  %v5772_v0 = vpop.f32.mrf.mxu2  ;;  %v12404_v53 = vld [vmem:[#allocation7 + $0x14bc] sm:$0xf]  ;;  %v9851_v59 = vor.u32 %v12244_v44, %v9848_v45  ;;  %v9094_v45 = vld [vmem:[#allocation7 + $0x9d0] sm:$0xf]  ;;  %v8455_v52 = vor.u32 %v11900_v41, %v8454_v43  ;;  %v12040_v19 = vld [vmem:[#allocation7 + $0x954] sm:$0xf0] }
 0x290   :  { %6011 = vmatpush.bf16.msrb.mxu1 %v10331_v54  ;;  %v10488_v54 = vld [vmem:[#allocation7 + $0x14e0] sm:$0xf0]  ;;  %v5785_v24 = vpop.f32.mrf.mxu3  ;;  %v5761_v60 = vpop.f32.mrf.mxu1  ;;  %v9095_v56 = vor.u32 %v12060_v47, %v9094_v45  ;;  %v12030_v43 = vld [vmem:[#allocation7 + $0x904] sm:$0xf0] }
 0x291   :  { %6024 = vmatpush.bf16.msrb.mxu2 %v10651_v55  ;;  %v5773_v55 = vadd.f32 %v5772_v0, %v5760_v35  ;;  %v10491_v62 = vor.u32 %v12404_v53, %v10488_v54  ;;  %v8134_v35 = vld [vmem:[#allocation7 + $0x250] sm:$0xf]  ;;  %v8094_v54 = vld [vmem:[#allocation7 + $0x200] sm:$0xf] }
 0x292   :  { %6037 = vmatpush.bf16.msrb.mxu3 %v10971_v58  ;;  %v5748_v58 = vpop.f32.mrf.mxu0  ;;  %v8135_v0 = vor.u32 %v11820_v39, %v8134_v35  ;;  %v9054_v60 = vld [vmem:[#allocation7 + $0x980] sm:$0xf]  ;;  %v11950_v35 = vld [vmem:[#allocation7 + $0x684] sm:$0xf0] }
 0x293   :  { %5999 = vmatpush.bf16.msrb.mxu0 %v9971_v2  ;;  %v13246_v12 = vadd.f32 %v5785_v24, %v5773_v55  ;;  %v12234_v2 = vld [vmem:[#allocation7 + $0xf6c] sm:$0xf]  ;;  %v11810_v55 = vld [vmem:[#allocation7 + $0x224] sm:$0xf0]  ;;  %v8414_v24 = vld [vmem:[#allocation7 + $0x480] sm:$0xf] }
 0x294   :  { %6012 = vmatpush.bf16.msrb.mxu1 %v10291_v63  ;;  %v9808_v63 = vld [vmem:[#allocation7 + $0xf90] sm:$0xf0]  ;;  %v8734_v58 = vld [vmem:[#allocation7 + $0x700] sm:$0xf] }
 0x295   :  { %6025 = vmatpush.bf16.msrb.mxu2 %v10611_v21  ;;  %v12314_v21 = vld [vmem:[#allocation7 + $0x11ec] sm:$0xf]  ;;  %v9811_v14 = vor.u32 %v12234_v2, %v9808_v63  ;;  %v8415_v2 = vor.u32 %v11890_v5, %v8414_v24  ;;  %v8974_v39 = vld [vmem:[#allocation7 + $0x8e0] sm:$0xf]  ;;  %vm6314_vm5 = vcmp.gt.f32.partialorder %v13246_v12, 0.0 }
 0x296   :  { %6038 = vmatpush.bf16.msrb.mxu3 %v10931_v7  ;;  %v10448_v7 = vld [vmem:[#allocation7 + $0x1490] sm:$0xf0]  ;;  %v10131_v22 = vor.u32 %v12314_v21, %v10128_v6  ;;  %v8054_v21 = vld [vmem:[#allocation7 + $0x1b0] sm:$0xf] }
 0x297   :  { %6000 = vmatpush.bf16.msrb.mxu0 %v9931_v26  ;;  %v10451_v23 = vor.u32 %v12394_v17, %v10448_v7  ;;  %v12304_v26 = vld [vmem:[#allocation7 + $0x119c] sm:$0xf]  ;;  %v8374_v6 = vld [vmem:[#allocation7 + $0x430] sm:$0xf]  ;;  %v11880_v7 = vld [vmem:[#allocation7 + $0x454] sm:$0xf0] }
 0x298   :  { %6013 = vmatpush.bf16.msrb.mxu1 %v10251_v28  ;;  %v12384_v28 = vld [vmem:[#allocation7 + $0x141c] sm:$0xf]  ;;  %v5787_v50 = vpop.f32.mrf.mxu3 }
 0x299   :  { %6026 = vmatpush.bf16.msrb.mxu2 %v10571_v29  ;;  %v10771_v29 = vor.u32 %v12474_v10, %v10768_v11  ;;  %v10411_v44 = vor.u32 %v12384_v28, %v10408_v31  ;;  %v8694_v10 = vld [vmem:[#allocation7 + $0x6b0] sm:$0xf]  ;;  %v11960_v11 = vld [vmem:[#allocation7 + $0x6d4] sm:$0xf0]  ;;  %v8334_v28 = vld [vmem:[#allocation7 + $0x3e0] sm:$0xf] }
 0x29a   :  { %6039 = vmatpush.bf16.msrb.mxu3 %v10891_v30  ;;  %v5774_v30 = vpop.f32.mrf.mxu2 }
 0x29b   :  { %6001 = vmatpush.bf16.msrb.mxu0 %v9891_v36  ;;  %v8774_v36 = vld [vmem:[#allocation7 + $0x750] sm:$0xf]  ;;  %v8654_v30 = vld [vmem:[#allocation7 + $0x660] sm:$0xf] }
 0x29c   :  { %6014 = vmatpush.bf16.msrb.mxu1 %v10211_v48  ;;  %v11980_v48 = vld [vmem:[#allocation7 + $0x774] sm:$0xf0] }
 0x29d   :  { %6027 = vmatpush.bf16.msrb.mxu2 %v10531_v42  ;;  %v10091_v42 = vor.u32 %v12304_v26, %v10088_v27  ;;  %v8775_v53 = vor.u32 %v11980_v48, %v8774_v36  ;;  %v8695_v26 = vor.u32 %v11960_v11, %v8694_v10  ;;  %v11790_v27 = vld [vmem:[#allocation7 + $0x184] sm:$0xf0]  ;;  %v8655_v36 = vor.u32 %v11950_v35, %v8654_v30  ;;  %v7974_v48 = vld [vmem:[#allocation7 + $0x110] sm:$0xf]  ;;  %v11920_v30 = vld [vmem:[#allocation7 + $0x594] sm:$0xf0] }
 0x29e   :  { %6040 = vmatpush.bf16.msrb.mxu3 %v10851_v51  ;;  %v10731_v51 = vor.u32 %v12464_v32, %v10728_v33  ;;  %v11870_v33 = vld [vmem:[#allocation7 + $0x404] sm:$0xf0]  ;;  %v8854_v35 = vld [vmem:[#allocation7 + $0x7f0] sm:$0xf] }
 0x29f   :  { %6002 = vmatpush.bf16.msrb.mxu0 %v9851_v59  ;;  %v11970_v59 = vld [vmem:[#allocation7 + $0x724] sm:$0xf0]  ;;  %v8335_v41 = vor.u32 %v11870_v33, %v8334_v28  ;;  %v8534_v33 = vld [vmem:[#allocation7 + $0x570] sm:$0xf] }
 0x2a0   :  { %6015 = vmatpush.bf16.msrb.mxu1 %v10171_v61  ;;  %v12050_v61 = vld [vmem:[#allocation7 + $0x9a4] sm:$0xf0]  ;;  %v8735_v63 = vor.u32 %v11970_v59, %v8734_v58  ;;  %v7934_v59 = vld [vmem:[#allocation7 + $0xc0] sm:$0xf] }
 0x2a1   :  { %6028 = vmatpush.bf16.msrb.mxu2 %v10491_v62  ;;  %v8095_v62 = vor.u32 %v11810_v55, %v8094_v54  ;;  %v9055_v17 = vor.u32 %v12050_v61, %v9054_v60  ;;  %v8934_v54 = vld [vmem:[#allocation7 + $0x890] sm:$0xf]  ;;  %v12020_v55 = vld [vmem:[#allocation7 + $0x8b4] sm:$0xf0]  ;;  %v11770_v60 = vld [vmem:[#allocation7 + $0xe4] sm:$0xf0] }
 0x2a2   :  { %6041 = vmatpush.bf16.msrb.mxu3 %v10811_v3  ;;  %v11800_v3 = vld [vmem:[#allocation7 + $0x1d4] sm:$0xf0]  ;;  %v8254_v61 = vld [vmem:[#allocation7 + $0x340] sm:$0xf]  ;;  %v12010_v10 = vld [vmem:[#allocation7 + $0x864] sm:$0xf0]  ;;  %v7935_v11 = vor.u32 %v11770_v60, %v7934_v59 }
 0x2a3   :  { %6003 = vmatpush.bf16.msrb.mxu0 %v9811_v14  ;;  %v9014_v14 = vld [vmem:[#allocation7 + $0x930] sm:$0xf]  ;;  %v8055_v18 = vor.u32 %v11800_v3, %v8054_v21  ;;  %v8574_v21 = vld [vmem:[#allocation7 + $0x5c0] sm:$0xf]  ;;  %v11930_v3 = vld [vmem:[#allocation7 + $0x5e4] sm:$0xf0] }
 0x2a4   :  { %6016 = vmatpush.bf16.msrb.mxu1 %v10131_v22  ;;  %v8014_v22 = vld [vmem:[#allocation7 + $0x160] sm:$0xf]  ;;  %v9015_v32 = vor.u32 %v12040_v19, %v9014_v14  ;;  %v12300_v59 = vld [vmem:[#allocation7 + $0x1174] sm:$0xf0] }
 0x2a5   :  { %6029 = vmatpush.bf16.msrb.mxu2 %v10451_v23  ;;  %v8375_v23 = vor.u32 %v11880_v7, %v8374_v6  ;;  %v8015_v50 = vor.u32 %v11790_v27, %v8014_v22  ;;  %v8894_v7 = vld [vmem:[#allocation7 + $0x840] sm:$0xf]  ;;  %v8575_v22 = vor.u32 %v11930_v3, %v8574_v21  ;;  %v8214_v27 = vld [vmem:[#allocation7 + $0x2f0] sm:$0xf] }
 0x2a6   :  { %6042 = vmatpush.bf16.msrb.mxu3 %v10771_v29  ;;  %v13252_v29 = vld [vmem:[#allocation8] sm:$0xff] }
 0x2a7   :  { %6004 = vmatpush.bf16.msrb.mxu0 %v9771_v49  ;;  %v995_v31 = vperm.slane %v13252_v29, 6  ;;  %v5798_v49 = vpop.f32.mrf.mxu0 }
 0x2a8   :  { %6017 = vmatpush.bf16.msrb.mxu1 %v10091_v42  ;;  %v11780_v42 = vld [vmem:[#allocation7 + $0x134] sm:$0xf0]  ;;  %v5811_v47 = vpop.f32.mrf.mxu1 }
 0x2a9   :  { %6030 = vmatpush.bf16.msrb.mxu2 %v10411_v44  ;;  %v8294_v44 = vld [vmem:[#allocation7 + $0x390] sm:$0xf]  ;;  %v5799_v45 = vadd.f32 %v5798_v49, %v995_v31  ;;  %v8895_v31 = vor.u32 %v12010_v10, %v8894_v7  ;;  %v11750_v49 = vld [vmem:[#allocation7 + $0x44] sm:$0xf0]  ;;  %v9694_v10 = vld [vmem:[#allocation7 + $0xe80] sm:$0xf] }
 0x2aa   :  { %6043 = vmatpush.bf16.msrb.mxu3 %v10731_v51  ;;  %6005 = vmatmul.bf16.vlgmr.msrb.gmra.mxu0 %v13104_v34  ;;  %v8975_v51 = vor.u32 %v12030_v43, %v8974_v39  ;;  %v12000_v39 = vld [vmem:[#allocation7 + $0x814] sm:$0xf0]  ;;  %v12130_v7 = vld [vmem:[#allocation7 + $0xc24] sm:$0xf0] }
 0x2ab   :  { %6049 = vmatpush.bf16.msra.mxu0 %v8135_v0  ;;  %6018 = vmatmul.bf16.vlgmr.msrb.gmra.mxu1 %v13108_v38  ;;  %v11860_v0 = vld [vmem:[#allocation7 + $0x3b4] sm:$0xf0]  ;;  %v5812_v24 = vadd.f32 %v5811_v47, %v5799_v45  ;;  %v8855_v47 = vor.u32 %v12000_v39, %v8854_v35 }
 0x2ac   :  { %6062 = vmatpush.bf16.msra.mxu1 %v8455_v52  ;;  %6031 = vmatmul.bf16.vlgmr.msrb.gmra.mxu2 %v13116_v16  ;;  %v8614_v52 = vld [vmem:[#allocation7 + $0x610] sm:$0xf]  ;;  %v8295_v5 = vor.u32 %v11860_v0, %v8294_v44  ;;  %v8494_v44 = vld [vmem:[#allocation7 + $0x520] sm:$0xf]  ;;  %v12200_v39 = vld [vmem:[#allocation7 + $0xe54] sm:$0xf0] }
 0x2ad   :  { %6075 = vmatpush.bf16.msra.mxu2 %v8775_v53  ;;  %6044 = vmatmul.bf16.vlgmr.msrb.gmra.mxu3 %v13118_v20  ;;  %v11940_v53 = vld [vmem:[#allocation7 + $0x634] sm:$0xf0]  ;;  %v8814_v0 = vld [vmem:[#allocation7 + $0x7a0] sm:$0xf] }
 0x2ae   :  { %6088 = vmatpush.bf16.msra.mxu3 %v9095_v56  ;;  %v7975_v56 = vor.u32 %v11780_v42, %v7974_v48  ;;  %v8615_v58 = vor.u32 %v11940_v53, %v8614_v52  ;;  %v8174_v48 = vld [vmem:[#allocation7 + $0x2a0] sm:$0xf]  ;;  %v11830_v42 = vld [vmem:[#allocation7 + $0x2c4] sm:$0xf0] }
 0x2af   :  { %6050 = vmatpush.bf16.msra.mxu0 %v8095_v62  ;;  %v5824_v62 = vpop.f32.mrf.mxu2  ;;  %v5800_v19 = vpop.f32.mrf.mxu0  ;;  %v11990_v52 = vld [vmem:[#allocation7 + $0x7c4] sm:$0xf0]  ;;  %v8175_v60 = vor.u32 %v11830_v42, %v8174_v48 }
 0x2b0   :  { %6063 = vmatpush.bf16.msra.mxu1 %v8415_v2  ;;  %v8935_v2 = vor.u32 %v12020_v55, %v8934_v54  ;;  %v5825_v6 = vadd.f32 %v5824_v62, %v5812_v24  ;;  %v5813_v28 = vpop.f32.mrf.mxu1  ;;  %v9414_v54 = vld [vmem:[#allocation7 + $0xc50] sm:$0xf]  ;;  %v12140_v55 = vld [vmem:[#allocation7 + $0xc74] sm:$0xf0]  ;;  %v12210_v19 = vld [vmem:[#allocation7 + $0xea4] sm:$0xf0] }
 0x2b1   :  { %6076 = vmatpush.bf16.msra.mxu2 %v8735_v63  ;;  %v11850_v63 = vld [vmem:[#allocation7 + $0x364] sm:$0xf0]  ;;  %v9734_v24 = vld [vmem:[#allocation7 + $0xed0] sm:$0xf]  ;;  %v9415_v21 = vor.u32 %v12140_v55, %v9414_v54  ;;  %v9695_v28 = vor.u32 %v12210_v19, %v9694_v10  ;;  %v10254_v54 = vld [vmem:[#allocation7 + $0x12e0] sm:$0xf] }
 0x2b2   :  { %6089 = vmatpush.bf16.msra.mxu3 %v9055_v17  ;;  %v5837_v17 = vpop.f32.mrf.mxu3  ;;  %v10374_v62 = vld [vmem:[#allocation7 + $0x13d0] sm:$0xf]  ;;  %v12350_v55 = vld [vmem:[#allocation7 + $0x1304] sm:$0xf0] }
 0x2b3   :  { %6051 = vmatpush.bf16.msra.mxu0 %v8055_v18  ;;  %v13255_v14 = vadd.f32 %v5837_v17, %v5825_v6  ;;  %v8255_v18 = vor.u32 %v11850_v63, %v8254_v61  ;;  %v8815_v63 = vor.u32 %v11990_v52, %v8814_v0  ;;  %v9374_v17 = vld [vmem:[#allocation7 + $0xc00] sm:$0xf]  ;;  %v12190_v0 = vld [vmem:[#allocation7 + $0xe04] sm:$0xf0] }
 0x2b4   :  { %6064 = vmatpush.bf16.msra.mxu1 %v8375_v23  ;;  %v7894_v23 = vld [vmem:[#allocation7 + $0x70] sm:$0xf]  ;;  %v9934_v52 = vld [vmem:[#allocation7 + $0x1060] sm:$0xf] }
 0x2b5   :  { %6077 = vmatpush.bf16.msra.mxu2 %v8695_v26  ;;  %v11760_v26 = vld [vmem:[#allocation7 + $0x94] sm:$0xf0] }
 0x2b6   :  { %6090 = vmatpush.bf16.msra.mxu3 %v9015_v32  ;;  %v11840_v32 = vld [vmem:[#allocation7 + $0x314] sm:$0xf0]  ;;  %v7895_v43 = vor.u32 %v11760_v26, %v7894_v23  ;;  %v10334_v23 = vld [vmem:[#allocation7 + $0x1380] sm:$0xf]  ;;  %v12370_v26 = vld [vmem:[#allocation7 + $0x13a4] sm:$0xf0] }
 0x2b7   :  { %6052 = vmatpush.bf16.msra.mxu0 %v8015_v50  ;;  %v7854_v50 = vld [vmem:[#allocation7 + $0x20] sm:$0xf]  ;;  %v5826_v45 = vpop.f32.mrf.mxu2  ;;  %v10335_v35 = vor.u32 %v12370_v26, %v10334_v23  ;;  %v12090_v23 = vld [vmem:[#allocation7 + $0xae4] sm:$0xf0] }
 0x2b8   :  { %6065 = vmatpush.bf16.msra.mxu1 %v8335_v41  ;;  %v8215_v41 = vor.u32 %v11840_v32, %v8214_v27  ;;  %v9375_v27 = vor.u32 %v12130_v7, %v9374_v17  ;;  %v9334_v32 = vld [vmem:[#allocation7 + $0xbb0] sm:$0xf]  ;;  %v12110_v45 = vld [vmem:[#allocation7 + $0xb84] sm:$0xf0]  ;;  %v12340_v7 = vld [vmem:[#allocation7 + $0x12b4] sm:$0xf0] }
 0x2b9   :  { %6078 = vmatpush.bf16.msra.mxu2 %v8655_v36  ;;  %v8535_v36 = vor.u32 %v11920_v30, %v8534_v33  ;;  %v12120_v33 = vld [vmem:[#allocation7 + $0xbd4] sm:$0xf0]  ;;  %v9654_v30 = vld [vmem:[#allocation7 + $0xe30] sm:$0xf]  ;;  %v9534_v26 = vld [vmem:[#allocation7 + $0xd40] sm:$0xf] }
 0x2ba   :  { %6091 = vmatpush.bf16.msra.mxu3 %v8975_v51  ;;  %v11910_v51 = vld [vmem:[#allocation7 + $0x544] sm:$0xf0]  ;;  %v5839_v53 = vpop.f32.mrf.mxu3  ;;  %v9655_v48 = vor.u32 %v12200_v39, %v9654_v30  ;;  %v10214_v17 = vld [vmem:[#allocation7 + $0x1290] sm:$0xf] }
 0x2bb   :  { %6053 = vmatpush.bf16.msra.mxu0 %v7975_v56  ;;  %v7855_v56 = vor.u32 %v11750_v49, %v7854_v50  ;;  %v8495_v61 = vor.u32 %v11910_v51, %v8494_v44  ;;  %v12280_v50 = vld [vmem:[#allocation7 + $0x10d4] sm:$0xf0]  ;;  %v10294_v49 = vld [vmem:[#allocation7 + $0x1330] sm:$0xf]  ;;  %v9294_v44 = vld [vmem:[#allocation7 + $0xb60] sm:$0xf] }
 0x2bc   :  { %6066 = vmatpush.bf16.msra.mxu1 %v8295_v5  ;;  %v12220_v5 = vld [vmem:[#allocation7 + $0xef4] sm:$0xf0]  ;;  %v12270_v53 = vld [vmem:[#allocation7 + $0x1084] sm:$0xf0] }
 0x2bd   :  { %6079 = vmatpush.bf16.msra.mxu2 %v8615_v58  ;;  %v10054_v58 = vld [vmem:[#allocation7 + $0x1150] sm:$0xf]  ;;  %v9735_v3 = vor.u32 %v12220_v5, %v9734_v24  ;;  %v9295_v24 = vor.u32 %v12110_v45, %v9294_v44  ;;  %v12330_v39 = vld [vmem:[#allocation7 + $0x1264] sm:$0xf0] }
 0x2be   :  { %6092 = vmatpush.bf16.msra.mxu3 %v8935_v2  ;;  %v12380_v2 = vld [vmem:[#allocation7 + $0x13f4] sm:$0xf0]  ;;  %v10055_v6 = vor.u32 %v12300_v59, %v10054_v58  ;;  %v9935_v58 = vor.u32 %v12270_v53, %v9934_v52  ;;  %v9254_v59 = vld [vmem:[#allocation7 + $0xb10] sm:$0xf] }
 0x2bf   :  { %6054 = vmatpush.bf16.msra.mxu0 %v7935_v11  ;;  %v10375_v11 = vor.u32 %v12380_v2, %v10374_v62  ;;  %v9494_v44 = vld [vmem:[#allocation7 + $0xcf0] sm:$0xf]  ;;  %v12240_v52 = vld [vmem:[#allocation7 + $0xf94] sm:$0xf0] }
 0x2c0   :  { %6067 = vmatpush.bf16.msra.mxu1 %v8255_v18  ;;  %v10014_v18 = vld [vmem:[#allocation7 + $0x1100] sm:$0xf]  ;;  %v10134_v53 = vld [vmem:[#allocation7 + $0x11f0] sm:$0xf] }
 0x2c1   :  { %6080 = vmatpush.bf16.msra.mxu2 %v8575_v22  ;;  %v12290_v22 = vld [vmem:[#allocation7 + $0x1124] sm:$0xf0] }
 0x2c2   :  { %6093 = vmatpush.bf16.msra.mxu3 %v8895_v31  ;;  %v10015_v31 = vor.u32 %v12290_v22, %v10014_v18  ;;  %v9214_v22 = vld [vmem:[#allocation7 + $0xac0] sm:$0xf] }
 0x2c3   :  { %6055 = vmatpush.bf16.msra.mxu0 %v7895_v43  ;;  %v9974_v43 = vld [vmem:[#allocation7 + $0x10b0] sm:$0xf] }
 0x2c4   :  { %6068 = vmatpush.bf16.msra.mxu1 %v8215_v41  ;;  %v12360_v41 = vld [vmem:[#allocation7 + $0x1354] sm:$0xf0]  ;;  %v9975_v42 = vor.u32 %v12280_v50, %v9974_v43  ;;  %v9215_v43 = vor.u32 %v12090_v23, %v9214_v22  ;;  %v8136_v22 = vld [vmem:[#allocation7 + $0x278] sm:$0xf0] }
 0x2c5   :  { %6081 = vmatpush.bf16.msra.mxu2 %v8535_v36  ;;  %v9335_v36 = vor.u32 %v12120_v33, %v9334_v32  ;;  %v10295_v51 = vor.u32 %v12360_v41, %v10294_v49  ;;  %v12250_v32 = vld [vmem:[#allocation7 + $0xfe4] sm:$0xf0] }
 0x2c6   :  { %6094 = vmatpush.bf16.msra.mxu3 %v8855_v47  ;;  %v9614_v47 = vld [vmem:[#allocation7 + $0xde0] sm:$0xf] }
 0x2c7   :  { %6056 = vmatpush.bf16.msra.mxu0 %v7855_v56  ;;  %v5850_v56 = vpop.f32.mrf.mxu0  ;;  %v9615_v5 = vor.u32 %v12190_v0, %v9614_v47  ;;  %v9814_v0 = vld [vmem:[#allocation7 + $0xf70] sm:$0xf] }
 0x2c8   :  { %6069 = vmatpush.bf16.msra.mxu1 %v8175_v60  ;;  %v12100_v60 = vld [vmem:[#allocation7 + $0xb34] sm:$0xf0]  ;;  %v5851_v62 = vadd.f32 %v5850_v56, %v13255_v14  ;;  %v5863_v2 = vpop.f32.mrf.mxu1  ;;  %v10215_v14 = vor.u32 %v12340_v7, %v10214_v17  ;;  %v12070_v56 = vld [vmem:[#allocation7 + $0xa44] sm:$0xf0]  ;;  %v10694_v17 = vld [vmem:[#allocation7 + $0x1650] sm:$0xf] }
 0x2c9   :  { %6082 = vmatpush.bf16.msra.mxu2 %v8495_v61  ;;  %v9574_v61 = vld [vmem:[#allocation7 + $0xd90] sm:$0xf]  ;;  %v12460_v7 = vld [vmem:[#allocation7 + $0x1674] sm:$0xf0] }
 0x2ca   :  { %6095 = vmatpush.bf16.msra.mxu3 %v8815_v63  ;;  %6057 = vmatmul.bf16.vlgmr.msra.gmra.mxu0 %v13094_v9  ;;  %v10255_v63 = vor.u32 %v12350_v55, %v10254_v54  ;;  %v5864_v10 = vadd.f32 %v5863_v2, %v5851_v62  ;;  %v12320_v54 = vld [vmem:[#allocation7 + $0x1214] sm:$0xf0] }
 0x2cb   :  { %6101 = vmatpush.bf16.msrb.mxu0 %v9415_v21  ;;  %6070 = vmatmul.bf16.vlgmr.msra.gmra.mxu1 %v13101_v25  ;;  %v12180_v21 = vld [vmem:[#allocation7 + $0xdb4] sm:$0xf0]  ;;  %v10135_v2 = vor.u32 %v12320_v54, %v10134_v53 }
 0x2cc   :  { %6114 = vmatpush.bf16.msrb.mxu1 %v9735_v3  ;;  %6083 = vmatmul.bf16.vlgmr.msra.gmra.mxu2 %v13092_v8  ;;  %v9894_v3 = vld [vmem:[#allocation7 + $0x1010] sm:$0xf]  ;;  %v9575_v19 = vor.u32 %v12180_v21, %v9574_v61  ;;  %v9774_v61 = vld [vmem:[#allocation7 + $0xf20] sm:$0xf]  ;;  %v12520_v54 = vld [vmem:[#allocation7 + $0x1854] sm:$0xf0] }
 0x2cd   :  { %6127 = vmatpush.bf16.msrb.mxu2 %v10055_v6  ;;  %6096 = vmatmul.bf16.vlgmr.msra.gmra.mxu3 %v13096_v15  ;;  %v12260_v6 = vld [vmem:[#allocation7 + $0x1034] sm:$0xf0]  ;;  %v10094_v21 = vld [vmem:[#allocation7 + $0x11a0] sm:$0xf] }
 0x2ce   :  { %6140 = vmatpush.bf16.msrb.mxu3 %v10375_v11  ;;  %v9255_v11 = vor.u32 %v12100_v60, %v9254_v59  ;;  %v9895_v18 = vor.u32 %v12260_v6, %v9894_v3  ;;  %v9454_v59 = vld [vmem:[#allocation7 + $0xca0] sm:$0xf]  ;;  %v12150_v60 = vld [vmem:[#allocation7 + $0xcc4] sm:$0xf0] }
 0x2cf   :  { %6102 = vmatpush.bf16.msrb.mxu0 %v9375_v27  ;;  %v5876_v27 = vpop.f32.mrf.mxu2  ;;  %v5852_v49 = vpop.f32.mrf.mxu0  ;;  %v12310_v3 = vld [vmem:[#allocation7 + $0x11c4] sm:$0xf0]  ;;  %v9455_v23 = vor.u32 %v12150_v60, %v9454_v59 }
 0x2d0   :  { %6115 = vmatpush.bf16.msrb.mxu1 %v9695_v28  ;;  %v12170_v28 = vld [vmem:[#allocation7 + $0xd64] sm:$0xf0]  ;;  %v5877_v33 = vadd.f32 %v5876_v27, %v5864_v10  ;;  %v5889_v30 = vpop.f32.mrf.mxu3  ;;  %v5865_v45 = vpop.f32.mrf.mxu1  ;;  %v11014_v10 = vld [vmem:[#allocation7 + $0x18d0] sm:$0xf]  ;;  %v11895_v27 = vld [vmem:[#allocation7 + $0x4d4] sm:$0xf] }
 0x2d1   :  { %6128 = vmatpush.bf16.msrb.mxu2 %v10015_v31  ;;  %v9854_v31 = vld [vmem:[#allocation7 + $0xfc0] sm:$0xf]  ;;  %v9535_v41 = vor.u32 %v12170_v28, %v9534_v26  ;;  %v10095_v28 = vor.u32 %v12310_v3, %v10094_v21  ;;  %v12530_v49 = vld [vmem:[#allocation7 + $0x18a4] sm:$0xf0]  ;;  %v11785_v3 = vld [vmem:[#allocation7 + $0x164] sm:$0xf] }
 0x2d2   :  { %6141 = vmatpush.bf16.msrb.mxu3 %v10335_v35  ;;  %v10174_v35 = vld [vmem:[#allocation7 + $0x1240] sm:$0xf]  ;;  %v13262_v50 = vadd.f32 %v5889_v30, %v5877_v33  ;;  %v12510_v21 = vld [vmem:[#allocation7 + $0x1804] sm:$0xf0] }
 0x2d3   :  { %6103 = vmatpush.bf16.msrb.mxu0 %v9335_v36  ;;  %v9855_v36 = vor.u32 %v12250_v32, %v9854_v31  ;;  %v10175_v47 = vor.u32 %v12330_v39, %v10174_v35  ;;  %v10695_v31 = vor.u32 %v12460_v7, %v10694_v17  ;;  %v10654_v30 = vld [vmem:[#allocation7 + $0x1600] sm:$0xf]  ;;  %v12450_v35 = vld [vmem:[#allocation7 + $0x1624] sm:$0xf0]  ;;  %v11865_v7 = vld [vmem:[#allocation7 + $0x3e4] sm:$0xf] }
 0x2d4   :  { %6116 = vmatpush.bf16.msrb.mxu1 %v9655_v48  ;;  %v9174_v48 = vld [vmem:[#allocation7 + $0xa70] sm:$0xf]  ;;  %v10974_v39 = vld [vmem:[#allocation7 + $0x1880] sm:$0xf] }
 0x2d5   :  { %6129 = vmatpush.bf16.msrb.mxu2 %v9975_v42  ;;  %v12080_v42 = vld [vmem:[#allocation7 + $0xa94] sm:$0xf0]  ;;  %v10975_v45 = vor.u32 %v12530_v49, %v10974_v39  ;;  %v8296_v39 = vld [vmem:[#allocation7 + $0x3b8] sm:$0xf0] }
 0x2d6   :  { %6142 = vmatpush.bf16.msrb.mxu3 %v10295_v51  ;;  %v12160_v51 = vld [vmem:[#allocation7 + $0xd14] sm:$0xf0]  ;;  %v9175_v55 = vor.u32 %v12080_v42, %v9174_v48  ;;  %v11885_v48 = vld [vmem:[#allocation7 + $0x484] sm:$0xf]  ;;  %v8416_v42 = vld [vmem:[#allocation7 + $0x4a8] sm:$0xf0] }
 0x2d7   :  { %6104 = vmatpush.bf16.msrb.mxu0 %v9295_v24  ;;  %v9134_v24 = vld [vmem:[#allocation7 + $0xa20] sm:$0xf]  ;;  %v5878_v62 = vpop.f32.mrf.mxu2  ;;  %v8419_v53 = vor.u32 %v11885_v48, %v8416_v42  ;;  %v12410_v48 = vld [vmem:[#allocation7 + $0x14e4] sm:$0xf0] }
 0x2d8   :  { %6117 = vmatpush.bf16.msrb.mxu1 %v9615_v5  ;;  %v9495_v5 = vor.u32 %v12160_v51, %v9494_v44  ;;  %v5891_v6 = vpop.f32.mrf.mxu3  ;;  %v10655_v44 = vor.u32 %v12450_v35, %v10654_v30  ;;  %v10614_v51 = vld [vmem:[#allocation7 + $0x15b0] sm:$0xf]  ;;  %v12430_v62 = vld [vmem:[#allocation7 + $0x1584] sm:$0xf0]  ;;  %v7976_v30 = vld [vmem:[#allocation7 + $0x138] sm:$0xf0] }
 0x2d9   :  { %6130 = vmatpush.bf16.msrb.mxu2 %v9935_v58  ;;  %v9815_v58 = vor.u32 %v12240_v52, %v9814_v0  ;;  %v12440_v0 = vld [vmem:[#allocation7 + $0x15d4] sm:$0xf0]  ;;  %v10934_v52 = vld [vmem:[#allocation7 + $0x1830] sm:$0xf]  ;;  %v8016_v6 = vld [vmem:[#allocation7 + $0x188] sm:$0xf0] }
 0x2da   :  { %6143 = vmatpush.bf16.msrb.mxu3 %v10255_v63  ;;  %v12230_v63 = vld [vmem:[#allocation7 + $0xf44] sm:$0xf0]  ;;  %v10935_v59 = vor.u32 %v12520_v54, %v10934_v52  ;;  %v11855_v35 = vld [vmem:[#allocation7 + $0x394] sm:$0xf]  ;;  %v10814_v42 = vld [vmem:[#allocation7 + $0x1740] sm:$0xf] }
 0x2db   :  { %6105 = vmatpush.bf16.msrb.mxu0 %v9255_v11  ;;  %v9135_v11 = vor.u32 %v12070_v56, %v9134_v24  ;;  %v9775_v26 = vor.u32 %v12230_v63, %v9774_v61  ;;  %v8056_v24 = vld [vmem:[#allocation7 + $0x1d8] sm:$0xf0]  ;;  %v11875_v56 = vld [vmem:[#allocation7 + $0x434] sm:$0xf]  ;;  %v10574_v61 = vld [vmem:[#allocation7 + $0x1560] sm:$0xf] }
 0x2dc   :  { %6118 = vmatpush.bf16.msrb.mxu1 %v9575_v19  ;;  %v12540_v19 = vld [vmem:[#allocation7 + $0x18f4] sm:$0xf0]  ;;  %v11845_v52 = vld [vmem:[#allocation7 + $0x344] sm:$0xf] }
 0x2dd   :  { %6131 = vmatpush.bf16.msrb.mxu2 %v9895_v18  ;;  %v11815_v18 = vld [vmem:[#allocation7 + $0x254] sm:$0xf]  ;;  %v11015_v32 = vor.u32 %v12540_v19, %v11014_v10  ;;  %v8336_v10 = vld [vmem:[#allocation7 + $0x408] sm:$0xf0]  ;;  %v10575_v19 = vor.u32 %v12430_v62, %v10574_v61  ;;  %v10774_v61 = vld [vmem:[#allocation7 + $0x16f0] sm:$0xf] }
 0x2de   :  { %6144 = vmatpush.bf16.msrb.mxu3 %v10215_v14  ;;  %v8456_v14 = vld [vmem:[#allocation7 + $0x4f8] sm:$0xf0]  ;;  %v8139_v33 = vor.u32 %v11815_v18, %v8136_v22 }
 0x2df   :  { %6106 = vmatpush.bf16.msrb.mxu0 %v9215_v43  ;;  %v8459_v43 = vor.u32 %v11895_v27, %v8456_v14  ;;  %v12420_v27 = vld [vmem:[#allocation7 + $0x1534] sm:$0xf0]  ;;  %v10854_v14 = vld [vmem:[#allocation7 + $0x1790] sm:$0xf] }
 0x2e0   :  { %6119 = vmatpush.bf16.msrb.mxu1 %v9535_v41  ;;  %v11805_v41 = vld [vmem:[#allocation7 + $0x204] sm:$0xf] }
 0x2e1   :  { %6132 = vmatpush.bf16.msrb.mxu2 %v9855_v36  ;;  %v8096_v36 = vld [vmem:[#allocation7 + $0x228] sm:$0xf0] }
 0x2e2   :  { %6145 = vmatpush.bf16.msrb.mxu3 %v10175_v47  ;;  %v8099_v47 = vor.u32 %v11805_v41, %v8096_v36  ;;  %v10494_v36 = vld [vmem:[#allocation7 + $0x14c0] sm:$0xf] }
 0x2e3   :  { %6107 = vmatpush.bf16.msrb.mxu0 %v9175_v55  ;;  %v11795_v55 = vld [vmem:[#allocation7 + $0x1b4] sm:$0xf] }
 0x2e4   :  { %6120 = vmatpush.bf16.msrb.mxu1 %v9495_v5  ;;  %v8376_v5 = vld [vmem:[#allocation7 + $0x458] sm:$0xf0]  ;;  %v8059_v60 = vor.u32 %v11795_v55, %v8056_v24  ;;  %v10495_v24 = vor.u32 %v12410_v48, %v10494_v36 }
 0x2e5   :  { %6133 = vmatpush.bf16.msrb.mxu2 %v9815_v58  ;;  %v10615_v58 = vor.u32 %v12440_v0, %v10614_v51  ;;  %v8379_v63 = vor.u32 %v11875_v56, %v8376_v5  ;;  %v7936_v51 = vld [vmem:[#allocation7 + $0xe8] sm:$0xf0]  ;;  %v9416_v36 = vld [vmem:[#allocation7 + $0xc78] sm:$0xf0] }
 0x2e6   :  { %6146 = vmatpush.bf16.msrb.mxu3 %v10135_v2  ;;  %v10894_v2 = vld [vmem:[#allocation7 + $0x17e0] sm:$0xf] }
 0x2e7   :  { %6108 = vmatpush.bf16.msrb.mxu0 %v9135_v11  ;;  %v5902_v17 = vpop.f32.mrf.mxu0  ;;  %v10895_v22 = vor.u32 %v12510_v21, %v10894_v2  ;;  %v11755_v21 = vld [vmem:[#allocation7 + $0x74] sm:$0xf] }
 0x2e8   :  { %6121 = vmatpush.bf16.msrb.mxu1 %v9455_v23  ;;  %v5903_v11 = vadd.f32 %v5902_v17, %v13262_v50  ;;  %v5915_v18 = vpop.f32.mrf.mxu1  ;;  %v8019_v23 = vor.u32 %v11785_v3, %v8016_v6  ;;  %v996_v50 = vperm.slane %v13252_v29, 7  ;;  %v7896_v3 = vld [vmem:[#allocation7 + $0x98] sm:$0xf0]  ;;  %v11835_v6 = vld [vmem:[#allocation7 + $0x2f4] sm:$0xf] }
 0x2e9   :  { %6134 = vmatpush.bf16.msrb.mxu2 %v9775_v26  ;;  %v10534_v26 = vld [vmem:[#allocation7 + $0x1510] sm:$0xf]  ;;  %v8216_v17 = vld [vmem:[#allocation7 + $0x318] sm:$0xf0] }
 0x2ea   :  { %6147 = vmatpush.bf16.msrb.mxu3 %v10095_v28  ;;  %6109 = vmatmul.bf16.vlgmr.msrb.gmra.mxu0 %v13106_v37  ;;  %v8339_v28 = vor.u32 %v11865_v7, %v8336_v10  ;;  %v10414_v10 = vld [vmem:[#allocation7 + $0x1420] sm:$0xf] }
 0x2eb   :  { %6153 = vmatpush.bf16.msra.mxu0 %v10695_v31  ;;  %6122 = vmatmul.bf16.vlgmr.msrb.gmra.mxu1 %v13110_v40  ;;  %v13269_v31 = vadd.f32 %v5915_v18, %v5903_v11  ;;  %v12390_v11 = vld [vmem:[#allocation7 + $0x1444] sm:$0xf0]  ;;  %v7899_v18 = vor.u32 %v11755_v21, %v7896_v3  ;;  %v8696_v21 = vld [vmem:[#allocation7 + $0x6d8] sm:$0xf0]  ;;  %v12035_v3 = vld [vmem:[#allocation7 + $0x934] sm:$0xf] }
 0x2ec   :  { %6166 = vmatpush.bf16.msra.mxu1 %v11015_v32  ;;  %6135 = vmatmul.bf16.vlgmr.msrb.gmra.mxu2 %v13104_v34  ;;  %v12500_v32 = vld [vmem:[#allocation7 + $0x17b4] sm:$0xf0] }
 0x2ed   :  { %6179 = vmatpush.bf16.msra.mxu2 %v8139_v33  ;;  %6148 = vmatmul.bf16.vlgmr.msrb.gmra.mxu3 %v13108_v38  ;;  %v11775_v33 = vld [vmem:[#allocation7 + $0x114] sm:$0xf]  ;;  %v10855_v49 = vor.u32 %v12500_v32, %v10854_v14  ;;  %v7856_v14 = vld [vmem:[#allocation7 + $0x48] sm:$0xf0]  ;;  %vm6315_vm6 = vcmp.gt.f32.partialorder %v13269_v31, 0.0 }
 0x2ee   :  { %6192 = vmatpush.bf16.msra.mxu3 %v8459_v43  ;;  %v10535_v43 = vor.u32 %v12420_v27, %v10534_v26  ;;  %v7979_v41 = vor.u32 %v11775_v33, %v7976_v30  ;;  %v11745_v26 = vld [vmem:[#allocation7 + $0x24] sm:$0xf]  ;;  %v8219_v27 = vor.u32 %v11835_v6, %v8216_v17  ;;  %v8176_v32 = vld [vmem:[#allocation7 + $0x2c8] sm:$0xf0]  ;;  %v11975_v30 = vld [vmem:[#allocation7 + $0x754] sm:$0xf] }
 0x2ef   :  { %6154 = vmatpush.bf16.msra.mxu0 %v10655_v44  ;;  %v8299_v44 = vor.u32 %v11855_v35, %v8296_v39  ;;  %v5928_v0 = vpop.f32.mrf.mxu2  ;;  %v5904_v29 = vpop.f32.mrf.mxu0  ;;  %v8776_v35 = vld [vmem:[#allocation7 + $0x778] sm:$0xf0]  ;;  %v12055_v39 = vld [vmem:[#allocation7 + $0x9d4] sm:$0xf] }
 0x2f0   :  { %6167 = vmatpush.bf16.msra.mxu1 %v10975_v45  ;;  %v12490_v45 = vld [vmem:[#allocation7 + $0x1764] sm:$0xf0]  ;;  %v5929_v54 = vadd.f32 %v5928_v0, %v996_v50  ;;  %v5941_v55 = vpop.f32.mrf.mxu3  ;;  %v5917_v56 = vpop.f32.mrf.mxu1  ;;  %v9016_v17 = vld [vmem:[#allocation7 + $0x958] sm:$0xf0] }
 0x2f1   :  { %6180 = vmatpush.bf16.msra.mxu2 %v8099_v47  ;;  %v11765_v47 = vld [vmem:[#allocation7 + $0xc4] sm:$0xf]  ;;  %v10815_v5 = vor.u32 %v12490_v45, %v10814_v42  ;;  %v7859_v42 = vor.u32 %v11745_v26, %v7856_v14  ;;  %v9736_v45 = vld [vmem:[#allocation7 + $0xef8] sm:$0xf0] }
 0x2f2   :  { %6193 = vmatpush.bf16.msra.mxu3 %v8419_v53  ;;  %v8256_v53 = vld [vmem:[#allocation7 + $0x368] sm:$0xf0]  ;;  %v13272_v62 = vadd.f32 %v5941_v55, %v5929_v54  ;;  %v12045_v55 = vld [vmem:[#allocation7 + $0x984] sm:$0xf] }
 0x2f3   :  { %6155 = vmatpush.bf16.msra.mxu0 %v10615_v58  ;;  %v7939_v58 = vor.u32 %v11765_v47, %v7936_v51  ;;  %v8259_v2 = vor.u32 %v11845_v52, %v8256_v53  ;;  %v8779_v51 = vor.u32 %v11975_v30, %v8776_v35  ;;  %v11965_v53 = vld [vmem:[#allocation7 + $0x704] sm:$0xf]  ;;  %v8736_v54 = vld [vmem:[#allocation7 + $0x728] sm:$0xf0] }
 0x2f4   :  { %6168 = vmatpush.bf16.msra.mxu1 %v10935_v59  ;;  %v10454_v59 = vld [vmem:[#allocation7 + $0x1470] sm:$0xf]  ;;  %v12125_v56 = vld [vmem:[#allocation7 + $0xc04] sm:$0xf]  ;;  %v9296_v30 = vld [vmem:[#allocation7 + $0xb88] sm:$0xf0] }
 0x2f5   :  { %6181 = vmatpush.bf16.msra.mxu2 %v8059_v60  ;;  %v12400_v60 = vld [vmem:[#allocation7 + $0x1494] sm:$0xf0]  ;;  %v11945_v26 = vld [vmem:[#allocation7 + $0x664] sm:$0xf] }
 0x2f6   :  { %6194 = vmatpush.bf16.msra.mxu3 %v8379_v63  ;;  %v12480_v63 = vld [vmem:[#allocation7 + $0x1714] sm:$0xf0]  ;;  %v10455_v7 = vor.u32 %v12400_v60, %v10454_v59  ;;  %v9696_v59 = vld [vmem:[#allocation7 + $0xea8] sm:$0xf0]  ;;  %v8739_v60 = vor.u32 %v11965_v53, %v8736_v54  ;;  %v12025_v14 = vld [vmem:[#allocation7 + $0x8e4] sm:$0xf] }
 0x2f7   :  { %6156 = vmatpush.bf16.msra.mxu0 %v10575_v19  ;;  %v10775_v19 = vor.u32 %v12480_v63, %v10774_v61  ;;  %v5930_v33 = vpop.f32.mrf.mxu2  ;;  %v11955_v63 = vld [vmem:[#allocation7 + $0x6b4] sm:$0xf]  ;;  %v12185_v35 = vld [vmem:[#allocation7 + $0xde4] sm:$0xf] }
 0x2f8   :  { %6169 = vmatpush.bf16.msra.mxu1 %v10895_v22  ;;  %v10734_v22 = vld [vmem:[#allocation7 + $0x16a0] sm:$0xf]  ;;  %v5943_v50 = vpop.f32.mrf.mxu3  ;;  %v12105_v33 = vld [vmem:[#allocation7 + $0xb64] sm:$0xf] }
 0x2f9   :  { %6182 = vmatpush.bf16.msra.mxu2 %v8019_v23  ;;  %v12470_v23 = vld [vmem:[#allocation7 + $0x16c4] sm:$0xf0] }
 0x2fa   :  { %6195 = vmatpush.bf16.msra.mxu3 %v8339_v28  ;;  %v11825_v28 = vld [vmem:[#allocation7 + $0x2a4] sm:$0xf]  ;;  %v10735_v48 = vor.u32 %v12470_v23, %v10734_v22  ;;  %v9019_v22 = vor.u32 %v12035_v3, %v9016_v17  ;;  %v9536_v3 = vld [vmem:[#allocation7 + $0xd68] sm:$0xf0] }
 0x2fb   :  { %6157 = vmatpush.bf16.msra.mxu0 %v10535_v43  ;;  %v10415_v43 = vor.u32 %v12390_v11, %v10414_v10  ;;  %v8179_v47 = vor.u32 %v11825_v28, %v8176_v32  ;;  %v9336_v10 = vld [vmem:[#allocation7 + $0xbd8] sm:$0xf0]  ;;  %v12195_v11 = vld [vmem:[#allocation7 + $0xe34] sm:$0xf]  ;;  %v8976_v32 = vld [vmem:[#allocation7 + $0x908] sm:$0xf0] }
 0x2fc   :  { %6170 = vmatpush.bf16.msra.mxu1 %v10855_v49  ;;  %v9096_v49 = vld [vmem:[#allocation7 + $0x9f8] sm:$0xf0] }
 0x2fd   :  { %6183 = vmatpush.bf16.msra.mxu2 %v7979_v41  ;;  %v12135_v41 = vld [vmem:[#allocation7 + $0xc54] sm:$0xf]  ;;  %v9099_v0 = vor.u32 %v12055_v39, %v9096_v49  ;;  %v9616_v39 = vld [vmem:[#allocation7 + $0xe08] sm:$0xf0] }
 0x2fe   :  { %6196 = vmatpush.bf16.msra.mxu3 %v8299_v44  ;;  %v12215_v44 = vld [vmem:[#allocation7 + $0xed4] sm:$0xf]  ;;  %v9419_v52 = vor.u32 %v12135_v41, %v9416_v36  ;;  %v8616_v41 = vld [vmem:[#allocation7 + $0x638] sm:$0xf0] }
 0x2ff   :  { %6158 = vmatpush.bf16.msra.mxu0 %v10495_v24  ;;  %v9739_v29 = vor.u32 %v12215_v44, %v9736_v45  ;;  %v9056_v24 = vld [vmem:[#allocation7 + $0x9a8] sm:$0xf0]  ;;  %v11935_v49 = vld [vmem:[#allocation7 + $0x614] sm:$0xf]  ;;  %v9619_v44 = vor.u32 %v12185_v35, %v9616_v39  ;;  %v8936_v45 = vld [vmem:[#allocation7 + $0x8b8] sm:$0xf0] }
 0x300   :  { %6171 = vmatpush.bf16.msra.mxu1 %v10815_v5  ;;  %v9376_v5 = vld [vmem:[#allocation7 + $0xc28] sm:$0xf0]  ;;  %v9059_v61 = vor.u32 %v12045_v55, %v9056_v24  ;;  %v12015_v36 = vld [vmem:[#allocation7 + $0x894] sm:$0xf]  ;;  %v8619_v54 = vor.u32 %v11935_v49, %v8616_v41  ;;  %v11925_v24 = vld [vmem:[#allocation7 + $0x5c4] sm:$0xf] }
 0x301   :  { %6184 = vmatpush.bf16.msra.mxu2 %v7939_v58  ;;  %v12205_v58 = vld [vmem:[#allocation7 + $0xe84] sm:$0xf]  ;;  %v8939_v55 = vor.u32 %v12015_v36, %v8936_v45  ;;  %v8496_v39 = vld [vmem:[#allocation7 + $0x548] sm:$0xf0] }
 0x302   :  { %6197 = vmatpush.bf16.msra.mxu3 %v8259_v2  ;;  %v9379_v2 = vor.u32 %v12125_v56, %v9376_v5  ;;  %v9699_v6 = vor.u32 %v12205_v58, %v9696_v59  ;;  %v8576_v56 = vld [vmem:[#allocation7 + $0x5e8] sm:$0xf0]  ;;  %v12005_v5 = vld [vmem:[#allocation7 + $0x844] sm:$0xf] }
 0x303   :  { %6159 = vmatpush.bf16.msra.mxu0 %v10455_v7  ;;  %v12115_v7 = vld [vmem:[#allocation7 + $0xbb4] sm:$0xf]  ;;  %v8896_v59 = vld [vmem:[#allocation7 + $0x868] sm:$0xf0]  ;;  %v11905_v35 = vld [vmem:[#allocation7 + $0x524] sm:$0xf] }
 0x304   :  { %6172 = vmatpush.bf16.msra.mxu1 %v10775_v19  ;;  %v9656_v19 = vld [vmem:[#allocation7 + $0xe58] sm:$0xf0]  ;;  %v9339_v23 = vor.u32 %v12115_v7, %v9336_v10  ;;  %v8899_v10 = vor.u32 %v12005_v5, %v8896_v59  ;;  %v12065_v49 = vld [vmem:[#allocation7 + $0xa24] sm:$0xf] }
 0x305   :  { %6185 = vmatpush.bf16.msra.mxu2 %v7899_v18  ;;  %v8699_v18 = vor.u32 %v11955_v63, %v8696_v21  ;;  %v9659_v28 = vor.u32 %v12195_v11, %v9656_v19  ;;  %v12165_v21 = vld [vmem:[#allocation7 + $0xd44] sm:$0xf]  ;;  %v11915_v19 = vld [vmem:[#allocation7 + $0x574] sm:$0xf]  ;;  %v11016_v5 = vld [vmem:[#allocation7 + $0x18f8] sm:$0xf0] }
 0x306   :  { %6198 = vmatpush.bf16.msra.mxu3 %v8219_v27  ;;  %v8656_v27 = vld [vmem:[#allocation7 + $0x688] sm:$0xf0] }
 0x307   :  { %6160 = vmatpush.bf16.msra.mxu0 %v10415_v43  ;;  %v5954_v50 = vpop.f32.mrf.mxu0  ;;  %v9299_v43 = vor.u32 %v12105_v33, %v9296_v30  ;;  %v9496_v33 = vld [vmem:[#allocation7 + $0xd18] sm:$0xf0] }
 0x308   :  { %6173 = vmatpush.bf16.msra.mxu1 %v10735_v48  ;;  %v5955_v48 = vadd.f32 %v5954_v50, %v13272_v62 }
 0x309   :  { %6186 = vmatpush.bf16.msra.mxu2 %v7859_v42  ;;  %v5967_v42 = vpop.f32.mrf.mxu1 }
 0x30a   :  { %6199 = vmatpush.bf16.msra.mxu3 %v8179_v47  ;;  %6161 = vmatmul.bf16.vlgmr.msra.gmra.mxu0 %v13116_v16  ;;  %v12095_v47 = vld [vmem:[#allocation7 + $0xb14] sm:$0xf]  ;;  %v5968_v53 = vadd.f32 %v5967_v42, %v5955_v48  ;;  %v9136_v48 = vld [vmem:[#allocation7 + $0xa48] sm:$0xf0]  ;;  %v12145_v42 = vld [vmem:[#allocation7 + $0xca4] sm:$0xf] }
 0x30b   :  { %6205 = vmatpush.bf16.msrb.mxu0 %v8779_v51  ;;  %6174 = vmatmul.bf16.vlgmr.msra.gmra.mxu1 %v13118_v20  ;;  %v9256_v51 = vld [vmem:[#allocation7 + $0xb38] sm:$0xf0] }
 0x30c   :  { %6218 = vmatpush.bf16.msrb.mxu1 %v9099_v0  ;;  %6187 = vmatmul.bf16.vlgmr.msra.gmra.mxu2 %v13094_v9  ;;  %v8659_v9 = vor.u32 %v11945_v26, %v8656_v27  ;;  %v12175_v0 = vld [vmem:[#allocation7 + $0xd94] sm:$0xf]  ;;  %v9539_v26 = vor.u32 %v12165_v21, %v9536_v3  ;;  %v8856_v27 = vld [vmem:[#allocation7 + $0x818] sm:$0xf0]  ;;  %v10336_v3 = vld [vmem:[#allocation7 + $0x13a8] sm:$0xf0] }
 0x30d   :  { %6231 = vmatpush.bf16.msrb.mxu2 %v9419_v52  ;;  %6200 = vmatmul.bf16.vlgmr.msra.gmra.mxu3 %v13101_v25  ;;  %v8979_v25 = vor.u32 %v12025_v14, %v8976_v32  ;;  %v9576_v52 = vld [vmem:[#allocation7 + $0xdb8] sm:$0xf0]  ;;  %v12075_v14 = vld [vmem:[#allocation7 + $0xa74] sm:$0xf] }
 0x30e   :  { %6244 = vmatpush.bf16.msrb.mxu3 %v9739_v29  ;;  %v9259_v29 = vor.u32 %v12095_v47, %v9256_v51  ;;  %v9579_v62 = vor.u32 %v12175_v0, %v9576_v52  ;;  %v12155_v32 = vld [vmem:[#allocation7 + $0xcf4] sm:$0xf]  ;;  %v10056_v51 = vld [vmem:[#allocation7 + $0x1178] sm:$0xf0]  ;;  %v8499_v52 = vor.u32 %v11905_v35, %v8496_v39 }
 0x30f   :  { %6206 = vmatpush.bf16.msrb.mxu0 %v8739_v60  ;;  %v5980_v58 = vpop.f32.mrf.mxu2  ;;  %v12085_v60 = vld [vmem:[#allocation7 + $0xac4] sm:$0xf]  ;;  %v5956_v7 = vpop.f32.mrf.mxu0  ;;  %v9499_v36 = vor.u32 %v12155_v32, %v9496_v33  ;;  %v12295_v47 = vld [vmem:[#allocation7 + $0x1154] sm:$0xf]  ;;  %v10616_v33 = vld [vmem:[#allocation7 + $0x15d8] sm:$0xf0] }
 0x310   :  { %6219 = vmatpush.bf16.msrb.mxu1 %v9059_v61  ;;  %v9216_v61 = vld [vmem:[#allocation7 + $0xae8] sm:$0xf0]  ;;  %v5993_v63 = vpop.f32.mrf.mxu3  ;;  %v12375_v0 = vld [vmem:[#allocation7 + $0x13d4] sm:$0xf]  ;;  %v10936_v35 = vld [vmem:[#allocation7 + $0x1858] sm:$0xf0] }
 0x311   :  { %6232 = vmatpush.bf16.msrb.mxu2 %v9379_v2  ;;  %v5981_v2 = vadd.f32 %v5980_v58, %v5968_v53  ;;  %v9219_v11 = vor.u32 %v12085_v60, %v9216_v61  ;;  %v10376_v53 = vld [vmem:[#allocation7 + $0x13f8] sm:$0xf0]  ;;  %v12285_v61 = vld [vmem:[#allocation7 + $0x1104] sm:$0xf]  ;;  %v10656_v7 = vld [vmem:[#allocation7 + $0x1628] sm:$0xf0] }
 0x312   :  { %6245 = vmatpush.bf16.msrb.mxu3 %v9699_v6  ;;  %v8579_v6 = vor.u32 %v11925_v24, %v8576_v56  ;;  %v9139_v24 = vor.u32 %v12065_v49, %v9136_v48  ;;  %v12535_v56 = vld [vmem:[#allocation7 + $0x18d4] sm:$0xf]  ;;  %v10379_v59 = vor.u32 %v12375_v0, %v10376_v53  ;;  %v10576_v48 = vld [vmem:[#allocation7 + $0x1588] sm:$0xf0] }
 0x313   :  { %6207 = vmatpush.bf16.msrb.mxu0 %v8699_v18  ;;  %v13279_v17 = vadd.f32 %v5993_v63, %v5981_v2  ;;  %v8536_v18 = vld [vmem:[#allocation7 + $0x598] sm:$0xf0]  ;;  %v10016_v2 = vld [vmem:[#allocation7 + $0x1128] sm:$0xf0]  ;;  %v12365_v63 = vld [vmem:[#allocation7 + $0x1384] sm:$0xf]  ;;  %v11019_v21 = vor.u32 %v12535_v56, %v11016_v5 }
 0x314   :  { %6220 = vmatpush.bf16.msrb.mxu1 %v9019_v22  ;;  %v11995_v22 = vld [vmem:[#allocation7 + $0x7f4] sm:$0xf]  ;;  %v8539_v30 = vor.u32 %v11915_v19, %v8536_v18  ;;  %v10019_v19 = vor.u32 %v12285_v61, %v10016_v2  ;;  %v10339_v18 = vor.u32 %v12365_v63, %v10336_v3  ;;  %v10536_v56 = vld [vmem:[#allocation7 + $0x1538] sm:$0xf0]  ;;  %v9856_v61 = vld [vmem:[#allocation7 + $0xfe8] sm:$0xf0] }
 0x315   :  { %6233 = vmatpush.bf16.msrb.mxu2 %v9339_v23  ;;  %v5969_v23 = vpop.f32.mrf.mxu1  ;;  %v12435_v32 = vld [vmem:[#allocation7 + $0x15b4] sm:$0xf]  ;;  %v12325_v2 = vld [vmem:[#allocation7 + $0x1244] sm:$0xf]  ;;  %v10176_v3 = vld [vmem:[#allocation7 + $0x1268] sm:$0xf0] }
 0x316   :  { %6246 = vmatpush.bf16.msrb.mxu3 %v9659_v28  ;;  %v9176_v28 = vld [vmem:[#allocation7 + $0xa98] sm:$0xf0]  ;;  %v12275_v23 = vld [vmem:[#allocation7 + $0x10b4] sm:$0xf] }
 0x317   :  { %6208 = vmatpush.bf16.msrb.mxu0 %v8659_v9  ;;  %v8859_v9 = vor.u32 %v11995_v22, %v8856_v27  ;;  %v9179_v50 = vor.u32 %v12075_v14, %v9176_v28  ;;  %v5982_v41 = vpop.f32.mrf.mxu2  ;;  %v12355_v27 = vld [vmem:[#allocation7 + $0x1334] sm:$0xf]  ;;  %v10296_v28 = vld [vmem:[#allocation7 + $0x1358] sm:$0xf0] }
 0x318   :  { %6221 = vmatpush.bf16.msrb.mxu1 %v8979_v25  ;;  %v11985_v25 = vld [vmem:[#allocation7 + $0x7a4] sm:$0xf]  ;;  %v5995_v45 = vpop.f32.mrf.mxu3  ;;  %v10256_v41 = vld [vmem:[#allocation7 + $0x1308] sm:$0xf0]  ;;  %v12255_v0 = vld [vmem:[#allocation7 + $0x1014] sm:$0xf] }
 0x319   :  { %6234 = vmatpush.bf16.msrb.mxu2 %v9299_v43  ;;  %v8816_v43 = vld [vmem:[#allocation7 + $0x7c8] sm:$0xf0]  ;;  %v12335_v53 = vld [vmem:[#allocation7 + $0x1294] sm:$0xf] }
 0x31a   :  { %6247 = vmatpush.bf16.msrb.mxu3 %v9619_v44  ;;  %v9456_v44 = vld [vmem:[#allocation7 + $0xcc8] sm:$0xf0]  ;;  %v12495_v5 = vld [vmem:[#allocation7 + $0x1794] sm:$0xf] }
 0x31b   :  { %6209 = vmatpush.bf16.msrb.mxu0 %v8619_v54  ;;  %v12455_v54 = vld [vmem:[#allocation7 + $0x1654] sm:$0xf]  ;;  %v9459_v58 = vor.u32 %v12145_v42, %v9456_v44  ;;  %v10896_v44 = vld [vmem:[#allocation7 + $0x1808] sm:$0xf0] }
 0x31c   :  { %6222 = vmatpush.bf16.msrb.mxu1 %v8939_v55  ;;  %v10696_v55 = vld [vmem:[#allocation7 + $0x1678] sm:$0xf0] }
 0x31d   :  { %6235 = vmatpush.bf16.msrb.mxu2 %v9259_v29  ;;  %v8819_v29 = vor.u32 %v11985_v25, %v8816_v43  ;;  %v10699_v60 = vor.u32 %v12455_v54, %v10696_v55  ;;  %v12265_v25 = vld [vmem:[#allocation7 + $0x1064] sm:$0xf]  ;;  %v9936_v43 = vld [vmem:[#allocation7 + $0x1088] sm:$0xf0] }
 0x31e   :  { %6248 = vmatpush.bf16.msrb.mxu3 %v9579_v62  ;;  %v10059_v62 = vor.u32 %v12295_v47, %v10056_v51  ;;  %v9939_v45 = vor.u32 %v12265_v25, %v9936_v43  ;;  %v12475_v25 = vld [vmem:[#allocation7 + $0x16f4] sm:$0xf]  ;;  %v10776_v43 = vld [vmem:[#allocation7 + $0x1718] sm:$0xf0] }
 0x31f   :  { %6210 = vmatpush.bf16.msrb.mxu0 %v8579_v6  ;;  %v12445_v6 = vld [vmem:[#allocation7 + $0x1604] sm:$0xf] }
 0x320   :  { %6223 = vmatpush.bf16.msrb.mxu1 %v8899_v10  ;;  %v12525_v10 = vld [vmem:[#allocation7 + $0x1884] sm:$0xf]  ;;  %v10659_v22 = vor.u32 %v12445_v6, %v10656_v7  ;;  %v10496_v7 = vld [vmem:[#allocation7 + $0x14e8] sm:$0xf0] }
 0x321   :  { %6236 = vmatpush.bf16.msrb.mxu2 %v9219_v11  ;;  %v10976_v11 = vld [vmem:[#allocation7 + $0x18a8] sm:$0xf0]  ;;  %v12405_v6 = vld [vmem:[#allocation7 + $0x14c4] sm:$0xf] }
 0x322   :  { %6249 = vmatpush.bf16.msrb.mxu3 %v9539_v26  ;;  %v9976_v26 = vld [vmem:[#allocation7 + $0x10d8] sm:$0xf0]  ;;  %v10979_v14 = vor.u32 %v12525_v10, %v10976_v11 }
 0x323   :  { %6211 = vmatpush.bf16.msrb.mxu0 %v8539_v30  ;;  %v12515_v30 = vld [vmem:[#allocation7 + $0x1834] sm:$0xf]  ;;  %v9979_v39 = vor.u32 %v12275_v23, %v9976_v26 }
 0x324   :  { %6224 = vmatpush.bf16.msrb.mxu1 %v8859_v9  ;;  %v10299_v9 = vor.u32 %v12355_v27, %v10296_v28  ;;  %v10939_v49 = vor.u32 %v12515_v30, %v10936_v35  ;;  %v10499_v28 = vor.u32 %v12405_v6, %v10496_v7  ;;  %v12315_v30 = vld [vmem:[#allocation7 + $0x11f4] sm:$0xf] }
 0x325   :  { %6237 = vmatpush.bf16.msrb.mxu2 %v9179_v50  ;;  %v10619_v50 = vor.u32 %v12435_v32, %v10616_v33  ;;  %v12235_v32 = vld [vmem:[#allocation7 + $0xf74] sm:$0xf]  ;;  %v9816_v33 = vld [vmem:[#allocation7 + $0xf98] sm:$0xf0] }
 0x326   :  { %6250 = vmatpush.bf16.msrb.mxu3 %v9499_v36  ;;  %v12425_v36 = vld [vmem:[#allocation7 + $0x1564] sm:$0xf]  ;;  %v12570_v7 = vld [vmem:[#allocation10 + $0xe4] sm:$0xf0] }
 0x327   :  { %6212 = vmatpush.bf16.msrb.mxu0 %v8499_v52  ;;  %v6006_v42 = vpop.f32.mrf.mxu0  ;;  %v10579_v51 = vor.u32 %v12425_v36, %v10576_v48  ;;  %v9896_v52 = vld [vmem:[#allocation7 + $0x1038] sm:$0xf0] }
 0x328   :  { %6225 = vmatpush.bf16.msrb.mxu1 %v8819_v29  ;;  %v10216_v29 = vld [vmem:[#allocation7 + $0x12b8] sm:$0xf0] }
 0x329   :  { %6238 = vmatpush.bf16.msrb.mxu2 %v9139_v24  ;;  %v12415_v24 = vld [vmem:[#allocation7 + $0x1514] sm:$0xf] }
 0x32a   :  { %6251 = vmatpush.bf16.msrb.mxu3 %v9459_v58  ;;  %6213 = vmatmul.bf16.vlgmr.msrb.gmra.mxu0 %v13092_v8  ;;  %v12505_v8 = vld [vmem:[#allocation7 + $0x17e4] sm:$0xf]  ;;  %v10856_v58 = vld [vmem:[#allocation7 + $0x17b8] sm:$0xf0] }
 0x32b   :  { %6257 = vmatpush.bf16.msra.mxu0 %v10059_v62  ;;  %6226 = vmatmul.bf16.vlgmr.msrb.gmra.mxu1 %v13096_v15  ;;  %v6019_v15 = vpop.f32.mrf.mxu1  ;;  %v10899_v54 = vor.u32 %v12505_v8, %v10896_v44  ;;  %v9899_v62 = vor.u32 %v12255_v0, %v9896_v52  ;;  %v10859_v63 = vor.u32 %v12495_v5, %v10856_v58  ;;  %v10096_v8 = vld [vmem:[#allocation7 + $0x11c8] sm:$0xf0]  ;;  %v12385_v44 = vld [vmem:[#allocation7 + $0x1424] sm:$0xf]  ;;  %v11078_v0 = vld [vmem:[#allocation10 + $0x70] sm:$0xf] }
 0x32c   :  { %6270 = vmatpush.bf16.msra.mxu1 %v10379_v59  ;;  %6239 = vmatmul.bf16.vlgmr.msrb.gmra.mxu2 %v13106_v37  ;;  %v12345_v37 = vld [vmem:[#allocation7 + $0x12e4] sm:$0xf]  ;;  %v10539_v59 = vor.u32 %v12415_v24, %v10536_v56  ;;  %v11206_v24 = vld [vmem:[#allocation10 + $0x170] sm:$0xf] }
 0x32d   :  { %6283 = vmatpush.bf16.msra.mxu2 %v10699_v60  ;;  %6252 = vmatmul.bf16.vlgmr.msrb.gmra.mxu3 %v13110_v40  ;;  %v6007_v40 = vadd.f32 %v6006_v42, %v13279_v17  ;;  %v10259_v47 = vor.u32 %v12345_v37, %v10256_v41  ;;  %v10219_v17 = vor.u32 %v12335_v53, %v10216_v29  ;;  %v12245_v60 = vld [vmem:[#allocation7 + $0xfc4] sm:$0xf]  ;;  %v9776_v41 = vld [vmem:[#allocation7 + $0xf48] sm:$0xf0]  ;;  %v11142_v53 = vld [vmem:[#allocation10 + $0xf0] sm:$0xf] }
 0x32e   :  { %6296 = vmatpush.bf16.msra.mxu3 %v11019_v21  ;;  %v9859_v23 = vor.u32 %v12245_v60, %v9856_v61  ;;  %v9819_v37 = vor.u32 %v12235_v32, %v9816_v33  ;;  %v12305_v42 = vld [vmem:[#allocation7 + $0x11a4] sm:$0xf]  ;;  %v11126_v32 = vld [vmem:[#allocation10 + $0xd0] sm:$0xf] }
 0x32f   :  { %6258 = vmatpush.bf16.msra.mxu0 %v10019_v19  ;;  %v6020_v55 = vadd.f32 %v6019_v15, %v6007_v40  ;;  %v6032_v21 = vpop.f32.mrf.mxu2  ;;  %v12485_v19 = vld [vmem:[#allocation7 + $0x1744] sm:$0xf]  ;;  %v10779_v40 = vor.u32 %v12475_v25, %v10776_v43  ;;  %v10099_v5 = vor.u32 %v12305_v42, %v10096_v8  ;;  %v11182_v42 = vld [vmem:[#allocation10 + $0x140] sm:$0xf] }
 0x330   :  { %6271 = vmatpush.bf16.msra.mxu1 %v10339_v18  ;;  %v6045_v11 = vpop.f32.mrf.mxu3  ;;  %v10816_v18 = vld [vmem:[#allocation7 + $0x1768] sm:$0xf0]  ;;  %v12465_v15 = vld [vmem:[#allocation7 + $0x16a4] sm:$0xf] }
 0x331   :  { %6284 = vmatpush.bf16.msra.mxu2 %v10659_v22  ;;  %v6033_v10 = vadd.f32 %v6032_v21, %v6020_v55  ;;  %v6008_v22 = vpop.f32.mrf.mxu0  ;;  %v10819_v35 = vor.u32 %v12485_v19, %v10816_v18  ;;  %v12556_v52 = vld [vmem:[#allocation10 + $0x74] sm:$0xf0]  ;;  %v12554_v21 = vld [vmem:[#allocation10 + $0x64] sm:$0xf0]  ;;  %v11262_v19 = vld [vmem:[#allocation10 + $0x1e0] sm:$0xf] }
 0x332   :  { %6297 = vmatpush.bf16.msra.mxu3 %v10979_v14  ;;  %v10179_v14 = vor.u32 %v12325_v2, %v10176_v3  ;;  %v12572_v29 = vld [vmem:[#allocation10 + $0xf4] sm:$0xf0]  ;;  %v11079_v60 = vor.u32 %v12556_v52, %v11078_v0  ;;  %v11134_v3 = vld [vmem:[#allocation10 + $0xe0] sm:$0xf]  ;;  %v12602_v18 = vld [vmem:[#allocation10 + $0x1e4] sm:$0xf0] }
 0x333   :  { %6259 = vmatpush.bf16.msra.mxu0 %v9979_v39  ;;  %v6021_v26 = vpop.f32.mrf.mxu1  ;;  %v13286_v27 = vadd.f32 %v6045_v11, %v6033_v10  ;;  %v10136_v39 = vld [vmem:[#allocation7 + $0x1218] sm:$0xf0]  ;;  %v12588_v56 = vld [vmem:[#allocation10 + $0x174] sm:$0xf0]  ;;  %v11143_v61 = vor.u32 %v12572_v29, %v11142_v53  ;;  %v11198_v10 = vld [vmem:[#allocation10 + $0x160] sm:$0xf]  ;;  %v11263_v33 = vor.u32 %v12602_v18, %v11262_v19 }
 0x334   :  { %6272 = vmatpush.bf16.msra.mxu1 %v10299_v9  ;;  %v12395_v9 = vld [vmem:[#allocation7 + $0x1474] sm:$0xf]  ;;  %v10139_v36 = vor.u32 %v12315_v30, %v10136_v39  ;;  %v11207_v2 = vor.u32 %v12588_v56, %v11206_v24  ;;  %v12568_v30 = vld [vmem:[#allocation10 + $0xd4] sm:$0xf0]  ;;  %v11246_v8 = vld [vmem:[#allocation10 + $0x1c0] sm:$0xf] }
 0x335   :  { %6285 = vmatpush.bf16.msra.mxu2 %v10619_v50  ;;  %v10456_v50 = vld [vmem:[#allocation7 + $0x1498] sm:$0xf0]  ;;  %v12586_v11 = vld [vmem:[#allocation10 + $0x164] sm:$0xf0]  ;;  %v12584_v39 = vld [vmem:[#allocation10 + $0x154] sm:$0xf0]  ;;  %v11127_v43 = vor.u32 %v12568_v30, %v11126_v32 }
 0x336   :  { %6298 = vmatpush.bf16.msra.mxu3 %v10939_v49  ;;  %v12225_v49 = vld [vmem:[#allocation7 + $0xf24] sm:$0xf]  ;;  %v10459_v48 = vor.u32 %v12395_v9, %v10456_v50  ;;  %v11199_v26 = vor.u32 %v12586_v11, %v11198_v10  ;;  %v11254_v9 = vld [vmem:[#allocation10 + $0x1d0] sm:$0xf]  ;;  %v6319_v10 = vmul.f32 0.01, %v13149_v46 }
 0x337   :  { %6260 = vmatpush.bf16.msra.mxu0 %v9939_v45  ;;  %v10416_v45 = vld [vmem:[#allocation7 + $0x1448] sm:$0xf0]  ;;  %v9779_v55 = vor.u32 %v12225_v49, %v9776_v41  ;;  %v12600_v50 = vld [vmem:[#allocation10 + $0x1d4] sm:$0xf0]  ;;  %v11238_v29 = vld [vmem:[#allocation10 + $0x1b0] sm:$0xf] }
 0x338   :  { %6273 = vmatpush.bf16.msra.mxu1 %v10259_v47  ;;  %v10736_v47 = vld [vmem:[#allocation7 + $0x16c8] sm:$0xf0]  ;;  %v10419_v58 = vor.u32 %v12385_v44, %v10416_v45  ;;  %v12564_v53 = vld [vmem:[#allocation10 + $0xb4] sm:$0xf0]  ;;  %v6320_v11 = vmul.f32 0.01, %v13166_v13 }
 0x339   :  { %6286 = vmatpush.bf16.msra.mxu2 %v10579_v51  ;;  %v6034_v51 = vpop.f32.mrf.mxu2  ;;  %v11054_v49 = vld [vmem:[#allocation10 + $0x40] sm:$0xf]  ;;  %v12596_v24 = vld [vmem:[#allocation10 + $0x1b4] sm:$0xf0]  ;;  %vm6316_vm7 = vcmp.gt.f32.partialorder %v13286_v27, 0.0 }
 0x33a   :  { %6299 = vmatpush.bf16.msra.mxu3 %v10899_v54  ;;  %v6047_v54 = vpop.f32.mrf.mxu3  ;;  %v11118_v41 = vld [vmem:[#allocation10 + $0xc0] sm:$0xf]  ;;  %v11110_v51 = vld [vmem:[#allocation10 + $0xb0] sm:$0xf]  ;;  %v12560_v30 = vld [vmem:[#allocation10 + $0x94] sm:$0xf0] }
 0x33b   :  { %6261 = vmatpush.bf16.msra.mxu0 %v9899_v62  ;;  %v11270_v62 = vld [vmem:[#allocation10 + $0x1f0] sm:$0xf] }
 0x33c   :  { %6274 = vmatpush.bf16.msra.mxu1 %v10219_v17  ;;  %v12604_v17 = vld [vmem:[#allocation10 + $0x1f4] sm:$0xf0]  ;;  %v11174_v54 = vld [vmem:[#allocation10 + $0x130] sm:$0xf] }
 0x33d   :  { %6287 = vmatpush.bf16.msra.mxu2 %v10539_v59  ;;  %v10739_v59 = vor.u32 %v12465_v15, %v10736_v47  ;;  %v11271_v6 = vor.u32 %v12604_v17, %v11270_v62  ;;  %v11046_v15 = vld [vmem:[#allocation10 + $0x30] sm:$0xf]  ;;  %v12548_v47 = vld [vmem:[#allocation10 + $0x34] sm:$0xf0]  ;;  %v11038_v62 = vld [vmem:[#allocation10 + $0x20] sm:$0xf] }
 0x33e   :  { %6300 = vmatpush.bf16.msra.mxu3 %v10859_v63  ;;  %v11070_v63 = vld [vmem:[#allocation10 + $0x60] sm:$0xf]  ;;  %v11047_v56 = vor.u32 %v12548_v47, %v11046_v15  ;;  %v12546_v17 = vld [vmem:[#allocation10 + $0x24] sm:$0xf0]  ;;  %v11334_v15 = vld [vmem:[#allocation10 + $0x270] sm:$0xf] }
 0x33f   :  { %6262 = vmatpush.bf16.msra.mxu0 %v9859_v23  ;;  %v11071_v22 = vor.u32 %v12554_v21, %v11070_v63  ;;  %v11135_v23 = vor.u32 %v12570_v7, %v11134_v3  ;;  %v11166_v63 = vld [vmem:[#allocation10 + $0x120] sm:$0xf]  ;;  %v12578_v21 = vld [vmem:[#allocation10 + $0x124] sm:$0xf0]  ;;  %v11039_v19 = vor.u32 %v12546_v17, %v11038_v62  ;;  %v12620_v47 = vld [vmem:[#allocation10 + $0x274] sm:$0xf0] }
 0x340   :  { %6275 = vmatpush.bf16.msra.mxu1 %v10179_v14  ;;  %v11062_v14 = vld [vmem:[#allocation10 + $0x50] sm:$0xf]  ;;  %v12594_v7 = vld [vmem:[#allocation10 + $0x1a4] sm:$0xf0]  ;;  %v11335_v17 = vor.u32 %v12620_v47, %v11334_v15  ;;  %v11502_v15 = vld [vmem:[#allocation10 + $0x3c0] sm:$0xf] }
 0x341   :  { %6288 = vmatpush.bf16.msra.mxu2 %v10499_v28  ;;  %v12552_v28 = vld [vmem:[#allocation10 + $0x54] sm:$0xf0]  ;;  %v12662_v47 = vld [vmem:[#allocation10 + $0x3c4] sm:$0xf0] }
 0x342   :  { %6301 = vmatpush.bf16.msra.mxu3 %v10819_v35  ;;  %v11190_v35 = vld [vmem:[#allocation10 + $0x150] sm:$0xf]  ;;  %v11063_v25 = vor.u32 %v12552_v28, %v11062_v14  ;;  %v12544_v14 = vld [vmem:[#allocation10 + $0x14] sm:$0xf0] }
 0x343   :  { %6263 = vmatpush.bf16.msra.mxu0 %v9819_v37  ;;  %v11191_v37 = vor.u32 %v12584_v39, %v11190_v35  ;;  %v11094_v28 = vld [vmem:[#allocation10 + $0x90] sm:$0xf]  ;;  %v12576_v39 = vld [vmem:[#allocation10 + $0x114] sm:$0xf0] }
 0x344   :  { %6276 = vmatpush.bf16.msra.mxu1 %v10139_v36  ;;  %v11255_v36 = vor.u32 %v12600_v50, %v11254_v9  ;;  %v11158_v35 = vld [vmem:[#allocation10 + $0x110] sm:$0xf]  ;;  %v12592_v50 = vld [vmem:[#allocation10 + $0x194] sm:$0xf0] }
 0x345   :  { %6289 = vmatpush.bf16.msra.mxu2 %v10459_v48  ;;  %v12566_v48 = vld [vmem:[#allocation10 + $0xc4] sm:$0xf0]  ;;  %v11222_v9 = vld [vmem:[#allocation10 + $0x190] sm:$0xf] }
 0x346   :  { %6302 = vmatpush.bf16.msra.mxu3 %v10779_v40 }
 0x347   :  { %6264 = vmatpush.bf16.msra.mxu0 %v9779_v55  ;;  %v13292_v40 = vpop.f32.mrf.mxu0  ;;  %v12580_v55 = vld [vmem:[#allocation10 + $0x134] sm:$0xf0] }
 0x348   :  { %6277 = vmatpush.bf16.msra.mxu1 %v10099_v5  ;;  %v13294_v0 = vpop.f32.mrf.mxu1  ;;  %v11111_v5 = vor.u32 %v12564_v53, %v11110_v51  ;;  %v11398_v51 = vld [vmem:[#allocation10 + $0x2f0] sm:$0xf]  ;;  %v12636_v53 = vld [vmem:[#allocation10 + $0x2f4] sm:$0xf0] }
 0x349   :  { %6290 = vmatpush.bf16.msra.mxu2 %v10419_v58  ;;  %v11175_v58 = vor.u32 %v12580_v55, %v11174_v54  ;;  %v11462_v54 = vld [vmem:[#allocation10 + $0x370] sm:$0xf]  ;;  %v12652_v55 = vld [vmem:[#allocation10 + $0x374] sm:$0xf0] }
 0x34a   :  { %6303 = vmatpush.bf16.msra.mxu3 %v10739_v59  ;;  %6265 = vmatmul.bf16.vlgmr.msra.gmra.mxu0 %v13104_v34  ;;  %v12550_v34 = vld [vmem:[#allocation10 + $0x44] sm:$0xf0]  ;;  %v11102_v59 = vld [vmem:[#allocation10 + $0xa0] sm:$0xf] }
 0x34b   :  { %7315 = vmatpush.bf16.msrb.mxu0 %v11079_v60  ;;  %6278 = vmatmul.bf16.vlgmr.msra.gmra.mxu1 %v13108_v38  ;;  %v12582_v38 = vld [vmem:[#allocation10 + $0x144] sm:$0xf0]  ;;  %v11055_v44 = vor.u32 %v12550_v34, %v11054_v49  ;;  %v11095_v34 = vor.u32 %v12560_v30, %v11094_v28  ;;  %v11318_v30 = vld [vmem:[#allocation10 + $0x250] sm:$0xf] }
 0x34c   :  { %7328 = vmatpush.bf16.msrb.mxu1 %v11143_v61  ;;  %6291 = vmatmul.bf16.vlgmr.msra.gmra.mxu2 %v13116_v16  ;;  %v12598_v16 = vld [vmem:[#allocation10 + $0x1c4] sm:$0xf0]  ;;  %v11183_v45 = vor.u32 %v12582_v38, %v11182_v42  ;;  %v11239_v61 = vor.u32 %v12596_v24, %v11238_v29  ;;  %v11150_v42 = vld [vmem:[#allocation10 + $0x100] sm:$0xf]  ;;  %v6322_v29 = vmul.f32 0.01, %v13206_v57 }
 0x34d   :  { %7341 = vmatpush.bf16.msrb.mxu2 %v11207_v2  ;;  %6304 = vmatmul.bf16.vlgmr.msra.gmra.mxu3 %v13118_v20  ;;  %v11119_v20 = vor.u32 %v12566_v48, %v11118_v41  ;;  %v11247_v52 = vor.u32 %v12598_v16, %v11246_v8  ;;  %v12562_v2 = vld [vmem:[#allocation10 + $0xa4] sm:$0xf0]  ;;  %v11159_v41 = vor.u32 %v12576_v39, %v11158_v35  ;;  %v12616_v35 = vld [vmem:[#allocation10 + $0x254] sm:$0xf0] }
 0x34e   :  { %7354 = vmatpush.bf16.msrb.mxu3 %v11271_v6  ;;  %v11230_v6 = vld [vmem:[#allocation10 + $0x1a0] sm:$0xf]  ;;  %v12542_v49 = vld [vmem:[#allocation10 + $0x4] sm:$0xf0]  ;;  %v11223_v8 = vor.u32 %v12592_v50, %v11222_v9  ;;  %v12632_v50 = vld [vmem:[#allocation10 + $0x2d4] sm:$0xf0] }
 0x34f   :  { %7316 = vmatpush.bf16.msrb.mxu0 %v11071_v22  ;;  %v13296_v60 = vpop.f32.mrf.mxu2  ;;  %v6060_v18 = vpop.f32.mrf.mxu0  ;;  %v11103_v22 = vor.u32 %v12562_v2, %v11102_v59  ;;  %v12558_v48 = vld [vmem:[#allocation10 + $0x84] sm:$0xf0]  ;;  %v6329_v59 = vsel %vm6309_vm0, %v13149_v46, %v6319_v10  ;;  %v11399_v2 = vor.u32 %v12636_v53, %v11398_v51  ;;  %v6332_v46 = vsel %vm6312_vm3, %v13206_v57, %v6322_v29  ;;  %v11382_v57 = vld [vmem:[#allocation10 + $0x2d0] sm:$0xf] }
 0x350   :  { %7329 = vmatpush.bf16.msrb.mxu1 %v11135_v23  ;;  %v13298_v3 = vpop.f32.mrf.mxu3  ;;  %v11167_v23 = vor.u32 %v12578_v21, %v11166_v63  ;;  %v6073_v32 = vpop.f32.mrf.mxu1  ;;  %v12574_v16 = vld [vmem:[#allocation10 + $0x104] sm:$0xf0]  ;;  %v11463_v63 = vor.u32 %v12652_v55, %v11462_v54  ;;  %v11326_v21 = vld [vmem:[#allocation10 + $0x260] sm:$0xf]  ;;  %v13326_v39 = vpack.c.bf16 %v6332_v46, %v6332_v46  ;;  %v11302_v29 = vld [vmem:[#allocation10 + $0x230] sm:$0xf] }
 0x351   :  { %7342 = vmatpush.bf16.msrb.mxu2 %v11199_v26  ;;  %v11030_v26 = vld [vmem:[#allocation10 + $0x10] sm:$0xf]  ;;  %v12666_v10 = vld [vmem:[#allocation10 + $0x3e4] sm:$0xf0] }
 0x352   :  { %7355 = vmatpush.bf16.msrb.mxu3 %v11263_v33  ;;  %v11231_v33 = vor.u32 %v12594_v7, %v11230_v6  ;;  %v12618_v6 = vld [vmem:[#allocation10 + $0x264] sm:$0xf0]  ;;  %v11390_v7 = vld [vmem:[#allocation10 + $0x2e0] sm:$0xf] }
 0x353   :  { %7317 = vmatpush.bf16.msrb.mxu0 %v11063_v25  ;;  %v6321_v25 = vmul.f32 0.01, %v13189_v4  ;;  %v12626_v46 = vld [vmem:[#allocation10 + $0x2a4] sm:$0xf0] }
 0x354   :  { %7330 = vmatpush.bf16.msrb.mxu1 %v11127_v43  ;;  %v11031_v43 = vor.u32 %v12544_v14, %v11030_v26  ;;  %v12650_v26 = vld [vmem:[#allocation10 + $0x364] sm:$0xf0] }
 0x355   :  { %7343 = vmatpush.bf16.msrb.mxu2 %v11191_v37  ;;  %v11022_v37 = vld [vmem:[#allocation10] sm:$0xf] }
 0x356   :  { %7356 = vmatpush.bf16.msrb.mxu3 %v11255_v36  ;;  %v11086_v36 = vld [vmem:[#allocation10 + $0x80] sm:$0xf] }
 0x357   :  { %7318 = vmatpush.bf16.msrb.mxu0 %v11055_v44  ;;  %v6086_v38 = vpop.f32.mrf.mxu2  ;;  %v11214_v44 = vld [vmem:[#allocation10 + $0x180] sm:$0xf]  ;;  %v11087_v24 = vor.u32 %v12558_v48, %v11086_v36  ;;  %v11383_v36 = vor.u32 %v12632_v50, %v11382_v57 }
 0x358   :  { %7331 = vmatpush.bf16.msrb.mxu1 %v11119_v20  ;;  %v12590_v20 = vld [vmem:[#allocation10 + $0x184] sm:$0xf0] }
 0x359   :  { %7344 = vmatpush.bf16.msrb.mxu2 %v11183_v45  ;;  %v6099_v45 = vpop.f32.mrf.mxu3  ;;  %v11215_v62 = vor.u32 %v12590_v20, %v11214_v44  ;;  %v12614_v38 = vld [vmem:[#allocation10 + $0x244] sm:$0xf0]  ;;  %v11438_v20 = vld [vmem:[#allocation10 + $0x340] sm:$0xf] }
 0x35a   :  { %7357 = vmatpush.bf16.msrb.mxu3 %v11247_v52  ;;  %v11023_v52 = vor.u32 %v12542_v49, %v11022_v37  ;;  %v11510_v37 = vld [vmem:[#allocation10 + $0x3d0] sm:$0xf]  ;;  %v12664_v49 = vld [vmem:[#allocation10 + $0x3d4] sm:$0xf0]  ;;  %v12630_v44 = vld [vmem:[#allocation10 + $0x2c4] sm:$0xf0] }
 0x35b   :  { %7319 = vmatpush.bf16.msrb.mxu0 %v11047_v56  ;;  %v11151_v56 = vor.u32 %v12574_v16, %v11150_v42  ;;  %v11310_v42 = vld [vmem:[#allocation10 + $0x240] sm:$0xf]  ;;  %v11511_v16 = vor.u32 %v12664_v49, %v11510_v37  ;;  %v12646_v45 = vld [vmem:[#allocation10 + $0x344] sm:$0xf0]  ;;  %v11350_v37 = vld [vmem:[#allocation10 + $0x290] sm:$0xf] }
 0x35c   :  { %7332 = vmatpush.bf16.msrb.mxu1 %v11111_v5  ;;  %v11526_v5 = vld [vmem:[#allocation10 + $0x3f0] sm:$0xf]  ;;  %v11439_v55 = vor.u32 %v12646_v45, %v11438_v20  ;;  %v6326_v20 = vmul.f32 0.01, %v13286_v27 }
 0x35d   :  { %7345 = vmatpush.bf16.msrb.mxu2 %v11175_v58  ;;  %v12668_v58 = vld [vmem:[#allocation10 + $0x3f4] sm:$0xf0] }
 0x35e   :  { %7358 = vmatpush.bf16.msrb.mxu3 %v11239_v61  ;;  %v6330_v61 = vsel %vm6310_vm1, %v13166_v13, %v6320_v11  ;;  %v11527_v18 = vor.u32 %v12668_v58, %v11526_v5  ;;  %v11518_v13 = vld [vmem:[#allocation10 + $0x3e0] sm:$0xf]  ;;  %v13320_v11 = vpack.c.bf16 %v6329_v59, %v6329_v59  ;;  %v11503_v58 = vor.u32 %v12662_v47, %v11502_v15  ;;  %v12644_v59 = vld [vmem:[#allocation10 + $0x334] sm:$0xf0]  ;;  %v12606_v47 = vld [vmem:[#allocation10 + $0x204] sm:$0xf0] }
 0x35f   :  { %7320 = vmatpush.bf16.msrb.mxu0 %v11039_v19  ;;  %v6331_v19 = vsel %vm6311_vm2, %v13189_v4, %v6321_v25  ;;  %v13322_v14 = vpack.c.bf16 %v6330_v61, %v6330_v61  ;;  %v11327_v4 = vor.u32 %v12618_v6, %v11326_v21  ;;  %v11519_v9 = vor.u32 %v12666_v10, %v11518_v13  ;;  %v11446_v25 = vld [vmem:[#allocation10 + $0x350] sm:$0xf]  ;;  %v11422_v13 = vld [vmem:[#allocation10 + $0x320] sm:$0xf]  ;;  %v12642_v10 = vld [vmem:[#allocation10 + $0x324] sm:$0xf0] }
 0x360   :  { %7333 = vmatpush.bf16.msrb.mxu1 %v11103_v22  ;;  %v12634_v22 = vld [vmem:[#allocation10 + $0x2e4] sm:$0xf0]  ;;  %v13324_v28 = vpack.c.bf16 %v6331_v19, %v6331_v19  ;;  %v11494_v61 = vld [vmem:[#allocation10 + $0x3b0] sm:$0xf]  ;;  %v11423_v50 = vor.u32 %v12642_v10, %v11422_v13  ;;  %v11278_v15 = vld [vmem:[#allocation10 + $0x200] sm:$0xf] }
 0x361   :  { %7346 = vmatpush.bf16.msrb.mxu2 %v11167_v23  ;;  %v11454_v23 = vld [vmem:[#allocation10 + $0x360] sm:$0xf]  ;;  %v11391_v32 = vor.u32 %v12634_v22, %v11390_v7  ;;  %v12610_v19 = vld [vmem:[#allocation10 + $0x224] sm:$0xf0] }
 0x362   :  { %7359 = vmatpush.bf16.msrb.mxu3 %v11231_v33  ;;  %v11455_v33 = vor.u32 %v12650_v26, %v11454_v23  ;;  %v11294_v7 = vld [vmem:[#allocation10 + $0x220] sm:$0xf] }
 0x363   :  { %7321 = vmatpush.bf16.msrb.mxu0 %v11031_v43  ;;  %v12648_v43 = vld [vmem:[#allocation10 + $0x354] sm:$0xf0]  ;;  %v11295_v57 = vor.u32 %v12610_v19, %v11294_v7  ;;  %v11080_v7 = vld [vmem:[#allocation10 + $0x78] sm:$0xf0]  ;;  %v12571_v19 = vld [vmem:[#allocation10 + $0xf4] sm:$0xf] }
 0x364   :  { %7334 = vmatpush.bf16.msrb.mxu1 %v11095_v34  ;;  %v13332_v34 = vld [vmem:[#allocation8 + $0x8] sm:$0x3]  ;;  %v11447_v48 = vor.u32 %v12648_v43, %v11446_v25  ;;  %v11286_v25 = vld [vmem:[#allocation10 + $0x210] sm:$0xf]  ;;  %v12608_v43 = vld [vmem:[#allocation10 + $0x214] sm:$0xf0] }
 0x365   :  { %7347 = vmatpush.bf16.msrb.mxu2 %v11159_v41  ;;  %v11319_v41 = vor.u32 %v12616_v35, %v11318_v30  ;;  %v997_v51 = vperm.slane %v13332_v34, 0  ;;  %v12658_v30 = vld [vmem:[#allocation10 + $0x3a4] sm:$0xf0]  ;;  %v6324_v35 = vmul.f32 0.01, %v13246_v12  ;;  %v11287_v45 = vor.u32 %v12608_v43, %v11286_v25 }
 0x366   :  { %7360 = vmatpush.bf16.msrb.mxu3 %v11223_v8  ;;  %v11374_v8 = vld [vmem:[#allocation10 + $0x2c0] sm:$0xf]  ;;  %v12569_v25 = vld [vmem:[#allocation10 + $0xe4] sm:$0xf] }
 0x367   :  { %7322 = vmatpush.bf16.msrb.mxu0 %v11023_v52  ;;  %v11311_v52 = vor.u32 %v12614_v38, %v11310_v42  ;;  %v13335_v53 = vpop.f32.mrf.mxu0  ;;  %v11375_v54 = vor.u32 %v12630_v44, %v11374_v8  ;;  %v6059_v23 = vadd.f32 %v13292_v40, %v997_v51  ;;  %v11414_v42 = vld [vmem:[#allocation10 + $0x310] sm:$0xf]  ;;  %v12640_v38 = vld [vmem:[#allocation10 + $0x314] sm:$0xf0]  ;;  %v6325_v8 = vmul.f32 0.01, %v13269_v31 }
 0x368   :  { %7335 = vmatpush.bf16.msrb.mxu1 %v11087_v24  ;;  %v12612_v24 = vld [vmem:[#allocation10 + $0x234] sm:$0xf0]  ;;  %v13337_v5 = vpop.f32.mrf.mxu1 }
 0x369   :  { %7348 = vmatpush.bf16.msrb.mxu2 %v11151_v56  ;;  %v11366_v56 = vld [vmem:[#allocation10 + $0x2b0] sm:$0xf]  ;;  %v12656_v44 = vld [vmem:[#allocation10 + $0x394] sm:$0xf0] }
 0x36a   :  { %7361 = vmatpush.bf16.msrb.mxu3 %v11215_v62  ;;  %7323 = vmatmul.bf16.vlgmr.msrb.gmra.mxu0 %v13320_v11  ;;  %v12628_v62 = vld [vmem:[#allocation10 + $0x2b4] sm:$0xf0] }
 0x36b   :  { %7367 = vmatpush.bf16.msra.mxu0 %v11335_v17  ;;  %7336 = vmatmul.bf16.vlgmr.msrb.gmra.mxu1 %v13322_v14  ;;  %v11430_v17 = vld [vmem:[#allocation10 + $0x330] sm:$0xf]  ;;  %v11367_v21 = vor.u32 %v12628_v62, %v11366_v56  ;;  %v11470_v62 = vld [vmem:[#allocation10 + $0x380] sm:$0xf] }
 0x36c   :  { %7380 = vmatpush.bf16.msra.mxu1 %v11399_v2  ;;  %7349 = vmatmul.bf16.vlgmr.msrb.gmra.mxu2 %v13324_v28  ;;  %v12660_v2 = vld [vmem:[#allocation10 + $0x3b4] sm:$0xf0]  ;;  %v11431_v6 = vor.u32 %v12644_v59, %v11430_v17  ;;  %v12654_v17 = vld [vmem:[#allocation10 + $0x384] sm:$0xf0] }
 0x36d   :  { %7393 = vmatpush.bf16.msra.mxu2 %v11463_v63  ;;  %7362 = vmatmul.bf16.vlgmr.msrb.gmra.mxu3 %v13326_v39  ;;  %v11303_v63 = vor.u32 %v12612_v24, %v11302_v29  ;;  %v11495_v26 = vor.u32 %v12660_v2, %v11494_v61  ;;  %v11590_v61 = vld [vmem:[#allocation10 + $0x470] sm:$0xf]  ;;  %v12684_v2 = vld [vmem:[#allocation10 + $0x474] sm:$0xf0]  ;;  %v11471_v13 = vor.u32 %v12654_v17, %v11470_v62  ;;  %v11056_v62 = vld [vmem:[#allocation10 + $0x48] sm:$0xf0] }
 0x36e   :  { %7406 = vmatpush.bf16.msra.mxu3 %v11527_v18  ;;  %v11358_v18 = vld [vmem:[#allocation10 + $0x2a0] sm:$0xf]  ;;  %v11591_v10 = vor.u32 %v12684_v2, %v11590_v61  ;;  %v12565_v17 = vld [vmem:[#allocation10 + $0xc4] sm:$0xf] }
 0x36f   :  { %7368 = vmatpush.bf16.msra.mxu0 %v11327_v4  ;;  %v13340_v22 = vpop.f32.mrf.mxu2  ;;  %v6112_v40 = vpop.f32.mrf.mxu0 }
 0x370   :  { %7381 = vmatpush.bf16.msra.mxu1 %v11391_v32  ;;  %v13343_v4 = vpop.f32.mrf.mxu3  ;;  %v6323_v32 = vmul.f32 0.01, %v13229_v1  ;;  %v6125_v49 = vpop.f32.mrf.mxu1  ;;  %v12700_v40 = vld [vmem:[#allocation10 + $0x4f4] sm:$0xf0] }
 0x371   :  { %7394 = vmatpush.bf16.msra.mxu2 %v11455_v33  ;;  %v11486_v33 = vld [vmem:[#allocation10 + $0x3a0] sm:$0xf] }
 0x372   :  { %7407 = vmatpush.bf16.msra.mxu3 %v11519_v9  ;;  %v11359_v9 = vor.u32 %v12626_v46, %v11358_v18  ;;  %v11144_v18 = vld [vmem:[#allocation10 + $0xf8] sm:$0xf0]  ;;  %v6335_v46 = vsel %vm6315_vm6, %v13269_v31, %v6325_v8  ;;  %v11136_v31 = vld [vmem:[#allocation10 + $0xe8] sm:$0xf0] }
 0x373   :  { %7369 = vmatpush.bf16.msra.mxu0 %v11319_v41  ;;  %v6072_v41 = vadd.f32 %v13294_v0, %v6059_v23  ;;  %v11342_v0 = vld [vmem:[#allocation10 + $0x280] sm:$0xf]  ;;  %v11139_v8 = vor.u32 %v12569_v25, %v11136_v31  ;;  %v11040_v25 = vld [vmem:[#allocation10 + $0x28] sm:$0xf0]  ;;  %v12561_v31 = vld [vmem:[#allocation10 + $0xa4] sm:$0xf] }
 0x374   :  { %7382 = vmatpush.bf16.msra.mxu1 %v11383_v36  ;;  %v11487_v36 = vor.u32 %v12658_v30, %v11486_v33  ;;  %v12682_v33 = vld [vmem:[#allocation10 + $0x464] sm:$0xf0] }
 0x375   :  { %7395 = vmatpush.bf16.msra.mxu2 %v11447_v48  ;;  %v12624_v48 = vld [vmem:[#allocation10 + $0x294] sm:$0xf0]  ;;  %v6085_v24 = vadd.f32 %v13296_v60, %v6072_v41  ;;  %v6334_v60 = vsel %vm6314_vm5, %v13246_v12, %v6324_v35  ;;  %v12553_v12 = vld [vmem:[#allocation10 + $0x64] sm:$0xf]  ;;  %v11654_v35 = vld [vmem:[#allocation10 + $0x4f0] sm:$0xf] }
 0x376   :  { %7408 = vmatpush.bf16.msra.mxu3 %v11511_v16  ;;  %v11478_v16 = vld [vmem:[#allocation10 + $0x390] sm:$0xf]  ;;  %v11351_v51 = vor.u32 %v12624_v48, %v11350_v37  ;;  %v13371_v37 = vpack.c.bf16 %v6335_v46, %v6335_v46  ;;  %v12680_v48 = vld [vmem:[#allocation10 + $0x454] sm:$0xf0]  ;;  %v11048_v46 = vld [vmem:[#allocation10 + $0x38] sm:$0xf0] }
 0x377   :  { %7370 = vmatpush.bf16.msra.mxu0 %v11311_v52  ;;  %v11415_v52 = vor.u32 %v12640_v38, %v11414_v42  ;;  %v6138_v29 = vpop.f32.mrf.mxu2  ;;  %v11479_v56 = vor.u32 %v12656_v44, %v11478_v16  ;;  %v12551_v16 = vld [vmem:[#allocation10 + $0x54] sm:$0xf]  ;;  %v11646_v44 = vld [vmem:[#allocation10 + $0x4e0] sm:$0xf] }
 0x378   :  { %7383 = vmatpush.bf16.msra.mxu1 %v11375_v54  ;;  %v12622_v54 = vld [vmem:[#allocation10 + $0x284] sm:$0xf0]  ;;  %v6151_v59 = vpop.f32.mrf.mxu3 }
 0x379   :  { %7396 = vmatpush.bf16.msra.mxu2 %v11439_v55  ;;  %v11406_v55 = vld [vmem:[#allocation10 + $0x300] sm:$0xf]  ;;  %v11343_v23 = vor.u32 %v12622_v54, %v11342_v0  ;;  %v12678_v0 = vld [vmem:[#allocation10 + $0x444] sm:$0xf0]  ;;  %v11120_v59 = vld [vmem:[#allocation10 + $0xc8] sm:$0xf0] }
 0x37a   :  { %7409 = vmatpush.bf16.msra.mxu3 %v11503_v58  ;;  %v12638_v58 = vld [vmem:[#allocation10 + $0x304] sm:$0xf0] }
 0x37b   :  { %7371 = vmatpush.bf16.msra.mxu0 %v11303_v63  ;;  %v12555_v63 = vld [vmem:[#allocation10 + $0x74] sm:$0xf] }
 0x37c   :  { %7384 = vmatpush.bf16.msra.mxu1 %v11367_v21  ;;  %v6333_v21 = vsel %vm6313_vm4, %v13229_v1, %v6323_v32  ;;  %v6098_v1 = vadd.f32 %v13298_v3, %v6085_v24  ;;  %v11582_v32 = vld [vmem:[#allocation10 + $0x460] sm:$0xf]  ;;  %v11083_v30 = vor.u32 %v12555_v63, %v11080_v7  ;;  %v13369_v3 = vpack.c.bf16 %v6334_v60, %v6334_v60  ;;  %v12549_v24 = vld [vmem:[#allocation10 + $0x44] sm:$0xf]  ;;  %v12547_v60 = vld [vmem:[#allocation10 + $0x34] sm:$0xf] }
 0x37d   :  { %7397 = vmatpush.bf16.msra.mxu2 %v11431_v6  ;;  %v11279_v6 = vor.u32 %v12606_v47, %v11278_v15  ;;  %v13367_v43 = vpack.c.bf16 %v6333_v21, %v6333_v21  ;;  %v11583_v41 = vor.u32 %v12682_v33, %v11582_v32  ;;  %v11128_v15 = vld [vmem:[#allocation10 + $0xd8] sm:$0xf0]  ;;  %v11558_v21 = vld [vmem:[#allocation10 + $0x430] sm:$0xf]  ;;  %v11550_v32 = vld [vmem:[#allocation10 + $0x420] sm:$0xf] }
 0x37e   :  { %7410 = vmatpush.bf16.msra.mxu3 %v11495_v26  ;;  %v11407_v26 = vor.u32 %v12638_v58, %v11406_v55  ;;  %v6111_v49 = vadd.f32 %v13335_v53, %v6098_v1  ;;  %v11064_v53 = vld [vmem:[#allocation10 + $0x58] sm:$0xf0]  ;;  %v12696_v58 = vld [vmem:[#allocation10 + $0x4d4] sm:$0xf0]  ;;  %v12563_v1 = vld [vmem:[#allocation10 + $0xb4] sm:$0xf] }
 0x37f   :  { %7372 = vmatpush.bf16.msra.mxu0 %v11295_v57  ;;  %v11147_v57 = vor.u32 %v12571_v19, %v11144_v18  ;;  %v11067_v55 = vor.u32 %v12551_v16, %v11064_v53  ;;  %v11059_v19 = vor.u32 %v12549_v24, %v11056_v62  ;;  %v11123_v18 = vor.u32 %v12565_v17, %v11120_v59  ;;  %v12674_v33 = vld [vmem:[#allocation10 + $0x424] sm:$0xf0]  ;;  %v12543_v53 = vld [vmem:[#allocation10 + $0x14] sm:$0xf]  ;;  %v12541_v24 = vld [vmem:[#allocation10 + $0x4] sm:$0xf] }
 0x380   :  { %7385 = vmatpush.bf16.msra.mxu1 %v11359_v9  ;;  %v6336_v9 = vsel %vm6316_vm7, %v13286_v27, %v6326_v20  ;;  %v11655_v27 = vor.u32 %v12700_v40, %v11654_v35  ;;  %v12698_v20 = vld [vmem:[#allocation10 + $0x4e4] sm:$0xf0]  ;;  %v6124_v47 = vadd.f32 %v13337_v5, %v6111_v49  ;;  %v12545_v35 = vld [vmem:[#allocation10 + $0x24] sm:$0xf]  ;;  %v11622_v40 = vld [vmem:[#allocation10 + $0x4b0] sm:$0xf] }
 0x381   :  { %7398 = vmatpush.bf16.msra.mxu2 %v11423_v50  ;;  %v11072_v50 = vld [vmem:[#allocation10 + $0x68] sm:$0xf0]  ;;  %v13374_v42 = vpack.c.bf16 %v6336_v9, %v6336_v9  ;;  %v11647_v54 = vor.u32 %v12698_v20, %v11646_v44  ;;  %v12692_v9 = vld [vmem:[#allocation10 + $0x4b4] sm:$0xf0]  ;;  %v11043_v44 = vor.u32 %v12545_v35, %v11040_v25  ;;  %v12686_v35 = vld [vmem:[#allocation10 + $0x484] sm:$0xf0] }
 0x382   :  { %7411 = vmatpush.bf16.msra.mxu3 %v11487_v36  ;;  %v11574_v36 = vld [vmem:[#allocation10 + $0x450] sm:$0xf]  ;;  %v11075_v38 = vor.u32 %v12553_v12, %v11072_v50  ;;  %v6137_v2 = vadd.f32 %v13340_v22, %v6124_v47  ;;  %v11104_v49 = vld [vmem:[#allocation10 + $0xa8] sm:$0xf0]  ;;  %v11623_v16 = vor.u32 %v12692_v9, %v11622_v40  ;;  %v12617_v9 = vld [vmem:[#allocation10 + $0x264] sm:$0xf] }
 0x383   :  { %7373 = vmatpush.bf16.msra.mxu0 %v11287_v45  ;;  %v12567_v45 = vld [vmem:[#allocation10 + $0xd4] sm:$0xf]  ;;  %v11107_v20 = vor.u32 %v12561_v31, %v11104_v49  ;;  %v12633_v25 = vld [vmem:[#allocation10 + $0x2e4] sm:$0xf]  ;;  %v11392_v31 = vld [vmem:[#allocation10 + $0x2e8] sm:$0xf0] }
 0x384   :  { %7386 = vmatpush.bf16.msra.mxu1 %v11351_v51  ;;  %v11575_v51 = vor.u32 %v12680_v48, %v11574_v36  ;;  %v11131_v29 = vor.u32 %v12567_v45, %v11128_v15  ;;  %v11551_v48 = vor.u32 %v12674_v33, %v11550_v32  ;;  %v11614_v45 = vld [vmem:[#allocation10 + $0x4a0] sm:$0xf]  ;;  %v12690_v15 = vld [vmem:[#allocation10 + $0x4a4] sm:$0xf0]  ;;  %v12603_v49 = vld [vmem:[#allocation10 + $0x1f4] sm:$0xf] }
 0x385   :  { %7399 = vmatpush.bf16.msra.mxu2 %v11415_v52  ;;  %v11566_v52 = vld [vmem:[#allocation10 + $0x440] sm:$0xf]  ;;  %v11615_v62 = vor.u32 %v12690_v15, %v11614_v45  ;;  %v11320_v45 = vld [vmem:[#allocation10 + $0x258] sm:$0xf0]  ;;  %v12631_v15 = vld [vmem:[#allocation10 + $0x2d4] sm:$0xf] }
 0x386   :  { %7412 = vmatpush.bf16.msra.mxu3 %v11479_v56  ;;  %v11638_v56 = vld [vmem:[#allocation10 + $0x4d0] sm:$0xf]  ;;  %v11567_v5 = vor.u32 %v12678_v0, %v11566_v52  ;;  %v12559_v52 = vld [vmem:[#allocation10 + $0x94] sm:$0xf]  ;;  %v11096_v0 = vld [vmem:[#allocation10 + $0x98] sm:$0xf0] }
 0x387   :  { %7374 = vmatpush.bf16.msra.mxu0 %v11279_v6  ;;  %v6162_v61 = vpop.f32.mrf.mxu0  ;;  %v12676_v6 = vld [vmem:[#allocation10 + $0x434] sm:$0xf0]  ;;  %v11639_v7 = vor.u32 %v12696_v58, %v11638_v56  ;;  %v11024_v56 = vld [vmem:[#allocation10 + $0x8] sm:$0xf0]  ;;  %v12557_v58 = vld [vmem:[#allocation10 + $0x84] sm:$0xf]  ;;  %v11099_v59 = vor.u32 %v12559_v52, %v11096_v0 }
 0x388   :  { %7387 = vmatpush.bf16.msra.mxu1 %v11343_v23  ;;  %v6175_v63 = vpop.f32.mrf.mxu1  ;;  %v11630_v23 = vld [vmem:[#allocation10 + $0x4c0] sm:$0xf]  ;;  %v11559_v22 = vor.u32 %v12676_v6, %v11558_v21  ;;  %v12587_v21 = vld [vmem:[#allocation10 + $0x174] sm:$0xf]  ;;  %v11208_v6 = vld [vmem:[#allocation10 + $0x178] sm:$0xf0] }
 0x389   :  { %7400 = vmatpush.bf16.msra.mxu2 %v11407_v26  ;;  %v12694_v26 = vld [vmem:[#allocation10 + $0x4c4] sm:$0xf0]  ;;  %v11211_v33 = vor.u32 %v12587_v21, %v11208_v6  ;;  %v12601_v52 = vld [vmem:[#allocation10 + $0x1e4] sm:$0xf]  ;;  %v11264_v0 = vld [vmem:[#allocation10 + $0x1e8] sm:$0xf0] }
 0x38a   :  { %7413 = vmatpush.bf16.msra.mxu3 %v11471_v13  ;;  %7375 = vmatmul.bf16.vlgmr.msra.gmra.mxu0 %v13367_v43  ;;  %v11112_v13 = vld [vmem:[#allocation10 + $0xb8] sm:$0xf0] }
 0x38b   :  { %7419 = vmatpush.bf16.msrb.mxu0 %v11591_v10  ;;  %7388 = vmatmul.bf16.vlgmr.msra.gmra.mxu1 %v13369_v3  ;;  %v6150_v10 = vadd.f32 %v13343_v4, %v6137_v2  ;;  %v11115_v12 = vor.u32 %v12563_v1, %v11112_v13  ;;  %v11606_v2 = vld [vmem:[#allocation10 + $0x490] sm:$0xf]  ;;  %v11027_v13 = vor.u32 %v12541_v24, %v11024_v56  ;;  %v11184_v24 = vld [vmem:[#allocation10 + $0x148] sm:$0xf0]  ;;  %v11176_v21 = vld [vmem:[#allocation10 + $0x138] sm:$0xf0] }
 0x38c   :  { %7401 = vmatmul.bf16.vlgmr.msra.gmra.mxu2 %v13371_v37  ;;  %7432 = vmatpush.bf16.msrb.mxu1 %v11655_v27  ;;  %v11542_v27 = vld [vmem:[#allocation10 + $0x410] sm:$0xf] }
 0x38d   :  { %7445 = vmatpush.bf16.msrb.mxu2 %v11083_v30  ;;  %7414 = vmatmul.bf16.vlgmr.msra.gmra.mxu3 %v13374_v42  ;;  %v11631_v30 = vor.u32 %v12694_v26, %v11630_v23  ;;  %v6163_v50 = vadd.f32 %v6162_v61, %v6150_v10  ;;  %v11088_v61 = vld [vmem:[#allocation10 + $0x88] sm:$0xf0]  ;;  %v12635_v26 = vld [vmem:[#allocation10 + $0x2f4] sm:$0xf] }
 0x38e   :  { %7458 = vmatpush.bf16.msrb.mxu3 %v11147_v57  ;;  %v11051_v57 = vor.u32 %v12547_v60, %v11048_v46  ;;  %v11400_v46 = vld [vmem:[#allocation10 + $0x2f8] sm:$0xf0]  ;;  %v11091_v10 = vor.u32 %v12557_v58, %v11088_v61  ;;  %v12613_v58 = vld [vmem:[#allocation10 + $0x244] sm:$0xf]  ;;  %v12599_v61 = vld [vmem:[#allocation10 + $0x1d4] sm:$0xf] }
 0x38f   :  { %7420 = vmatpush.bf16.msrb.mxu0 %v11583_v41  ;;  %v13383_v41 = vpop.f32.mrf.mxu2  ;;  %v6164_v36 = vpop.f32.mrf.mxu0  ;;  %v6176_v47 = vadd.f32 %v6175_v63, %v6163_v50  ;;  %v11403_v40 = vor.u32 %v12635_v26, %v11400_v46  ;;  %v11328_v50 = vld [vmem:[#allocation10 + $0x268] sm:$0xf0]  ;;  %v11368_v46 = vld [vmem:[#allocation10 + $0x2b8] sm:$0xf0] }
 0x390   :  { %7433 = vmatpush.bf16.msrb.mxu1 %v11647_v54  ;;  %v13385_v4 = vpop.f32.mrf.mxu3  ;;  %v11534_v54 = vld [vmem:[#allocation10 + $0x400] sm:$0xf]  ;;  %v11272_v36 = vld [vmem:[#allocation10 + $0x1f8] sm:$0xf0] }
 0x391   :  { %7446 = vmatpush.bf16.msrb.mxu2 %v11075_v38  ;;  %v12672_v38 = vld [vmem:[#allocation10 + $0x414] sm:$0xf0]  ;;  %v6327_v63 = vmul.f32 0.01, %v6176_v47  ;;  %vm6317_vm8 = vcmp.gt.f32.partialorder %v6176_v47, 0.0 }
 0x392   :  { %7459 = vmatpush.bf16.msrb.mxu3 %v11139_v8  ;;  %v6177_v8 = vpop.f32.mrf.mxu1 }
 0x393   :  { %7421 = vmatpush.bf16.msrb.mxu0 %v11575_v51  ;;  %v11032_v51 = vld [vmem:[#allocation10 + $0x18] sm:$0xf0]  ;;  %v6337_v32 = vsel %vm6317_vm8, %v6176_v47, %v6327_v63  ;;  %v11331_v8 = vor.u32 %v12617_v9, %v11328_v50  ;;  %v11275_v47 = vor.u32 %v12603_v49, %v11272_v36  ;;  %v12579_v63 = vld [vmem:[#allocation10 + $0x134] sm:$0xf] }
 0x394   :  { %7434 = vmatpush.bf16.msrb.mxu1 %v11639_v7  ;;  %v11035_v17 = vor.u32 %v12543_v53, %v11032_v51  ;;  %v12615_v53 = vld [vmem:[#allocation10 + $0x254] sm:$0xf]  ;;  %v11384_v51 = vld [vmem:[#allocation10 + $0x2d8] sm:$0xf0] }
 0x395   :  { %7447 = vmatpush.bf16.msrb.mxu2 %v11067_v55  ;;  %v12670_v55 = vld [vmem:[#allocation10 + $0x404] sm:$0xf0]  ;;  %v11387_v56 = vor.u32 %v12631_v15, %v11384_v51  ;;  %v12595_v49 = vld [vmem:[#allocation10 + $0x1b4] sm:$0xf] }
 0x396   :  { %7460 = vmatpush.bf16.msrb.mxu3 %v11131_v29  ;;  %v11543_v29 = vor.u32 %v12672_v38, %v11542_v27  ;;  %v11535_v23 = vor.u32 %v12670_v55, %v11534_v54  ;;  %v11323_v55 = vor.u32 %v12615_v53, %v11320_v45  ;;  %v12607_v53 = vld [vmem:[#allocation10 + $0x214] sm:$0xf]  ;;  %v11288_v45 = vld [vmem:[#allocation10 + $0x218] sm:$0xf0] }
 0x397   :  { %7422 = vmatpush.bf16.msrb.mxu0 %v11567_v5  ;;  %v12688_v5 = vld [vmem:[#allocation10 + $0x494] sm:$0xf0]  ;;  %v6190_v7 = vpop.f32.mrf.mxu2  ;;  %v12623_v15 = vld [vmem:[#allocation10 + $0x294] sm:$0xf] }
 0x398   :  { %7435 = vmatpush.bf16.msrb.mxu1 %v11631_v30  ;;  %v6203_v60 = vpop.f32.mrf.mxu3  ;;  %v11607_v1 = vor.u32 %v12688_v5, %v11606_v2 }
 0x399   :  { %7448 = vmatpush.bf16.msrb.mxu2 %v11059_v19  ;;  %v12619_v19 = vld [vmem:[#allocation10 + $0x274] sm:$0xf] }
 0x39a   :  { %7461 = vmatpush.bf16.msrb.mxu3 %v11123_v18  ;;  %v11336_v18 = vld [vmem:[#allocation10 + $0x278] sm:$0xf0]  ;;  %v12627_v60 = vld [vmem:[#allocation10 + $0x2b4] sm:$0xf] }
 0x39b   :  { %7423 = vmatpush.bf16.msrb.mxu0 %v11559_v22  ;;  %v12585_v22 = vld [vmem:[#allocation10 + $0x164] sm:$0xf]  ;;  %v11339_v30 = vor.u32 %v12619_v19, %v11336_v18  ;;  %v12611_v19 = vld [vmem:[#allocation10 + $0x234] sm:$0xf]  ;;  %v11304_v18 = vld [vmem:[#allocation10 + $0x238] sm:$0xf0] }
 0x39c   :  { %7436 = vmatpush.bf16.msrb.mxu1 %v11623_v16  ;;  %v12583_v16 = vld [vmem:[#allocation10 + $0x154] sm:$0xf] }
 0x39d   :  { %7449 = vmatpush.bf16.msrb.mxu2 %v11051_v57  ;;  %v11200_v57 = vld [vmem:[#allocation10 + $0x168] sm:$0xf0] }
 0x39e   :  { %7462 = vmatpush.bf16.msrb.mxu3 %v11115_v12  ;;  %v11598_v12 = vld [vmem:[#allocation10 + $0x480] sm:$0xf]  ;;  %v11203_v38 = vor.u32 %v12585_v22, %v11200_v57  ;;  %v11179_v22 = vor.u32 %v12579_v63, %v11176_v21  ;;  %v11371_v57 = vor.u32 %v12627_v60, %v11368_v46  ;;  %v12683_v63 = vld [vmem:[#allocation10 + $0x474] sm:$0xf] }
 0x39f   :  { %7424 = vmatpush.bf16.msrb.mxu0 %v11551_v48  ;;  %v13387_v48 = vpack.c.bf16 %v6337_v32, %v6337_v32  ;;  %v11599_v27 = vor.u32 %v12686_v35, %v11598_v12  ;;  %v11307_v32 = vor.u32 %v12611_v19, %v11304_v18  ;;  %v12609_v12 = vld [vmem:[#allocation10 + $0x224] sm:$0xf]  ;;  %v11296_v35 = vld [vmem:[#allocation10 + $0x228] sm:$0xf0]  ;;  %v12699_v19 = vld [vmem:[#allocation10 + $0x4f4] sm:$0xf] }
 0x3a0   :  { %7437 = vmatpush.bf16.msrb.mxu1 %v11615_v62  ;;  %v11312_v62 = vld [vmem:[#allocation10 + $0x248] sm:$0xf0]  ;;  %v11656_v18 = vld [vmem:[#allocation10 + $0x4f8] sm:$0xf0] }
 0x3a1   :  { %7450 = vmatpush.bf16.msrb.mxu2 %v11043_v44  ;;  %v11192_v44 = vld [vmem:[#allocation10 + $0x158] sm:$0xf0]  ;;  %v11315_v5 = vor.u32 %v12613_v58, %v11312_v62  ;;  %v12605_v58 = vld [vmem:[#allocation10 + $0x204] sm:$0xf] }
 0x3a2   :  { %7463 = vmatpush.bf16.msrb.mxu3 %v11107_v20  ;;  %v11395_v20 = vor.u32 %v12633_v25, %v11392_v31  ;;  %v11195_v54 = vor.u32 %v12583_v16, %v11192_v44  ;;  %v11360_v25 = vld [vmem:[#allocation10 + $0x2a8] sm:$0xf0] }
 0x3a3   :  { %7425 = vmatpush.bf16.msrb.mxu0 %v11543_v29  ;;  %v12581_v29 = vld [vmem:[#allocation10 + $0x144] sm:$0xf] }
 0x3a4   :  { %7438 = vmatpush.bf16.msrb.mxu1 %v11607_v1  ;;  %v11187_v2 = vor.u32 %v12581_v29, %v11184_v24  ;;  %v12597_v1 = vld [vmem:[#allocation10 + $0x1c4] sm:$0xf]  ;;  %v11291_v29 = vor.u32 %v12607_v53, %v11288_v45  ;;  %v11640_v53 = vld [vmem:[#allocation10 + $0x4d8] sm:$0xf0] }
 0x3a5   :  { %7451 = vmatpush.bf16.msrb.mxu2 %v11035_v17  ;;  %v12629_v17 = vld [vmem:[#allocation10 + $0x2c4] sm:$0xf] }
 0x3a6   :  { %7464 = vmatpush.bf16.msrb.mxu3 %v11099_v59  ;;  %v11267_v59 = vor.u32 %v12601_v52, %v11264_v0  ;;  %v11352_v52 = vld [vmem:[#allocation10 + $0x298] sm:$0xf0]  ;;  %v12593_v0 = vld [vmem:[#allocation10 + $0x1a4] sm:$0xf] }
 0x3a7   :  { %7426 = vmatpush.bf16.msrb.mxu0 %v11535_v23  ;;  %v13392_v6 = vpop.f32.mrf.mxu0  ;;  %v12573_v24 = vld [vmem:[#allocation10 + $0x104] sm:$0xf]  ;;  %v11355_v62 = vor.u32 %v12623_v15, %v11352_v52 }
 0x3a8   :  { %7439 = vmatpush.bf16.msrb.mxu1 %v11599_v27  ;;  %v13394_v23 = vpop.f32.mrf.mxu1  ;;  %v11299_v27 = vor.u32 %v12609_v12, %v11296_v35  ;;  %v11584_v12 = vld [vmem:[#allocation10 + $0x468] sm:$0xf0]  ;;  %v12697_v35 = vld [vmem:[#allocation10 + $0x4e4] sm:$0xf] }
 0x3a9   :  { %7452 = vmatpush.bf16.msrb.mxu2 %v11027_v13  ;;  %v11248_v13 = vld [vmem:[#allocation10 + $0x1c8] sm:$0xf0]  ;;  %v12645_v52 = vld [vmem:[#allocation10 + $0x344] sm:$0xf] }
 0x3aa   :  { %7465 = vmatpush.bf16.msrb.mxu3 %v11091_v10  ;;  %7427 = vmatmul.bf16.vlgmr.msrb.gmra.mxu0 %v13387_v48  ;;  %v998_v10 = vperm.slane %v13332_v34, 1  ;;  %v11251_v50 = vor.u32 %v12597_v1, %v11248_v13  ;;  %v11240_v34 = vld [vmem:[#allocation10 + $0x1b8] sm:$0xf0]  ;;  %v12591_v13 = vld [vmem:[#allocation10 + $0x194] sm:$0xf] }
 0x3ab   :  { %7471 = vmatpush.bf16.msra.mxu0 %v11211_v33  ;;  %v12577_v33 = vld [vmem:[#allocation10 + $0x124] sm:$0xf]  ;;  %v11243_v51 = vor.u32 %v12595_v49, %v11240_v34  ;;  %v11216_v34 = vld [vmem:[#allocation10 + $0x188] sm:$0xf0] }
 0x3ac   :  { %7453 = vmatmul.bf16.vlgmr.msrb.gmra.mxu2 %v13320_v11  ;;  %7484 = vmatpush.bf16.msra.mxu1 %v11275_v47  ;;  %v11376_v11 = vld [vmem:[#allocation10 + $0x2c8] sm:$0xf0]  ;;  %v6189_v44 = vadd.f32 %v13383_v41, %v998_v10  ;;  %v11224_v10 = vld [vmem:[#allocation10 + $0x198] sm:$0xf0]  ;;  %v12589_v49 = vld [vmem:[#allocation10 + $0x184] sm:$0xf] }
 0x3ad   :  { %7497 = vmatpush.bf16.msra.mxu2 %v11339_v30  ;;  %7466 = vmatmul.bf16.vlgmr.msrb.gmra.mxu3 %v13322_v14  ;;  %v11256_v14 = vld [vmem:[#allocation10 + $0x1d8] sm:$0xf0]  ;;  %v11379_v7 = vor.u32 %v12629_v17, %v11376_v11  ;;  %v11168_v30 = vld [vmem:[#allocation10 + $0x128] sm:$0xf0] }
 0x3ae   :  { %7510 = vmatpush.bf16.msra.mxu3 %v11403_v40  ;;  %v11259_v26 = vor.u32 %v12599_v61, %v11256_v14  ;;  %v12625_v40 = vld [vmem:[#allocation10 + $0x2a4] sm:$0xf]  ;;  %v11171_v36 = vor.u32 %v12577_v33, %v11168_v30  ;;  %v6202_v41 = vadd.f32 %v13385_v4, %v6189_v44  ;;  %v11280_v17 = vld [vmem:[#allocation10 + $0x208] sm:$0xf0]  ;;  %v11576_v44 = vld [vmem:[#allocation10 + $0x458] sm:$0xf0] }
 0x3af   :  { %7472 = vmatpush.bf16.msra.mxu0 %v11203_v38  ;;  %v13397_v9 = vpop.f32.mrf.mxu2  ;;  %v12575_v38 = vld [vmem:[#allocation10 + $0x114] sm:$0xf]  ;;  %v6216_v16 = vpop.f32.mrf.mxu0  ;;  %v11344_v11 = vld [vmem:[#allocation10 + $0x288] sm:$0xf0]  ;;  %v12649_v33 = vld [vmem:[#allocation10 + $0x364] sm:$0xf] }
 0x3b0   :  { %7485 = vmatpush.bf16.msra.mxu1 %v11267_v59  ;;  %v13399_v31 = vpop.f32.mrf.mxu3  ;;  %v6229_v47 = vpop.f32.mrf.mxu1  ;;  %v12621_v59 = vld [vmem:[#allocation10 + $0x284] sm:$0xf]  ;;  %v6215_v4 = vadd.f32 %v13392_v6, %v6202_v41  ;;  %v11456_v30 = vld [vmem:[#allocation10 + $0x368] sm:$0xf0]  ;;  %v12679_v16 = vld [vmem:[#allocation10 + $0x454] sm:$0xf] }
 0x3b1   :  { %7498 = vmatpush.bf16.msra.mxu2 %v11331_v8  ;;  %v11160_v8 = vld [vmem:[#allocation10 + $0x118] sm:$0xf0]  ;;  %v11347_v46 = vor.u32 %v12621_v59, %v11344_v11  ;;  %v11459_v6 = vor.u32 %v12649_v33, %v11456_v30  ;;  %v11579_v47 = vor.u32 %v12679_v16, %v11576_v44  ;;  %v12643_v41 = vld [vmem:[#allocation10 + $0x334] sm:$0xf]  ;;  %v11408_v16 = vld [vmem:[#allocation10 + $0x308] sm:$0xf0] }
 0x3b2   :  { %7511 = vmatpush.bf16.msra.mxu3 %v11395_v20  ;;  %v11363_v20 = vor.u32 %v12625_v40, %v11360_v25  ;;  %v11648_v40 = vld [vmem:[#allocation10 + $0x4e8] sm:$0xf0]  ;;  %v6228_v25 = vadd.f32 %v13394_v23, %v6215_v4  ;;  %v11219_v23 = vor.u32 %v12589_v49, %v11216_v34  ;;  %v11560_v11 = vld [vmem:[#allocation10 + $0x438] sm:$0xf0]  ;;  %v12639_v30 = vld [vmem:[#allocation10 + $0x314] sm:$0xf] }
 0x3b3   :  { %7473 = vmatpush.bf16.msra.mxu0 %v11195_v54  ;;  %v11232_v54 = vld [vmem:[#allocation10 + $0x1a8] sm:$0xf0]  ;;  %v12669_v44 = vld [vmem:[#allocation10 + $0x404] sm:$0xf] }
 0x3b4   :  { %7486 = vmatpush.bf16.msra.mxu1 %v11259_v26  ;;  %v11235_v14 = vor.u32 %v12593_v0, %v11232_v54  ;;  %v11283_v26 = vor.u32 %v12605_v58, %v11280_v17  ;;  %v6241_v45 = vadd.f32 %v13397_v9, %v6228_v25  ;;  %v11440_v0 = vld [vmem:[#allocation10 + $0x348] sm:$0xf0]  ;;  %v12675_v17 = vld [vmem:[#allocation10 + $0x434] sm:$0xf]  ;;  %v11608_v25 = vld [vmem:[#allocation10 + $0x498] sm:$0xf0] }
 0x3b5   :  { %7499 = vmatpush.bf16.msra.mxu2 %v11323_v55  ;;  %v11163_v55 = vor.u32 %v12575_v38, %v11160_v8  ;;  %v12647_v38 = vld [vmem:[#allocation10 + $0x354] sm:$0xf]  ;;  %v11448_v8 = vld [vmem:[#allocation10 + $0x358] sm:$0xf0]  ;;  %v11568_v54 = vld [vmem:[#allocation10 + $0x448] sm:$0xf0] }
 0x3b6   :  { %7512 = vmatpush.bf16.msra.mxu3 %v11387_v56  ;;  %v11152_v56 = vld [vmem:[#allocation10 + $0x108] sm:$0xf0]  ;;  %v11451_v15 = vor.u32 %v12647_v38, %v11448_v8  ;;  %v12637_v8 = vld [vmem:[#allocation10 + $0x304] sm:$0xf] }
 0x3b7   :  { %7474 = vmatpush.bf16.msra.mxu0 %v11187_v2  ;;  %v6242_v61 = vpop.f32.mrf.mxu2  ;;  %v12651_v2 = vld [vmem:[#allocation10 + $0x374] sm:$0xf]  ;;  %v11155_v60 = vor.u32 %v12573_v24, %v11152_v56  ;;  %v11443_v24 = vor.u32 %v12645_v52, %v11440_v0  ;;  %v11411_v0 = vor.u32 %v12637_v8, %v11408_v16 }
 0x3b8   :  { %7487 = vmatpush.bf16.msra.mxu1 %v11251_v50  ;;  %v6255_v21 = vpop.f32.mrf.mxu3  ;;  %v11227_v50 = vor.u32 %v12591_v13, %v11224_v10  ;;  %v12691_v61 = vld [vmem:[#allocation10 + $0x4b4] sm:$0xf] }
 0x3b9   :  { %7500 = vmatpush.bf16.msra.mxu2 %v11315_v5  ;;  %v11464_v5 = vld [vmem:[#allocation10 + $0x378] sm:$0xf0]  ;;  %v11424_v21 = vld [vmem:[#allocation10 + $0x328] sm:$0xf0] }
 0x3ba   :  { %7513 = vmatpush.bf16.msra.mxu3 %v11379_v7  ;;  %v11592_v7 = vld [vmem:[#allocation10 + $0x478] sm:$0xf0]  ;;  %v11467_v1 = vor.u32 %v12651_v2, %v11464_v5  ;;  %v12706_v16 = vld [vmem:[%s13471_s6 + $0x28] sm:$0xff] }
 0x3bb   :  { %7475 = vmatpush.bf16.msra.mxu0 %v11179_v22  ;;  %v11595_v22 = vor.u32 %v12683_v63, %v11592_v7  ;;  %v12641_v63 = vld [vmem:[#allocation10 + $0x324] sm:$0xf] }
 0x3bc   :  { %7488 = vmatpush.bf16.msra.mxu1 %v11243_v51  ;;  %v12673_v7 = vld [vmem:[#allocation10 + $0x424] sm:$0xf]  ;;  %v11427_v10 = vor.u32 %v12641_v63, %v11424_v21  ;;  %v12655_v21 = vld [vmem:[#allocation10 + $0x394] sm:$0xf] }
 0x3bd   :  { %7501 = vmatpush.bf16.msra.mxu2 %v11307_v32  ;;  %v11659_v32 = vor.u32 %v12699_v19, %v11656_v18  ;;  %v11552_v18 = vld [vmem:[#allocation10 + $0x428] sm:$0xf0] }
 0x3be   :  { %7514 = vmatpush.bf16.msra.mxu3 %v11371_v57  ;;  %v12681_v57 = vld [vmem:[#allocation10 + $0x464] sm:$0xf] }
 0x3bf   :  { %7476 = vmatpush.bf16.msra.mxu0 %v11171_v36  ;;  %v11587_v36 = vor.u32 %v12681_v57, %v11584_v12  ;;  %v11416_v57 = vld [vmem:[#allocation10 + $0x318] sm:$0xf0]  ;;  %v12671_v12 = vld [vmem:[#allocation10 + $0x414] sm:$0xf] }
 0x3c0   :  { %7489 = vmatpush.bf16.msra.mxu1 %v11235_v14  ;;  %v11624_v14 = vld [vmem:[#allocation10 + $0x4b8] sm:$0xf0]  ;;  %v11419_v34 = vor.u32 %v12639_v30, %v11416_v57 }
 0x3c1   :  { %7502 = vmatpush.bf16.msra.mxu2 %v11299_v27  ;;  %v11651_v27 = vor.u32 %v12697_v35, %v11648_v40  ;;  %v11627_v5 = vor.u32 %v12691_v61, %v11624_v14  ;;  %v11544_v40 = vld [vmem:[#allocation10 + $0x418] sm:$0xf0] }
 0x3c2   :  { %7515 = vmatpush.bf16.msra.mxu3 %v11363_v20  ;;  %v12695_v20 = vld [vmem:[#allocation10 + $0x4d4] sm:$0xf] }
 0x3c3   :  { %7477 = vmatpush.bf16.msra.mxu0 %v11163_v55  ;;  %v11643_v51 = vor.u32 %v12695_v20, %v11640_v53  ;;  %v11632_v55 = vld [vmem:[#allocation10 + $0x4c8] sm:$0xf0] }
 0x3c4   :  { %7490 = vmatpush.bf16.msra.mxu1 %v11227_v50  ;;  %v12687_v50 = vld [vmem:[#allocation10 + $0x494] sm:$0xf]  ;;  %v11536_v53 = vld [vmem:[#allocation10 + $0x408] sm:$0xf0] }
 0x3c5   :  { %7503 = vmatpush.bf16.msra.mxu2 %v11291_v29  ;;  %v6254_v29 = vadd.f32 %v13399_v31, %v6241_v45  ;;  %v11563_v31 = vor.u32 %v12675_v17, %v11560_v11  ;;  %v11611_v38 = vor.u32 %v12687_v50, %v11608_v25  ;;  %v11600_v45 = vld [vmem:[#allocation10 + $0x488] sm:$0xf0]  ;;  %v11496_v11 = vld [vmem:[#allocation10 + $0x3b8] sm:$0xf0] }
 0x3c6   :  { %7516 = vmatpush.bf16.msra.mxu3 %v11355_v62  ;;  %v11432_v62 = vld [vmem:[#allocation10 + $0x338] sm:$0xf0] }
 0x3c7   :  { %7478 = vmatpush.bf16.msra.mxu0 %v11155_v60  ;;  %v11435_v2 = vor.u32 %v12643_v41, %v11432_v62  ;;  %v12689_v60 = vld [vmem:[#allocation10 + $0x4a4] sm:$0xf]  ;;  %v11504_v41 = vld [vmem:[#allocation10 + $0x3c8] sm:$0xf0] }
 0x3c8   :  { %7491 = vmatpush.bf16.msra.mxu1 %v11219_v23  ;;  %v6279_v9 = vpop.f32.mrf.mxu1  ;;  %v12685_v23 = vld [vmem:[#allocation10 + $0x484] sm:$0xf] }
 0x3c9   :  { %7504 = vmatpush.bf16.msra.mxu2 %v11283_v26  ;;  %v11616_v26 = vld [vmem:[#allocation10 + $0x4a8] sm:$0xf0] }
 0x3ca   :  { %7517 = vmatpush.bf16.msra.mxu3 %v11347_v46  ;;  %7479 = vmatmul.bf16.vlgmr.msra.gmra.mxu0 %v13324_v28  ;;  %v12677_v28 = vld [vmem:[#allocation10 + $0x444] sm:$0xf]  ;;  %v11619_v33 = vor.u32 %v12689_v60, %v11616_v26 }
 0x3cb   :  { %7523 = vmatpush.bf16.msrb.mxu0 %v11467_v1  ;;  %v11571_v56 = vor.u32 %v12677_v28, %v11568_v54  ;;  %v12665_v28 = vld [vmem:[#allocation10 + $0x3e4] sm:$0xf]  ;;  %v11520_v54 = vld [vmem:[#allocation10 + $0x3e8] sm:$0xf0] }
 0x3cc   :  { %7505 = vmatmul.bf16.vlgmr.msra.gmra.mxu2 %v13367_v43  ;;  %v12693_v43 = vld [vmem:[#allocation10 + $0x4c4] sm:$0xf] }
 0x3cd   :  { %7549 = vmatpush.bf16.msrb.mxu2 %v11595_v22  ;;  %7518 = vmatmul.bf16.vlgmr.msra.gmra.mxu3 %v13369_v3  ;;  %v6266_v3 = vpop.f32.mrf.mxu0  ;;  %v11635_v58 = vor.u32 %v12693_v43, %v11632_v55  ;;  %v11539_v43 = vor.u32 %v12669_v44, %v11536_v53  ;;  %v11603_v55 = vor.u32 %v12685_v23, %v11600_v45 }
 0x3ce   :  { %7562 = vmatpush.bf16.msrb.mxu3 %v11659_v32  ;;  %v6267_v59 = vadd.f32 %v6266_v3, %v6254_v29  ;;  %v11555_v32 = vor.u32 %v12673_v7, %v11552_v18  ;;  %v11523_v29 = vor.u32 %v12665_v28, %v11520_v54  ;;  %v12663_v3 = vld [vmem:[#allocation10 + $0x3d4] sm:$0xf]  ;;  %v11480_v7 = vld [vmem:[#allocation10 + $0x398] sm:$0xf0]  ;;  %v12701_v54 = vld [vmem:[%s13471_s6] sm:$0xff] }
 0x3cf   :  { %7524 = vmatpush.bf16.msrb.mxu0 %v11459_v6  ;;  %v6292_v4 = vpop.f32.mrf.mxu2  ;;  %v12667_v6 = vld [vmem:[#allocation10 + $0x3f4] sm:$0xf] }
 0x3d0   :  { %v6280_v19 = vadd.f32 %v6279_v9, %v6267_v59  ;;  %v6305_v1 = vpop.f32.mrf.mxu3  ;;  %v6281_v22 = vpop.f32.mrf.mxu1  ;;  %v12659_v59 = vld [vmem:[#allocation10 + $0x3b4] sm:$0xf] }
 0x3d1   :  { %7550 = vmatpush.bf16.msrb.mxu2 %v11587_v36  ;;  %v11528_v36 = vld [vmem:[#allocation10 + $0x3f8] sm:$0xf0]  ;;  %v12702_v28 = vld [vmem:[%s13471_s6 + $0x8] sm:$0xff] }
 0x3d2   :  { %7563 = vmatpush.bf16.msrb.mxu3 %v11651_v27  ;;  %v6293_v46 = vadd.f32 %v6292_v4, %v6280_v19  ;;  %v11547_v27 = vor.u32 %v12671_v12, %v11544_v40 }
 0x3d3   :  { %7525 = vmatpush.bf16.msrb.mxu0 %v11451_v15 }
 0x3d4   :  { %v6306_v35 = vadd.f32 %v6305_v1, %v6293_v46  ;;  %v11483_v46 = vor.u32 %v12655_v21, %v11480_v7  ;;  %v12709_v21 = vld [vmem:[%s13471_s6 + $0x40] sm:$0xff] }
 0x3d5   :  { %7551 = vmatpush.bf16.msrb.mxu2 %v11579_v47  ;;  %v6268_v13 = vpop.f32.mrf.mxu0 }
 0x3d6   :  { %7564 = vmatpush.bf16.msrb.mxu3 %v11643_v51  ;;  %vm6318_vm9 = vcmp.gt.f32.partialorder %v6306_v35, 0.0  ;;  %v6328_v49 = vmul.f32 0.01, %v6306_v35  ;;  %v11531_v51 = vor.u32 %v12667_v6, %v11528_v36  ;;  %v12653_v13 = vld [vmem:[#allocation10 + $0x384] sm:$0xf] }
 0x3d7   :  { %7526 = vmatpush.bf16.msrb.mxu0 %v11443_v24  ;;  %v6294_v47 = vpop.f32.mrf.mxu2  ;;  %v11512_v24 = vld [vmem:[#allocation10 + $0x3d8] sm:$0xf0] }
 0x3d8   :  { %v6338_v20 = vsel %vm6318_vm9, %v6306_v35, %v6328_v49  ;;  %v6307_v52 = vpop.f32.mrf.mxu3  ;;  %v11515_v9 = vor.u32 %v12663_v3, %v11512_v24  ;;  %v12704_v47 = vld [vmem:[%s13471_s6 + $0x18] sm:$0xff] }
 0x3d9   :  { %7552 = vmatpush.bf16.msrb.mxu2 %v11571_v56  ;;  %v6348_v15 = vpack.c.bf16 %v6338_v20, %v6338_v20  ;;  %v6509_v56 = vld [vmem:[#allocation11] sm:$0x3] }
 0x3da   :  { %7565 = vmatpush.bf16.msrb.mxu3 %v11635_v58  ;;  %v12661_v58 = vld [vmem:[#allocation10 + $0x3c4] sm:$0xf]  ;;  %v6511_v62 = vperm.slane %v6509_v56, 0  ;;  %v6512_v8 = vperm.slane %v6509_v56, 1  ;;  %v12714_v56 = vld [vmem:[%s13471_s6 + $0x68] sm:$0xff] }
 0x3db   :  { %7527 = vmatpush.bf16.msrb.mxu0 %v11435_v2  ;;  %7440 = vmatmul.bf16.vlgmr.msrb.gmra.mxu1 %v6348_v15  ;;  %v11507_v17 = vor.u32 %v12661_v58, %v11504_v41 }
 0x3dc   :  { %7536 = vmatpush.bf16.msrb.mxu1 %v11531_v51 }
 0x3dd   :  { %7553 = vmatpush.bf16.msrb.mxu2 %v11563_v31  ;;  %v11499_v31 = vor.u32 %v12659_v59, %v11496_v11 }
 0x3de   :  { %7566 = vmatpush.bf16.msrb.mxu3 %v11627_v5  ;;  %v12657_v5 = vld [vmem:[#allocation10 + $0x3a4] sm:$0xf] }
 0x3df   :  { %7528 = vmatpush.bf16.msrb.mxu0 %v11427_v10  ;;  %v11472_v10 = vld [vmem:[#allocation10 + $0x388] sm:$0xf0] }
 0x3e0   :  { %7537 = vmatpush.bf16.msrb.mxu1 %v11523_v29  ;;  %v11475_v22 = vor.u32 %v12653_v13, %v11472_v10 }
 0x3e1   :  { %7554 = vmatpush.bf16.msrb.mxu2 %v11555_v32 }
 0x3e2   :  { %7567 = vmatpush.bf16.msrb.mxu3 %v11619_v33 }
 0x3e3   :  { %7529 = vmatpush.bf16.msrb.mxu0 %v11419_v34 }
 0x3e4   :  { %7538 = vmatpush.bf16.msrb.mxu1 %v11515_v9  ;;  %v12715_v9 = vld [vmem:[%s13471_s6 + $0x70] sm:$0xff] }
 0x3e5   :  { %7555 = vmatpush.bf16.msrb.mxu2 %v11547_v27  ;;  %v12708_v27 = vld [vmem:[%s13471_s6 + $0x38] sm:$0xff] }
 0x3e6   :  { %7568 = vmatpush.bf16.msrb.mxu3 %v11611_v38 }
 0x3e7   :  { %7530 = vmatpush.bf16.msrb.mxu0 %v11411_v0  ;;  %v7324_v61 = vpop.f32.mrf.mxu0  ;;  %v12703_v0 = vld [vmem:[%s13471_s6 + $0x10] sm:$0xff] }
 0x3e8   :  { %v7325_v14 = vadd.f32 %v7324_v61, %v6511_v62  ;;  %v7337_v2 = vpop.f32.mrf.mxu1  ;;  %7539 = vmatpush.bf16.msrb.mxu1 %v11507_v17  ;;  %v12713_v62 = vld [vmem:[%s13471_s6 + $0x60] sm:$0xff]  ;;  %v12712_v17 = vld [vmem:[%s13471_s6 + $0x58] sm:$0xff] }
 0x3e9   :  { %7556 = vmatpush.bf16.msrb.mxu2 %v11539_v43 }
 0x3ea   :  { %7569 = vmatpush.bf16.msrb.mxu3 %v11603_v55  ;;  %7531 = vmatmul.bf16.vlgmr.msrb.gmra.mxu0 %v13371_v37  ;;  %v11488_v37 = vld [vmem:[#allocation10 + $0x3a8] sm:$0xf0]  ;;  %v7338_v63 = vadd.f32 %v7337_v2, %v7325_v14  ;;  %v12716_v55 = vld [vmem:[%s13471_s6 + $0x78] sm:$0xff]  ;;  %v12711_v14 = vld [vmem:[%s13471_s6 + $0x50] sm:$0xff] }
 0x3eb   :  { %7492 = vmatmul.bf16.vlgmr.msra.gmra.mxu1 %v13326_v39  ;;  %7715 = vmatpush.bf16.msra.mxu0 %v12708_v27  ;;  %v12717_v27 = vld [vmem:[#allocation14] sm:$0xff] }
 0x3ec   :  { %7557 = vmatmul.bf16.vlgmr.msrb.gmra.mxu2 %v13387_v48  ;;  %7540 = vmatpush.bf16.msrb.mxu1 %v11499_v31  ;;  %v11491_v48 = vor.u32 %v12657_v5, %v11488_v37  ;;  %v12710_v37 = vld [vmem:[%s13471_s6 + $0x48] sm:$0xff] }
 0x3ed   :  { %7570 = vmatmul.bf16.vlgmr.msrb.gmra.mxu3 %v6348_v15  ;;  %v12705_v15 = vld [vmem:[%s13471_s6 + $0x20] sm:$0xff] }
 0x3ef   :  { %v7350_v19 = vpop.f32.mrf.mxu2  ;;  %v7326_v26 = vpop.f32.mrf.mxu0 }
 0x3f0   :  { %v7351_v18 = vadd.f32 %v7350_v19, %v7338_v63  ;;  %v7363_v60 = vpop.f32.mrf.mxu3  ;;  %v7339_v4 = vpop.f32.mrf.mxu1  ;;  %7541 = vmatpush.bf16.msrb.mxu1 %v11491_v48 }
 0x3f2   :  { %v7364_v1 = vadd.f32 %v7363_v60, %v7351_v18 }
 0x3f4   :  { %7542 = vmatpush.bf16.msrb.mxu1 %v11483_v46 }
 0x3f7   :  { %v7352_v32 = vpop.f32.mrf.mxu2 }
 0x3f8   :  { %v7365_v33 = vpop.f32.mrf.mxu3  ;;  %7543 = vmatpush.bf16.msrb.mxu1 %v11475_v22 }
 0x3fb   :  { %7544 = vmatmul.bf16.vlgmr.msrb.gmra.mxu1 %v13374_v42  ;;  %v12707_v42 = vld [vmem:[%s13471_s6 + $0x30] sm:$0xff]  ;;  %s13009_s6 = smov [#allocation17]  }
 0x3fc   :  { %7716 = vmatpush.bf16.msra.mxu0 %v12707_v42  ;;  %7728 = vmatpush.bf16.msra.mxu1 %v12716_v55  ;;  %s7804_s15 = sshll.u32 %s13009_s6, 4  ;;  %s7805_s15 = int_to_ptr.vmem [resolvable:$true] %s7804_s15 }
 0x400   :  { %7717 = vmatpush.bf16.msra.mxu0 %v12706_v16  ;;  %7729 = vmatpush.bf16.msra.mxu1 %v12715_v9 }
 0x404   :  { %7718 = vmatpush.bf16.msra.mxu0 %v12705_v15  ;;  %7730 = vmatpush.bf16.msra.mxu1 %v12714_v56 }
 0x407   :  { %v7376_v39 = vpop.f32.mrf.mxu0 }
 0x408   :  { %v7389_v30 = vpop.f32.mrf.mxu1  ;;  %v7377_v57 = vadd.f32 %v7376_v39, %v7364_v1  ;;  %7719 = vmatpush.bf16.msra.mxu0 %v12704_v47  ;;  %7731 = vmatpush.bf16.msra.mxu1 %v12713_v62 }
 0x40a   :  { %v7390_v12 = vadd.f32 %v7389_v30, %v7377_v57 }
 0x40c   :  { %7720 = vmatpush.bf16.msra.mxu0 %v12703_v0  ;;  %7732 = vmatpush.bf16.msra.mxu1 %v12712_v17 }
 0x40f   :  { %v7402_v35 = vpop.f32.mrf.mxu2  ;;  %v7378_v25 = vpop.f32.mrf.mxu0 }
 0x410   :  { %v7415_v40 = vpop.f32.mrf.mxu3  ;;  %v7403_v50 = vadd.f32 %v7402_v35, %v7390_v12  ;;  %v7391_v6 = vpop.f32.mrf.mxu1  ;;  %7721 = vmatpush.bf16.msra.mxu0 %v12702_v28  ;;  %7733 = vmatpush.bf16.msra.mxu1 %v12711_v14  ;;  %v12720_v25 = vld [vmem:[#allocation14 + $0x18] sm:$0xff] }
 0x411   :  { %7789 = vmatpush.bf16.msra.mxu2 %v12720_v25  ;;  %v12719_v6 = vld [vmem:[#allocation14 + $0x10] sm:$0xff] }
 0x412   :  { %v7416_v49 = vadd.f32 %v7415_v40, %v7403_v50 }
 0x414   :  { %7722 = vmatpush.bf16.msra.mxu0 %v12701_v54  ;;  %7734 = vmatpush.bf16.msra.mxu1 %v12710_v37 }
 0x415   :  { %7790 = vmatpush.bf16.msra.mxu2 %v12719_v6 }
 0x417   :  { %v7404_v34 = vpop.f32.mrf.mxu2 }
 0x418   :  { %v7417_v36 = vpop.f32.mrf.mxu3  ;;  %7735 = vmatpush.bf16.msra.mxu1 %v12709_v21  ;;  %v12718_v34 = vld [vmem:[#allocation14 + $0x8] sm:$0xff] }
 0x419   :  { %7791 = vmatpush.bf16.msra.mxu2 %v12718_v34 }
 0x41d   :  { %7792 = vmatpush.bf16.msra.mxu2 %v12717_v27 }
 0x427   :  { %v7428_v38 = vpop.f32.mrf.mxu0 }
 0x428   :  { %v7429_v59 = vadd.f32 %v7428_v38, %v7416_v49  ;;  %v12737_v38 = vld [vmem:[#allocation13] ss:$0 sm:$0xff] }
 0x42f   :  { %v7454_v44 = vpop.f32.mrf.mxu2  ;;  %v7430_v23 = vpop.f32.mrf.mxu0 }
 0x430   :  { %v7467_v20 = vpop.f32.mrf.mxu3  ;;  %v7455_v53 = vadd.f32 %v7454_v44, %v6512_v8 }
 0x432   :  { %v7468_v45 = vadd.f32 %v7467_v20, %v7455_v53 }
 0x437   :  { %v7456_v51 = vpop.f32.mrf.mxu2 }
 0x438   :  { %v7469_v52 = vpop.f32.mrf.mxu3 }
 0x447   :  { %v7480_v43 = vpop.f32.mrf.mxu0 }
 0x448   :  { %v7481_v26 = vadd.f32 %v7480_v43, %v7468_v45  ;;  %v12738_v45 = vld [vmem:[#allocation16] ss:$0 sm:$0xff] }
 0x44f   :  { %v7506_v29 = vpop.f32.mrf.mxu2  ;;  %v7482_v24 = vpop.f32.mrf.mxu0 }
 0x450   :  { %v7519_v3 = vpop.f32.mrf.mxu3 }
 0x457   :  { %v7508_v58 = vpop.f32.mrf.mxu2 }
 0x458   :  { %v7521_v41 = vpop.f32.mrf.mxu3  ;;  %v7441_v11 = vpop.f32.mrf.mxu1 }
 0x459   :  { %v7442_v61 = vadd.f32 %v7441_v11, %v7429_v59 }
 0x45b   :  { %vm7575_vm10 = vcmp.gt.f32.partialorder %v7442_v61, 0.0  ;;  %v7577_v2 = vmul.f32 0.01, %v7442_v61 }
 0x45d   :  { %v7579_v31 = vsel %vm7575_vm10, %v7442_v61, %v7577_v2 }
 0x45e   :  { %v7581_v63 = vpack.c.bf16 %v7579_v31, %v7579_v31 }
 0x460   :  { %v7443_v48 = vpop.f32.mrf.mxu1  ;;  %7723 = vmatmul.bf16.vlgmr.msra.gmra.mxu0 %v7581_v63 }
 0x467   :  { %v7532_v5 = vpop.f32.mrf.mxu0 }
 0x468   :  { %v7493_v60 = vpop.f32.mrf.mxu1 }
 0x469   :  { %v7494_v4 = vadd.f32 %v7493_v60, %v7481_v26 }
 0x46b   :  { %v7507_v13 = vadd.f32 %v7506_v29, %v7494_v4 }
 0x46d   :  { %v7520_v22 = vadd.f32 %v7519_v3, %v7507_v13 }
 0x46f   :  { %v7558_v7 = vpop.f32.mrf.mxu2  ;;  %v7534_v18 = vpop.f32.mrf.mxu0  ;;  %v7533_v32 = vadd.f32 %v7532_v5, %v7520_v22 }
 0x470   :  { %v7571_v19 = vpop.f32.mrf.mxu3  ;;  %v7495_v10 = vpop.f32.mrf.mxu1 }
 0x477   :  { %v7560_v46 = vpop.f32.mrf.mxu2 }
 0x478   :  { %v7573_v1 = vpop.f32.mrf.mxu3  ;;  %v7545_v33 = vpop.f32.mrf.mxu1 }
 0x479   :  { %v7546_v39 = vadd.f32 %v7545_v33, %v7533_v32 }
 0x47b   :  { %v7559_v30 = vadd.f32 %v7558_v7, %v7546_v39 }
 0x47d   :  { %v7572_v57 = vadd.f32 %v7571_v19, %v7559_v30 }
 0x47f   :  { %vm7576_vm11 = vcmp.gt.f32.partialorder %v7572_v57, 0.0  ;;  %v7578_v12 = vmul.f32 0.01, %v7572_v57 }
 0x480   :  { %v7547_v35 = vpop.f32.mrf.mxu1 }
 0x481   :  { %v7580_v40 = vsel %vm7576_vm11, %v7572_v57, %v7578_v12 }
 0x482   :  { %v7582_v50 = vpack.c.bf16 %v7580_v40, %v7580_v40 }
 0x484   :  { %7736 = vmatmul.bf16.vlgmr.msra.gmra.mxu1 %v7582_v50 }
 0x4dd   :  { %v7724_v49 = vpop.f32.mrf.mxu0 }
 0x4de   :  { %v7725_v42 = vadd.f32 %v12737_v38, %v7724_v49 }
 0x4e5   :  { %v7726_v36 = vpop.f32.mrf.mxu0 }
 0x501   :  { %v7737_v8 = vpop.f32.mrf.mxu1 }
 0x502   :  { %v7738_v16 = vadd.f32 %v7737_v8, %v7725_v42 }
 0x504   :  { %vm7741_vm12 = vcmp.gt.f32.partialorder %v7738_v16, 0.0  ;;  %v7742_v44 = vmul.f32 0.01, %v7738_v16 }
 0x506   :  { %v7743_v20 = vsel %vm7741_vm12, %v7738_v16, %v7742_v44 }
 0x507   :  { %v7744_v53 = vpack.c.bf16 %v7743_v20, %v7743_v20 }
 0x509   :  { %v7739_v23 = vpop.f32.mrf.mxu1  ;;  %11740 = vmatmul.msk.bf16.vlgmr.msra.gmra.mxu2 %vm7781_vm13, %v7744_v53 }
 0x58c   :  { %v7794_v15 = vpop.f32.mrf.mxu2 }
 0x58d   :  { %v7795_v47 = vadd.f32 %v12738_v45, %v7794_v15 }
 0x58f   :  { %7798 = vst [vmem:[#allocation17] sm:$0xff] %v7795_v47 }
 0x590   :  { %7809 = dma.vmem_to_hbm [thread:$0]  %s7805_s15, 128, %s7807_s17, [#allocation4]  }
 0x594   :  { %v7796_v51 = vpop.f32.mrf.mxu2 }
 0x595   :  { %12992 = dma.done.wait [#allocation4], 128  }
 0x596   :  { %12993 = vsyncadd [#allocation4], 4294967168 }
 0x597   :  { %7814 = vsyncpa [#allocation3], 1 }
 0x598   :  { %7815 = vsyncpa [#allocation6], 1 }
 0x599   :  { %7816 = vsyncpa [#allocation9], 1 }
 0x59a   :  { %7817 = vsyncpa [#allocation12], 1 }
 0x59b   :  { %7818 = vsyncpa [#allocation15], 1 }
 0x59c   :  { %7819 = vsyncpa [#allocation4], 1 }

</bundles_post_ra>
